<compile_context>
chip_gen: v7x
topology: tpu7x:2x2x1
jax: 0.10.0
libtpu: 0.0.40
codegen_flags: <defaults>
</compile_context>

<pallas_src>
import functools

import jax
import jax.numpy as jnp
from jax.experimental import pallas as pl
from jax.experimental.pallas import tpu as pltpu

# Scoped-VMEM request: well under v7x's 64 MiB physical; v5e/v6e have 128 MiB.
_VMEM_LIMIT = 32 * 1024 * 1024
# Working-set budget used to choose the fused single-block path (sized for v7x).
_FUSED_BUDGET = 24 * 1024 * 1024


def _row_tile(M, target=2048):
    """Largest multiple-of-8 divisor of M <= target (full slab if none)."""
    cap = min(target, M)
    best = None
    for t in range(8, cap + 1, 8):
        if M % t == 0:
            best = t
    return best if best is not None else M


# --------------------------- fused conv + BN kernel --------------------------

def _conv_bn_fused_kernel(*refs, act, groups, eps, residual):
    """One shot: y = x@W + b (bf16 MXU operands, f32 acc); BatchNorm batch stats
    over rows and over the `groups` packed column-groups; affine + activation
    (+ residual add); bf16 store.  Single full-block grid step -> the pre-BN
    activation never leaves VMEM."""
    if residual:
        x_ref, w_ref, b_ref, gam_ref, bet_ref, res_ref, o_ref = refs
    else:
        x_ref, w_ref, b_ref, gam_ref, bet_ref, o_ref = refs
        res_ref = None

    y = jnp.dot(x_ref[...], w_ref[...],
                preferred_element_type=jnp.float32) + b_ref[...]
    rows, ncols = y.shape
    c = ncols // groups

    # Per-column sums -> per-channel sums (columns are `groups` repeats of the
    # true channels; channel is the fastest-varying column index).
    s = jnp.sum(y, axis=0, keepdims=True)
    q = jnp.sum(y * y, axis=0, keepdims=True)
    s_c = s[:, 0:c]
    q_c = q[:, 0:c]
    for j in range(1, groups):
        s_c = s_c + s[:, j * c:(j + 1) * c]
        q_c = q_c + q[:, j * c:(j + 1) * c]

    count = rows * groups
    mean = s_c / count
    # E[x^2]-E[x]^2 in f32; max(.,0) guards cancellation (fine for a GAN fwd).
    var = jnp.maximum(q_c / count - mean * mean, 0.0)
    scale_c = gam_ref[...] * jax.lax.rsqrt(var + eps)
    shift_c = bet_ref[...] - mean * scale_c
    if groups > 1:
        scale = jnp.concatenate([scale_c] * groups, axis=-1)
        shift = jnp.concatenate([shift_c] * groups, axis=-1)
    else:
        scale, shift = scale_c, shift_c

    out = y * scale + shift
    if res_ref is not None:
        out = out + res_ref[...].astype(jnp.float32)
    if act == "relu":
        out = jnp.maximum(out, 0.0)
    o_ref[...] = out.astype(o_ref.dtype)


# ------------------------- tiled fallback kernels ---------------------------

def _mm_bias_stats_kernel(x_ref, w_ref, b_ref, o_ref, sum_ref, sq_ref):
    # Per-row-tile PARTIAL BN sums: each grid step writes its own (1, N) block,
    # so the axis stays "parallel" (both v7x TensorCores get work); partials are
    # reduced in the epilogue.
    y = jnp.dot(x_ref[...], w_ref[...],
                preferred_element_type=jnp.float32) + b_ref[...]
    o_ref[...] = y.astype(o_ref.dtype)
    sum_ref[...] = jnp.sum(y, axis=0, keepdims=True)
    sq_ref[...] = jnp.sum(y * y, axis=0, keepdims=True)


def _mm_bias_act_kernel(x_ref, w_ref, b_ref, o_ref, *, act):
    y = jnp.dot(x_ref[...], w_ref[...],
                preferred_element_type=jnp.float32) + b_ref[...]
    if act == "relu":
        y = jnp.maximum(y, 0.0)
    elif act == "tanh":
        y = jnp.tanh(y)          # EUP slot; essentially free under the matmul
    o_ref[...] = y.astype(o_ref.dtype)


def matmul_bias(x, w, b, *, act="none", emit_stats=False, out_dtype=jnp.float32):
    """(M, K) @ (K, N) + b with fused epilogue; optional per-tile BN partials."""
    M, K = x.shape
    _, N = w.shape
    x = x.astype(jnp.bfloat16)
    w = w.astype(jnp.bfloat16)
    b = b.reshape(1, N).astype(jnp.float32)
    tm = _row_tile(M)
    steps = M // tm
    lhs = pl.BlockSpec((tm, K), lambda i: (i, 0))
    rhs = pl.BlockSpec((K, N), lambda i: (0, 0))
    bias = pl.BlockSpec((1, N), lambda i: (0, 0))
    params = pltpu.CompilerParams(dimension_semantics=("parallel",),
                                  vmem_limit_bytes=_VMEM_LIMIT)
    if emit_stats:
        return pl.pallas_call(
            _mm_bias_stats_kernel,
            out_shape=(jax.ShapeDtypeStruct((M, N), out_dtype),
                       jax.ShapeDtypeStruct((steps, N), jnp.float32),
                       jax.ShapeDtypeStruct((steps, N), jnp.float32)),
            grid=(steps,),
            in_specs=[lhs, rhs, bias],
            out_specs=(pl.BlockSpec((tm, N), lambda i: (i, 0)),
                       pl.BlockSpec((1, N), lambda i: (i, 0)),
                       pl.BlockSpec((1, N), lambda i: (i, 0))),
            compiler_params=params,
        )(x, w, b)
    return pl.pallas_call(
        functools.partial(_mm_bias_act_kernel, act=act),
        out_shape=jax.ShapeDtypeStruct((M, N), out_dtype),
        grid=(steps,),
        in_specs=[lhs, rhs, bias],
        out_specs=pl.BlockSpec((tm, N), lambda i: (i, 0)),
        compiler_params=params,
    )(x, w, b)


def _affine_act_kernel(x_ref, scale_ref, shift_ref, o_ref, *, act):
    y = x_ref[...].astype(jnp.float32) * scale_ref[...] + shift_ref[...]
    if act == "relu":
        y = jnp.maximum(y, 0.0)
    o_ref[...] = y.astype(o_ref.dtype)


def _affine_res_kernel(x_ref, scale_ref, shift_ref, res_ref, o_ref):
    y = (x_ref[...].astype(jnp.float32) * scale_ref[...] + shift_ref[...]
         + res_ref[...].astype(jnp.float32))
    o_ref[...] = y.astype(o_ref.dtype)


def affine_act(x, scale, shift, act="none", residual=None, out_dtype=jnp.bfloat16):
    """y = act(x*scale + shift) (+residual), per channel, lane-dense when C|128."""
    M, C = x.shape
    scale = scale.reshape(-1).astype(jnp.float32)
    shift = shift.reshape(-1).astype(jnp.float32)
    if C < 128 and 128 % C == 0 and (M * C) % 128 == 0:
        rep = 128 // C
        xd = x.reshape(M * C // 128, 128)
        sd = jnp.tile(scale, rep).reshape(1, 128)
        td = jnp.tile(shift, rep).reshape(1, 128)
        rd = None if residual is None else residual.reshape(M * C // 128, 128)
    else:
        xd, rd = x, residual
        sd, td = scale.reshape(1, C), shift.reshape(1, C)
    R, Wd = xd.shape
    tm = _row_tile(R)
    rows = pl.BlockSpec((tm, Wd), lambda i: (i, 0))
    bcast = pl.BlockSpec((1, Wd), lambda i: (0, 0))
    if residual is None:
        kern = functools.partial(_affine_act_kernel, act=act)
        in_specs, args = [rows, bcast, bcast], (xd, sd, td)
    else:
        assert act == "none"
        kern = _affine_res_kernel
        in_specs, args = [rows, bcast, bcast, rows], (xd, sd, td, rd)
    y = pl.pallas_call(
        kern,
        out_shape=jax.ShapeDtypeStruct((R, Wd), out_dtype),
        grid=(R // tm,),
        in_specs=in_specs,
        out_specs=rows,
        compiler_params=pltpu.CompilerParams(dimension_semantics=("parallel",),
                                             vmem_limit_bytes=_VMEM_LIMIT),
    )(*args)
    return y.reshape(M, C)


def _bn_apply(y, s, q, bn, *, groups=1, eps=1e-5, act="none", residual=None,
              out_dtype=jnp.bfloat16):
    """Finish BatchNorm from per-tile partial sums, then affine+act (+residual)."""
    R, Ctot = y.shape
    C = Ctot // groups
    s = jnp.sum(s, axis=0).reshape(groups, C).sum(axis=0)
    q = jnp.sum(q, axis=0).reshape(groups, C).sum(axis=0)
    count = R * groups
    mean = s / count
    var = jnp.maximum(q / count - mean * mean, 0.0)
    scale = bn["gamma"] * jax.lax.rsqrt(var + eps)
    shift = bn["beta"] - mean * scale
    if groups > 1:
        scale = jnp.tile(scale, groups)
        shift = jnp.tile(shift, groups)
    return affine_act(y, scale, shift, act=act, residual=residual,
                      out_dtype=out_dtype)


# ------------------------------- conv glue ----------------------------------

def _pad_hw(x, p, mode):
    if p == 0:
        return x
    if mode == "reflect":
        return jnp.pad(x, ((0, 0), (p, p), (p, p), (0, 0)), mode="reflect")
    return jnp.pad(x, ((0, 0), (p, p), (p, p), (0, 0)))


def _im2col(xp, K, stride):
    # TODO(synk): move this gather into the kernel (shifted VMEM reads) to avoid
    # the K*K patch expansion in HBM; patches are bf16 meanwhile.
    N, Hp, Wp, C = xp.shape
    Ho = (Hp - K) // stride + 1
    Wo = (Wp - K) // stride + 1
    cols = []
    for kh in range(K):
        for kw in range(K):
            cols.append(xp[:, kh:kh + stride * Ho:stride,
                           kw:kw + stride * Wo:stride, :])
    patches = jnp.concatenate(cols, axis=-1)          # features (kh, kw, cin)
    return patches.reshape(N * Ho * Wo, K * K * C), (N, Ho, Wo)


def _pack_lanes(patches, w_mat, b_cols):
    """Pack g = 128 // cols consecutive output rows into the lane dimension via a
    block-diagonal weight so the matmul N dim is 128 (full-lane stores).  The
    activation-side reshape is a pure view of the row-major flat layout."""
    M, K = patches.shape
    cols = w_mat.shape[1]
    g = 1
    if cols < 128 and 128 % cols == 0:
        g = 128 // cols
        while g > 1 and M % g != 0:
            g //= 2
    if g == 1:
        return patches, w_mat, b_cols, 1
    lhs = patches.reshape(M // g, g * K)
    w_bd = jnp.kron(jnp.eye(g, dtype=jnp.float32), w_mat.astype(jnp.float32))
    return lhs, w_bd, jnp.tile(b_cols, g), g


def _matmul_bn(patches, w_mat, b_cols, bn, *, extra_groups=1, act="relu",
               residual=None, eps=1e-5):
    """patches @ w_mat + b, then BatchNorm (batch stats) + act (+residual).
    Columns = extra_groups * C (conv-transpose parity groups); rows are packed
    into lanes (see _pack_lanes).  Fused single-launch path when it fits VMEM."""
    M = patches.shape[0]
    lhs, w_bd, b_t, g = _pack_lanes(patches, w_mat, b_cols)
    groups = g * extra_groups
    R, K_eff = lhs.shape
    ncols = w_bd.shape[1]
    res = None if residual is None else residual.reshape(R, ncols)

    gamma = bn["gamma"].reshape(1, -1).astype(jnp.float32)
    beta = bn["beta"].reshape(1, -1).astype(jnp.float32)

    # Double-buffered bf16 operands + bf16 out + f32 y in flight.
    est = 2 * (R * K_eff + K_eff * ncols + 2 * R * ncols) * 2 + R * ncols * 4
    if est <= _FUSED_BUDGET:
        kern = functools.partial(_conv_bn_fused_kernel, act=act, groups=groups,
                                 eps=eps, residual=res is not None)

        def full(shp):
            return pl.BlockSpec(shp, lambda i: (0,) * len(shp))

        args = [lhs.astype(jnp.bfloat16), w_bd.astype(jnp.bfloat16),
                b_t.reshape(1, ncols).astype(jnp.float32), gamma, beta]
        in_specs = [full((R, K_eff)), full((K_eff, ncols)), full((1, ncols)),
                    full(gamma.shape), full(beta.shape)]
        if res is not None:
            args.append(res.astype(jnp.bfloat16))
            in_specs.append(full((R, ncols)))
        y = pl.pallas_call(
            kern,
            out_shape=jax.ShapeDtypeStruct((R, ncols), jnp.bfloat16),
            grid=(1,),
            in_specs=in_specs,
            out_specs=full((R, ncols)),
            compiler_params=pltpu.CompilerParams(
                dimension_semantics=("arbitrary",),
                vmem_limit_bytes=_VMEM_LIMIT),
        )(*args)
    else:
        # Tiled fallback for slabs exceeding VMEM: per-tile partial BN sums
        # ("parallel" grid axis), then a lane-dense affine pass.
        y, s, q = matmul_bias(lhs, w_bd, b_t, emit_stats=True,
                              out_dtype=jnp.bfloat16)
        y = _bn_apply(y, s, q, bn, groups=groups, eps=eps, act=act,
                      residual=res, out_dtype=jnp.bfloat16)
    return y.reshape(M, ncols // g)     # back to (pixels, extra_groups*C)


def conv_bn(x_nhwc, layer, *, stride=1, padding=0, pad_mode="zero", act="relu",
            residual=None):
    """Conv2d (PyTorch (Cout,Cin,K,K) weights) + BatchNorm2d (batch stats) + act
    (+ residual add), fused."""
    w, b, bn = layer["w"], layer["b"], layer["bn"]
    Cout, Cin, K, _ = w.shape
    xp = _pad_hw(x_nhwc, padding, pad_mode).astype(jnp.bfloat16)
    patches, (N, Ho, Wo) = _im2col(xp, K, stride)
    w_mat = jnp.transpose(w, (2, 3, 1, 0)).reshape(K * K * Cin, Cout)
    y = _matmul_bn(patches, w_mat, b, bn, extra_groups=1, act=act,
                   residual=residual)
    return y.reshape(N, Ho, Wo, Cout)


def conv_transpose_bn(x_nhwc, layer, act="relu"):
    """ConvTranspose2d(k=3, s=2, p=1, op=1) + BN + ReLU via the sub-pixel
    decomposition: one 2x2 'valid' conv on the bottom/right zero-padded input
    producing 4*Cout parity-group channels, then depth-to-space."""
    w_t, b, bn = layer["w"], layer["b"], layer["bn"]
    Cin, Cout, K, _ = w_t.shape
    assert K == 3
    N, H, W, _ = x_nhwc.shape
    xp = jnp.pad(x_nhwc, ((0, 0), (0, 1), (0, 1), (0, 0))).astype(jnp.bfloat16)
    patches, _ = _im2col(xp, 2, 1)                    # taps (dh,dw): (N*H*W, 4*Cin)

    # oh = 2j+ph pulls from ih = j+dh with kernel index kh s.t. 2*ih + kh = oh + 1.
    kmap = {(0, 0): 1, (0, 1): None, (1, 0): 2, (1, 1): 0}
    zero = jnp.zeros((Cin, Cout), w_t.dtype)
    rows = []
    for dh in range(2):
        for dw in range(2):
            cols = []
            for ph in range(2):
                for pw in range(2):
                    kh, kw = kmap[(ph, dh)], kmap[(pw, dw)]
                    cols.append(zero if (kh is None or kw is None)
                                else w_t[:, :, kh, kw])
            rows.append(jnp.concatenate(cols, axis=1))        # (Cin, 4*Cout)
    w_mat = jnp.concatenate(rows, axis=0)                     # (4*Cin, 4*Cout)
    b4 = jnp.tile(b, 4)

    y = _matmul_bn(patches, w_mat, b4, bn, extra_groups=4, act=act)
    # depth-to-space: columns ordered (ph, pw, co); rows ordered (n, j, i).
    # TODO(synk): fold this de-interleave into the next layer's patch gather.
    y = y.reshape(N, H, W, 2, 2, Cout)
    y = jnp.transpose(y, (0, 1, 3, 2, 4, 5))
    return y.reshape(N, 2 * H, 2 * W, Cout)


def conv_tanh(x_nhwc, layer, padding=3):
    """Head: ReflectionPad + Conv7 + Tanh (tanh fused into the matmul epilogue)."""
    w, b = layer["w"], layer["b"]
    Cout, Cin, K, _ = w.shape
    xp = _pad_hw(x_nhwc, padding, "reflect").astype(jnp.bfloat16)
    patches, (N, Ho, Wo) = _im2col(xp, K, 1)
    w_mat = jnp.transpose(w, (2, 3, 1, 0)).reshape(K * K * Cin, Cout)
    # Cout=3 does not divide 128 -> masked store, but the head slab is tiny.
    y = matmul_bias(patches, w_mat, b, act="tanh", out_dtype=jnp.float32)
    return y.reshape(N, Ho, Wo, Cout)


# ------------------------------ model / params ------------------------------

def init_params(key, input_nc=3, output_nc=3, ngf=16, n_downsampling=2, n_blocks=3):
    keys = iter(jax.random.split(key, 64))

    def conv_p(cout, cin, k):
        k1, k2 = jax.random.split(next(keys))
        return {"w": 0.05 * jax.random.normal(k1, (cout, cin, k, k), jnp.float32),
                "b": 0.05 * jax.random.normal(k2, (cout,), jnp.float32)}

    def bn_p(c):  # PyTorch BatchNorm2d default init: weight=1, bias=0
        return {"gamma": jnp.ones((c,), jnp.float32),
                "beta": jnp.zeros((c,), jnp.float32)}

    p = {"stem": dict(conv_p(ngf, input_nc, 7), bn=bn_p(ngf)),
         "down": [], "res": [], "up": []}
    for i in range(n_downsampling):
        mult = 2 ** i
        p["down"].append(dict(conv_p(ngf * mult * 2, ngf * mult, 3),
                              bn=bn_p(ngf * mult * 2)))
    mult = 2 ** n_downsampling
    for _ in range(n_blocks):
        p["res"].append(
            {"c1": dict(conv_p(ngf * mult, ngf * mult, 3), bn=bn_p(ngf * mult)),
             "c2": dict(conv_p(ngf * mult, ngf * mult, 3), bn=bn_p(ngf * mult))})
    for i in range(n_downsampling):
        m = 2 ** (n_downsampling - i)
        cin, cout = ngf * m, ngf * m // 2
        k1, k2 = jax.random.split(next(keys))
        p["up"].append(
            {"w": 0.05 * jax.random.normal(k1, (cin, cout, 3, 3), jnp.float32),
             "b": 0.05 * jax.random.normal(k2, (cout,), jnp.float32),
             "bn": bn_p(cout)})
    p["head"] = conv_p(output_nc, ngf, 7)
    return p


def unet_generator_forward(params, x_nchw):
    x = jnp.transpose(x_nchw, (0, 2, 3, 1)).astype(jnp.float32)  # NCHW -> NHWC

    # stem: ReflectionPad2d(3) + Conv7 + BN + ReLU
    x = conv_bn(x, params["stem"], stride=1, padding=3, pad_mode="reflect")

    # downsampling: Conv3 s2 p1 + BN + ReLU
    for layer in params["down"]:
        x = conv_bn(x, layer, stride=2, padding=1, pad_mode="zero")

    # residual blocks: x + BN(conv(ReLU(BN(conv(reflect-pad(x)))))), no final act
    for blk in params["res"]:
        N, H, W, C = x.shape
        res_flat = x.reshape(N * H * W, C)
        h = conv_bn(x, blk["c1"], stride=1, padding=1, pad_mode="reflect")
        x = conv_bn(h, blk["c2"], stride=1, padding=1, pad_mode="reflect",
                    act="none", residual=res_flat)

    # upsampling: ConvTranspose3 s2 p1 op1 + BN + ReLU (sub-pixel decomposition)
    for layer in params["up"]:
        x = conv_transpose_bn(x, layer)

    # head: ReflectionPad2d(3) + Conv7 + Tanh
    y = conv_tanh(x, params["head"], padding=3)
    return jnp.transpose(y, (0, 3, 1, 2))              # NHWC -> NCHW


# ---------------------------------- main -------------------------------------

if __name__ == "__main__":
    key = jax.random.PRNGKey(0)
    kx, kp = jax.random.split(key)

    # Small config consistent with the module (constructor args scaled down):
    # input_nc=3, output_nc=3, ngf=16, n_downsampling=2, n_blocks=3
    params = init_params(kp, input_nc=3, output_nc=3, ngf=16,
                         n_downsampling=2, n_blocks=3)

    # PyTorch-convention NCHW input: (batch=2, channels=3, H=16, W=16)
    x = jax.random.normal(kx, (2, 3, 16, 16), jnp.float32)

    fwd = jax.jit(unet_generator_forward)
    out = fwd(params, x)
    jax.block_until_ready(out)

    assert out.shape == (2, 3, 16, 16), out.shape
    assert bool(jnp.all(jnp.isfinite(out)))
    assert bool(jnp.all(jnp.abs(out) <= 1.0 + 1e-6))   # tanh output range
    print("KERNEL_OK")
</pallas_src>

<mosaic_0001>
module attributes {stable_mosaic.version = 11 : i64} {
  func.func @_conv_bn_fused_kernel(%arg0: i32, %arg1: memref<64x1176xbf16, #tpu.memory_space<vmem>>, %arg2: memref<1176x128xbf16, #tpu.memory_space<vmem>>, %arg3: memref<1x128xf32, #tpu.memory_space<vmem>>, %arg4: memref<1x16xf32, #tpu.memory_space<vmem>>, %arg5: memref<1x16xf32, #tpu.memory_space<vmem>>, %arg6: memref<64x128xbf16, #tpu.memory_space<vmem>>) attributes {dimension_semantics = [#tpu.dimension_semantics<arbitrary>], iteration_bounds = array<i64: 1>, scalar_prefetch = 0 : i64, scratch_operands = 0 : i64, tpu.core_type = #tpu.core_type<tc>, window_params = [{pipeline_mode = #tpu.pipeline_mode<synchronous>, transform_indices = @transform_0, window_bounds = array<i64: 64, 1176>}, {pipeline_mode = #tpu.pipeline_mode<synchronous>, transform_indices = @transform_1, window_bounds = array<i64: 1176, 128>}, {pipeline_mode = #tpu.pipeline_mode<synchronous>, transform_indices = @transform_2, window_bounds = array<i64: 1, 128>}, {pipeline_mode = #tpu.pipeline_mode<synchronous>, transform_indices = @transform_3, window_bounds = array<i64: 1, 16>}, {pipeline_mode = #tpu.pipeline_mode<synchronous>, transform_indices = @transform_4, window_bounds = array<i64: 1, 16>}, {pipeline_mode = #tpu.pipeline_mode<synchronous>, transform_indices = @transform_5, window_bounds = array<i64: 64, 128>}]} {
    %c0 = arith.constant 0 : index
    %c0_0 = arith.constant 0 : index
    %0 = vector.load %arg1[%c0, %c0_0] : memref<64x1176xbf16, #tpu.memory_space<vmem>>, vector<64x1176xbf16>
    %c0_1 = arith.constant 0 : index
    %c0_2 = arith.constant 0 : index
    %1 = vector.load %arg2[%c0_1, %c0_2] : memref<1176x128xbf16, #tpu.memory_space<vmem>>, vector<1176x128xbf16>
    %cst = arith.constant dense<0.000000e+00> : vector<64x128xf32>
    %2 = tpu.matmul %0, %1, %cst {dimension_numbers = #tpu.dot_dimension_numbers<[1], [0], [0], [1], [0, 0, 1, 1], [], []>} : vector<64x1176xbf16>, vector<1176x128xbf16>, vector<64x128xf32> -> vector<64x128xf32>
    %c0_3 = arith.constant 0 : index
    %c0_4 = arith.constant 0 : index
    %3 = vector.load %arg3[%c0_3, %c0_4] : memref<1x128xf32, #tpu.memory_space<vmem>>, vector<1x128xf32>
    %4 = vector.broadcast %3 : vector<1x128xf32> to vector<64x128xf32>
    %5 = arith.addf %2, %4 : vector<64x128xf32>
    %cst_5 = arith.constant dense<0.000000e+00> : vector<128xf32>
    %6 = vector.multi_reduction <add>, %5, %cst_5 [0] : vector<64x128xf32> to vector<128xf32>
    %7 = vector.shape_cast %6 : vector<128xf32> to vector<1x128xf32>
    %8 = arith.mulf %5, %5 : vector<64x128xf32>
    %cst_6 = arith.constant dense<0.000000e+00> : vector<128xf32>
    %9 = vector.multi_reduction <add>, %8, %cst_6 [0] : vector<64x128xf32> to vector<128xf32>
    %10 = vector.shape_cast %9 : vector<128xf32> to vector<1x128xf32>
    %11 = vector.extract_strided_slice %7 {offsets = [0, 0], sizes = [1, 16], strides = [1, 1]} : vector<1x128xf32> to vector<1x16xf32>
    %12 = vector.extract_strided_slice %10 {offsets = [0, 0], sizes = [1, 16], strides = [1, 1]} : vector<1x128xf32> to vector<1x16xf32>
    %13 = vector.extract_strided_slice %7 {offsets = [0, 16], sizes = [1, 16], strides = [1, 1]} : vector<1x128xf32> to vector<1x16xf32>
    %14 = arith.addf %11, %13 : vector<1x16xf32>
    %15 = vector.extract_strided_slice %10 {offsets = [0, 16], sizes = [1, 16], strides = [1, 1]} : vector<1x128xf32> to vector<1x16xf32>
    %16 = arith.addf %12, %15 : vector<1x16xf32>
    %17 = vector.extract_strided_slice %7 {offsets = [0, 32], sizes = [1, 16], strides = [1, 1]} : vector<1x128xf32> to vector<1x16xf32>
    %18 = arith.addf %14, %17 : vector<1x16xf32>
    %19 = vector.extract_strided_slice %10 {offsets = [0, 32], sizes = [1, 16], strides = [1, 1]} : vector<1x128xf32> to vector<1x16xf32>
    %20 = arith.addf %16, %19 : vector<1x16xf32>
    %21 = vector.extract_strided_slice %7 {offsets = [0, 48], sizes = [1, 16], strides = [1, 1]} : vector<1x128xf32> to vector<1x16xf32>
    %22 = arith.addf %18, %21 : vector<1x16xf32>
    %23 = vector.extract_strided_slice %10 {offsets = [0, 48], sizes = [1, 16], strides = [1, 1]} : vector<1x128xf32> to vector<1x16xf32>
    %24 = arith.addf %20, %23 : vector<1x16xf32>
    %25 = vector.extract_strided_slice %7 {offsets = [0, 64], sizes = [1, 16], strides = [1, 1]} : vector<1x128xf32> to vector<1x16xf32>
    %26 = arith.addf %22, %25 : vector<1x16xf32>
    %27 = vector.extract_strided_slice %10 {offsets = [0, 64], sizes = [1, 16], strides = [1, 1]} : vector<1x128xf32> to vector<1x16xf32>
    %28 = arith.addf %24, %27 : vector<1x16xf32>
    %29 = vector.extract_strided_slice %7 {offsets = [0, 80], sizes = [1, 16], strides = [1, 1]} : vector<1x128xf32> to vector<1x16xf32>
    %30 = arith.addf %26, %29 : vector<1x16xf32>
    %31 = vector.extract_strided_slice %10 {offsets = [0, 80], sizes = [1, 16], strides = [1, 1]} : vector<1x128xf32> to vector<1x16xf32>
    %32 = arith.addf %28, %31 : vector<1x16xf32>
    %33 = vector.extract_strided_slice %7 {offsets = [0, 96], sizes = [1, 16], strides = [1, 1]} : vector<1x128xf32> to vector<1x16xf32>
    %34 = arith.addf %30, %33 : vector<1x16xf32>
    %35 = vector.extract_strided_slice %10 {offsets = [0, 96], sizes = [1, 16], strides = [1, 1]} : vector<1x128xf32> to vector<1x16xf32>
    %36 = arith.addf %32, %35 : vector<1x16xf32>
    %37 = vector.extract_strided_slice %7 {offsets = [0, 112], sizes = [1, 16], strides = [1, 1]} : vector<1x128xf32> to vector<1x16xf32>
    %38 = arith.addf %34, %37 : vector<1x16xf32>
    %39 = vector.extract_strided_slice %10 {offsets = [0, 112], sizes = [1, 16], strides = [1, 1]} : vector<1x128xf32> to vector<1x16xf32>
    %40 = arith.addf %36, %39 : vector<1x16xf32>
    %cst_7 = arith.constant 5.120000e+02 : f32
    %41 = vector.broadcast %cst_7 : f32 to vector<1x16xf32>
    %42 = arith.divf %38, %41 : vector<1x16xf32>
    %cst_8 = arith.constant 5.120000e+02 : f32
    %43 = vector.broadcast %cst_8 : f32 to vector<1x16xf32>
    %44 = arith.divf %40, %43 : vector<1x16xf32>
    %45 = arith.mulf %42, %42 : vector<1x16xf32>
    %46 = arith.subf %44, %45 : vector<1x16xf32>
    %cst_9 = arith.constant 0.000000e+00 : f32
    %47 = vector.broadcast %cst_9 : f32 to vector<1x16xf32>
    %48 = arith.maximumf %46, %47 : vector<1x16xf32>
    %c0_10 = arith.constant 0 : index
    %c0_11 = arith.constant 0 : index
    %49 = vector.load %arg4[%c0_10, %c0_11] : memref<1x16xf32, #tpu.memory_space<vmem>>, vector<1x16xf32>
    %cst_12 = arith.constant 9.99999974E-6 : f32
    %50 = vector.broadcast %cst_12 : f32 to vector<1x16xf32>
    %51 = arith.addf %48, %50 : vector<1x16xf32>
    %52 = math.rsqrt %51 : vector<1x16xf32>
    %53 = arith.mulf %49, %52 : vector<1x16xf32>
    %c0_13 = arith.constant 0 : index
    %c0_14 = arith.constant 0 : index
    %54 = vector.load %arg5[%c0_13, %c0_14] : memref<1x16xf32, #tpu.memory_space<vmem>>, vector<1x16xf32>
    %55 = arith.mulf %42, %53 : vector<1x16xf32>
    %56 = arith.subf %54, %55 : vector<1x16xf32>
    %57 = tpu.concatenate %53, %53, %53, %53, %53, %53, %53, %53 in 1 : vector<1x16xf32>, vector<1x16xf32>, vector<1x16xf32>, vector<1x16xf32>, vector<1x16xf32>, vector<1x16xf32>, vector<1x16xf32>, vector<1x16xf32> -> vector<1x128xf32>
    %58 = tpu.concatenate %56, %56, %56, %56, %56, %56, %56, %56 in 1 : vector<1x16xf32>, vector<1x16xf32>, vector<1x16xf32>, vector<1x16xf32>, vector<1x16xf32>, vector<1x16xf32>, vector<1x16xf32>, vector<1x16xf32> -> vector<1x128xf32>
    %59 = vector.broadcast %57 : vector<1x128xf32> to vector<64x128xf32>
    %60 = arith.mulf %5, %59 : vector<64x128xf32>
    %61 = vector.broadcast %58 : vector<1x128xf32> to vector<64x128xf32>
    %62 = arith.addf %60, %61 : vector<64x128xf32>
    %cst_15 = arith.constant 0.000000e+00 : f32
    %63 = vector.broadcast %cst_15 : f32 to vector<64x128xf32>
    %64 = arith.maximumf %62, %63 : vector<64x128xf32>
    %65 = arith.truncf %64 : vector<64x128xf32> to vector<64x128xbf16>
    %c0_16 = arith.constant 0 : index
    %c0_17 = arith.constant 0 : index
    %66 = vector.load %arg6[%c0_16, %c0_17] : memref<64x128xbf16, #tpu.memory_space<vmem>>, vector<64x128xbf16>
    tpu.vector_store %arg6[%c0_16, %c0_17], %65 {strides = array<i32>} : memref<64x128xbf16, #tpu.memory_space<vmem>>, vector<64x128xbf16>,
    return
  }
  func.func @transform_0(%arg0: i32) -> (i32, i32) {
    %c0_i32 = arith.constant 0 : i32
    %c0_i32_0 = arith.constant 0 : i32
    %c0_i32_1 = arith.constant 0 : i32
    return %c0_i32, %c0_i32_0 : i32, i32
  }
  func.func @transform_1(%arg0: i32) -> (i32, i32) {
    %c0_i32 = arith.constant 0 : i32
    %c0_i32_0 = arith.constant 0 : i32
    %c0_i32_1 = arith.constant 0 : i32
    return %c0_i32, %c0_i32_0 : i32, i32
  }
  func.func @transform_2(%arg0: i32) -> (i32, i32) {
    %c0_i32 = arith.constant 0 : i32
    %c0_i32_0 = arith.constant 0 : i32
    %c0_i32_1 = arith.constant 0 : i32
    return %c0_i32, %c0_i32_0 : i32, i32
  }
  func.func @transform_3(%arg0: i32) -> (i32, i32) {
    %c0_i32 = arith.constant 0 : i32
    %c0_i32_0 = arith.constant 0 : i32
    %c0_i32_1 = arith.constant 0 : i32
    return %c0_i32, %c0_i32_0 : i32, i32
  }
  func.func @transform_4(%arg0: i32) -> (i32, i32) {
    %c0_i32 = arith.constant 0 : i32
    %c0_i32_0 = arith.constant 0 : i32
    %c0_i32_1 = arith.constant 0 : i32
    return %c0_i32, %c0_i32_0 : i32, i32
  }
  func.func @transform_5(%arg0: i32) -> (i32, i32) {
    %c0_i32 = arith.constant 0 : i32
    %c0_i32_0 = arith.constant 0 : i32
    %c0_i32_1 = arith.constant 0 : i32
    return %c0_i32, %c0_i32_0 : i32, i32
  }
}

module attributes {stable_mosaic.version = 11 : i64} {
  func.func @_conv_bn_fused_kernel(%arg0: i32, %arg1: memref<32x576xbf16, #tpu.memory_space<vmem>>, %arg2: memref<576x128xbf16, #tpu.memory_space<vmem>>, %arg3: memref<1x128xf32, #tpu.memory_space<vmem>>, %arg4: memref<1x32xf32, #tpu.memory_space<vmem>>, %arg5: memref<1x32xf32, #tpu.memory_space<vmem>>, %arg6: memref<32x128xbf16, #tpu.memory_space<vmem>>) attributes {dimension_semantics = [#tpu.dimension_semantics<arbitrary>], iteration_bounds = array<i64: 1>, scalar_prefetch = 0 : i64, scratch_operands = 0 : i64, tpu.core_type = #tpu.core_type<tc>, window_params = [{pipeline_mode = #tpu.pipeline_mode<synchronous>, transform_indices = @transform_0, window_bounds = array<i64: 32, 576>}, {pipeline_mode = #tpu.pipeline_mode<synchronous>, transform_indices = @transform_1, window_bounds = array<i64: 576, 128>}, {pipeline_mode = #tpu.pipeline_mode<synchronous>, transform_indices = @transform_2, window_bounds = array<i64: 1, 128>}, {pipeline_mode = #tpu.pipeline_mode<synchronous>, transform_indices = @transform_3, window_bounds = array<i64: 1, 32>}, {pipeline_mode = #tpu.pipeline_mode<synchronous>, transform_indices = @transform_4, window_bounds = array<i64: 1, 32>}, {pipeline_mode = #tpu.pipeline_mode<synchronous>, transform_indices = @transform_5, window_bounds = array<i64: 32, 128>}]} {
    %c0 = arith.constant 0 : index
    %c0_0 = arith.constant 0 : index
    %0 = vector.load %arg1[%c0, %c0_0] : memref<32x576xbf16, #tpu.memory_space<vmem>>, vector<32x576xbf16>
    %c0_1 = arith.constant 0 : index
    %c0_2 = arith.constant 0 : index
    %1 = vector.load %arg2[%c0_1, %c0_2] : memref<576x128xbf16, #tpu.memory_space<vmem>>, vector<576x128xbf16>
    %cst = arith.constant dense<0.000000e+00> : vector<32x128xf32>
    %2 = tpu.matmul %0, %1, %cst {dimension_numbers = #tpu.dot_dimension_numbers<[1], [0], [0], [1], [0, 0, 1, 1], [], []>} : vector<32x576xbf16>, vector<576x128xbf16>, vector<32x128xf32> -> vector<32x128xf32>
    %c0_3 = arith.constant 0 : index
    %c0_4 = arith.constant 0 : index
    %3 = vector.load %arg3[%c0_3, %c0_4] : memref<1x128xf32, #tpu.memory_space<vmem>>, vector<1x128xf32>
    %4 = vector.broadcast %3 : vector<1x128xf32> to vector<32x128xf32>
    %5 = arith.addf %2, %4 : vector<32x128xf32>
    %cst_5 = arith.constant dense<0.000000e+00> : vector<128xf32>
    %6 = vector.multi_reduction <add>, %5, %cst_5 [0] : vector<32x128xf32> to vector<128xf32>
    %7 = vector.shape_cast %6 : vector<128xf32> to vector<1x128xf32>
    %8 = arith.mulf %5, %5 : vector<32x128xf32>
    %cst_6 = arith.constant dense<0.000000e+00> : vector<128xf32>
    %9 = vector.multi_reduction <add>, %8, %cst_6 [0] : vector<32x128xf32> to vector<128xf32>
    %10 = vector.shape_cast %9 : vector<128xf32> to vector<1x128xf32>
    %11 = vector.extract_strided_slice %7 {offsets = [0, 0], sizes = [1, 32], strides = [1, 1]} : vector<1x128xf32> to vector<1x32xf32>
    %12 = vector.extract_strided_slice %10 {offsets = [0, 0], sizes = [1, 32], strides = [1, 1]} : vector<1x128xf32> to vector<1x32xf32>
    %13 = vector.extract_strided_slice %7 {offsets = [0, 32], sizes = [1, 32], strides = [1, 1]} : vector<1x128xf32> to vector<1x32xf32>
    %14 = arith.addf %11, %13 : vector<1x32xf32>
    %15 = vector.extract_strided_slice %10 {offsets = [0, 32], sizes = [1, 32], strides = [1, 1]} : vector<1x128xf32> to vector<1x32xf32>
    %16 = arith.addf %12, %15 : vector<1x32xf32>
    %17 = vector.extract_strided_slice %7 {offsets = [0, 64], sizes = [1, 32], strides = [1, 1]} : vector<1x128xf32> to vector<1x32xf32>
    %18 = arith.addf %14, %17 : vector<1x32xf32>
    %19 = vector.extract_strided_slice %10 {offsets = [0, 64], sizes = [1, 32], strides = [1, 1]} : vector<1x128xf32> to vector<1x32xf32>
    %20 = arith.addf %16, %19 : vector<1x32xf32>
    %21 = vector.extract_strided_slice %7 {offsets = [0, 96], sizes = [1, 32], strides = [1, 1]} : vector<1x128xf32> to vector<1x32xf32>
    %22 = arith.addf %18, %21 : vector<1x32xf32>
    %23 = vector.extract_strided_slice %10 {offsets = [0, 96], sizes = [1, 32], strides = [1, 1]} : vector<1x128xf32> to vector<1x32xf32>
    %24 = arith.addf %20, %23 : vector<1x32xf32>
    %cst_7 = arith.constant 1.280000e+02 : f32
    %25 = vector.broadcast %cst_7 : f32 to vector<1x32xf32>
    %26 = arith.divf %22, %25 : vector<1x32xf32>
    %cst_8 = arith.constant 1.280000e+02 : f32
    %27 = vector.broadcast %cst_8 : f32 to vector<1x32xf32>
    %28 = arith.divf %24, %27 : vector<1x32xf32>
    %29 = arith.mulf %26, %26 : vector<1x32xf32>
    %30 = arith.subf %28, %29 : vector<1x32xf32>
    %cst_9 = arith.constant 0.000000e+00 : f32
    %31 = vector.broadcast %cst_9 : f32 to vector<1x32xf32>
    %32 = arith.maximumf %30, %31 : vector<1x32xf32>
    %c0_10 = arith.constant 0 : index
    %c0_11 = arith.constant 0 : index
    %33 = vector.load %arg4[%c0_10, %c0_11] : memref<1x32xf32, #tpu.memory_space<vmem>>, vector<1x32xf32>
    %cst_12 = arith.constant 9.99999974E-6 : f32
    %34 = vector.broadcast %cst_12 : f32 to vector<1x32xf32>
    %35 = arith.addf %32, %34 : vector<1x32xf32>
    %36 = math.rsqrt %35 : vector<1x32xf32>
    %37 = arith.mulf %33, %36 : vector<1x32xf32>
    %c0_13 = arith.constant 0 : index
    %c0_14 = arith.constant 0 : index
    %38 = vector.load %arg5[%c0_13, %c0_14] : memref<1x32xf32, #tpu.memory_space<vmem>>, vector<1x32xf32>
    %39 = arith.mulf %26, %37 : vector<1x32xf32>
    %40 = arith.subf %38, %39 : vector<1x32xf32>
    %41 = tpu.concatenate %37, %37, %37, %37 in 1 : vector<1x32xf32>, vector<1x32xf32>, vector<1x32xf32>, vector<1x32xf32> -> vector<1x128xf32>
    %42 = tpu.concatenate %40, %40, %40, %40 in 1 : vector<1x32xf32>, vector<1x32xf32>, vector<1x32xf32>, vector<1x32xf32> -> vector<1x128xf32>
    %43 = vector.broadcast %41 : vector<1x128xf32> to vector<32x128xf32>
    %44 = arith.mulf %5, %43 : vector<32x128xf32>
    %45 = vector.broadcast %42 : vector<1x128xf32> to vector<32x128xf32>
    %46 = arith.addf %44, %45 : vector<32x128xf32>
    %cst_15 = arith.constant 0.000000e+00 : f32
    %47 = vector.broadcast %cst_15 : f32 to vector<32x128xf32>
    %48 = arith.maximumf %46, %47 : vector<32x128xf32>
    %49 = arith.truncf %48 : vector<32x128xf32> to vector<32x128xbf16>
    %c0_16 = arith.constant 0 : index
    %c0_17 = arith.constant 0 : index
    %50 = vector.load %arg6[%c0_16, %c0_17] : memref<32x128xbf16, #tpu.memory_space<vmem>>, vector<32x128xbf16>
    tpu.vector_store %arg6[%c0_16, %c0_17], %49 {strides = array<i32>} : memref<32x128xbf16, #tpu.memory_space<vmem>>, vector<32x128xbf16>,
    return
  }
  func.func @transform_0(%arg0: i32) -> (i32, i32) {
    %c0_i32 = arith.constant 0 : i32
    %c0_i32_0 = arith.constant 0 : i32
    %c0_i32_1 = arith.constant 0 : i32
    return %c0_i32, %c0_i32_0 : i32, i32
  }
  func.func @transform_1(%arg0: i32) -> (i32, i32) {
    %c0_i32 = arith.constant 0 : i32
    %c0_i32_0 = arith.constant 0 : i32
    %c0_i32_1 = arith.constant 0 : i32
    return %c0_i32, %c0_i32_0 : i32, i32
  }
  func.func @transform_2(%arg0: i32) -> (i32, i32) {
    %c0_i32 = arith.constant 0 : i32
    %c0_i32_0 = arith.constant 0 : i32
    %c0_i32_1 = arith.constant 0 : i32
    return %c0_i32, %c0_i32_0 : i32, i32
  }
  func.func @transform_3(%arg0: i32) -> (i32, i32) {
    %c0_i32 = arith.constant 0 : i32
    %c0_i32_0 = arith.constant 0 : i32
    %c0_i32_1 = arith.constant 0 : i32
    return %c0_i32, %c0_i32_0 : i32, i32
  }
  func.func @transform_4(%arg0: i32) -> (i32, i32) {
    %c0_i32 = arith.constant 0 : i32
    %c0_i32_0 = arith.constant 0 : i32
    %c0_i32_1 = arith.constant 0 : i32
    return %c0_i32, %c0_i32_0 : i32, i32
  }
  func.func @transform_5(%arg0: i32) -> (i32, i32) {
    %c0_i32 = arith.constant 0 : i32
    %c0_i32_0 = arith.constant 0 : i32
    %c0_i32_1 = arith.constant 0 : i32
    return %c0_i32, %c0_i32_0 : i32, i32
  }
}

module attributes {stable_mosaic.version = 11 : i64} {
  func.func @_conv_bn_fused_kernel(%arg0: i32, %arg1: memref<16x576xbf16, #tpu.memory_space<vmem>>, %arg2: memref<576x128xbf16, #tpu.memory_space<vmem>>, %arg3: memref<1x128xf32, #tpu.memory_space<vmem>>, %arg4: memref<1x64xf32, #tpu.memory_space<vmem>>, %arg5: memref<1x64xf32, #tpu.memory_space<vmem>>, %arg6: memref<16x128xbf16, #tpu.memory_space<vmem>>) attributes {dimension_semantics = [#tpu.dimension_semantics<arbitrary>], iteration_bounds = array<i64: 1>, scalar_prefetch = 0 : i64, scratch_operands = 0 : i64, tpu.core_type = #tpu.core_type<tc>, window_params = [{pipeline_mode = #tpu.pipeline_mode<synchronous>, transform_indices = @transform_0, window_bounds = array<i64: 16, 576>}, {pipeline_mode = #tpu.pipeline_mode<synchronous>, transform_indices = @transform_1, window_bounds = array<i64: 576, 128>}, {pipeline_mode = #tpu.pipeline_mode<synchronous>, transform_indices = @transform_2, window_bounds = array<i64: 1, 128>}, {pipeline_mode = #tpu.pipeline_mode<synchronous>, transform_indices = @transform_3, window_bounds = array<i64: 1, 64>}, {pipeline_mode = #tpu.pipeline_mode<synchronous>, transform_indices = @transform_4, window_bounds = array<i64: 1, 64>}, {pipeline_mode = #tpu.pipeline_mode<synchronous>, transform_indices = @transform_5, window_bounds = array<i64: 16, 128>}]} {
    %c0 = arith.constant 0 : index
    %c0_0 = arith.constant 0 : index
    %0 = vector.load %arg1[%c0, %c0_0] : memref<16x576xbf16, #tpu.memory_space<vmem>>, vector<16x576xbf16>
    %c0_1 = arith.constant 0 : index
    %c0_2 = arith.constant 0 : index
    %1 = vector.load %arg2[%c0_1, %c0_2] : memref<576x128xbf16, #tpu.memory_space<vmem>>, vector<576x128xbf16>
    %cst = arith.constant dense<0.000000e+00> : vector<16x128xf32>
    %2 = tpu.matmul %0, %1, %cst {dimension_numbers = #tpu.dot_dimension_numbers<[1], [0], [0], [1], [0, 0, 1, 1], [], []>} : vector<16x576xbf16>, vector<576x128xbf16>, vector<16x128xf32> -> vector<16x128xf32>
    %c0_3 = arith.constant 0 : index
    %c0_4 = arith.constant 0 : index
    %3 = vector.load %arg3[%c0_3, %c0_4] : memref<1x128xf32, #tpu.memory_space<vmem>>, vector<1x128xf32>
    %4 = vector.broadcast %3 : vector<1x128xf32> to vector<16x128xf32>
    %5 = arith.addf %2, %4 : vector<16x128xf32>
    %cst_5 = arith.constant dense<0.000000e+00> : vector<128xf32>
    %6 = vector.multi_reduction <add>, %5, %cst_5 [0] : vector<16x128xf32> to vector<128xf32>
    %7 = vector.shape_cast %6 : vector<128xf32> to vector<1x128xf32>
    %8 = arith.mulf %5, %5 : vector<16x128xf32>
    %cst_6 = arith.constant dense<0.000000e+00> : vector<128xf32>
    %9 = vector.multi_reduction <add>, %8, %cst_6 [0] : vector<16x128xf32> to vector<128xf32>
    %10 = vector.shape_cast %9 : vector<128xf32> to vector<1x128xf32>
    %11 = vector.extract_strided_slice %7 {offsets = [0, 0], sizes = [1, 64], strides = [1, 1]} : vector<1x128xf32> to vector<1x64xf32>
    %12 = vector.extract_strided_slice %10 {offsets = [0, 0], sizes = [1, 64], strides = [1, 1]} : vector<1x128xf32> to vector<1x64xf32>
    %13 = vector.extract_strided_slice %7 {offsets = [0, 64], sizes = [1, 64], strides = [1, 1]} : vector<1x128xf32> to vector<1x64xf32>
    %14 = arith.addf %11, %13 : vector<1x64xf32>
    %15 = vector.extract_strided_slice %10 {offsets = [0, 64], sizes = [1, 64], strides = [1, 1]} : vector<1x128xf32> to vector<1x64xf32>
    %16 = arith.addf %12, %15 : vector<1x64xf32>
    %cst_7 = arith.constant 3.200000e+01 : f32
    %17 = vector.broadcast %cst_7 : f32 to vector<1x64xf32>
    %18 = arith.divf %14, %17 : vector<1x64xf32>
    %cst_8 = arith.constant 3.200000e+01 : f32
    %19 = vector.broadcast %cst_8 : f32 to vector<1x64xf32>
    %20 = arith.divf %16, %19 : vector<1x64xf32>
    %21 = arith.mulf %18, %18 : vector<1x64xf32>
    %22 = arith.subf %20, %21 : vector<1x64xf32>
    %cst_9 = arith.constant 0.000000e+00 : f32
    %23 = vector.broadcast %cst_9 : f32 to vector<1x64xf32>
    %24 = arith.maximumf %22, %23 : vector<1x64xf32>
    %c0_10 = arith.constant 0 : index
    %c0_11 = arith.constant 0 : index
    %25 = vector.load %arg4[%c0_10, %c0_11] : memref<1x64xf32, #tpu.memory_space<vmem>>, vector<1x64xf32>
    %cst_12 = arith.constant 9.99999974E-6 : f32
    %26 = vector.broadcast %cst_12 : f32 to vector<1x64xf32>
    %27 = arith.addf %24, %26 : vector<1x64xf32>
    %28 = math.rsqrt %27 : vector<1x64xf32>
    %29 = arith.mulf %25, %28 : vector<1x64xf32>
    %c0_13 = arith.constant 0 : index
    %c0_14 = arith.constant 0 : index
    %30 = vector.load %arg5[%c0_13, %c0_14] : memref<1x64xf32, #tpu.memory_space<vmem>>, vector<1x64xf32>
    %31 = arith.mulf %18, %29 : vector<1x64xf32>
    %32 = arith.subf %30, %31 : vector<1x64xf32>
    %33 = tpu.concatenate %29, %29 in 1 : vector<1x64xf32>, vector<1x64xf32> -> vector<1x128xf32>
    %34 = tpu.concatenate %32, %32 in 1 : vector<1x64xf32>, vector<1x64xf32> -> vector<1x128xf32>
    %35 = vector.broadcast %33 : vector<1x128xf32> to vector<16x128xf32>
    %36 = arith.mulf %5, %35 : vector<16x128xf32>
    %37 = vector.broadcast %34 : vector<1x128xf32> to vector<16x128xf32>
    %38 = arith.addf %36, %37 : vector<16x128xf32>
    %cst_15 = arith.constant 0.000000e+00 : f32
    %39 = vector.broadcast %cst_15 : f32 to vector<16x128xf32>
    %40 = arith.maximumf %38, %39 : vector<16x128xf32>
    %41 = arith.truncf %40 : vector<16x128xf32> to vector<16x128xbf16>
    %c0_16 = arith.constant 0 : index
    %c0_17 = arith.constant 0 : index
    %42 = vector.load %arg6[%c0_16, %c0_17] : memref<16x128xbf16, #tpu.memory_space<vmem>>, vector<16x128xbf16>
    tpu.vector_store %arg6[%c0_16, %c0_17], %41 {strides = array<i32>} : memref<16x128xbf16, #tpu.memory_space<vmem>>, vector<16x128xbf16>,
    return
  }
  func.func @transform_0(%arg0: i32) -> (i32, i32) {
    %c0_i32 = arith.constant 0 : i32
    %c0_i32_0 = arith.constant 0 : i32
    %c0_i32_1 = arith.constant 0 : i32
    return %c0_i32, %c0_i32_0 : i32, i32
  }
  func.func @transform_1(%arg0: i32) -> (i32, i32) {
    %c0_i32 = arith.constant 0 : i32
    %c0_i32_0 = arith.constant 0 : i32
    %c0_i32_1 = arith.constant 0 : i32
    return %c0_i32, %c0_i32_0 : i32, i32
  }
  func.func @transform_2(%arg0: i32) -> (i32, i32) {
    %c0_i32 = arith.constant 0 : i32
    %c0_i32_0 = arith.constant 0 : i32
    %c0_i32_1 = arith.constant 0 : i32
    return %c0_i32, %c0_i32_0 : i32, i32
  }
  func.func @transform_3(%arg0: i32) -> (i32, i32) {
    %c0_i32 = arith.constant 0 : i32
    %c0_i32_0 = arith.constant 0 : i32
    %c0_i32_1 = arith.constant 0 : i32
    return %c0_i32, %c0_i32_0 : i32, i32
  }
  func.func @transform_4(%arg0: i32) -> (i32, i32) {
    %c0_i32 = arith.constant 0 : i32
    %c0_i32_0 = arith.constant 0 : i32
    %c0_i32_1 = arith.constant 0 : i32
    return %c0_i32, %c0_i32_0 : i32, i32
  }
  func.func @transform_5(%arg0: i32) -> (i32, i32) {
    %c0_i32 = arith.constant 0 : i32
    %c0_i32_0 = arith.constant 0 : i32
    %c0_i32_1 = arith.constant 0 : i32
    return %c0_i32, %c0_i32_0 : i32, i32
  }
}

module attributes {stable_mosaic.version = 11 : i64} {
  func.func @_conv_bn_fused_kernel(%arg0: i32, %arg1: memref<16x1152xbf16, #tpu.memory_space<vmem>>, %arg2: memref<1152x128xbf16, #tpu.memory_space<vmem>>, %arg3: memref<1x128xf32, #tpu.memory_space<vmem>>, %arg4: memref<1x64xf32, #tpu.memory_space<vmem>>, %arg5: memref<1x64xf32, #tpu.memory_space<vmem>>, %arg6: memref<16x128xbf16, #tpu.memory_space<vmem>>) attributes {dimension_semantics = [#tpu.dimension_semantics<arbitrary>], iteration_bounds = array<i64: 1>, scalar_prefetch = 0 : i64, scratch_operands = 0 : i64, tpu.core_type = #tpu.core_type<tc>, window_params = [{pipeline_mode = #tpu.pipeline_mode<synchronous>, transform_indices = @transform_0, window_bounds = array<i64: 16, 1152>}, {pipeline_mode = #tpu.pipeline_mode<synchronous>, transform_indices = @transform_1, window_bounds = array<i64: 1152, 128>}, {pipeline_mode = #tpu.pipeline_mode<synchronous>, transform_indices = @transform_2, window_bounds = array<i64: 1, 128>}, {pipeline_mode = #tpu.pipeline_mode<synchronous>, transform_indices = @transform_3, window_bounds = array<i64: 1, 64>}, {pipeline_mode = #tpu.pipeline_mode<synchronous>, transform_indices = @transform_4, window_bounds = array<i64: 1, 64>}, {pipeline_mode = #tpu.pipeline_mode<synchronous>, transform_indices = @transform_5, window_bounds = array<i64: 16, 128>}]} {
    %c0 = arith.constant 0 : index
    %c0_0 = arith.constant 0 : index
    %0 = vector.load %arg1[%c0, %c0_0] : memref<16x1152xbf16, #tpu.memory_space<vmem>>, vector<16x1152xbf16>
    %c0_1 = arith.constant 0 : index
    %c0_2 = arith.constant 0 : index
    %1 = vector.load %arg2[%c0_1, %c0_2] : memref<1152x128xbf16, #tpu.memory_space<vmem>>, vector<1152x128xbf16>
    %cst = arith.constant dense<0.000000e+00> : vector<16x128xf32>
    %2 = tpu.matmul %0, %1, %cst {dimension_numbers = #tpu.dot_dimension_numbers<[1], [0], [0], [1], [0, 0, 1, 1], [], []>} : vector<16x1152xbf16>, vector<1152x128xbf16>, vector<16x128xf32> -> vector<16x128xf32>
    %c0_3 = arith.constant 0 : index
    %c0_4 = arith.constant 0 : index
    %3 = vector.load %arg3[%c0_3, %c0_4] : memref<1x128xf32, #tpu.memory_space<vmem>>, vector<1x128xf32>
    %4 = vector.broadcast %3 : vector<1x128xf32> to vector<16x128xf32>
    %5 = arith.addf %2, %4 : vector<16x128xf32>
    %cst_5 = arith.constant dense<0.000000e+00> : vector<128xf32>
    %6 = vector.multi_reduction <add>, %5, %cst_5 [0] : vector<16x128xf32> to vector<128xf32>
    %7 = vector.shape_cast %6 : vector<128xf32> to vector<1x128xf32>
    %8 = arith.mulf %5, %5 : vector<16x128xf32>
    %cst_6 = arith.constant dense<0.000000e+00> : vector<128xf32>
    %9 = vector.multi_reduction <add>, %8, %cst_6 [0] : vector<16x128xf32> to vector<128xf32>
    %10 = vector.shape_cast %9 : vector<128xf32> to vector<1x128xf32>
    %11 = vector.extract_strided_slice %7 {offsets = [0, 0], sizes = [1, 64], strides = [1, 1]} : vector<1x128xf32> to vector<1x64xf32>
    %12 = vector.extract_strided_slice %10 {offsets = [0, 0], sizes = [1, 64], strides = [1, 1]} : vector<1x128xf32> to vector<1x64xf32>
    %13 = vector.extract_strided_slice %7 {offsets = [0, 64], sizes = [1, 64], strides = [1, 1]} : vector<1x128xf32> to vector<1x64xf32>
    %14 = arith.addf %11, %13 : vector<1x64xf32>
    %15 = vector.extract_strided_slice %10 {offsets = [0, 64], sizes = [1, 64], strides = [1, 1]} : vector<1x128xf32> to vector<1x64xf32>
    %16 = arith.addf %12, %15 : vector<1x64xf32>
    %cst_7 = arith.constant 3.200000e+01 : f32
    %17 = vector.broadcast %cst_7 : f32 to vector<1x64xf32>
    %18 = arith.divf %14, %17 : vector<1x64xf32>
    %cst_8 = arith.constant 3.200000e+01 : f32
    %19 = vector.broadcast %cst_8 : f32 to vector<1x64xf32>
    %20 = arith.divf %16, %19 : vector<1x64xf32>
    %21 = arith.mulf %18, %18 : vector<1x64xf32>
    %22 = arith.subf %20, %21 : vector<1x64xf32>
    %cst_9 = arith.constant 0.000000e+00 : f32
    %23 = vector.broadcast %cst_9 : f32 to vector<1x64xf32>
    %24 = arith.maximumf %22, %23 : vector<1x64xf32>
    %c0_10 = arith.constant 0 : index
    %c0_11 = arith.constant 0 : index
    %25 = vector.load %arg4[%c0_10, %c0_11] : memref<1x64xf32, #tpu.memory_space<vmem>>, vector<1x64xf32>
    %cst_12 = arith.constant 9.99999974E-6 : f32
    %26 = vector.broadcast %cst_12 : f32 to vector<1x64xf32>
    %27 = arith.addf %24, %26 : vector<1x64xf32>
    %28 = math.rsqrt %27 : vector<1x64xf32>
    %29 = arith.mulf %25, %28 : vector<1x64xf32>
    %c0_13 = arith.constant 0 : index
    %c0_14 = arith.constant 0 : index
    %30 = vector.load %arg5[%c0_13, %c0_14] : memref<1x64xf32, #tpu.memory_space<vmem>>, vector<1x64xf32>
    %31 = arith.mulf %18, %29 : vector<1x64xf32>
    %32 = arith.subf %30, %31 : vector<1x64xf32>
    %33 = tpu.concatenate %29, %29 in 1 : vector<1x64xf32>, vector<1x64xf32> -> vector<1x128xf32>
    %34 = tpu.concatenate %32, %32 in 1 : vector<1x64xf32>, vector<1x64xf32> -> vector<1x128xf32>
    %35 = vector.broadcast %33 : vector<1x128xf32> to vector<16x128xf32>
    %36 = arith.mulf %5, %35 : vector<16x128xf32>
    %37 = vector.broadcast %34 : vector<1x128xf32> to vector<16x128xf32>
    %38 = arith.addf %36, %37 : vector<16x128xf32>
    %cst_15 = arith.constant 0.000000e+00 : f32
    %39 = vector.broadcast %cst_15 : f32 to vector<16x128xf32>
    %40 = arith.maximumf %38, %39 : vector<16x128xf32>
    %41 = arith.truncf %40 : vector<16x128xf32> to vector<16x128xbf16>
    %c0_16 = arith.constant 0 : index
    %c0_17 = arith.constant 0 : index
    %42 = vector.load %arg6[%c0_16, %c0_17] : memref<16x128xbf16, #tpu.memory_space<vmem>>, vector<16x128xbf16>
    tpu.vector_store %arg6[%c0_16, %c0_17], %41 {strides = array<i32>} : memref<16x128xbf16, #tpu.memory_space<vmem>>, vector<16x128xbf16>,
    return
  }
  func.func @transform_0(%arg0: i32) -> (i32, i32) {
    %c0_i32 = arith.constant 0 : i32
    %c0_i32_0 = arith.constant 0 : i32
    %c0_i32_1 = arith.constant 0 : i32
    return %c0_i32, %c0_i32_0 : i32, i32
  }
  func.func @transform_1(%arg0: i32) -> (i32, i32) {
    %c0_i32 = arith.constant 0 : i32
    %c0_i32_0 = arith.constant 0 : i32
    %c0_i32_1 = arith.constant 0 : i32
    return %c0_i32, %c0_i32_0 : i32, i32
  }
  func.func @transform_2(%arg0: i32) -> (i32, i32) {
    %c0_i32 = arith.constant 0 : i32
    %c0_i32_0 = arith.constant 0 : i32
    %c0_i32_1 = arith.constant 0 : i32
    return %c0_i32, %c0_i32_0 : i32, i32
  }
  func.func @transform_3(%arg0: i32) -> (i32, i32) {
    %c0_i32 = arith.constant 0 : i32
    %c0_i32_0 = arith.constant 0 : i32
    %c0_i32_1 = arith.constant 0 : i32
    return %c0_i32, %c0_i32_0 : i32, i32
  }
  func.func @transform_4(%arg0: i32) -> (i32, i32) {
    %c0_i32 = arith.constant 0 : i32
    %c0_i32_0 = arith.constant 0 : i32
    %c0_i32_1 = arith.constant 0 : i32
    return %c0_i32, %c0_i32_0 : i32, i32
  }
  func.func @transform_5(%arg0: i32) -> (i32, i32) {
    %c0_i32 = arith.constant 0 : i32
    %c0_i32_0 = arith.constant 0 : i32
    %c0_i32_1 = arith.constant 0 : i32
    return %c0_i32, %c0_i32_0 : i32, i32
  }
}

module attributes {stable_mosaic.version = 11 : i64} {
  func.func @_conv_bn_fused_kernel(%arg0: i32, %arg1: memref<16x1152xbf16, #tpu.memory_space<vmem>>, %arg2: memref<1152x128xbf16, #tpu.memory_space<vmem>>, %arg3: memref<1x128xf32, #tpu.memory_space<vmem>>, %arg4: memref<1x64xf32, #tpu.memory_space<vmem>>, %arg5: memref<1x64xf32, #tpu.memory_space<vmem>>, %arg6: memref<16x128xbf16, #tpu.memory_space<vmem>>, %arg7: memref<16x128xbf16, #tpu.memory_space<vmem>>) attributes {dimension_semantics = [#tpu.dimension_semantics<arbitrary>], iteration_bounds = array<i64: 1>, scalar_prefetch = 0 : i64, scratch_operands = 0 : i64, tpu.core_type = #tpu.core_type<tc>, window_params = [{pipeline_mode = #tpu.pipeline_mode<synchronous>, transform_indices = @transform_0, window_bounds = array<i64: 16, 1152>}, {pipeline_mode = #tpu.pipeline_mode<synchronous>, transform_indices = @transform_1, window_bounds = array<i64: 1152, 128>}, {pipeline_mode = #tpu.pipeline_mode<synchronous>, transform_indices = @transform_2, window_bounds = array<i64: 1, 128>}, {pipeline_mode = #tpu.pipeline_mode<synchronous>, transform_indices = @transform_3, window_bounds = array<i64: 1, 64>}, {pipeline_mode = #tpu.pipeline_mode<synchronous>, transform_indices = @transform_4, window_bounds = array<i64: 1, 64>}, {pipeline_mode = #tpu.pipeline_mode<synchronous>, transform_indices = @transform_5, window_bounds = array<i64: 16, 128>}, {pipeline_mode = #tpu.pipeline_mode<synchronous>, transform_indices = @transform_6, window_bounds = array<i64: 16, 128>}]} {
    %c0 = arith.constant 0 : index
    %c0_0 = arith.constant 0 : index
    %0 = vector.load %arg1[%c0, %c0_0] : memref<16x1152xbf16, #tpu.memory_space<vmem>>, vector<16x1152xbf16>
    %c0_1 = arith.constant 0 : index
    %c0_2 = arith.constant 0 : index
    %1 = vector.load %arg2[%c0_1, %c0_2] : memref<1152x128xbf16, #tpu.memory_space<vmem>>, vector<1152x128xbf16>
    %cst = arith.constant dense<0.000000e+00> : vector<16x128xf32>
    %2 = tpu.matmul %0, %1, %cst {dimension_numbers = #tpu.dot_dimension_numbers<[1], [0], [0], [1], [0, 0, 1, 1], [], []>} : vector<16x1152xbf16>, vector<1152x128xbf16>, vector<16x128xf32> -> vector<16x128xf32>
    %c0_3 = arith.constant 0 : index
    %c0_4 = arith.constant 0 : index
    %3 = vector.load %arg3[%c0_3, %c0_4] : memref<1x128xf32, #tpu.memory_space<vmem>>, vector<1x128xf32>
    %4 = vector.broadcast %3 : vector<1x128xf32> to vector<16x128xf32>
    %5 = arith.addf %2, %4 : vector<16x128xf32>
    %cst_5 = arith.constant dense<0.000000e+00> : vector<128xf32>
    %6 = vector.multi_reduction <add>, %5, %cst_5 [0] : vector<16x128xf32> to vector<128xf32>
    %7 = vector.shape_cast %6 : vector<128xf32> to vector<1x128xf32>
    %8 = arith.mulf %5, %5 : vector<16x128xf32>
    %cst_6 = arith.constant dense<0.000000e+00> : vector<128xf32>
    %9 = vector.multi_reduction <add>, %8, %cst_6 [0] : vector<16x128xf32> to vector<128xf32>
    %10 = vector.shape_cast %9 : vector<128xf32> to vector<1x128xf32>
    %11 = vector.extract_strided_slice %7 {offsets = [0, 0], sizes = [1, 64], strides = [1, 1]} : vector<1x128xf32> to vector<1x64xf32>
    %12 = vector.extract_strided_slice %10 {offsets = [0, 0], sizes = [1, 64], strides = [1, 1]} : vector<1x128xf32> to vector<1x64xf32>
    %13 = vector.extract_strided_slice %7 {offsets = [0, 64], sizes = [1, 64], strides = [1, 1]} : vector<1x128xf32> to vector<1x64xf32>
    %14 = arith.addf %11, %13 : vector<1x64xf32>
    %15 = vector.extract_strided_slice %10 {offsets = [0, 64], sizes = [1, 64], strides = [1, 1]} : vector<1x128xf32> to vector<1x64xf32>
    %16 = arith.addf %12, %15 : vector<1x64xf32>
    %cst_7 = arith.constant 3.200000e+01 : f32
    %17 = vector.broadcast %cst_7 : f32 to vector<1x64xf32>
    %18 = arith.divf %14, %17 : vector<1x64xf32>
    %cst_8 = arith.constant 3.200000e+01 : f32
    %19 = vector.broadcast %cst_8 : f32 to vector<1x64xf32>
    %20 = arith.divf %16, %19 : vector<1x64xf32>
    %21 = arith.mulf %18, %18 : vector<1x64xf32>
    %22 = arith.subf %20, %21 : vector<1x64xf32>
    %cst_9 = arith.constant 0.000000e+00 : f32
    %23 = vector.broadcast %cst_9 : f32 to vector<1x64xf32>
    %24 = arith.maximumf %22, %23 : vector<1x64xf32>
    %c0_10 = arith.constant 0 : index
    %c0_11 = arith.constant 0 : index
    %25 = vector.load %arg4[%c0_10, %c0_11] : memref<1x64xf32, #tpu.memory_space<vmem>>, vector<1x64xf32>
    %cst_12 = arith.constant 9.99999974E-6 : f32
    %26 = vector.broadcast %cst_12 : f32 to vector<1x64xf32>
    %27 = arith.addf %24, %26 : vector<1x64xf32>
    %28 = math.rsqrt %27 : vector<1x64xf32>
    %29 = arith.mulf %25, %28 : vector<1x64xf32>
    %c0_13 = arith.constant 0 : index
    %c0_14 = arith.constant 0 : index
    %30 = vector.load %arg5[%c0_13, %c0_14] : memref<1x64xf32, #tpu.memory_space<vmem>>, vector<1x64xf32>
    %31 = arith.mulf %18, %29 : vector<1x64xf32>
    %32 = arith.subf %30, %31 : vector<1x64xf32>
    %33 = tpu.concatenate %29, %29 in 1 : vector<1x64xf32>, vector<1x64xf32> -> vector<1x128xf32>
    %34 = tpu.concatenate %32, %32 in 1 : vector<1x64xf32>, vector<1x64xf32> -> vector<1x128xf32>
    %35 = vector.broadcast %33 : vector<1x128xf32> to vector<16x128xf32>
    %36 = arith.mulf %5, %35 : vector<16x128xf32>
    %37 = vector.broadcast %34 : vector<1x128xf32> to vector<16x128xf32>
    %38 = arith.addf %36, %37 : vector<16x128xf32>
    %c0_15 = arith.constant 0 : index
    %c0_16 = arith.constant 0 : index
    %39 = vector.load %arg6[%c0_15, %c0_16] : memref<16x128xbf16, #tpu.memory_space<vmem>>, vector<16x128xbf16>
    %40 = arith.extf %39 : vector<16x128xbf16> to vector<16x128xf32>
    %41 = arith.addf %38, %40 : vector<16x128xf32>
    %42 = arith.truncf %41 : vector<16x128xf32> to vector<16x128xbf16>
    %c0_17 = arith.constant 0 : index
    %c0_18 = arith.constant 0 : index
    %43 = vector.load %arg7[%c0_17, %c0_18] : memref<16x128xbf16, #tpu.memory_space<vmem>>, vector<16x128xbf16>
    tpu.vector_store %arg7[%c0_17, %c0_18], %42 {strides = array<i32>} : memref<16x128xbf16, #tpu.memory_space<vmem>>, vector<16x128xbf16>,
    return
  }
  func.func @transform_0(%arg0: i32) -> (i32, i32) {
    %c0_i32 = arith.constant 0 : i32
    %c0_i32_0 = arith.constant 0 : i32
    %c0_i32_1 = arith.constant 0 : i32
    return %c0_i32, %c0_i32_0 : i32, i32
  }
  func.func @transform_1(%arg0: i32) -> (i32, i32) {
    %c0_i32 = arith.constant 0 : i32
    %c0_i32_0 = arith.constant 0 : i32
    %c0_i32_1 = arith.constant 0 : i32
    return %c0_i32, %c0_i32_0 : i32, i32
  }
  func.func @transform_2(%arg0: i32) -> (i32, i32) {
    %c0_i32 = arith.constant 0 : i32
    %c0_i32_0 = arith.constant 0 : i32
    %c0_i32_1 = arith.constant 0 : i32
    return %c0_i32, %c0_i32_0 : i32, i32
  }
  func.func @transform_3(%arg0: i32) -> (i32, i32) {
    %c0_i32 = arith.constant 0 : i32
    %c0_i32_0 = arith.constant 0 : i32
    %c0_i32_1 = arith.constant 0 : i32
    return %c0_i32, %c0_i32_0 : i32, i32
  }
  func.func @transform_4(%arg0: i32) -> (i32, i32) {
    %c0_i32 = arith.constant 0 : i32
    %c0_i32_0 = arith.constant 0 : i32
    %c0_i32_1 = arith.constant 0 : i32
    return %c0_i32, %c0_i32_0 : i32, i32
  }
  func.func @transform_5(%arg0: i32) -> (i32, i32) {
    %c0_i32 = arith.constant 0 : i32
    %c0_i32_0 = arith.constant 0 : i32
    %c0_i32_1 = arith.constant 0 : i32
    return %c0_i32, %c0_i32_0 : i32, i32
  }
  func.func @transform_6(%arg0: i32) -> (i32, i32) {
    %c0_i32 = arith.constant 0 : i32
    %c0_i32_0 = arith.constant 0 : i32
    %c0_i32_1 = arith.constant 0 : i32
    return %c0_i32, %c0_i32_0 : i32, i32
  }
}

module attributes {stable_mosaic.version = 11 : i64} {
  func.func @_conv_bn_fused_kernel(%arg0: i32, %arg1: memref<32x256xbf16, #tpu.memory_space<vmem>>, %arg2: memref<256x128xbf16, #tpu.memory_space<vmem>>, %arg3: memref<1x128xf32, #tpu.memory_space<vmem>>, %arg4: memref<1x32xf32, #tpu.memory_space<vmem>>, %arg5: memref<1x32xf32, #tpu.memory_space<vmem>>, %arg6: memref<32x128xbf16, #tpu.memory_space<vmem>>) attributes {dimension_semantics = [#tpu.dimension_semantics<arbitrary>], iteration_bounds = array<i64: 1>, scalar_prefetch = 0 : i64, scratch_operands = 0 : i64, tpu.core_type = #tpu.core_type<tc>, window_params = [{pipeline_mode = #tpu.pipeline_mode<synchronous>, transform_indices = @transform_0, window_bounds = array<i64: 32, 256>}, {pipeline_mode = #tpu.pipeline_mode<synchronous>, transform_indices = @transform_1, window_bounds = array<i64: 256, 128>}, {pipeline_mode = #tpu.pipeline_mode<synchronous>, transform_indices = @transform_2, window_bounds = array<i64: 1, 128>}, {pipeline_mode = #tpu.pipeline_mode<synchronous>, transform_indices = @transform_3, window_bounds = array<i64: 1, 32>}, {pipeline_mode = #tpu.pipeline_mode<synchronous>, transform_indices = @transform_4, window_bounds = array<i64: 1, 32>}, {pipeline_mode = #tpu.pipeline_mode<synchronous>, transform_indices = @transform_5, window_bounds = array<i64: 32, 128>}]} {
    %c0 = arith.constant 0 : index
    %c0_0 = arith.constant 0 : index
    %0 = vector.load %arg1[%c0, %c0_0] : memref<32x256xbf16, #tpu.memory_space<vmem>>, vector<32x256xbf16>
    %c0_1 = arith.constant 0 : index
    %c0_2 = arith.constant 0 : index
    %1 = vector.load %arg2[%c0_1, %c0_2] : memref<256x128xbf16, #tpu.memory_space<vmem>>, vector<256x128xbf16>
    %cst = arith.constant dense<0.000000e+00> : vector<32x128xf32>
    %2 = tpu.matmul %0, %1, %cst {dimension_numbers = #tpu.dot_dimension_numbers<[1], [0], [0], [1], [0, 0, 1, 1], [], []>} : vector<32x256xbf16>, vector<256x128xbf16>, vector<32x128xf32> -> vector<32x128xf32>
    %c0_3 = arith.constant 0 : index
    %c0_4 = arith.constant 0 : index
    %3 = vector.load %arg3[%c0_3, %c0_4] : memref<1x128xf32, #tpu.memory_space<vmem>>, vector<1x128xf32>
    %4 = vector.broadcast %3 : vector<1x128xf32> to vector<32x128xf32>
    %5 = arith.addf %2, %4 : vector<32x128xf32>
    %cst_5 = arith.constant dense<0.000000e+00> : vector<128xf32>
    %6 = vector.multi_reduction <add>, %5, %cst_5 [0] : vector<32x128xf32> to vector<128xf32>
    %7 = vector.shape_cast %6 : vector<128xf32> to vector<1x128xf32>
    %8 = arith.mulf %5, %5 : vector<32x128xf32>
    %cst_6 = arith.constant dense<0.000000e+00> : vector<128xf32>
    %9 = vector.multi_reduction <add>, %8, %cst_6 [0] : vector<32x128xf32> to vector<128xf32>
    %10 = vector.shape_cast %9 : vector<128xf32> to vector<1x128xf32>
    %11 = vector.extract_strided_slice %7 {offsets = [0, 0], sizes = [1, 32], strides = [1, 1]} : vector<1x128xf32> to vector<1x32xf32>
    %12 = vector.extract_strided_slice %10 {offsets = [0, 0], sizes = [1, 32], strides = [1, 1]} : vector<1x128xf32> to vector<1x32xf32>
    %13 = vector.extract_strided_slice %7 {offsets = [0, 32], sizes = [1, 32], strides = [1, 1]} : vector<1x128xf32> to vector<1x32xf32>
    %14 = arith.addf %11, %13 : vector<1x32xf32>
    %15 = vector.extract_strided_slice %10 {offsets = [0, 32], sizes = [1, 32], strides = [1, 1]} : vector<1x128xf32> to vector<1x32xf32>
    %16 = arith.addf %12, %15 : vector<1x32xf32>
    %17 = vector.extract_strided_slice %7 {offsets = [0, 64], sizes = [1, 32], strides = [1, 1]} : vector<1x128xf32> to vector<1x32xf32>
    %18 = arith.addf %14, %17 : vector<1x32xf32>
    %19 = vector.extract_strided_slice %10 {offsets = [0, 64], sizes = [1, 32], strides = [1, 1]} : vector<1x128xf32> to vector<1x32xf32>
    %20 = arith.addf %16, %19 : vector<1x32xf32>
    %21 = vector.extract_strided_slice %7 {offsets = [0, 96], sizes = [1, 32], strides = [1, 1]} : vector<1x128xf32> to vector<1x32xf32>
    %22 = arith.addf %18, %21 : vector<1x32xf32>
    %23 = vector.extract_strided_slice %10 {offsets = [0, 96], sizes = [1, 32], strides = [1, 1]} : vector<1x128xf32> to vector<1x32xf32>
    %24 = arith.addf %20, %23 : vector<1x32xf32>
    %cst_7 = arith.constant 1.280000e+02 : f32
    %25 = vector.broadcast %cst_7 : f32 to vector<1x32xf32>
    %26 = arith.divf %22, %25 : vector<1x32xf32>
    %cst_8 = arith.constant 1.280000e+02 : f32
    %27 = vector.broadcast %cst_8 : f32 to vector<1x32xf32>
    %28 = arith.divf %24, %27 : vector<1x32xf32>
    %29 = arith.mulf %26, %26 : vector<1x32xf32>
    %30 = arith.subf %28, %29 : vector<1x32xf32>
    %cst_9 = arith.constant 0.000000e+00 : f32
    %31 = vector.broadcast %cst_9 : f32 to vector<1x32xf32>
    %32 = arith.maximumf %30, %31 : vector<1x32xf32>
    %c0_10 = arith.constant 0 : index
    %c0_11 = arith.constant 0 : index
    %33 = vector.load %arg4[%c0_10, %c0_11] : memref<1x32xf32, #tpu.memory_space<vmem>>, vector<1x32xf32>
    %cst_12 = arith.constant 9.99999974E-6 : f32
    %34 = vector.broadcast %cst_12 : f32 to vector<1x32xf32>
    %35 = arith.addf %32, %34 : vector<1x32xf32>
    %36 = math.rsqrt %35 : vector<1x32xf32>
    %37 = arith.mulf %33, %36 : vector<1x32xf32>
    %c0_13 = arith.constant 0 : index
    %c0_14 = arith.constant 0 : index
    %38 = vector.load %arg5[%c0_13, %c0_14] : memref<1x32xf32, #tpu.memory_space<vmem>>, vector<1x32xf32>
    %39 = arith.mulf %26, %37 : vector<1x32xf32>
    %40 = arith.subf %38, %39 : vector<1x32xf32>
    %41 = tpu.concatenate %37, %37, %37, %37 in 1 : vector<1x32xf32>, vector<1x32xf32>, vector<1x32xf32>, vector<1x32xf32> -> vector<1x128xf32>
    %42 = tpu.concatenate %40, %40, %40, %40 in 1 : vector<1x32xf32>, vector<1x32xf32>, vector<1x32xf32>, vector<1x32xf32> -> vector<1x128xf32>
    %43 = vector.broadcast %41 : vector<1x128xf32> to vector<32x128xf32>
    %44 = arith.mulf %5, %43 : vector<32x128xf32>
    %45 = vector.broadcast %42 : vector<1x128xf32> to vector<32x128xf32>
    %46 = arith.addf %44, %45 : vector<32x128xf32>
    %cst_15 = arith.constant 0.000000e+00 : f32
    %47 = vector.broadcast %cst_15 : f32 to vector<32x128xf32>
    %48 = arith.maximumf %46, %47 : vector<32x128xf32>
    %49 = arith.truncf %48 : vector<32x128xf32> to vector<32x128xbf16>
    %c0_16 = arith.constant 0 : index
    %c0_17 = arith.constant 0 : index
    %50 = vector.load %arg6[%c0_16, %c0_17] : memref<32x128xbf16, #tpu.memory_space<vmem>>, vector<32x128xbf16>
    tpu.vector_store %arg6[%c0_16, %c0_17], %49 {strides = array<i32>} : memref<32x128xbf16, #tpu.memory_space<vmem>>, vector<32x128xbf16>,
    return
  }
  func.func @transform_0(%arg0: i32) -> (i32, i32) {
    %c0_i32 = arith.constant 0 : i32
    %c0_i32_0 = arith.constant 0 : i32
    %c0_i32_1 = arith.constant 0 : i32
    return %c0_i32, %c0_i32_0 : i32, i32
  }
  func.func @transform_1(%arg0: i32) -> (i32, i32) {
    %c0_i32 = arith.constant 0 : i32
    %c0_i32_0 = arith.constant 0 : i32
    %c0_i32_1 = arith.constant 0 : i32
    return %c0_i32, %c0_i32_0 : i32, i32
  }
  func.func @transform_2(%arg0: i32) -> (i32, i32) {
    %c0_i32 = arith.constant 0 : i32
    %c0_i32_0 = arith.constant 0 : i32
    %c0_i32_1 = arith.constant 0 : i32
    return %c0_i32, %c0_i32_0 : i32, i32
  }
  func.func @transform_3(%arg0: i32) -> (i32, i32) {
    %c0_i32 = arith.constant 0 : i32
    %c0_i32_0 = arith.constant 0 : i32
    %c0_i32_1 = arith.constant 0 : i32
    return %c0_i32, %c0_i32_0 : i32, i32
  }
  func.func @transform_4(%arg0: i32) -> (i32, i32) {
    %c0_i32 = arith.constant 0 : i32
    %c0_i32_0 = arith.constant 0 : i32
    %c0_i32_1 = arith.constant 0 : i32
    return %c0_i32, %c0_i32_0 : i32, i32
  }
  func.func @transform_5(%arg0: i32) -> (i32, i32) {
    %c0_i32 = arith.constant 0 : i32
    %c0_i32_0 = arith.constant 0 : i32
    %c0_i32_1 = arith.constant 0 : i32
    return %c0_i32, %c0_i32_0 : i32, i32
  }
}

module attributes {stable_mosaic.version = 11 : i64} {
  func.func @_conv_bn_fused_kernel(%arg0: i32, %arg1: memref<64x256xbf16, #tpu.memory_space<vmem>>, %arg2: memref<256x128xbf16, #tpu.memory_space<vmem>>, %arg3: memref<1x128xf32, #tpu.memory_space<vmem>>, %arg4: memref<1x16xf32, #tpu.memory_space<vmem>>, %arg5: memref<1x16xf32, #tpu.memory_space<vmem>>, %arg6: memref<64x128xbf16, #tpu.memory_space<vmem>>) attributes {dimension_semantics = [#tpu.dimension_semantics<arbitrary>], iteration_bounds = array<i64: 1>, scalar_prefetch = 0 : i64, scratch_operands = 0 : i64, tpu.core_type = #tpu.core_type<tc>, window_params = [{pipeline_mode = #tpu.pipeline_mode<synchronous>, transform_indices = @transform_0, window_bounds = array<i64: 64, 256>}, {pipeline_mode = #tpu.pipeline_mode<synchronous>, transform_indices = @transform_1, window_bounds = array<i64: 256, 128>}, {pipeline_mode = #tpu.pipeline_mode<synchronous>, transform_indices = @transform_2, window_bounds = array<i64: 1, 128>}, {pipeline_mode = #tpu.pipeline_mode<synchronous>, transform_indices = @transform_3, window_bounds = array<i64: 1, 16>}, {pipeline_mode = #tpu.pipeline_mode<synchronous>, transform_indices = @transform_4, window_bounds = array<i64: 1, 16>}, {pipeline_mode = #tpu.pipeline_mode<synchronous>, transform_indices = @transform_5, window_bounds = array<i64: 64, 128>}]} {
    %c0 = arith.constant 0 : index
    %c0_0 = arith.constant 0 : index
    %0 = vector.load %arg1[%c0, %c0_0] : memref<64x256xbf16, #tpu.memory_space<vmem>>, vector<64x256xbf16>
    %c0_1 = arith.constant 0 : index
    %c0_2 = arith.constant 0 : index
    %1 = vector.load %arg2[%c0_1, %c0_2] : memref<256x128xbf16, #tpu.memory_space<vmem>>, vector<256x128xbf16>
    %cst = arith.constant dense<0.000000e+00> : vector<64x128xf32>
    %2 = tpu.matmul %0, %1, %cst {dimension_numbers = #tpu.dot_dimension_numbers<[1], [0], [0], [1], [0, 0, 1, 1], [], []>} : vector<64x256xbf16>, vector<256x128xbf16>, vector<64x128xf32> -> vector<64x128xf32>
    %c0_3 = arith.constant 0 : index
    %c0_4 = arith.constant 0 : index
    %3 = vector.load %arg3[%c0_3, %c0_4] : memref<1x128xf32, #tpu.memory_space<vmem>>, vector<1x128xf32>
    %4 = vector.broadcast %3 : vector<1x128xf32> to vector<64x128xf32>
    %5 = arith.addf %2, %4 : vector<64x128xf32>
    %cst_5 = arith.constant dense<0.000000e+00> : vector<128xf32>
    %6 = vector.multi_reduction <add>, %5, %cst_5 [0] : vector<64x128xf32> to vector<128xf32>
    %7 = vector.shape_cast %6 : vector<128xf32> to vector<1x128xf32>
    %8 = arith.mulf %5, %5 : vector<64x128xf32>
    %cst_6 = arith.constant dense<0.000000e+00> : vector<128xf32>
    %9 = vector.multi_reduction <add>, %8, %cst_6 [0] : vector<64x128xf32> to vector<128xf32>
    %10 = vector.shape_cast %9 : vector<128xf32> to vector<1x128xf32>
    %11 = vector.extract_strided_slice %7 {offsets = [0, 0], sizes = [1, 16], strides = [1, 1]} : vector<1x128xf32> to vector<1x16xf32>
    %12 = vector.extract_strided_slice %10 {offsets = [0, 0], sizes = [1, 16], strides = [1, 1]} : vector<1x128xf32> to vector<1x16xf32>
    %13 = vector.extract_strided_slice %7 {offsets = [0, 16], sizes = [1, 16], strides = [1, 1]} : vector<1x128xf32> to vector<1x16xf32>
    %14 = arith.addf %11, %13 : vector<1x16xf32>
    %15 = vector.extract_strided_slice %10 {offsets = [0, 16], sizes = [1, 16], strides = [1, 1]} : vector<1x128xf32> to vector<1x16xf32>
    %16 = arith.addf %12, %15 : vector<1x16xf32>
    %17 = vector.extract_strided_slice %7 {offsets = [0, 32], sizes = [1, 16], strides = [1, 1]} : vector<1x128xf32> to vector<1x16xf32>
    %18 = arith.addf %14, %17 : vector<1x16xf32>
    %19 = vector.extract_strided_slice %10 {offsets = [0, 32], sizes = [1, 16], strides = [1, 1]} : vector<1x128xf32> to vector<1x16xf32>
    %20 = arith.addf %16, %19 : vector<1x16xf32>
    %21 = vector.extract_strided_slice %7 {offsets = [0, 48], sizes = [1, 16], strides = [1, 1]} : vector<1x128xf32> to vector<1x16xf32>
    %22 = arith.addf %18, %21 : vector<1x16xf32>
    %23 = vector.extract_strided_slice %10 {offsets = [0, 48], sizes = [1, 16], strides = [1, 1]} : vector<1x128xf32> to vector<1x16xf32>
    %24 = arith.addf %20, %23 : vector<1x16xf32>
    %25 = vector.extract_strided_slice %7 {offsets = [0, 64], sizes = [1, 16], strides = [1, 1]} : vector<1x128xf32> to vector<1x16xf32>
    %26 = arith.addf %22, %25 : vector<1x16xf32>
    %27 = vector.extract_strided_slice %10 {offsets = [0, 64], sizes = [1, 16], strides = [1, 1]} : vector<1x128xf32> to vector<1x16xf32>
    %28 = arith.addf %24, %27 : vector<1x16xf32>
    %29 = vector.extract_strided_slice %7 {offsets = [0, 80], sizes = [1, 16], strides = [1, 1]} : vector<1x128xf32> to vector<1x16xf32>
    %30 = arith.addf %26, %29 : vector<1x16xf32>
    %31 = vector.extract_strided_slice %10 {offsets = [0, 80], sizes = [1, 16], strides = [1, 1]} : vector<1x128xf32> to vector<1x16xf32>
    %32 = arith.addf %28, %31 : vector<1x16xf32>
    %33 = vector.extract_strided_slice %7 {offsets = [0, 96], sizes = [1, 16], strides = [1, 1]} : vector<1x128xf32> to vector<1x16xf32>
    %34 = arith.addf %30, %33 : vector<1x16xf32>
    %35 = vector.extract_strided_slice %10 {offsets = [0, 96], sizes = [1, 16], strides = [1, 1]} : vector<1x128xf32> to vector<1x16xf32>
    %36 = arith.addf %32, %35 : vector<1x16xf32>
    %37 = vector.extract_strided_slice %7 {offsets = [0, 112], sizes = [1, 16], strides = [1, 1]} : vector<1x128xf32> to vector<1x16xf32>
    %38 = arith.addf %34, %37 : vector<1x16xf32>
    %39 = vector.extract_strided_slice %10 {offsets = [0, 112], sizes = [1, 16], strides = [1, 1]} : vector<1x128xf32> to vector<1x16xf32>
    %40 = arith.addf %36, %39 : vector<1x16xf32>
    %cst_7 = arith.constant 5.120000e+02 : f32
    %41 = vector.broadcast %cst_7 : f32 to vector<1x16xf32>
    %42 = arith.divf %38, %41 : vector<1x16xf32>
    %cst_8 = arith.constant 5.120000e+02 : f32
    %43 = vector.broadcast %cst_8 : f32 to vector<1x16xf32>
    %44 = arith.divf %40, %43 : vector<1x16xf32>
    %45 = arith.mulf %42, %42 : vector<1x16xf32>
    %46 = arith.subf %44, %45 : vector<1x16xf32>
    %cst_9 = arith.constant 0.000000e+00 : f32
    %47 = vector.broadcast %cst_9 : f32 to vector<1x16xf32>
    %48 = arith.maximumf %46, %47 : vector<1x16xf32>
    %c0_10 = arith.constant 0 : index
    %c0_11 = arith.constant 0 : index
    %49 = vector.load %arg4[%c0_10, %c0_11] : memref<1x16xf32, #tpu.memory_space<vmem>>, vector<1x16xf32>
    %cst_12 = arith.constant 9.99999974E-6 : f32
    %50 = vector.broadcast %cst_12 : f32 to vector<1x16xf32>
    %51 = arith.addf %48, %50 : vector<1x16xf32>
    %52 = math.rsqrt %51 : vector<1x16xf32>
    %53 = arith.mulf %49, %52 : vector<1x16xf32>
    %c0_13 = arith.constant 0 : index
    %c0_14 = arith.constant 0 : index
    %54 = vector.load %arg5[%c0_13, %c0_14] : memref<1x16xf32, #tpu.memory_space<vmem>>, vector<1x16xf32>
    %55 = arith.mulf %42, %53 : vector<1x16xf32>
    %56 = arith.subf %54, %55 : vector<1x16xf32>
    %57 = tpu.concatenate %53, %53, %53, %53, %53, %53, %53, %53 in 1 : vector<1x16xf32>, vector<1x16xf32>, vector<1x16xf32>, vector<1x16xf32>, vector<1x16xf32>, vector<1x16xf32>, vector<1x16xf32>, vector<1x16xf32> -> vector<1x128xf32>
    %58 = tpu.concatenate %56, %56, %56, %56, %56, %56, %56, %56 in 1 : vector<1x16xf32>, vector<1x16xf32>, vector<1x16xf32>, vector<1x16xf32>, vector<1x16xf32>, vector<1x16xf32>, vector<1x16xf32>, vector<1x16xf32> -> vector<1x128xf32>
    %59 = vector.broadcast %57 : vector<1x128xf32> to vector<64x128xf32>
    %60 = arith.mulf %5, %59 : vector<64x128xf32>
    %61 = vector.broadcast %58 : vector<1x128xf32> to vector<64x128xf32>
    %62 = arith.addf %60, %61 : vector<64x128xf32>
    %cst_15 = arith.constant 0.000000e+00 : f32
    %63 = vector.broadcast %cst_15 : f32 to vector<64x128xf32>
    %64 = arith.maximumf %62, %63 : vector<64x128xf32>
    %65 = arith.truncf %64 : vector<64x128xf32> to vector<64x128xbf16>
    %c0_16 = arith.constant 0 : index
    %c0_17 = arith.constant 0 : index
    %66 = vector.load %arg6[%c0_16, %c0_17] : memref<64x128xbf16, #tpu.memory_space<vmem>>, vector<64x128xbf16>
    tpu.vector_store %arg6[%c0_16, %c0_17], %65 {strides = array<i32>} : memref<64x128xbf16, #tpu.memory_space<vmem>>, vector<64x128xbf16>,
    return
  }
  func.func @transform_0(%arg0: i32) -> (i32, i32) {
    %c0_i32 = arith.constant 0 : i32
    %c0_i32_0 = arith.constant 0 : i32
    %c0_i32_1 = arith.constant 0 : i32
    return %c0_i32, %c0_i32_0 : i32, i32
  }
  func.func @transform_1(%arg0: i32) -> (i32, i32) {
    %c0_i32 = arith.constant 0 : i32
    %c0_i32_0 = arith.constant 0 : i32
    %c0_i32_1 = arith.constant 0 : i32
    return %c0_i32, %c0_i32_0 : i32, i32
  }
  func.func @transform_2(%arg0: i32) -> (i32, i32) {
    %c0_i32 = arith.constant 0 : i32
    %c0_i32_0 = arith.constant 0 : i32
    %c0_i32_1 = arith.constant 0 : i32
    return %c0_i32, %c0_i32_0 : i32, i32
  }
  func.func @transform_3(%arg0: i32) -> (i32, i32) {
    %c0_i32 = arith.constant 0 : i32
    %c0_i32_0 = arith.constant 0 : i32
    %c0_i32_1 = arith.constant 0 : i32
    return %c0_i32, %c0_i32_0 : i32, i32
  }
  func.func @transform_4(%arg0: i32) -> (i32, i32) {
    %c0_i32 = arith.constant 0 : i32
    %c0_i32_0 = arith.constant 0 : i32
    %c0_i32_1 = arith.constant 0 : i32
    return %c0_i32, %c0_i32_0 : i32, i32
  }
  func.func @transform_5(%arg0: i32) -> (i32, i32) {
    %c0_i32 = arith.constant 0 : i32
    %c0_i32_0 = arith.constant 0 : i32
    %c0_i32_1 = arith.constant 0 : i32
    return %c0_i32, %c0_i32_0 : i32, i32
  }
}

module attributes {stable_mosaic.version = 11 : i64} {
  func.func @_mm_bias_act_kernel(%arg0: i32, %arg1: memref<512x784xbf16, #tpu.memory_space<vmem>>, %arg2: memref<784x3xbf16, #tpu.memory_space<vmem>>, %arg3: memref<1x3xf32, #tpu.memory_space<vmem>>, %arg4: memref<512x3xf32, #tpu.memory_space<vmem>>) attributes {dimension_semantics = [#tpu.dimension_semantics<parallel>], iteration_bounds = array<i64: 1>, scalar_prefetch = 0 : i64, scratch_operands = 0 : i64, tpu.core_type = #tpu.core_type<tc>, window_params = [{transform_indices = @transform_0, window_bounds = array<i64: 512, 784>}, {pipeline_mode = #tpu.pipeline_mode<synchronous>, transform_indices = @transform_1, window_bounds = array<i64: 784, 3>}, {pipeline_mode = #tpu.pipeline_mode<synchronous>, transform_indices = @transform_2, window_bounds = array<i64: 1, 3>}, {transform_indices = @transform_3, window_bounds = array<i64: 512, 3>}]} {
    %c0 = arith.constant 0 : index
    %c0_0 = arith.constant 0 : index
    %0 = vector.load %arg1[%c0, %c0_0] : memref<512x784xbf16, #tpu.memory_space<vmem>>, vector<512x784xbf16>
    %c0_1 = arith.constant 0 : index
    %c0_2 = arith.constant 0 : index
    %1 = vector.load %arg2[%c0_1, %c0_2] : memref<784x3xbf16, #tpu.memory_space<vmem>>, vector<784x3xbf16>
    %cst = arith.constant dense<0.000000e+00> : vector<512x3xf32>
    %2 = tpu.matmul %0, %1, %cst {dimension_numbers = #tpu.dot_dimension_numbers<[1], [0], [0], [1], [0, 0, 1, 1], [], []>} : vector<512x784xbf16>, vector<784x3xbf16>, vector<512x3xf32> -> vector<512x3xf32>
    %c0_3 = arith.constant 0 : index
    %c0_4 = arith.constant 0 : index
    %3 = vector.load %arg3[%c0_3, %c0_4] : memref<1x3xf32, #tpu.memory_space<vmem>>, vector<1x3xf32>
    %4 = vector.broadcast %3 : vector<1x3xf32> to vector<512x3xf32>
    %5 = arith.addf %2, %4 : vector<512x3xf32>
    %6 = math.tanh %5 : vector<512x3xf32>
    %c0_5 = arith.constant 0 : index
    %c0_6 = arith.constant 0 : index
    %7 = vector.load %arg4[%c0_5, %c0_6] : memref<512x3xf32, #tpu.memory_space<vmem>>, vector<512x3xf32>
    tpu.vector_store %arg4[%c0_5, %c0_6], %6 {strides = array<i32>} : memref<512x3xf32, #tpu.memory_space<vmem>>, vector<512x3xf32>,
    return
  }
  func.func @transform_0(%arg0: i32) -> (i32, i32) {
    %c0_i32 = arith.constant 0 : i32
    %c0_i32_0 = arith.constant 0 : i32
    return %arg0, %c0_i32 : i32, i32
  }
  func.func @transform_1(%arg0: i32) -> (i32, i32) {
    %c0_i32 = arith.constant 0 : i32
    %c0_i32_0 = arith.constant 0 : i32
    %c0_i32_1 = arith.constant 0 : i32
    return %c0_i32, %c0_i32_0 : i32, i32
  }
  func.func @transform_2(%arg0: i32) -> (i32, i32) {
    %c0_i32 = arith.constant 0 : i32
    %c0_i32_0 = arith.constant 0 : i32
    %c0_i32_1 = arith.constant 0 : i32
    return %c0_i32, %c0_i32_0 : i32, i32
  }
  func.func @transform_3(%arg0: i32) -> (i32, i32) {
    %c0_i32 = arith.constant 0 : i32
    %c0_i32_0 = arith.constant 0 : i32
    return %arg0, %c0_i32 : i32, i32
  }
}

</mosaic_0001>

<bundles_post_ra>
// kernel: mul.4
= control target key start
LH: loop header
LB: loop body
LE: loop exit
PB: predicated region body
PF: predicated region fallthrough
CT: control target
= control target key end

     0   :  { %vm246_vm0 = vcmask 130048   ;;  %s984_s0 = inlined_call_operand.vmem [shape: f32[7,7,3,16], index: 0, kind: input, shape index: {}]   ;;  %s985_s1 = inlined_call_operand.vmem [shape: f32[147,16], index: 1, kind: output, shape index: {}]  }
   0x1   :  { %v535_v0 = vld [vmem:[%s984_s0 + $0xc0] sm:$0xf]  ;;  %v536_v1 = vld [vmem:[%s984_s0 + $0xbc] sm:$0xf]  ;;  %v537_v2 = vld [vmem:[%s984_s0 + $0xb8] sm:$0xf] }
   0x2   :  { %8 = vst [vmem:[#allocation0 + $0x180] sm:$0xf] %v535_v0  ;;  %13 = vst [vmem:[#allocation0 + $0x178] sm:$0xf] %v536_v1  ;;  %v538_v3 = vld [vmem:[%s984_s0 + $0xb4] sm:$0xf] }
   0x3   :  { %18 = vst [vmem:[#allocation0 + $0x170] sm:$0xf] %v537_v2  ;;  %v539_v4 = vld [vmem:[%s984_s0 + $0xb0] sm:$0xf]  ;;  %v540_v5 = vld [vmem:[%s984_s0 + $0xac] sm:$0xf] }
   0x4   :  { %23 = vst [vmem:[#allocation0 + $0x168] sm:$0xf] %v538_v3  ;;  %28 = vst [vmem:[#allocation0 + $0x160] sm:$0xf] %v539_v4  ;;  %v541_v6 = vld [vmem:[%s984_s0 + $0xa8] sm:$0xf] }
   0x5   :  { %33 = vst [vmem:[#allocation0 + $0x158] sm:$0xf] %v540_v5  ;;  %v542_v7 = vld [vmem:[%s984_s0 + $0xa4] sm:$0xf]  ;;  %v543_v8 = vld [vmem:[%s984_s0 + $0xa0] sm:$0xf] }
   0x6   :  { %38 = vst [vmem:[#allocation0 + $0x150] sm:$0xf] %v541_v6  ;;  %43 = vst [vmem:[#allocation0 + $0x148] sm:$0xf] %v542_v7  ;;  %v544_v9 = vld [vmem:[%s984_s0 + $0x9c] sm:$0xf] }
   0x7   :  { %48 = vst [vmem:[#allocation0 + $0x140] sm:$0xf] %v543_v8  ;;  %v545_v10 = vld [vmem:[%s984_s0 + $0x98] sm:$0xf]  ;;  %v546_v11 = vld [vmem:[%s984_s0 + $0x94] sm:$0xf] }
   0x8   :  { %53 = vst [vmem:[#allocation0 + $0x138] sm:$0xf] %v544_v9  ;;  %58 = vst [vmem:[#allocation0 + $0x130] sm:$0xf] %v545_v10  ;;  %v547_v12 = vld [vmem:[%s984_s0 + $0x90] sm:$0xf] }
   0x9   :  { %63 = vst [vmem:[#allocation0 + $0x128] sm:$0xf] %v546_v11  ;;  %v548_v13 = vld [vmem:[%s984_s0 + $0x8c] sm:$0xf]  ;;  %v549_v14 = vld [vmem:[%s984_s0 + $0x88] sm:$0xf] }
   0xa   :  { %68 = vst [vmem:[#allocation0 + $0x120] sm:$0xf] %v547_v12  ;;  %73 = vst [vmem:[#allocation0 + $0x118] sm:$0xf] %v548_v13  ;;  %v550_v15 = vld [vmem:[%s984_s0 + $0x84] sm:$0xf] }
   0xb   :  { %78 = vst [vmem:[#allocation0 + $0x110] sm:$0xf] %v549_v14  ;;  %v551_v16 = vld [vmem:[%s984_s0 + $0x80] sm:$0xf]  ;;  %v552_v17 = vld [vmem:[%s984_s0 + $0x7c] sm:$0xf] }
   0xc   :  { %83 = vst [vmem:[#allocation0 + $0x108] sm:$0xf] %v550_v15  ;;  %88 = vst [vmem:[#allocation0 + $0x100] sm:$0xf] %v551_v16  ;;  %v553_v18 = vld [vmem:[%s984_s0 + $0x78] sm:$0xf] }
   0xd   :  { %93 = vst [vmem:[#allocation0 + $0xf8] sm:$0xf] %v552_v17  ;;  %v554_v19 = vld [vmem:[%s984_s0 + $0x74] sm:$0xf]  ;;  %v555_v20 = vld [vmem:[%s984_s0 + $0x70] sm:$0xf] }
   0xe   :  { %98 = vst [vmem:[#allocation0 + $0xf0] sm:$0xf] %v553_v18  ;;  %103 = vst [vmem:[#allocation0 + $0xe8] sm:$0xf] %v554_v19  ;;  %v556_v21 = vld [vmem:[%s984_s0 + $0x6c] sm:$0xf] }
   0xf   :  { %108 = vst [vmem:[#allocation0 + $0xe0] sm:$0xf] %v555_v20  ;;  %v557_v22 = vld [vmem:[%s984_s0 + $0x68] sm:$0xf]  ;;  %v558_v23 = vld [vmem:[%s984_s0 + $0x64] sm:$0xf] }
  0x10   :  { %113 = vst [vmem:[#allocation0 + $0xd8] sm:$0xf] %v556_v21  ;;  %118 = vst [vmem:[#allocation0 + $0xd0] sm:$0xf] %v557_v22  ;;  %v559_v24 = vld [vmem:[%s984_s0 + $0x60] sm:$0xf] }
  0x11   :  { %123 = vst [vmem:[#allocation0 + $0xc8] sm:$0xf] %v558_v23  ;;  %v560_v25 = vld [vmem:[%s984_s0 + $0x5c] sm:$0xf]  ;;  %v561_v26 = vld [vmem:[%s984_s0 + $0x58] sm:$0xf] }
  0x12   :  { %128 = vst [vmem:[#allocation0 + $0xc0] sm:$0xf] %v559_v24  ;;  %133 = vst [vmem:[#allocation0 + $0xb8] sm:$0xf] %v560_v25  ;;  %v562_v27 = vld [vmem:[%s984_s0 + $0x54] sm:$0xf] }
  0x13   :  { %138 = vst [vmem:[#allocation0 + $0xb0] sm:$0xf] %v561_v26  ;;  %v563_v28 = vld [vmem:[%s984_s0 + $0x50] sm:$0xf]  ;;  %v564_v29 = vld [vmem:[%s984_s0 + $0x4c] sm:$0xf] }
  0x14   :  { %143 = vst [vmem:[#allocation0 + $0xa8] sm:$0xf] %v562_v27  ;;  %148 = vst [vmem:[#allocation0 + $0xa0] sm:$0xf] %v563_v28  ;;  %v565_v30 = vld [vmem:[%s984_s0 + $0x48] sm:$0xf] }
  0x15   :  { %153 = vst [vmem:[#allocation0 + $0x98] sm:$0xf] %v564_v29  ;;  %v566_v31 = vld [vmem:[%s984_s0 + $0x44] sm:$0xf]  ;;  %v567_v32 = vld [vmem:[%s984_s0 + $0x40] sm:$0xf] }
  0x16   :  { %158 = vst [vmem:[#allocation0 + $0x90] sm:$0xf] %v565_v30  ;;  %163 = vst [vmem:[#allocation0 + $0x88] sm:$0xf] %v566_v31  ;;  %v568_v33 = vld [vmem:[%s984_s0 + $0x3c] sm:$0xf] }
  0x17   :  { %168 = vst [vmem:[#allocation0 + $0x80] sm:$0xf] %v567_v32  ;;  %v569_v34 = vld [vmem:[%s984_s0 + $0x38] sm:$0xf]  ;;  %v570_v35 = vld [vmem:[%s984_s0 + $0x34] sm:$0xf] }
  0x18   :  { %173 = vst [vmem:[#allocation0 + $0x78] sm:$0xf] %v568_v33  ;;  %178 = vst [vmem:[#allocation0 + $0x70] sm:$0xf] %v569_v34  ;;  %v571_v36 = vld [vmem:[%s984_s0 + $0x30] sm:$0xf] }
  0x19   :  { %183 = vst [vmem:[#allocation0 + $0x68] sm:$0xf] %v570_v35  ;;  %v572_v37 = vld [vmem:[%s984_s0 + $0x2c] sm:$0xf]  ;;  %v573_v38 = vld [vmem:[%s984_s0 + $0x28] sm:$0xf] }
  0x1a   :  { %188 = vst [vmem:[#allocation0 + $0x60] sm:$0xf] %v571_v36  ;;  %193 = vst [vmem:[#allocation0 + $0x58] sm:$0xf] %v572_v37  ;;  %v574_v39 = vld [vmem:[%s984_s0 + $0x24] sm:$0xf] }
  0x1b   :  { %198 = vst [vmem:[#allocation0 + $0x50] sm:$0xf] %v573_v38  ;;  %v575_v40 = vld [vmem:[%s984_s0 + $0x20] sm:$0xf]  ;;  %v576_v41 = vld [vmem:[%s984_s0 + $0x1c] sm:$0xf] }
  0x1c   :  { %203 = vst [vmem:[#allocation0 + $0x48] sm:$0xf] %v574_v39  ;;  %208 = vst [vmem:[#allocation0 + $0x40] sm:$0xf] %v575_v40  ;;  %v577_v42 = vld [vmem:[%s984_s0 + $0x18] sm:$0xf] }
  0x1d   :  { %213 = vst [vmem:[#allocation0 + $0x38] sm:$0xf] %v576_v41  ;;  %v578_v43 = vld [vmem:[%s984_s0 + $0x14] sm:$0xf]  ;;  %v579_v44 = vld [vmem:[%s984_s0 + $0x10] sm:$0xf] }
  0x1e   :  { %218 = vst [vmem:[#allocation0 + $0x30] sm:$0xf] %v577_v42  ;;  %223 = vst [vmem:[#allocation0 + $0x28] sm:$0xf] %v578_v43  ;;  %v580_v45 = vld [vmem:[%s984_s0 + $0xc] sm:$0xf] }
  0x1f   :  { %228 = vst [vmem:[#allocation0 + $0x20] sm:$0xf] %v579_v44  ;;  %v581_v46 = vld [vmem:[%s984_s0 + $0x8] sm:$0xf]  ;;  %v582_v47 = vld [vmem:[%s984_s0 + $0x4] sm:$0xf] }
  0x20   :  { %233 = vst [vmem:[#allocation0 + $0x18] sm:$0xf] %v580_v45  ;;  %238 = vst [vmem:[#allocation0 + $0x10] sm:$0xf] %v581_v46  ;;  %v243_v48 = vld [vmem:[%s984_s0] sm:$0xf] }
  0x21   :  { %242 = vst [vmem:[#allocation0 + $0x8] sm:$0xf] %v582_v47  ;;  %v354_v49 = vld [vmem:[#allocation0 + $0xb0] sm:$0x7]   ;;  %244 = vst [vmem:[#allocation0] sm:$0xf] %v243_v48 }
  0x22   :  { %v339_v50 = vld [vmem:[#allocation0 + $0x98] sm:$0x7]   ;;  %v344_v51 = vld [vmem:[#allocation0 + $0xa0] sm:$0x7]   ;;  %v349_v52 = vld [vmem:[#allocation0 + $0xa8] sm:$0x7]  }
  0x23   :  { %604 = vst.msk [vmem:[%s985_s1 + $0x42] sm:$0x7] %vm246_vm0, %v354_v49   ;;  %v324_v53 = vld [vmem:[#allocation0 + $0x80] sm:$0x7]   ;;  %v329_v54 = vld [vmem:[#allocation0 + $0x88] sm:$0x7]  }
  0x24   :  { %v334_v55 = vld [vmem:[#allocation0 + $0x90] sm:$0x7]   ;;  %601 = vst.msk [vmem:[%s985_s1 + $0x39] sm:$0x7] %vm246_vm0, %v339_v50   ;;  %602 = vst.msk [vmem:[%s985_s1 + $0x3c] sm:$0x7] %vm246_vm0, %v344_v51  }
  0x25   :  { %603 = vst.msk [vmem:[%s985_s1 + $0x3f] sm:$0x7] %vm246_vm0, %v349_v52   ;;  %v309_v56 = vld [vmem:[#allocation0 + $0x68] sm:$0x7]   ;;  %v314_v57 = vld [vmem:[#allocation0 + $0x70] sm:$0x7]  }
  0x26   :  { %v319_v58 = vld [vmem:[#allocation0 + $0x78] sm:$0x7]   ;;  %598 = vst.msk [vmem:[%s985_s1 + $0x30] sm:$0x7] %vm246_vm0, %v324_v53   ;;  %599 = vst.msk [vmem:[%s985_s1 + $0x33] sm:$0x7] %vm246_vm0, %v329_v54  }
  0x27   :  { %600 = vst.msk [vmem:[%s985_s1 + $0x36] sm:$0x7] %vm246_vm0, %v334_v55   ;;  %v294_v59 = vld [vmem:[#allocation0 + $0x50] sm:$0x7]   ;;  %v299_v60 = vld [vmem:[#allocation0 + $0x58] sm:$0x7]  }
  0x28   :  { %v304_v61 = vld [vmem:[#allocation0 + $0x60] sm:$0x7]   ;;  %595 = vst.msk [vmem:[%s985_s1 + $0x27] sm:$0x7] %vm246_vm0, %v309_v56   ;;  %596 = vst.msk [vmem:[%s985_s1 + $0x2a] sm:$0x7] %vm246_vm0, %v314_v57  }
  0x29   :  { %597 = vst.msk [vmem:[%s985_s1 + $0x2d] sm:$0x7] %vm246_vm0, %v319_v58   ;;  %v279_v62 = vld [vmem:[#allocation0 + $0x38] sm:$0x7]   ;;  %v284_v63 = vld [vmem:[#allocation0 + $0x40] sm:$0x7]  }
  0x2a   :  { %v289_v0 = vld [vmem:[#allocation0 + $0x48] sm:$0x7]   ;;  %592 = vst.msk [vmem:[%s985_s1 + $0x1e] sm:$0x7] %vm246_vm0, %v294_v59   ;;  %593 = vst.msk [vmem:[%s985_s1 + $0x21] sm:$0x7] %vm246_vm0, %v299_v60  }
  0x2b   :  { %594 = vst.msk [vmem:[%s985_s1 + $0x24] sm:$0x7] %vm246_vm0, %v304_v61   ;;  %v264_v1 = vld [vmem:[#allocation0 + $0x20] sm:$0x7]   ;;  %v269_v2 = vld [vmem:[#allocation0 + $0x28] sm:$0x7]  }
  0x2c   :  { %v274_v3 = vld [vmem:[#allocation0 + $0x30] sm:$0x7]   ;;  %589 = vst.msk [vmem:[%s985_s1 + $0x15] sm:$0x7] %vm246_vm0, %v279_v62   ;;  %590 = vst.msk [vmem:[%s985_s1 + $0x18] sm:$0x7] %vm246_vm0, %v284_v63  }
  0x2d   :  { %591 = vst.msk [vmem:[%s985_s1 + $0x1b] sm:$0x7] %vm246_vm0, %v289_v0   ;;  %v249_v4 = vld [vmem:[#allocation0 + $0x8] sm:$0x7]   ;;  %v254_v5 = vld [vmem:[#allocation0 + $0x10] sm:$0x7]  }
  0x2e   :  { %v259_v6 = vld [vmem:[#allocation0 + $0x18] sm:$0x7]   ;;  %586 = vst.msk [vmem:[%s985_s1 + $0xc] sm:$0x7] %vm246_vm0, %v264_v1   ;;  %587 = vst.msk [vmem:[%s985_s1 + $0xf] sm:$0x7] %vm246_vm0, %v269_v2  }
  0x2f   :  { %588 = vst.msk [vmem:[%s985_s1 + $0x12] sm:$0x7] %vm246_vm0, %v274_v3   ;;  %v245_v7 = vld [vmem:[#allocation0] sm:$0x7]   ;;  %583 = vst.msk [vmem:[%s985_s1 + $0x3] sm:$0x7] %vm246_vm0, %v249_v4  }
  0x30   :  { %584 = vst.msk [vmem:[%s985_s1 + $0x6] sm:$0x7] %vm246_vm0, %v254_v5   ;;  %585 = vst.msk [vmem:[%s985_s1 + $0x9] sm:$0x7] %vm246_vm0, %v259_v6   ;;  %v359_v8 = vld [vmem:[#allocation0 + $0xb8] sm:$0x7]  }
  0x31   :  { %v364_v9 = vld [vmem:[#allocation0 + $0xc0] sm:$0x7]   ;;  %247 = vst.msk [vmem:[%s985_s1] sm:$0x7] %vm246_vm0, %v245_v7   ;;  %605 = vst.msk [vmem:[%s985_s1 + $0x45] sm:$0x7] %vm246_vm0, %v359_v8  }
  0x32   :  { %606 = vst.msk [vmem:[%s985_s1 + $0x48] sm:$0x7] %vm246_vm0, %v364_v9   ;;  %v369_v10 = vld [vmem:[#allocation0 + $0xc8] sm:$0x7]   ;;  %v374_v11 = vld [vmem:[#allocation0 + $0xd0] sm:$0x7]  }
  0x33   :  { %v379_v12 = vld [vmem:[#allocation0 + $0xd8] sm:$0x7]   ;;  %607 = vst.msk [vmem:[%s985_s1 + $0x4b] sm:$0x7] %vm246_vm0, %v369_v10   ;;  %608 = vst.msk [vmem:[%s985_s1 + $0x4e] sm:$0x7] %vm246_vm0, %v374_v11  }
  0x34   :  { %609 = vst.msk [vmem:[%s985_s1 + $0x51] sm:$0x7] %vm246_vm0, %v379_v12   ;;  %v384_v13 = vld [vmem:[#allocation0 + $0xe0] sm:$0x7]   ;;  %v389_v14 = vld [vmem:[#allocation0 + $0xe8] sm:$0x7]  }
  0x35   :  { %v394_v15 = vld [vmem:[#allocation0 + $0xf0] sm:$0x7]   ;;  %610 = vst.msk [vmem:[%s985_s1 + $0x54] sm:$0x7] %vm246_vm0, %v384_v13   ;;  %611 = vst.msk [vmem:[%s985_s1 + $0x57] sm:$0x7] %vm246_vm0, %v389_v14  }
  0x36   :  { %612 = vst.msk [vmem:[%s985_s1 + $0x5a] sm:$0x7] %vm246_vm0, %v394_v15   ;;  %v399_v16 = vld [vmem:[#allocation0 + $0xf8] sm:$0x7]   ;;  %v404_v17 = vld [vmem:[#allocation0 + $0x100] sm:$0x7]  }
  0x37   :  { %v409_v18 = vld [vmem:[#allocation0 + $0x108] sm:$0x7]   ;;  %613 = vst.msk [vmem:[%s985_s1 + $0x5d] sm:$0x7] %vm246_vm0, %v399_v16   ;;  %614 = vst.msk [vmem:[%s985_s1 + $0x60] sm:$0x7] %vm246_vm0, %v404_v17  }
  0x38   :  { %615 = vst.msk [vmem:[%s985_s1 + $0x63] sm:$0x7] %vm246_vm0, %v409_v18   ;;  %v414_v19 = vld [vmem:[#allocation0 + $0x110] sm:$0x7]   ;;  %v419_v20 = vld [vmem:[#allocation0 + $0x118] sm:$0x7]  }
  0x39   :  { %v424_v21 = vld [vmem:[#allocation0 + $0x120] sm:$0x7]   ;;  %616 = vst.msk [vmem:[%s985_s1 + $0x66] sm:$0x7] %vm246_vm0, %v414_v19   ;;  %617 = vst.msk [vmem:[%s985_s1 + $0x69] sm:$0x7] %vm246_vm0, %v419_v20  }
  0x3a   :  { %618 = vst.msk [vmem:[%s985_s1 + $0x6c] sm:$0x7] %vm246_vm0, %v424_v21   ;;  %v429_v22 = vld [vmem:[#allocation0 + $0x128] sm:$0x7]   ;;  %v434_v23 = vld [vmem:[#allocation0 + $0x130] sm:$0x7]  }
  0x3b   :  { %v439_v24 = vld [vmem:[#allocation0 + $0x138] sm:$0x7]   ;;  %619 = vst.msk [vmem:[%s985_s1 + $0x6f] sm:$0x7] %vm246_vm0, %v429_v22   ;;  %620 = vst.msk [vmem:[%s985_s1 + $0x72] sm:$0x7] %vm246_vm0, %v434_v23  }
  0x3c   :  { %621 = vst.msk [vmem:[%s985_s1 + $0x75] sm:$0x7] %vm246_vm0, %v439_v24   ;;  %v444_v25 = vld [vmem:[#allocation0 + $0x140] sm:$0x7]   ;;  %v449_v26 = vld [vmem:[#allocation0 + $0x148] sm:$0x7]  }
  0x3d   :  { %v454_v27 = vld [vmem:[#allocation0 + $0x150] sm:$0x7]   ;;  %622 = vst.msk [vmem:[%s985_s1 + $0x78] sm:$0x7] %vm246_vm0, %v444_v25   ;;  %623 = vst.msk [vmem:[%s985_s1 + $0x7b] sm:$0x7] %vm246_vm0, %v449_v26  }
  0x3e   :  { %624 = vst.msk [vmem:[%s985_s1 + $0x7e] sm:$0x7] %vm246_vm0, %v454_v27   ;;  %v459_v28 = vld [vmem:[#allocation0 + $0x158] sm:$0x7]   ;;  %v464_v29 = vld [vmem:[#allocation0 + $0x160] sm:$0x7]  }
  0x3f   :  { %v469_v30 = vld [vmem:[#allocation0 + $0x168] sm:$0x7]   ;;  %625 = vst.msk [vmem:[%s985_s1 + $0x81] sm:$0x7] %vm246_vm0, %v459_v28   ;;  %626 = vst.msk [vmem:[%s985_s1 + $0x84] sm:$0x7] %vm246_vm0, %v464_v29  }
  0x40   :  { %627 = vst.msk [vmem:[%s985_s1 + $0x87] sm:$0x7] %vm246_vm0, %v469_v30   ;;  %v474_v31 = vld [vmem:[#allocation0 + $0x170] sm:$0x7]   ;;  %v479_v32 = vld [vmem:[#allocation0 + $0x178] sm:$0x7]  }
  0x41   :  { %v484_v33 = vld [vmem:[#allocation0 + $0x180] sm:$0x7]   ;;  %628 = vst.msk [vmem:[%s985_s1 + $0x8a] sm:$0x7] %vm246_vm0, %v474_v31   ;;  %629 = vst.msk [vmem:[%s985_s1 + $0x8d] sm:$0x7] %vm246_vm0, %v479_v32  }
  0x42   :  { %630 = vst.msk [vmem:[%s985_s1 + $0x90] sm:$0x7] %vm246_vm0, %v484_v33  }

// kernel: tile.62
= control target key start
LH: loop header
LB: loop body
LE: loop exit
PB: predicated region body
PF: predicated region fallthrough
CT: control target
= control target key end

     0   :  { %s22_s0 = inlined_call_operand.vmem [shape: f32[16], index: 0, kind: input, shape index: {}]   ;;  %s23_s1 = inlined_call_operand.vmem [shape: f32[8,16], index: 1, kind: output, shape index: {}]  }
   0x1   :  { %v4_v0 = vld [vmem:[%s22_s0] ss:$0 sm:$0xff] }
   0x2   :  { %5 = vst [vmem:[%s23_s1] sm:$0xff] %v4_v0 }

// kernel: tile.63
= control target key start
LH: loop header
LB: loop body
LE: loop exit
PB: predicated region body
PF: predicated region fallthrough
CT: control target
= control target key end

     0   :  { %s67_s10 = smov 112   ;;  %s68_s11 = smov 80   ;;  %vm3_vm0 = vcmask 130048   ;;  %vm9_vm1 = vcmask 1048448   ;;  %vm15_vm2 = vcmask 917248   ;;  %vm21_vm3 = vcmask 786048   ;;  %s111_s0 = inlined_call_operand.vmem [shape: f32[8,16], index: 0, kind: input, shape index: {}]   ;;  %s112_s1 = inlined_call_operand.vmem [shape: f32[1,128], index: 1, kind: output, shape index: {}]  }
   0x1   :  { %v53_v0 = vld [vmem:[%s111_s0 + $0x7] sm:$0x1]   ;;  %v55_v1 = vld [vmem:[%s111_s0 + $0x5] sm:$0x1]   ;;  %v54_v2 = vld [vmem:[%s111_s0 + $0x6] sm:$0x1]  }
   0x2   :  { %7 = vrot.lane.b32.xlu0 %v53_v0, %s67_s10  ;;  %19 = vrot.lane.b32.xlu1 %v55_v1, %s68_s11  ;;  %v56_v3 = vld [vmem:[%s111_s0 + $0x4] sm:$0x1]   ;;  %v2_v4 = vld [vmem:[%s111_s0] sm:$0x1]   ;;  %s69_s18 = smov 96   ;;  %s70_s19 = smov 64  }
   0x3   :  { %4 = vst.msk [vmem:[#allocation0] sm:$0x1] %vm3_vm0, %v2_v4   ;;  %v57_v5 = vld [vmem:[%s111_s0 + $0x3] sm:$0x1]   ;;  %v58_v6 = vld [vmem:[%s111_s0 + $0x2] sm:$0x1]  }
   0x4   :  { %s71_s24 = smov 48   ;;  %s72_s25 = smov 32   ;;  %v59_v7 = vld [vmem:[%s111_s0 + $0x1] sm:$0x1]   ;;  %vm27_vm4 = vcmask 654848   ;;  %vm33_vm5 = vcmask 523648  }
   0x5   :  { %s73_s0 = smov 16   ;;  %vm39_vm6 = vcmask 392448   ;;  %vm45_vm7 = vcmask 261248  }
   0x6   :  { %13 = vrot.lane.b32.xlu0 %v54_v2, %s69_s18  ;;  %25 = vrot.lane.b32.xlu1 %v56_v3, %s70_s19 }
   0xa   :  { %31 = vrot.lane.b32.xlu0 %v57_v5, %s71_s24  ;;  %37 = vrot.lane.b32.xlu1 %v58_v6, %s72_s25 }
   0xe   :  { %43 = vrot.lane.b32.xlu0 %v59_v7, %s73_s0 }
  0x74   :  { %v8_v8 = vpop.permute.xlu0 %7   ;;  %v20_v9 = vpop.permute.xlu1 %19  }
  0x75   :  { %10 = vst.msk [vmem:[#allocation0] sm:$0x1] %vm9_vm1, %v8_v8  }
  0x78   :  { %v14_v10 = vpop.permute.xlu0 %13   ;;  %v26_v11 = vpop.permute.xlu1 %25  }
  0x79   :  { %16 = vst.msk [vmem:[#allocation0] sm:$0x1] %vm15_vm2, %v14_v10  }
  0x7a   :  { %22 = vst.msk [vmem:[#allocation0] sm:$0x1] %vm21_vm3, %v20_v9  }
  0x7b   :  { %28 = vst.msk [vmem:[#allocation0] sm:$0x1] %vm27_vm4, %v26_v11  }
  0x7c   :  { %v32_v12 = vpop.permute.xlu0 %31   ;;  %v38_v13 = vpop.permute.xlu1 %37  }
  0x7d   :  { %34 = vst.msk [vmem:[#allocation0] sm:$0x1] %vm33_vm5, %v32_v12  }
  0x7e   :  { %40 = vst.msk [vmem:[#allocation0] sm:$0x1] %vm39_vm6, %v38_v13  }
  0x80   :  { %v44_v14 = vpop.permute.xlu0 %43  }
  0x81   :  { %46 = vst.msk [vmem:[#allocation0] sm:$0x1] %vm45_vm7, %v44_v14  }
  0x88   :  { %v50_v15 = vld [vmem:[#allocation0] sm:$0x1] }
  0x89   :  { %52 = vst [vmem:[%s112_s1] sm:$0x1] %v50_v15 }

// kernel: unet_generator_forward.12
= control target key start
LH: loop header
LB: loop body
LE: loop exit
PB: predicated region body
PF: predicated region fallthrough
CT: control target
= control target key end

     0   :  { %vm852_vm0 = vcmask 195584   ;;  %vm865_vm1 = vcmask 1043456   ;;  %s1933_s22 = smov 80   ;;  %s1934_s23 = smov 64   ;;  %vm1325_vm2 = vcmask 130048   ;;  %vm1327_vm3 = vcmask 261120   ;;  %s2445_s1 = inlined_call_operand.vmem [shape: bf16[1176,128], index: 1, kind: input, shape index: {}]   ;;  %s2446_s0 = inlined_call_operand.vmem [shape: bf16[64,1176], index: 0, kind: input, shape index: {}]   ;;  %s2447_s2 = inlined_call_operand.vmem [shape: f32[1,128], index: 2, kind: input, shape index: {}]   ;;  %s2448_s3 = inlined_call_operand.vmem [shape: f32[1,16], index: 3, kind: input, shape index: {}]   ;;  %s2449_s4 = inlined_call_operand.vmem [shape: f32[1,16], index: 4, kind: input, shape index: {}]   ;;  %s2450_s5 = inlined_call_operand.vmem [shape: bf16[64,128], index: 5, kind: output, shape index: {}]  }
   0x1   :  { %v1794_v0 = vld [vmem:[%s2445_s1 + $0x40] sm:$0xff]   ;;  %v1798_v4 = vld [vmem:[%s2445_s1 + $0x48] sm:$0xff]   ;;  %v1802_v8 = vld [vmem:[%s2445_s1 + $0x50] sm:$0xff]   ;;  %s1935_s24 = smov 48   ;;  %s1936_s25 = smov 32   ;;  %vm1329_vm4 = vcmask 392192  }
   0x2   :  { %v1795_v1 = vld [vmem:[%s2445_s1 + $0xc0] sm:$0xff]   ;;  %1606 = vmatprep.subr.bf16.mxu0 %v1794_v0  ;;  %v1799_v5 = vld [vmem:[%s2445_s1 + $0xc8] sm:$0xff]   ;;  %v1803_v9 = vld [vmem:[%s2445_s1 + $0xd0] sm:$0xff]   ;;  %s1937_s26 = smov 16   ;;  %vm1331_vm5 = vcmask 523264   ;;  %vm1333_vm6 = vcmask 654336  }
   0x3   :  { %v1796_v2 = vld [vmem:[%s2445_s1] sm:$0xff]   ;;  %1646 = vmatprep.subr.bf16.mxu1 %v1795_v1  ;;  %v1800_v6 = vld [vmem:[%s2445_s1 + $0x8] sm:$0xff]   ;;  %v1804_v10 = vld [vmem:[%s2445_s1 + $0x10] sm:$0xff]   ;;  %vm1335_vm7 = vcmask 785408   ;;  %vm1337_vm8 = vcmask 916480  }
   0x4   :  { %v1797_v3 = vld [vmem:[%s2445_s1 + $0x80] sm:$0xff]   ;;  %1607 = vmatpush3.bf16.msra.mxu0 %v1796_v2  ;;  %v1801_v7 = vld [vmem:[%s2445_s1 + $0x88] sm:$0xff]   ;;  %v1805_v11 = vld [vmem:[%s2445_s1 + $0x90] sm:$0xff]  }
   0x5   :  { %1647 = vmatpush3.bf16.msra.mxu1 %v1797_v3  ;;  %1608 = vmatprep.subr.bf16.mxu0 %v1798_v4  ;;  %v1806_v12 = vld [vmem:[%s2445_s1 + $0x58] sm:$0xff]   ;;  %v1810_v16 = vld [vmem:[%s2445_s1 + $0x60] sm:$0xff]   ;;  %v1814_v20 = vld [vmem:[%s2445_s1 + $0x68] sm:$0xff]  }
   0x6   :  { %1648 = vmatprep.subr.bf16.mxu1 %v1799_v5  ;;  %v1807_v13 = vld [vmem:[%s2445_s1 + $0xd8] sm:$0xff]   ;;  %v1811_v17 = vld [vmem:[%s2445_s1 + $0xe0] sm:$0xff]   ;;  %v1815_v21 = vld [vmem:[%s2445_s1 + $0xe8] sm:$0xff]  }
   0x7   :  { %v1808_v14 = vld [vmem:[%s2445_s1 + $0x18] sm:$0xff]   ;;  %v1812_v18 = vld [vmem:[%s2445_s1 + $0x20] sm:$0xff]   ;;  %v1816_v22 = vld [vmem:[%s2445_s1 + $0x28] sm:$0xff]  }
   0x8   :  { %1609 = vmatpush3.bf16.msra.mxu0 %v1800_v6  ;;  %v1809_v15 = vld [vmem:[%s2445_s1 + $0x98] sm:$0xff]   ;;  %v1813_v19 = vld [vmem:[%s2445_s1 + $0xa0] sm:$0xff]   ;;  %v1817_v23 = vld [vmem:[%s2445_s1 + $0xa8] sm:$0xff]  }
   0x9   :  { %1649 = vmatpush3.bf16.msra.mxu1 %v1801_v7  ;;  %1610 = vmatprep.subr.bf16.mxu0 %v1802_v8  ;;  %v1818_v24 = vld [vmem:[%s2445_s1 + $0x70] sm:$0xff]   ;;  %v1822_v28 = vld [vmem:[%s2445_s1 + $0x78] sm:$0xff]   ;;  %v1826_v32 = vld [vmem:[%s2446_s0] ss:$40 sps:$4 sm:$0xff]  }
   0xa   :  { %1650 = vmatprep.subr.bf16.mxu1 %v1803_v9  ;;  %v1819_v25 = vld [vmem:[%s2445_s1 + $0xf0] sm:$0xff]   ;;  %v1823_v29 = vld [vmem:[%s2445_s1 + $0xf8] sm:$0xff]   ;;  %v1828_v33 = vld [vmem:[%s2446_s0 + $0x4] ss:$40 sps:$4 sm:$0xff]  }
   0xb   :  { %v1820_v26 = vld [vmem:[%s2445_s1 + $0x30] sm:$0xff]   ;;  %v1824_v30 = vld [vmem:[%s2445_s1 + $0x38] sm:$0xff]   ;;  %901 = vmatprep.mubr.bf16.mxu0 %v1828_v33  ;;  %v1832_v36 = vld [vmem:[%s2445_s1 + $0x140] sm:$0xff]  }
   0xc   :  { %1611 = vmatpush3.bf16.msra.mxu0 %v1804_v10  ;;  %v1821_v27 = vld [vmem:[%s2445_s1 + $0xb0] sm:$0xff]   ;;  %v1825_v31 = vld [vmem:[%s2445_s1 + $0xb8] sm:$0xff]   ;;  %v1833_v37 = vld [vmem:[%s2445_s1 + $0x1c0] sm:$0xff]  }
   0xd   :  { %1651 = vmatpush3.bf16.msra.mxu1 %v1805_v11  ;;  %1612 = vmatprep.subr.bf16.mxu0 %v1806_v12  ;;  %v1829_v34 = vld [vmem:[%s2446_s0 + $0x8] ss:$40 sps:$4 sm:$0xff]   ;;  %v1831_v35 = vld [vmem:[%s2446_s0 + $0xc] ss:$40 sps:$4 sm:$0xff]   ;;  %v1834_v38 = vld [vmem:[%s2445_s1 + $0x100] sm:$0xff]  }
   0xe   :  { %1652 = vmatprep.subr.bf16.mxu1 %v1807_v13  ;;  %966 = vmatprep.mubr.bf16.mxu1 %v1831_v35  ;;  %v1835_v39 = vld [vmem:[%s2445_s1 + $0x180] sm:$0xff]   ;;  %v1836_v40 = vld [vmem:[%s2445_s1 + $0x148] sm:$0xff]   ;;  %v1840_v44 = vld [vmem:[%s2446_s0 + $0x54] ss:$40 sps:$4 sm:$0xff]  }
   0xf   :  { %v1837_v41 = vld [vmem:[%s2445_s1 + $0x1c8] sm:$0xff]   ;;  %v1842_v45 = vld [vmem:[%s2446_s0 + $0x50] ss:$40 sps:$4 sm:$0xff]   ;;  %v1843_v46 = vld [vmem:[%s2446_s0 + $0x5c] ss:$40 sps:$4 sm:$0xff]  }
  0x10   :  { %1613 = vmatpush3.bf16.msra.mxu0 %v1808_v14  ;;  %v1838_v42 = vld [vmem:[%s2445_s1 + $0x108] sm:$0xff]   ;;  %v1845_v47 = vld [vmem:[%s2445_s1 + $0x150] sm:$0xff]   ;;  %v1847_v49 = vld [vmem:[%s2446_s0 + $0x58] ss:$40 sps:$4 sm:$0xff]  }
  0x11   :  { %1653 = vmatpush3.bf16.msra.mxu1 %v1809_v15  ;;  %1614 = vmatprep.subr.bf16.mxu0 %v1810_v16  ;;  %v1839_v43 = vld [vmem:[%s2445_s1 + $0x188] sm:$0xff]   ;;  %v1846_v48 = vld [vmem:[%s2445_s1 + $0x1d0] sm:$0xff]   ;;  %v1850_v52 = vld [vmem:[%s2445_s1 + $0x158] sm:$0xff]  }
  0x12   :  { %1654 = vmatprep.subr.bf16.mxu1 %v1811_v17  ;;  %v1848_v50 = vld [vmem:[%s2445_s1 + $0x110] sm:$0xff]   ;;  %v1851_v53 = vld [vmem:[%s2445_s1 + $0x1d8] sm:$0xff]   ;;  %v1854_v56 = vld [vmem:[%s2446_s0 + $0xa4] ss:$40 sps:$4 sm:$0xff]  }
  0x13   :  { %v1849_v51 = vld [vmem:[%s2445_s1 + $0x190] sm:$0xff]   ;;  %v1852_v54 = vld [vmem:[%s2445_s1 + $0x118] sm:$0xff]   ;;  %v1856_v57 = vld [vmem:[%s2446_s0 + $0xa0] ss:$40 sps:$4 sm:$0xff]  }
  0x14   :  { %1615 = vmatpush3.bf16.msra.mxu0 %v1812_v18  ;;  %v1853_v55 = vld [vmem:[%s2445_s1 + $0x198] sm:$0xff]   ;;  %v1857_v58 = vld [vmem:[%s2446_s0 + $0xac] ss:$40 sps:$4 sm:$0xff]   ;;  %v1859_v59 = vld [vmem:[%s2445_s1 + $0x160] sm:$0xff]  }
  0x15   :  { %1655 = vmatpush3.bf16.msra.mxu1 %v1813_v19  ;;  %1616 = vmatprep.subr.bf16.mxu0 %v1814_v20  ;;  %v1860_v60 = vld [vmem:[%s2445_s1 + $0x1e0] sm:$0xff]   ;;  %v1861_v61 = vld [vmem:[%s2446_s0 + $0xa8] ss:$40 sps:$4 sm:$0xff]   ;;  %v1868_v4 = vld [vmem:[%s2446_s0 + $0xf4] ss:$40 sps:$4 sm:$0xff]   ;;  %v1930_v19 = vmov 0  }
  0x16   :  { %1656 = vmatprep.subr.bf16.mxu1 %v1815_v21  ;;  %v1862_v62 = vld [vmem:[%s2445_s1 + $0x120] sm:$0xff]   ;;  %v1864_v0 = vld [vmem:[%s2445_s1 + $0x168] sm:$0xff]   ;;  %v1870_v5 = vld [vmem:[%s2446_s0 + $0xf0] ss:$40 sps:$4 sm:$0xff]  }
  0x17   :  { %v1863_v63 = vld [vmem:[%s2445_s1 + $0x1a0] sm:$0xff]   ;;  %v1865_v1 = vld [vmem:[%s2445_s1 + $0x1e8] sm:$0xff]   ;;  %v1873_v7 = vld [vmem:[%s2445_s1 + $0x170] sm:$0xff]  }
  0x18   :  { %1617 = vmatpush3.bf16.msra.mxu0 %v1816_v22  ;;  %v1866_v2 = vld [vmem:[%s2445_s1 + $0x128] sm:$0xff]   ;;  %v1871_v6 = vld [vmem:[%s2446_s0 + $0xfc] ss:$40 sps:$4 sm:$0xff]   ;;  %v1874_v8 = vld [vmem:[%s2445_s1 + $0x1f0] sm:$0xff]  }
  0x19   :  { %1657 = vmatpush3.bf16.msra.mxu1 %v1817_v23  ;;  %1618 = vmatprep.subr.bf16.mxu0 %v1818_v24  ;;  %v1867_v3 = vld [vmem:[%s2445_s1 + $0x1a8] sm:$0xff]   ;;  %v1875_v9 = vld [vmem:[%s2446_s0 + $0xf8] ss:$40 sps:$4 sm:$0xff]   ;;  %v1876_v10 = vld [vmem:[%s2445_s1 + $0x130] sm:$0xff]  }
  0x1a   :  { %1658 = vmatprep.subr.bf16.mxu1 %v1819_v25  ;;  %v1877_v11 = vld [vmem:[%s2445_s1 + $0x1b0] sm:$0xff]   ;;  %v1878_v12 = vld [vmem:[%s2445_s1 + $0x178] sm:$0xff]   ;;  %v1888_v21 = vld [vmem:[%s2445_s1 + $0x200] sm:$0xff]  }
  0x1b   :  { %v1879_v13 = vld [vmem:[%s2445_s1 + $0x1f8] sm:$0xff]   ;;  %v1889_v22 = vld [vmem:[%s2445_s1 + $0x208] sm:$0xff]  }
  0x1c   :  { %1619 = vmatpush3.bf16.msra.mxu0 %v1820_v26  ;;  %v1880_v14 = vld [vmem:[%s2445_s1 + $0x138] sm:$0xff]   ;;  %v1890_v23 = vld [vmem:[%s2446_s0 + $0x64] ss:$40 sps:$4 sm:$0xff]   ;;  %v1892_v25 = vld [vmem:[%s2446_s0 + $0x60] ss:$40 sps:$4 sm:$0xff]  }
  0x1d   :  { %1659 = vmatpush3.bf16.msra.mxu1 %v1821_v27  ;;  %1620 = vmatprep.subr.bf16.mxu0 %v1822_v28  ;;  %v1881_v15 = vld [vmem:[%s2445_s1 + $0x1b8] sm:$0xff]   ;;  %v1893_v24 = vld [vmem:[%s2446_s0 + $0x6c] ss:$40 sps:$4 sm:$0xff]   ;;  %v1896_v27 = vld [vmem:[%s2446_s0 + $0x68] ss:$40 sps:$4 sm:$0xff]  }
  0x1e   :  { %1660 = vmatprep.subr.bf16.mxu1 %v1823_v29  ;;  %v1882_v16 = vld [vmem:[%s2446_s0 + $0x10] ss:$40 sps:$4 sm:$0xff]   ;;  %v1884_v17 = vld [vmem:[%s2446_s0 + $0x14] ss:$40 sps:$4 sm:$0xff]   ;;  %v1906_v33 = vld [vmem:[%s2446_s0 + $0x104] ss:$40 sps:$4 sm:$0xff]  }
  0x1f   :  { %v1885_v18 = vld [vmem:[%s2446_s0 + $0x18] ss:$40 sps:$4 sm:$0xff]   ;;  %v1887_v20 = vld [vmem:[%s2446_s0 + $0x1c] ss:$40 sps:$4 sm:$0xff]   ;;  %v1895_v26 = vld [vmem:[%s2445_s1 + $0x210] sm:$0xff]  }
  0x20   :  { %1621 = vmatpush3.bf16.msra.mxu0 %v1824_v30  ;;  %v1898_v28 = vld [vmem:[%s2446_s0 + $0xb4] ss:$40 sps:$4 sm:$0xff]  }
  0x21   :  { %1661 = vmatpush3.bf16.msra.mxu1 %v1825_v31  ;;  %1686 = vmatprep.subr.bf16.mxu0 %v1832_v36  ;;  %v1901_v29 = vld [vmem:[%s2446_s0 + $0xbc] ss:$40 sps:$4 sm:$0xff]   ;;  %v1900_v31 = vld [vmem:[%s2446_s0 + $0xb0] ss:$40 sps:$4 sm:$0xff]   ;;  %v1909_v35 = vld [vmem:[%s2446_s0 + $0x10c] ss:$40 sps:$4 sm:$0xff]  }
  0x22   :  { %1726 = vmatprep.subr.bf16.mxu1 %v1833_v37  ;;  %v1897_v30 = vld [vmem:[%s2445_s1 + $0x218] sm:$0xff]   ;;  %v1905_v36 = vld [vmem:[%s2445_s1 + $0x228] sm:$0xff]  }
  0x23   :  { %902 = vmatmul.mubr.bf16.vlgmr.msra.gmra.mrb[0].mxu0 %v1826_v32  ;;  %v1903_v32 = vld [vmem:[%s2445_s1 + $0x220] sm:$0xff]  }
  0x24   :  { %967 = vmatmul.mubr.bf16.vlgmr.msra.gmra.mrb[0].mxu1 %v1829_v34  ;;  %1687 = vmatpush3.bf16.msra.mxu0 %v1834_v38  ;;  %v1904_v34 = vld [vmem:[%s2446_s0 + $0xb8] ss:$40 sps:$4 sm:$0xff]   ;;  %v1918_v38 = vld [vmem:[%s2446_s0 + $0x24] ss:$40 sps:$4 sm:$0xff]  }
  0x25   :  { %1727 = vmatpush3.bf16.msra.mxu1 %v1835_v39  ;;  %1688 = vmatprep.subr.bf16.mxu0 %v1836_v40  ;;  %v1908_v37 = vld [vmem:[%s2446_s0 + $0x100] ss:$40 sps:$4 sm:$0xff]   ;;  %v1911_v39 = vld [vmem:[%s2445_s1 + $0x230] sm:$0xff]  }
  0x26   :  { %1728 = vmatprep.subr.bf16.mxu1 %v1837_v41  ;;  %909 = vmatprep.mubr.bf16.mxu0 %v1840_v44  ;;  %v1912_v40 = vld [vmem:[%s2446_s0 + $0x108] ss:$40 sps:$4 sm:$0xff]   ;;  %v1921_v41 = vld [vmem:[%s2446_s0 + $0xc4] ss:$40 sps:$4 sm:$0xff]  }
  0x27   :  { %974 = vmatprep.mubr.bf16.mxu1 %v1843_v46  ;;  %v1915_v44 = vld [vmem:[%s2445_s1 + $0x248] ss:$0 sps:$4 sm:$0xff]  }
  0x28   :  { %1689 = vmatpush3.bf16.msra.mxu0 %v1838_v42  ;;  %v1913_v42 = vld [vmem:[%s2445_s1 + $0x238] sm:$0xff]   ;;  %v1916_v46 = vld [vmem:[%s2446_s0 + $0x20] ss:$40 sps:$4 sm:$0xff]  }
  0x29   :  { %1729 = vmatpush3.bf16.msra.mxu1 %v1839_v43  ;;  %1690 = vmatprep.subr.bf16.mxu0 %v1845_v47  ;;  %v1914_v43 = vld [vmem:[%s2445_s1 + $0x240] sm:$0xff]  }
  0x2a   :  { %1730 = vmatprep.subr.bf16.mxu1 %v1846_v48  ;;  %v1919_v47 = vld [vmem:[%s2446_s0 + $0xc0] ss:$40 sps:$4 sm:$0xff]   ;;  %v1922_v48 = vld [vmem:[%s2446_s0 + $0x74] ss:$40 sps:$4 sm:$0xff]  }
  0x2b   :  { %910 = vmatmul.mubr.bf16.gmra.mrb[4].mxu0 %v1842_v45  ;;  %v867_v45 = vsel %vm865_vm1, %v1915_v44, 0 }
  0x2c   :  { %975 = vmatmul.mubr.bf16.gmra.mrb[4].mxu1 %v1847_v49  ;;  %1691 = vmatpush3.bf16.msra.mxu0 %v1848_v50  ;;  %v1924_v49 = vld [vmem:[%s2446_s0 + $0x114] ss:$40 sps:$4 sm:$0xff]   ;;  %v1926_v50 = vld [vmem:[%s2446_s0 + $0x70] ss:$40 sps:$4 sm:$0xff]  }
  0x2d   :  { %1731 = vmatpush3.bf16.msra.mxu1 %v1849_v51  ;;  %1692 = vmatprep.subr.bf16.mxu0 %v1850_v52  ;;  %v1927_v51 = vld [vmem:[%s2446_s0 + $0x110] ss:$40 sps:$4 sm:$0xff]   ;;  %s1931_s0 = smov 96  }
  0x2e   :  { %1732 = vmatprep.subr.bf16.mxu1 %v1851_v53  ;;  %917 = vmatprep.mubr.bf16.mxu0 %v1854_v56  ;;  %v1448_v53 = vld [vmem:[%s2447_s2] ss:$0 sm:$0xff]  ;;  %s1932_s2 = smov 112  }
  0x2f   :  { %982 = vmatprep.mubr.bf16.mxu1 %v1857_v58 }
  0x30   :  { %1693 = vmatpush3.bf16.msra.mxu0 %v1852_v54 }
  0x31   :  { %1733 = vmatpush3.bf16.msra.mxu1 %v1853_v55  ;;  %1694 = vmatprep.subr.bf16.mxu0 %v1859_v59 }
  0x32   :  { %1734 = vmatprep.subr.bf16.mxu1 %v1860_v60 }
  0x33   :  { %918 = vmatmul.mubr.bf16.gmra.mrb[8].mxu0 %v1856_v57 }
  0x34   :  { %983 = vmatmul.mubr.bf16.gmra.mrb[8].mxu1 %v1861_v61  ;;  %1695 = vmatpush3.bf16.msra.mxu0 %v1862_v62 }
  0x35   :  { %1735 = vmatpush3.bf16.msra.mxu1 %v1863_v63  ;;  %1696 = vmatprep.subr.bf16.mxu0 %v1864_v0 }
  0x36   :  { %1736 = vmatprep.subr.bf16.mxu1 %v1865_v1  ;;  %925 = vmatprep.mubr.bf16.mxu0 %v1868_v4 }
  0x37   :  { %990 = vmatprep.mubr.bf16.mxu1 %v1871_v6 }
  0x38   :  { %1697 = vmatpush3.bf16.msra.mxu0 %v1866_v2 }
  0x39   :  { %1737 = vmatpush3.bf16.msra.mxu1 %v1867_v3  ;;  %1698 = vmatprep.subr.bf16.mxu0 %v1873_v7 }
  0x3a   :  { %1738 = vmatprep.subr.bf16.mxu1 %v1874_v8 }
  0x3b   :  { %926 = vmatmul.mubr.bf16.gmra.mrb[12].mxu0 %v1870_v5 }
  0x3c   :  { %991 = vmatmul.mubr.bf16.gmra.mrb[12].mxu1 %v1875_v9  ;;  %1699 = vmatpush3.bf16.msra.mxu0 %v1876_v10 }
  0x3d   :  { %1739 = vmatpush3.bf16.msra.mxu1 %v1877_v11  ;;  %1700 = vmatprep.subr.bf16.mxu0 %v1878_v12 }
  0x3e   :  { %1740 = vmatprep.subr.bf16.mxu1 %v1879_v13  ;;  %1031 = vmatprep.mubr.bf16.mxu0 %v1884_v17 }
  0x3f   :  { %1096 = vmatprep.mubr.bf16.mxu1 %v1887_v20 }
  0x40   :  { %1701 = vmatpush3.bf16.msra.mxu0 %v1880_v14 }
  0x41   :  { %1741 = vmatpush3.bf16.msra.mxu1 %v1881_v15  ;;  %1129 = vmatprep.subr.bf16.mxu0 %v1930_v19 }
  0x42   :  { %1766 = vmatprep.subr.bf16.mxu1 %v1930_v19 }
  0x43   :  { %1032 = vmatmul.mubr.bf16.vlgmr.msra.gmra.mrb[16].mxu0 %v1882_v16 }
  0x44   :  { %1097 = vmatmul.mubr.bf16.vlgmr.msra.gmra.mrb[16].mxu1 %v1885_v18  ;;  %1130 = vmatpush1.bf16.msra.mxu0 %v1888_v21 }
  0x45   :  { %1776 = vmatpush1.bf16.msra.mxu1 %v1888_v21  ;;  %1131 = vmatprep.subr.bf16.mxu0 %v1930_v19 }
  0x46   :  { %1767 = vmatprep.subr.bf16.mxu1 %v1930_v19  ;;  %1039 = vmatprep.mubr.bf16.mxu0 %v1890_v23 }
  0x47   :  { %1104 = vmatprep.mubr.bf16.mxu1 %v1893_v24 }
  0x48   :  { %1132 = vmatpush1.bf16.msra.mxu0 %v1889_v22 }
  0x49   :  { %1777 = vmatpush1.bf16.msra.mxu1 %v1889_v22  ;;  %1133 = vmatprep.subr.bf16.mxu0 %v1930_v19 }
  0x4a   :  { %1768 = vmatprep.subr.bf16.mxu1 %v1930_v19 }
  0x4b   :  { %1040 = vmatmul.mubr.bf16.gmra.mrb[20].mxu0 %v1892_v25 }
  0x4c   :  { %1047 = vmatprep.mubr.bf16.mxu0 %v1898_v28  ;;  %1134 = vmatpush1.bf16.msra.mxu0 %v1895_v26 }
  0x4d   :  { %1105 = vmatmul.mubr.bf16.gmra.mrb[20].mxu1 %v1896_v27  ;;  %1135 = vmatprep.subr.bf16.mxu0 %v1930_v19 }
  0x4e   :  { %1778 = vmatpush1.bf16.msra.mxu1 %v1895_v26  ;;  %1112 = vmatprep.mubr.bf16.mxu1 %v1901_v29 }
  0x4f   :  { %1769 = vmatprep.subr.bf16.mxu1 %v1930_v19 }
  0x50   :  { %1136 = vmatpush1.bf16.msra.mxu0 %v1897_v30 }
  0x51   :  { %1137 = vmatprep.subr.bf16.mxu0 %v1930_v19 }
  0x52   :  { %1779 = vmatpush1.bf16.msra.mxu1 %v1897_v30 }
  0x53   :  { %1048 = vmatmul.mubr.bf16.gmra.mrb[24].mxu0 %v1900_v31  ;;  %1770 = vmatprep.subr.bf16.mxu1 %v1930_v19 }
  0x54   :  { %1055 = vmatprep.mubr.bf16.mxu0 %v1906_v33  ;;  %1138 = vmatpush1.bf16.msra.mxu0 %v1903_v32 }
  0x55   :  { %1113 = vmatmul.mubr.bf16.gmra.mrb[24].mxu1 %v1904_v34  ;;  %1139 = vmatprep.subr.bf16.mxu0 %v1930_v19 }
  0x56   :  { %1780 = vmatpush1.bf16.msra.mxu1 %v1903_v32  ;;  %1120 = vmatprep.mubr.bf16.mxu1 %v1909_v35 }
  0x57   :  { %1771 = vmatprep.subr.bf16.mxu1 %v1930_v19 }
  0x58   :  { %1140 = vmatpush1.bf16.msra.mxu0 %v1905_v36 }
  0x59   :  { %1141 = vmatprep.subr.bf16.mxu0 %v1930_v19 }
  0x5a   :  { %1781 = vmatpush1.bf16.msra.mxu1 %v1905_v36 }
  0x5b   :  { %1056 = vmatmul.mubr.bf16.gmra.mrb[28].mxu0 %v1908_v37  ;;  %1772 = vmatprep.subr.bf16.mxu1 %v1930_v19 }
  0x5c   :  { %1563 = vmatprep.mubr.msk.bf16.mxu0 %vm852_vm0, %v1918_v38  ;;  %1142 = vmatpush1.bf16.msra.mxu0 %v1911_v39 }
  0x5d   :  { %1121 = vmatmul.mubr.bf16.gmra.mrb[28].mxu1 %v1912_v40  ;;  %1143 = vmatprep.subr.bf16.mxu0 %v1930_v19 }
  0x5e   :  { %1782 = vmatpush1.bf16.msra.mxu1 %v1911_v39  ;;  %1565 = vmatprep.mubr.msk.bf16.mxu1 %vm852_vm0, %v1921_v41 }
  0x5f   :  { %1773 = vmatprep.subr.bf16.mxu1 %v1930_v19 }
  0x60   :  { %1144 = vmatpush1.bf16.msra.mxu0 %v1913_v42 }
  0x61   :  { %1145 = vmatprep.subr.bf16.mxu0 %v1930_v19 }
  0x62   :  { %1783 = vmatpush1.bf16.msra.mxu1 %v1913_v42 }
  0x63   :  { %1774 = vmatprep.subr.bf16.mxu1 %v1930_v19 }
  0x64   :  { %1146 = vmatpush1.bf16.msra.mxu0 %v1914_v43 }
  0x65   :  { %1147 = vmatprep.subr.bf16.mxu0 %v1930_v19 }
  0x66   :  { %1784 = vmatpush1.bf16.msra.mxu1 %v1914_v43 }
  0x67   :  { %1775 = vmatprep.subr.bf16.mxu1 %v1930_v19 }
  0x68   :  { %1148 = vmatpush1.bf16.msra.mxu0 %v867_v45 }
  0x6a   :  { %1785 = vmatpush1.bf16.msra.mxu1 %v867_v45 }
  0x6b   :  { %1162 = vmatmul.mubr.bf16.vlgmr.msra.gmra.mrb[32].mxu0 %v1916_v46 }
  0x6c   :  { %1564 = vmatprep.mubr.msk.bf16.mxu0 %vm852_vm0, %v1922_v48 }
  0x6d   :  { %1178 = vmatmul.mubr.bf16.vlgmr.msra.gmra.mrb[32].mxu1 %v1919_v47 }
  0x6e   :  { %1566 = vmatprep.mubr.msk.bf16.mxu1 %vm852_vm0, %v1924_v49 }
  0x73   :  { %1170 = vmatmul.mubr.bf16.gmra.mrb[36].mxu0 %v1926_v50 }
  0x75   :  { %1186 = vmatmul.mubr.bf16.gmra.mrb[36].mxu1 %v1927_v51 }
  0xf6   :  { %v1622_v52 = vpop.f32.mrb[0].mxu0 }
  0xf7   :  { %v1623_v54 = vpop.f32.mrb[1].mxu0  ;;  %v1662_v55 = vpop.f32.mrb[0].mxu1 }
  0xf8   :  { %v1624_v56 = vadd.f32 %v1623_v54, %v1622_v52  ;;  %v1625_v57 = vpop.f32.mrb[2].mxu0  ;;  %v1663_v58 = vpop.f32.mrb[1].mxu1 }
  0xf9   :  { %v1626_v59 = vpop.f32.mrb[3].mxu0  ;;  %v1664_v60 = vadd.f32 %v1663_v58, %v1662_v55  ;;  %v1665_v61 = vpop.f32.mrb[2].mxu1 }
  0xfa   :  { %v904_v62 = vadd.f32 %v1624_v56, %v1448_v53  ;;  %v1627_v63 = vadd.f32 %v1626_v59, %v1625_v57  ;;  %v1666_v0 = vpop.f32.mrb[3].mxu1 }
  0xfb   :  { %v1667_v1 = vadd.f32 %v1666_v0, %v1665_v61 }
  0xfc   :  { %v907_v2 = vadd.f32 %v1627_v63, %v1448_v53  ;;  %v969_v3 = vadd.f32 %v1664_v60, %v904_v62 }
  0xfe   :  { %v972_v4 = vadd.f32 %v1667_v1, %v907_v2  ;;  %v1628_v5 = vpop.f32.mrb[4].mxu0 }
  0xff   :  { %v1629_v6 = vpop.f32.mrb[5].mxu0  ;;  %v1668_v9 = vpop.f32.mrb[4].mxu1 }
 0x100   :  { %v1630_v7 = vadd.f32 %v1629_v6, %v1628_v5  ;;  %v1631_v8 = vpop.f32.mrb[6].mxu0  ;;  %v1669_v13 = vpop.f32.mrb[5].mxu1 }
 0x101   :  { %v1632_v10 = vpop.f32.mrb[7].mxu0  ;;  %v1670_v14 = vadd.f32 %v1669_v13, %v1668_v9  ;;  %v1671_v15 = vpop.f32.mrb[6].mxu1 }
 0x102   :  { %v912_v11 = vadd.f32 %v1630_v7, %v1448_v53  ;;  %v1633_v12 = vadd.f32 %v1632_v10, %v1631_v8  ;;  %v1672_v17 = vpop.f32.mrb[7].mxu1 }
 0x103   :  { %v1673_v19 = vadd.f32 %v1672_v17, %v1671_v15 }
 0x104   :  { %v915_v16 = vadd.f32 %v1633_v12, %v1448_v53  ;;  %v977_v18 = vadd.f32 %v1670_v14, %v912_v11 }
 0x106   :  { %v980_v20 = vadd.f32 %v1673_v19, %v915_v16  ;;  %v1634_v21 = vpop.f32.mrb[8].mxu0 }
 0x107   :  { %v1635_v22 = vpop.f32.mrb[9].mxu0  ;;  %v1674_v25 = vpop.f32.mrb[8].mxu1 }
 0x108   :  { %v1636_v23 = vadd.f32 %v1635_v22, %v1634_v21  ;;  %v1637_v24 = vpop.f32.mrb[10].mxu0  ;;  %v1675_v27 = vpop.f32.mrb[9].mxu1 }
 0x109   :  { %v1638_v26 = vpop.f32.mrb[11].mxu0  ;;  %v1676_v30 = vadd.f32 %v1675_v27, %v1674_v25  ;;  %v1677_v31 = vpop.f32.mrb[10].mxu1 }
 0x10a   :  { %v920_v28 = vadd.f32 %v1636_v23, %v1448_v53  ;;  %v1639_v29 = vadd.f32 %v1638_v26, %v1637_v24  ;;  %v1678_v32 = vpop.f32.mrb[11].mxu1 }
 0x10b   :  { %v1679_v35 = vadd.f32 %v1678_v32, %v1677_v31 }
 0x10c   :  { %v923_v33 = vadd.f32 %v1639_v29, %v1448_v53  ;;  %v985_v34 = vadd.f32 %v1676_v30, %v920_v28 }
 0x10e   :  { %v988_v36 = vadd.f32 %v1679_v35, %v923_v33  ;;  %v1640_v37 = vpop.f32.mrb[12].mxu0 }
 0x10f   :  { %v1641_v38 = vpop.f32.mrb[13].mxu0  ;;  %v1680_v41 = vpop.f32.mrb[12].mxu1 }
 0x110   :  { %v1642_v39 = vadd.f32 %v1641_v38, %v1640_v37  ;;  %v1643_v40 = vpop.f32.mrb[14].mxu0  ;;  %v1681_v45 = vpop.f32.mrb[13].mxu1 }
 0x111   :  { %v1644_v42 = vpop.f32.mrb[15].mxu0  ;;  %v1682_v46 = vadd.f32 %v1681_v45, %v1680_v41  ;;  %v1683_v47 = vpop.f32.mrb[14].mxu1 }
 0x112   :  { %v928_v43 = vadd.f32 %v1642_v39, %v1448_v53  ;;  %v1645_v44 = vadd.f32 %v1644_v42, %v1643_v40  ;;  %v1684_v49 = vpop.f32.mrb[15].mxu1 }
 0x113   :  { %v1685_v51 = vadd.f32 %v1684_v49, %v1683_v47 }
 0x114   :  { %v931_v48 = vadd.f32 %v1645_v44, %v1448_v53  ;;  %v993_v50 = vadd.f32 %v1682_v46, %v928_v43 }
 0x116   :  { %v996_v52 = vadd.f32 %v1685_v51, %v931_v48  ;;  %v1702_v54 = vpop.f32.mrb[16].mxu0 }
 0x117   :  { %v1703_v55 = vpop.f32.mrb[17].mxu0  ;;  %v1742_v58 = vpop.f32.mrb[16].mxu1 }
 0x118   :  { %v1704_v56 = vadd.f32 %v1703_v55, %v1702_v54  ;;  %v1705_v57 = vpop.f32.mrb[18].mxu0  ;;  %v1743_v60 = vpop.f32.mrb[17].mxu1 }
 0x119   :  { %v1706_v59 = vpop.f32.mrb[19].mxu0  ;;  %v1744_v63 = vadd.f32 %v1743_v60, %v1742_v58  ;;  %v1745_v0 = vpop.f32.mrb[18].mxu1 }
 0x11a   :  { %v1034_v61 = vadd.f32 %v1704_v56, %v969_v3  ;;  %v1707_v62 = vadd.f32 %v1706_v59, %v1705_v57  ;;  %v1746_v1 = vpop.f32.mrb[19].mxu1 }
 0x11b   :  { %v1747_v5 = vadd.f32 %v1746_v1, %v1745_v0 }
 0x11c   :  { %v1037_v2 = vadd.f32 %v1707_v62, %v972_v4  ;;  %v1099_v6 = vadd.f32 %v1744_v63, %v1034_v61 }
 0x11e   :  { %v1708_v53 = vpop.f32.mrb[20].mxu0  ;;  %v1102_v7 = vadd.f32 %v1747_v5, %v1037_v2 }
 0x11f   :  { %v1709_v8 = vpop.f32.mrb[21].mxu0 }
 0x120   :  { %v1710_v9 = vadd.f32 %v1709_v8, %v1708_v53  ;;  %v1711_v10 = vpop.f32.mrb[22].mxu0  ;;  %v1748_v11 = vpop.f32.mrb[20].mxu1 }
 0x121   :  { %v1712_v12 = vpop.f32.mrb[23].mxu0  ;;  %v1749_v13 = vpop.f32.mrb[21].mxu1 }
 0x122   :  { %v1042_v14 = vadd.f32 %v1710_v9, %v977_v18  ;;  %v1713_v15 = vadd.f32 %v1712_v12, %v1711_v10  ;;  %v1750_v16 = vadd.f32 %v1749_v13, %v1748_v11  ;;  %v1751_v17 = vpop.f32.mrb[22].mxu1 }
 0x123   :  { %v1752_v3 = vpop.f32.mrb[23].mxu1 }
 0x124   :  { %v1045_v19 = vadd.f32 %v1713_v15, %v980_v20  ;;  %v1753_v21 = vadd.f32 %v1752_v3, %v1751_v17  ;;  %v1107_v22 = vadd.f32 %v1750_v16, %v1042_v14 }
 0x126   :  { %v1714_v23 = vpop.f32.mrb[24].mxu0  ;;  %v1110_v4 = vadd.f32 %v1753_v21, %v1045_v19 }
 0x127   :  { %v1715_v24 = vpop.f32.mrb[25].mxu0 }
 0x128   :  { %v1716_v25 = vadd.f32 %v1715_v24, %v1714_v23  ;;  %v1717_v26 = vpop.f32.mrb[26].mxu0  ;;  %v1754_v27 = vpop.f32.mrb[24].mxu1 }
 0x129   :  { %v1718_v28 = vpop.f32.mrb[27].mxu0  ;;  %v1755_v29 = vpop.f32.mrb[25].mxu1 }
 0x12a   :  { %v1050_v30 = vadd.f32 %v1716_v25, %v985_v34  ;;  %v1719_v31 = vadd.f32 %v1718_v28, %v1717_v26  ;;  %v1756_v32 = vadd.f32 %v1755_v29, %v1754_v27  ;;  %v1757_v33 = vpop.f32.mrb[26].mxu1 }
 0x12b   :  { %v1758_v18 = vpop.f32.mrb[27].mxu1 }
 0x12c   :  { %v1053_v35 = vadd.f32 %v1719_v31, %v988_v36  ;;  %v1759_v37 = vadd.f32 %v1758_v18, %v1757_v33  ;;  %v1115_v38 = vadd.f32 %v1756_v32, %v1050_v30 }
 0x12e   :  { %v1720_v39 = vpop.f32.mrb[28].mxu0  ;;  %v1118_v20 = vadd.f32 %v1759_v37, %v1053_v35 }
 0x12f   :  { %v1721_v40 = vpop.f32.mrb[29].mxu0 }
 0x130   :  { %v1722_v41 = vadd.f32 %v1721_v40, %v1720_v39  ;;  %v1723_v42 = vpop.f32.mrb[30].mxu0  ;;  %v1760_v43 = vpop.f32.mrb[28].mxu1 }
 0x131   :  { %v1724_v44 = vpop.f32.mrb[31].mxu0  ;;  %v1761_v45 = vpop.f32.mrb[29].mxu1 }
 0x132   :  { %v1058_v46 = vadd.f32 %v1722_v41, %v993_v50  ;;  %v1725_v47 = vadd.f32 %v1724_v44, %v1723_v42  ;;  %v1762_v48 = vadd.f32 %v1761_v45, %v1760_v43  ;;  %v1763_v49 = vpop.f32.mrb[30].mxu1 }
 0x133   :  { %v1764_v34 = vpop.f32.mrb[31].mxu1 }
 0x134   :  { %v1061_v51 = vadd.f32 %v1725_v47, %v996_v52  ;;  %v1765_v54 = vadd.f32 %v1764_v34, %v1763_v49  ;;  %v1123_v55 = vadd.f32 %v1762_v48, %v1058_v46 }
 0x136   :  { %v1126_v56 = vadd.f32 %v1765_v54, %v1061_v51 }
 0x13e   :  { %v1163_v36 = vpop.f32.mrb[32].mxu0 }
 0x13f   :  { %v2337_v57 = vadd.f32 %v1163_v36, %v1099_v6  ;;  %v1165_v59 = vpop.f32.mrb[33].mxu0 }
 0x140   :  { %v1179_v58 = vpop.f32.mrb[32].mxu1  ;;  %v1166_v62 = vpop.f32.mrb[34].mxu0 }
 0x141   :  { %v2339_v60 = vadd.f32 %v1179_v58, %v1115_v38  ;;  %v1181_v61 = vpop.f32.mrb[33].mxu1  ;;  %v2341_v63 = vadd.f32 %v1166_v62, %v1102_v7  ;;  %v1168_v0 = vpop.f32.mrb[35].mxu0  ;;  %v1207_v6 = vmul.f32 %v2337_v57, %v2337_v57 }
 0x142   :  { %v1182_v50 = vpop.f32.mrb[34].mxu1 }
 0x143   :  { %v2343_v1 = vadd.f32 %v1182_v50, %v1118_v20  ;;  %v1184_v2 = vpop.f32.mrb[35].mxu1  ;;  %v1208_v52 = vmul.f32 %v2341_v63, %v2341_v63  ;;  %v1194_v53 = vadd.f32 %v2341_v63, %v2337_v57  ;;  %v1211_v25 = vmul.f32 %v2339_v60, %v2339_v60 }
 0x145   :  { %v1215_v13 = vadd.f32 %v1208_v52, %v1207_v6 }
 0x146   :  { %v1171_v5 = vpop.f32.mrb[36].mxu0 }
 0x147   :  { %v2351_v8 = vadd.f32 %v1171_v5, %v1107_v22  ;;  %v1173_v7 = vpop.f32.mrb[37].mxu0 }
 0x148   :  { %v1187_v9 = vpop.f32.mrb[36].mxu1  ;;  %v1174_v12 = vpop.f32.mrb[38].mxu0 }
 0x149   :  { %v2353_v10 = vadd.f32 %v1187_v9, %v1123_v55  ;;  %v1189_v11 = vpop.f32.mrb[37].mxu1  ;;  %v1195_v14 = vadd.f32 %v1194_v53, %v2351_v8  ;;  %v1209_v15 = vmul.f32 %v2351_v8, %v2351_v8  ;;  %v2358_v16 = vadd.f32 %v1174_v12, %v1110_v4  ;;  %v1176_v3 = vpop.f32.mrb[39].mxu0 }
 0x14a   :  { %v1190_v17 = vpop.f32.mrb[38].mxu1  ;;  %v1212_v4 = vmul.f32 %v2343_v1, %v2343_v1 }
 0x14b   :  { %v2360_v19 = vadd.f32 %v1190_v17, %v1126_v56  ;;  %v1192_v21 = vpop.f32.mrb[39].mxu1  ;;  %v1216_v22 = vadd.f32 %v1215_v13, %v1209_v15  ;;  %v1196_v23 = vadd.f32 %v1195_v14, %v2358_v16  ;;  %v1210_v24 = vmul.f32 %v2358_v16, %v2358_v16 }
 0x14c   :  { %v1213_v30 = vmul.f32 %v2353_v10, %v2353_v10 }
 0x14d   :  { %v1197_v26 = vadd.f32 %v1196_v23, %v2339_v60  ;;  %v1217_v27 = vadd.f32 %v1216_v22, %v1210_v24  ;;  %v1214_v18 = vmul.f32 %v2360_v19, %v2360_v19 }
 0x14f   :  { %v1218_v28 = vadd.f32 %v1217_v27, %v1211_v25  ;;  %v1198_v29 = vadd.f32 %v1197_v26, %v2343_v1 }
 0x151   :  { %v1199_v31 = vadd.f32 %v1198_v29, %v2353_v10  ;;  %v1219_v32 = vadd.f32 %v1218_v28, %v1212_v4  ;;  %v1300_v4 = vlaneseq  ;;  %v1292_v29 = vld [vmem:[%s2448_s3] sm:$0x1] }
 0x153   :  { %v1200_v33 = vadd.f32 %v1199_v31, %v2360_v19  ;;  %v1220_v35 = vadd.f32 %v1219_v32, %v1213_v30  ;;  %v1301_v28 = vshrl.u32 %v1300_v4, 7 }
 0x155   :  { %v1201_v37 = vrot.slane %v1200_v33, 4  ;;  %v1221_v38 = vadd.f32 %v1220_v35, %v1214_v18  ;;  %v1302_v30 = vsub.s32 0, %v1301_v28 }
 0x157   :  { %v1202_v39 = vadd.f32 %v1201_v37, %v1200_v33  ;;  %v1222_v20 = vrot.slane %v1221_v38, 4  ;;  %v1296_v33 = vld [vmem:[%s2449_s4] sm:$0x1] }
 0x159   :  { %v1203_v40 = vrot.slane %v1202_v39, 2  ;;  %v1223_v41 = vadd.f32 %v1222_v20, %v1221_v38 }
 0x15b   :  { %v1204_v42 = vadd.f32 %v1203_v40, %v1202_v39  ;;  %v1224_v43 = vrot.slane %v1223_v41, 2 }
 0x15d   :  { %v1205_v44 = vrot.slane %v1204_v42, 1  ;;  %v1225_v45 = vadd.f32 %v1224_v43, %v1223_v41 }
 0x15f   :  { %v1206_v46 = vadd.f32 %v1205_v44, %v1204_v42  ;;  %v1226_v47 = vrot.slane %v1225_v45, 1 }
 0x161   :  { %1238 = vrot.lane.b32.xlu1 %v1206_v46, %s1931_s0  ;;  %1229 = vrot.lane.b32.xlu0 %v1206_v46, %s1932_s2  ;;  %v1227_v48 = vadd.f32 %v1226_v47, %v1225_v45 }
 0x165   :  { %1242 = vrot.lane.b32.xlu1 %v1227_v48, %s1931_s0  ;;  %1246 = vrot.lane.b32.xlu0 %v1206_v46, %s1933_s22 }
 0x169   :  { %1250 = vrot.lane.b32.xlu1 %v1227_v48, %s1933_s22  ;;  %1254 = vrot.lane.b32.xlu0 %v1206_v46, %s1934_s23 }
 0x16d   :  { %1258 = vrot.lane.b32.xlu1 %v1227_v48, %s1934_s23  ;;  %1234 = vrot.lane.b32.xlu0 %v1227_v48, %s1932_s2 }
 0x171   :  { %1266 = vrot.lane.b32.xlu1 %v1227_v48, %s1935_s24  ;;  %1262 = vrot.lane.b32.xlu0 %v1206_v46, %s1935_s24 }
 0x175   :  { %1274 = vrot.lane.b32.xlu1 %v1227_v48, %s1936_s25  ;;  %1270 = vrot.lane.b32.xlu0 %v1206_v46, %s1936_s25 }
 0x179   :  { %1282 = vrot.lane.b32.xlu1 %v1227_v48, %s1937_s26  ;;  %1278 = vrot.lane.b32.xlu0 %v1206_v46, %s1937_s26 }
 0x1d3   :  { %v1239_v49 = vpop.permute.xlu1 %1238  ;;  %v1230_v34 = vpop.permute.xlu0 %1229 }
 0x1d4   :  { %v1232_v36 = vadd.f32 %v1230_v34, %v1206_v46 }
 0x1d6   :  { %v1241_v61 = vadd.f32 %v1239_v49, %v1232_v36 }
 0x1d7   :  { %v1243_v51 = vpop.permute.xlu1 %1242  ;;  %v1247_v54 = vpop.permute.xlu0 %1246 }
 0x1d8   :  { %v1249_v52 = vadd.f32 %v1247_v54, %v1241_v61 }
 0x1db   :  { %v1251_v55 = vpop.permute.xlu1 %1250  ;;  %v1255_v56 = vpop.permute.xlu0 %1254 }
 0x1dc   :  { %v1257_v6 = vadd.f32 %v1255_v56, %v1249_v52 }
 0x1df   :  { %v1259_v58 = vpop.permute.xlu1 %1258  ;;  %v1235_v59 = vpop.permute.xlu0 %1234 }
 0x1e0   :  { %v1237_v62 = vadd.f32 %v1235_v59, %v1227_v48 }
 0x1e2   :  { %v1245_v50 = vadd.f32 %v1243_v51, %v1237_v62 }
 0x1e3   :  { %v1267_v0 = vpop.permute.xlu1 %1266  ;;  %v1263_v2 = vpop.permute.xlu0 %1262 }
 0x1e4   :  { %v1253_v5 = vadd.f32 %v1251_v55, %v1245_v50  ;;  %v1265_v12 = vadd.f32 %v1263_v2, %v1257_v6 }
 0x1e6   :  { %v1261_v53 = vadd.f32 %v1259_v58, %v1253_v5 }
 0x1e7   :  { %v1275_v9 = vpop.permute.xlu1 %1274  ;;  %v1271_v7 = vpop.permute.xlu0 %1270 }
 0x1e8   :  { %v1269_v11 = vadd.f32 %v1267_v0, %v1261_v53  ;;  %v1273_v14 = vadd.f32 %v1271_v7, %v1265_v12 }
 0x1ea   :  { %v1277_v13 = vadd.f32 %v1275_v9, %v1269_v11 }
 0x1eb   :  { %v1283_v15 = vpop.permute.xlu1 %1282  ;;  %v1279_v17 = vpop.permute.xlu0 %1278 }
 0x1ec   :  { %v1285_v3 = vadd.f32 %v1283_v15, %v1277_v13  ;;  %v1281_v21 = vadd.f32 %v1279_v17, %v1273_v14 }
 0x1ee   :  { %v1287_v22 = vmul.f32 0.001953125, %v1281_v21  ;;  %v1288_v23 = vmul.f32 0.001953125, %v1285_v3 }
 0x1f0   :  { %v1289_v24 = vmul.f32 %v1287_v22, %v1287_v22 }
 0x1f2   :  { %v1290_v25 = vsub.f32 %v1288_v23, %v1289_v24 }
 0x1f4   :  { %v1291_v26 = vmax.f32 %v1290_v25, 0.0 }
 0x1f6   :  { %v1293_v27 = vadd.f32 1e-05, %v1291_v26 }
 0x1f8   :  { %1928 = vrsqrt.f32 %v1293_v27 }
 0x202   :  { %v1929_v31 = vpop.eup %1928 }
 0x203   :  { %v1295_v32 = vmul.f32 %v1929_v31, %v1292_v29 }
 0x205   :  { %v1297_v18 = vmul.f32 %v1295_v32, %v1287_v22  ;;  %v1303_v35 = vrot.slane %v1295_v32, %v1302_v30 }
 0x207   :  { %v1298_v37 = vsub.f32 %v1296_v33, %v1297_v18  ;;  %1307 = vrot.lane.b32.xlu1 %v1303_v35, %s1936_s25  ;;  %1304 = vrot.lane.b32.xlu0 %v1303_v35, %s1937_s26 }
 0x209   :  { %v1343_v38 = vrot.slane %v1298_v37, %v1302_v30 }
 0x20b   :  { %1310 = vrot.lane.b32.xlu0 %v1303_v35, %s1935_s24  ;;  %1344 = vrot.lane.b32.xlu1 %v1343_v38, %s1937_s26 }
 0x20f   :  { %1313 = vrot.lane.b32.xlu0 %v1303_v35, %s1934_s23  ;;  %1347 = vrot.lane.b32.xlu1 %v1343_v38, %s1936_s25 }
 0x213   :  { %1316 = vrot.lane.b32.xlu0 %v1303_v35, %s1933_s22  ;;  %1350 = vrot.lane.b32.xlu1 %v1343_v38, %s1935_s24 }
 0x217   :  { %1319 = vrot.lane.b32.xlu0 %v1303_v35, %s1931_s0  ;;  %1353 = vrot.lane.b32.xlu1 %v1343_v38, %s1934_s23 }
 0x21b   :  { %1322 = vrot.lane.b32.xlu0 %v1303_v35, %s1932_s2  ;;  %1356 = vrot.lane.b32.xlu1 %v1343_v38, %s1933_s22 }
 0x21f   :  { %1359 = vrot.lane.b32.xlu0 %v1343_v38, %s1931_s0  ;;  %1362 = vrot.lane.b32.xlu1 %v1343_v38, %s1932_s2 }
 0x279   :  { %v1308_v39 = vpop.permute.xlu1 %1307  ;;  %v1305_v20 = vpop.permute.xlu0 %1304 }
 0x27a   :  { %v1326_v46 = vsel %vm1325_vm2, %v1295_v32, %v1305_v20 }
 0x27b   :  { %v1328_v47 = vsel %vm1327_vm3, %v1326_v46, %v1308_v39 }
 0x27d   :  { %v1311_v40 = vpop.permute.xlu0 %1310  ;;  %v1345_v41 = vpop.permute.xlu1 %1344 }
 0x27e   :  { %v1330_v34 = vsel %vm1329_vm4, %v1328_v47, %v1311_v40  ;;  %v1365_v58 = vsel %vm1325_vm2, %v1298_v37, %v1345_v41 }
 0x281   :  { %v1314_v42 = vpop.permute.xlu0 %1313  ;;  %v1348_v43 = vpop.permute.xlu1 %1347 }
 0x282   :  { %v1332_v51 = vsel %vm1331_vm5, %v1330_v34, %v1314_v42  ;;  %v1366_v61 = vsel %vm1327_vm3, %v1365_v58, %v1348_v43 }
 0x285   :  { %v1317_v44 = vpop.permute.xlu0 %1316  ;;  %v1351_v45 = vpop.permute.xlu1 %1350 }
 0x286   :  { %v1334_v54 = vsel %vm1333_vm6, %v1332_v51, %v1317_v44  ;;  %v1367_v62 = vsel %vm1329_vm4, %v1366_v61, %v1351_v45 }
 0x289   :  { %v1320_v48 = vpop.permute.xlu0 %1319  ;;  %v1354_v49 = vpop.permute.xlu1 %1353 }
 0x28a   :  { %v1336_v55 = vsel %vm1335_vm7, %v1334_v54, %v1320_v48  ;;  %v1368_v0 = vsel %vm1331_vm5, %v1367_v62, %v1354_v49 }
 0x28d   :  { %v1323_v56 = vpop.permute.xlu0 %1322  ;;  %v1357_v36 = vpop.permute.xlu1 %1356 }
 0x28e   :  { %v1338_v59 = vsel %vm1337_vm8, %v1336_v55, %v1323_v56  ;;  %v1369_v5 = vsel %vm1333_vm6, %v1368_v0, %v1357_v36 }
 0x28f   :  { %v1375_v50 = vrot.slane %v1338_v59, %v1302_v30 }
 0x291   :  { %v1360_v2 = vpop.permute.xlu0 %1359  ;;  %v1363_v52 = vpop.permute.xlu1 %1362  ;;  %v1376_v53 = vmul.f32 %v1375_v50, %v2337_v57  ;;  %v1377_v7 = vmul.f32 %v1375_v50, %v2341_v63  ;;  %v1378_v11 = vmul.f32 %v1375_v50, %v2351_v8  ;;  %v1379_v12 = vmul.f32 %v1375_v50, %v2358_v16 }
 0x292   :  { %v1370_v6 = vsel %vm1335_vm7, %v1369_v5, %v1360_v2  ;;  %v1380_v14 = vmul.f32 %v1375_v50, %v2339_v60  ;;  %v1381_v15 = vmul.f32 %v1375_v50, %v2343_v1  ;;  %v1382_v17 = vmul.f32 %v1375_v50, %v2353_v10 }
 0x293   :  { %v1371_v9 = vsel %vm1337_vm8, %v1370_v6, %v1363_v52  ;;  %v1383_v3 = vmul.f32 %v1375_v50, %v2360_v19 }
 0x294   :  { %v1387_v13 = vrot.slane %v1371_v9, %v1302_v30 }
 0x296   :  { %v1388_v21 = vadd.f32 %v1387_v13, %v1376_v53  ;;  %v1389_v22 = vadd.f32 %v1387_v13, %v1377_v7  ;;  %v1390_v57 = vadd.f32 %v1387_v13, %v1378_v11  ;;  %v1391_v23 = vadd.f32 %v1387_v13, %v1379_v12 }
 0x297   :  { %v1392_v24 = vadd.f32 %v1387_v13, %v1380_v14  ;;  %v1393_v25 = vadd.f32 %v1387_v13, %v1381_v15  ;;  %v1394_v63 = vadd.f32 %v1387_v13, %v1382_v17  ;;  %v1395_v26 = vadd.f32 %v1387_v13, %v1383_v3 }
 0x298   :  { %v1396_v8 = vmax.f32 %v1388_v21, 0.0  ;;  %v1397_v27 = vmax.f32 %v1389_v22, 0.0  ;;  %v1398_v16 = vmax.f32 %v1390_v57, 0.0  ;;  %v1399_v4 = vmax.f32 %v1391_v23, 0.0 }
 0x299   :  { %v1400_v28 = vmax.f32 %v1392_v24, 0.0  ;;  %v1401_v60 = vmax.f32 %v1393_v25, 0.0  ;;  %v1402_v29 = vmax.f32 %v1394_v63, 0.0  ;;  %v1403_v1 = vmax.f32 %v1395_v26, 0.0 }
 0x29a   :  { %v1586_v30 = vpack.c.bf16 %v1397_v27, %v1396_v8  ;;  %v1591_v10 = vpack.c.bf16 %v1399_v4, %v1398_v16 }
 0x29b   :  { %v1596_v31 = vpack.c.bf16 %v1401_v60, %v1400_v28  ;;  %v1601_v19 = vpack.c.bf16 %v1403_v1, %v1402_v29 }
 0x29c   :  { %1587 = vst [vmem:[%s2450_s5] sm:$0xff] %v1586_v30   ;;  %1603 = vst [vmem:[%s2450_s5 + $0x8] sm:$0xff] %v1591_v10  }
 0x29d   :  { %1604 = vst [vmem:[%s2450_s5 + $0x10] sm:$0xff] %v1596_v31   ;;  %1605 = vst [vmem:[%s2450_s5 + $0x18] sm:$0xff] %v1601_v19  }

// kernel: tile.67
= control target key start
LH: loop header
LB: loop body
LE: loop exit
PB: predicated region body
PF: predicated region fallthrough
CT: control target
= control target key end

     0   :  { %s22_s0 = inlined_call_operand.vmem [shape: f32[32], index: 0, kind: input, shape index: {}]   ;;  %s23_s1 = inlined_call_operand.vmem [shape: f32[4,32], index: 1, kind: output, shape index: {}]  }
   0x1   :  { %v4_v0 = vld [vmem:[%s22_s0] ss:$0 sm:$0xff] }
   0x2   :  { %5 = vst [vmem:[%s23_s1] sm:$0xf] %v4_v0 }

// kernel: tile.68
= control target key start
LH: loop header
LB: loop body
LE: loop exit
PB: predicated region body
PF: predicated region fallthrough
CT: control target
= control target key end

     0   :  { %vm7_vm0 = vcmask 261120   ;;  %s37_s8 = smov 32   ;;  %s38_s9 = smov 64   ;;  %vm13_vm1 = vcmask 1048320   ;;  %vm19_vm2 = vcmask 785920   ;;  %vm25_vm3 = vcmask 523520   ;;  %s55_s0 = inlined_call_operand.vmem [shape: f32[4,32], index: 0, kind: input, shape index: {}]   ;;  %s56_s1 = inlined_call_operand.vmem [shape: f32[1,128], index: 1, kind: output, shape index: {}]  }
   0x1   :  { %v4_v0 = vld [vmem:[%s55_s0] sm:$0xf]  ;;  %s36_s0 = smov 96  }
   0x2   :  { %5 = vst [vmem:[#allocation1] sm:$0xf] %v4_v0 }
   0x9   :  { %v10_v1 = vld [vmem:[#allocation1 + $0x3] sm:$0x1]   ;;  %v22_v2 = vld [vmem:[#allocation1 + $0x1] sm:$0x1]   ;;  %v6_v3 = vld [vmem:[#allocation1] sm:$0x1]  }
   0xa   :  { %11 = vrot.lane.b32.xlu0 %v10_v1, %s36_s0  ;;  %23 = vrot.lane.b32.xlu1 %v22_v2, %s37_s8  ;;  %v16_v4 = vld [vmem:[#allocation1 + $0x2] sm:$0x1]   ;;  %8 = vst.msk [vmem:[#allocation0] sm:$0x1] %vm7_vm0, %v6_v3  }
   0xe   :  { %17 = vrot.lane.b32.xlu0 %v16_v4, %s38_s9 }
  0x7c   :  { %v12_v5 = vpop.permute.xlu0 %11   ;;  %v24_v6 = vpop.permute.xlu1 %23  }
  0x7d   :  { %14 = vst.msk [vmem:[#allocation0] sm:$0x1] %vm13_vm1, %v12_v5  }
  0x80   :  { %v18_v7 = vpop.permute.xlu0 %17  }
  0x81   :  { %20 = vst.msk [vmem:[#allocation0] sm:$0x1] %vm19_vm2, %v18_v7  }
  0x82   :  { %26 = vst.msk [vmem:[#allocation0] sm:$0x1] %vm25_vm3, %v24_v6  }
  0x89   :  { %v30_v8 = vld [vmem:[#allocation0] sm:$0x1] }
  0x8a   :  { %32 = vst [vmem:[%s56_s1] sm:$0x1] %v30_v8 }

// kernel: unet_generator_forward.13
= control target key start
LH: loop header
LB: loop body
LE: loop exit
PB: predicated region body
PF: predicated region fallthrough
CT: control target
= control target key end

     0   :  { %vm378_vm0 = vcmask 523264   ;;  %s872_s11 = smov 32   ;;  %vm607_vm1 = vcmask 261120   ;;  %vm610_vm2 = vcmask 785408   ;;  %s1096_s1 = inlined_call_operand.vmem [shape: bf16[576,128], index: 1, kind: input, shape index: {}]   ;;  %s1097_s0 = inlined_call_operand.vmem [shape: bf16[32,576], index: 0, kind: input, shape index: {}]   ;;  %s1098_s2 = inlined_call_operand.vmem [shape: f32[1,128], index: 2, kind: input, shape index: {}]   ;;  %s1099_s3 = inlined_call_operand.vmem [shape: f32[1,32], index: 3, kind: input, shape index: {}]   ;;  %s1100_s4 = inlined_call_operand.vmem [shape: f32[1,32], index: 4, kind: input, shape index: {}]   ;;  %s1101_s5 = inlined_call_operand.vmem [shape: bf16[32,128], index: 5, kind: output, shape index: {}]  }
   0x1   :  { %v818_v0 = vld [vmem:[%s1096_s1 + $0x40] sm:$0xff]   ;;  %v822_v4 = vld [vmem:[%s1096_s1 + $0x48] sm:$0xff]   ;;  %v826_v8 = vld [vmem:[%s1096_s1 + $0x50] sm:$0xff]  }
   0x2   :  { %v819_v1 = vld [vmem:[%s1096_s1] sm:$0xff]   ;;  %741 = vmatprep.subr.bf16.mxu0 %v818_v0  ;;  %v823_v5 = vld [vmem:[%s1096_s1 + $0x8] sm:$0xff]   ;;  %v827_v9 = vld [vmem:[%s1096_s1 + $0x10] sm:$0xff]  }
   0x3   :  { %v820_v2 = vld [vmem:[%s1096_s1 + $0xc0] sm:$0xff]   ;;  %742 = vmatpush3.bf16.msra.mxu0 %v819_v1  ;;  %v824_v6 = vld [vmem:[%s1096_s1 + $0xc8] sm:$0xff]   ;;  %v828_v10 = vld [vmem:[%s1096_s1 + $0xd0] sm:$0xff]  }
   0x4   :  { %v821_v3 = vld [vmem:[%s1096_s1 + $0x80] sm:$0xff]   ;;  %769 = vmatprep.subr.bf16.mxu1 %v820_v2  ;;  %743 = vmatprep.subr.bf16.mxu0 %v822_v4  ;;  %v825_v7 = vld [vmem:[%s1096_s1 + $0x88] sm:$0xff]   ;;  %v829_v11 = vld [vmem:[%s1096_s1 + $0x90] sm:$0xff]  }
   0x5   :  { %770 = vmatpush3.bf16.msra.mxu1 %v821_v3  ;;  %v830_v12 = vld [vmem:[%s1096_s1 + $0x58] sm:$0xff]   ;;  %v834_v16 = vld [vmem:[%s1096_s1 + $0x60] sm:$0xff]   ;;  %v838_v20 = vld [vmem:[%s1096_s1 + $0x68] sm:$0xff]  }
   0x6   :  { %771 = vmatprep.subr.bf16.mxu1 %v824_v6  ;;  %v831_v13 = vld [vmem:[%s1096_s1 + $0x18] sm:$0xff]   ;;  %v835_v17 = vld [vmem:[%s1096_s1 + $0x20] sm:$0xff]   ;;  %v839_v21 = vld [vmem:[%s1096_s1 + $0x28] sm:$0xff]  }
   0x7   :  { %744 = vmatpush3.bf16.msra.mxu0 %v823_v5  ;;  %v832_v14 = vld [vmem:[%s1096_s1 + $0xd8] sm:$0xff]   ;;  %v836_v18 = vld [vmem:[%s1096_s1 + $0xe0] sm:$0xff]   ;;  %v840_v22 = vld [vmem:[%s1096_s1 + $0xe8] sm:$0xff]  }
   0x8   :  { %745 = vmatprep.subr.bf16.mxu0 %v826_v8  ;;  %v833_v15 = vld [vmem:[%s1096_s1 + $0x98] sm:$0xff]   ;;  %v837_v19 = vld [vmem:[%s1096_s1 + $0xa0] sm:$0xff]   ;;  %v841_v23 = vld [vmem:[%s1096_s1 + $0xa8] sm:$0xff]  }
   0x9   :  { %772 = vmatpush3.bf16.msra.mxu1 %v825_v7  ;;  %v842_v24 = vld [vmem:[%s1096_s1 + $0x70] sm:$0xff]   ;;  %v846_v28 = vld [vmem:[%s1096_s1 + $0x78] sm:$0xff]   ;;  %v853_v34 = vld [vmem:[%s1096_s1 + $0x100] sm:$0xff]  }
   0xa   :  { %773 = vmatprep.subr.bf16.mxu1 %v828_v10  ;;  %v843_v25 = vld [vmem:[%s1096_s1 + $0x30] sm:$0xff]   ;;  %v847_v29 = vld [vmem:[%s1096_s1 + $0x38] sm:$0xff]   ;;  %v856_v36 = vld [vmem:[%s1097_s0 + $0xc] ss:$20 sps:$4 sm:$0xff]  }
   0xb   :  { %746 = vmatpush3.bf16.msra.mxu0 %v827_v9  ;;  %v844_v26 = vld [vmem:[%s1096_s1 + $0xf0] sm:$0xff]   ;;  %v848_v30 = vld [vmem:[%s1096_s1 + $0xf8] sm:$0xff]   ;;  %v857_v37 = vld [vmem:[%s1096_s1 + $0x108] sm:$0xff]   ;;  %466 = vmatprep.mubr.bf16.mxu1 %v856_v36 }
   0xc   :  { %747 = vmatprep.subr.bf16.mxu0 %v830_v12  ;;  %v845_v27 = vld [vmem:[%s1096_s1 + $0xb0] sm:$0xff]   ;;  %v851_v32 = vld [vmem:[%s1097_s0 + $0x4] ss:$20 sps:$4 sm:$0xff]   ;;  %v854_v35 = vld [vmem:[%s1097_s0 + $0x8] ss:$20 sps:$4 sm:$0xff]  }
   0xd   :  { %774 = vmatpush3.bf16.msra.mxu1 %v829_v11  ;;  %v849_v31 = vld [vmem:[%s1097_s0] ss:$20 sps:$4 sm:$0xff]   ;;  %v852_v33 = vld [vmem:[%s1096_s1 + $0xb8] sm:$0xff]   ;;  %417 = vmatprep.mubr.bf16.mxu0 %v851_v32  ;;  %v864_v42 = vld [vmem:[%s1097_s0 + $0x30] ss:$20 sps:$4 sm:$0xff]  }
   0xe   :  { %775 = vmatprep.subr.bf16.mxu1 %v832_v14  ;;  %v858_v38 = vld [vmem:[%s1097_s0 + $0x2c] ss:$20 sps:$4 sm:$0xff]   ;;  %v860_v39 = vld [vmem:[%s1097_s0 + $0x28] ss:$20 sps:$4 sm:$0xff]   ;;  %v861_v40 = vld [vmem:[%s1096_s1 + $0x110] sm:$0xff]  }
   0xf   :  { %748 = vmatpush3.bf16.msra.mxu0 %v831_v13  ;;  %v862_v41 = vld [vmem:[%s1097_s0 + $0x34] ss:$20 sps:$4 sm:$0xff]   ;;  %v865_v43 = vld [vmem:[%s1096_s1 + $0x118] sm:$0xff]   ;;  %v866_v44 = vld [vmem:[%s1097_s0 + $0x10] ss:$20 sps:$4 sm:$0xff]  }
  0x10   :  { %749 = vmatprep.subr.bf16.mxu0 %v834_v16  ;;  %v867_v45 = vld [vmem:[%s1097_s0 + $0x38] ss:$20 sps:$4 sm:$0xff]   ;;  %v673_v47 = vld [vmem:[%s1098_s2] ss:$0 sm:$0xff]  ;;  %s870_s0 = smov 64   ;;  %s871_s2 = smov 96  }
  0x11   :  { %776 = vmatpush3.bf16.msra.mxu1 %v833_v15 }
  0x12   :  { %777 = vmatprep.subr.bf16.mxu1 %v836_v18 }
  0x13   :  { %750 = vmatpush3.bf16.msra.mxu0 %v835_v17 }
  0x14   :  { %751 = vmatprep.subr.bf16.mxu0 %v838_v20 }
  0x15   :  { %778 = vmatpush3.bf16.msra.mxu1 %v837_v19 }
  0x16   :  { %779 = vmatprep.subr.bf16.mxu1 %v840_v22 }
  0x17   :  { %752 = vmatpush3.bf16.msra.mxu0 %v839_v21 }
  0x18   :  { %753 = vmatprep.subr.bf16.mxu0 %v842_v24 }
  0x19   :  { %780 = vmatpush3.bf16.msra.mxu1 %v841_v23 }
  0x1a   :  { %781 = vmatprep.subr.bf16.mxu1 %v844_v26 }
  0x1b   :  { %754 = vmatpush3.bf16.msra.mxu0 %v843_v25 }
  0x1c   :  { %755 = vmatprep.subr.bf16.mxu0 %v846_v28 }
  0x1d   :  { %782 = vmatpush3.bf16.msra.mxu1 %v845_v27 }
  0x1e   :  { %783 = vmatprep.subr.bf16.mxu1 %v848_v30 }
  0x1f   :  { %756 = vmatpush3.bf16.msra.mxu0 %v847_v29 }
  0x20   :  { %803 = vmatprep.subr.bf16.mxu0 %v853_v34 }
  0x21   :  { %784 = vmatpush3.bf16.msra.mxu1 %v852_v33 }
  0x22   :  { %418 = vmatmul.mubr.bf16.vlgmr.msra.gmra.mrb[0].mxu0 %v849_v31 }
  0x23   :  { %804 = vmatpush3.bf16.msra.mxu0 %v853_v34  ;;  %425 = vmatprep.mubr.bf16.mxu0 %v858_v38 }
  0x24   :  { %467 = vmatmul.mubr.bf16.vlgmr.msra.gmra.mrb[0].mxu1 %v854_v35  ;;  %805 = vmatprep.subr.bf16.mxu0 %v857_v37 }
  0x25   :  { %474 = vmatprep.mubr.bf16.mxu1 %v862_v41 }
  0x27   :  { %806 = vmatpush3.bf16.msra.mxu0 %v857_v37 }
  0x28   :  { %807 = vmatprep.subr.bf16.mxu0 %v861_v40 }
  0x2a   :  { %426 = vmatmul.mubr.bf16.gmra.mrb[4].mxu0 %v860_v39 }
  0x2b   :  { %811 = vmatprep.mubr.msk.bf16.mxu0 %vm378_vm0, %v866_v44  ;;  %808 = vmatpush3.bf16.msra.mxu0 %v861_v40 }
  0x2c   :  { %475 = vmatmul.mubr.bf16.gmra.mrb[4].mxu1 %v864_v42  ;;  %809 = vmatprep.subr.bf16.mxu0 %v865_v43 }
  0x2f   :  { %810 = vmatpush3.bf16.msra.mxu0 %v865_v43 }
  0x32   :  { %812 = vmatmul.mubr.msk.bf16.vlgmr.msra.gmra.mrb[8].mxu0 %vm378_vm0, %v867_v45 }
  0xf5   :  { %v757_v46 = vpop.f32.mrb[0].mxu0 }
  0xf6   :  { %v758_v48 = vpop.f32.mrb[1].mxu0 }
  0xf7   :  { %v759_v49 = vadd.f32 %v758_v48, %v757_v46  ;;  %v760_v50 = vpop.f32.mrb[2].mxu0  ;;  %v785_v51 = vpop.f32.mrb[0].mxu1 }
  0xf8   :  { %v761_v52 = vpop.f32.mrb[3].mxu0  ;;  %v786_v55 = vpop.f32.mrb[1].mxu1 }
  0xf9   :  { %v420_v53 = vadd.f32 %v759_v49, %v673_v47  ;;  %v762_v54 = vadd.f32 %v761_v52, %v760_v50  ;;  %v787_v56 = vadd.f32 %v786_v55, %v785_v51  ;;  %v788_v57 = vpop.f32.mrb[2].mxu1 }
  0xfa   :  { %v789_v59 = vpop.f32.mrb[3].mxu1 }
  0xfb   :  { %v423_v58 = vadd.f32 %v762_v54, %v673_v47  ;;  %v790_v60 = vadd.f32 %v789_v59, %v788_v57  ;;  %v469_v61 = vadd.f32 %v787_v56, %v420_v53 }
  0xfd   :  { %v763_v62 = vpop.f32.mrb[4].mxu0  ;;  %v472_v0 = vadd.f32 %v790_v60, %v423_v58 }
  0xfe   :  { %v764_v63 = vpop.f32.mrb[5].mxu0 }
  0xff   :  { %v765_v1 = vadd.f32 %v764_v63, %v763_v62  ;;  %v766_v2 = vpop.f32.mrb[6].mxu0  ;;  %v791_v3 = vpop.f32.mrb[4].mxu1  ;;  %v594_v63 = vlaneseq }
 0x100   :  { %v767_v4 = vpop.f32.mrb[7].mxu0  ;;  %v792_v7 = vpop.f32.mrb[5].mxu1 }
 0x101   :  { %v428_v5 = vadd.f32 %v765_v1, %v673_v47  ;;  %v768_v6 = vadd.f32 %v767_v4, %v766_v2  ;;  %v793_v8 = vadd.f32 %v792_v7, %v791_v3  ;;  %v794_v9 = vpop.f32.mrb[6].mxu1  ;;  %v586_v1 = vld [vmem:[%s1099_s3] sm:$0x1] }
 0x102   :  { %v795_v11 = vpop.f32.mrb[7].mxu1 }
 0x103   :  { %v431_v10 = vadd.f32 %v768_v6, %v673_v47  ;;  %v796_v12 = vadd.f32 %v795_v11, %v794_v9  ;;  %v477_v13 = vadd.f32 %v793_v8, %v428_v5  ;;  %v590_v5 = vld [vmem:[%s1100_s4] sm:$0x1] }
 0x105   :  { %v813_v14 = vpop.f32.mrb[8].mxu0  ;;  %v480_v15 = vadd.f32 %v796_v12, %v431_v10 }
 0x106   :  { %v1046_v16 = vadd.f32 %v813_v14, %v477_v13  ;;  %v517_v17 = vpop.f32.mrb[9].mxu0 }
 0x107   :  { %v1048_v18 = vadd.f32 %v517_v17, %v469_v61  ;;  %v814_v19 = vpop.f32.mrb[10].mxu0 }
 0x108   :  { %v1050_v20 = vadd.f32 %v814_v19, %v480_v15  ;;  %v520_v21 = vpop.f32.mrb[11].mxu0  ;;  %v543_v26 = vmul.f32 %v1046_v16, %v1046_v16 }
 0x109   :  { %v1052_v22 = vadd.f32 %v520_v21, %v472_v0  ;;  %v541_v23 = vmul.f32 %v1048_v18, %v1048_v18  ;;  %v595_v0 = vshrl.u32 %v594_v63, 7 }
 0x10a   :  { %v544_v29 = vmul.f32 %v1050_v20, %v1050_v20 }
 0x10b   :  { %v532_v24 = vadd.f32 %v1052_v22, %v1048_v18  ;;  %v542_v25 = vmul.f32 %v1052_v22, %v1052_v22  ;;  %v596_v2 = vsub.s32 0, %v595_v0 }
 0x10d   :  { %v533_v27 = vadd.f32 %v532_v24, %v1046_v16  ;;  %v545_v28 = vadd.f32 %v542_v25, %v541_v23 }
 0x10f   :  { %v534_v30 = vadd.f32 %v533_v27, %v1050_v20  ;;  %v546_v31 = vadd.f32 %v545_v28, %v543_v26 }
 0x111   :  { %v535_v32 = vrot.slane %v534_v30, 4  ;;  %v547_v33 = vadd.f32 %v546_v31, %v544_v29 }
 0x113   :  { %v536_v34 = vadd.f32 %v535_v32, %v534_v30  ;;  %v548_v35 = vrot.slane %v547_v33, 4 }
 0x115   :  { %v537_v36 = vrot.slane %v536_v34, 2  ;;  %v549_v37 = vadd.f32 %v548_v35, %v547_v33 }
 0x117   :  { %v538_v38 = vadd.f32 %v537_v36, %v536_v34  ;;  %v550_v39 = vrot.slane %v549_v37, 2 }
 0x119   :  { %v539_v40 = vrot.slane %v538_v38, 1  ;;  %v551_v41 = vadd.f32 %v550_v39, %v549_v37 }
 0x11b   :  { %v540_v42 = vadd.f32 %v539_v40, %v538_v38  ;;  %v552_v43 = vrot.slane %v551_v41, 1 }
 0x11d   :  { %564 = vrot.lane.b32.xlu1 %v540_v42, %s870_s0  ;;  %555 = vrot.lane.b32.xlu0 %v540_v42, %s871_s2  ;;  %v553_v44 = vadd.f32 %v552_v43, %v551_v41 }
 0x121   :  { %568 = vrot.lane.b32.xlu1 %v553_v44, %s870_s0  ;;  %560 = vrot.lane.b32.xlu0 %v553_v44, %s871_s2 }
 0x125   :  { %576 = vrot.lane.b32.xlu1 %v553_v44, %s872_s11  ;;  %572 = vrot.lane.b32.xlu0 %v540_v42, %s872_s11 }
 0x18f   :  { %v565_v45 = vpop.permute.xlu1 %564  ;;  %v556_v46 = vpop.permute.xlu0 %555 }
 0x190   :  { %v558_v47 = vadd.f32 %v556_v46, %v540_v42 }
 0x192   :  { %v567_v52 = vadd.f32 %v565_v45, %v558_v47 }
 0x193   :  { %v569_v48 = vpop.permute.xlu1 %568  ;;  %v561_v49 = vpop.permute.xlu0 %560 }
 0x194   :  { %v563_v50 = vadd.f32 %v561_v49, %v553_v44 }
 0x196   :  { %v571_v51 = vadd.f32 %v569_v48, %v563_v50 }
 0x197   :  { %v577_v53 = vpop.permute.xlu1 %576  ;;  %v573_v54 = vpop.permute.xlu0 %572 }
 0x198   :  { %v579_v55 = vadd.f32 %v577_v53, %v571_v51  ;;  %v575_v56 = vadd.f32 %v573_v54, %v567_v52 }
 0x19a   :  { %v581_v57 = vmul.f32 0.0078125, %v575_v56  ;;  %v582_v58 = vmul.f32 0.0078125, %v579_v55 }
 0x19c   :  { %v583_v59 = vmul.f32 %v581_v57, %v581_v57 }
 0x19e   :  { %v584_v60 = vsub.f32 %v582_v58, %v583_v59 }
 0x1a0   :  { %v585_v61 = vmax.f32 %v584_v60, 0.0 }
 0x1a2   :  { %v587_v62 = vadd.f32 1e-05, %v585_v61 }
 0x1a4   :  { %868 = vrsqrt.f32 %v587_v62 }
 0x1ae   :  { %v869_v3 = vpop.eup %868 }
 0x1af   :  { %v589_v4 = vmul.f32 %v869_v3, %v586_v1 }
 0x1b1   :  { %v591_v6 = vmul.f32 %v589_v4, %v581_v57  ;;  %v597_v7 = vrot.slane %v589_v4, %v596_v2 }
 0x1b3   :  { %v592_v8 = vsub.f32 %v590_v5, %v591_v6  ;;  %601 = vrot.lane.b32.xlu1 %v597_v7, %s870_s0  ;;  %598 = vrot.lane.b32.xlu0 %v597_v7, %s872_s11 }
 0x1b5   :  { %v616_v9 = vrot.slane %v592_v8, %v596_v2 }
 0x1b7   :  { %604 = vrot.lane.b32.xlu0 %v597_v7, %s871_s2  ;;  %617 = vrot.lane.b32.xlu1 %v616_v9, %s872_s11 }
 0x1bb   :  { %620 = vrot.lane.b32.xlu0 %v616_v9, %s870_s0  ;;  %623 = vrot.lane.b32.xlu1 %v616_v9, %s871_s2 }
 0x225   :  { %v602_v10 = vpop.permute.xlu1 %601  ;;  %v599_v11 = vpop.permute.xlu0 %598 }
 0x226   :  { %v608_v12 = vsel %vm607_vm1, %v589_v4, %v599_v11 }
 0x227   :  { %v609_v13 = vsel %vm378_vm0, %v608_v12, %v602_v10 }
 0x229   :  { %v605_v14 = vpop.permute.xlu0 %604  ;;  %v618_v15 = vpop.permute.xlu1 %617 }
 0x22a   :  { %v611_v17 = vsel %vm610_vm2, %v609_v13, %v605_v14  ;;  %v626_v21 = vsel %vm607_vm1, %v592_v8, %v618_v15 }
 0x22b   :  { %v632_v19 = vrot.slane %v611_v17, %v596_v2 }
 0x22d   :  { %v621_v23 = vpop.permute.xlu0 %620  ;;  %v624_v24 = vpop.permute.xlu1 %623  ;;  %v633_v26 = vmul.f32 %v632_v19, %v1048_v18  ;;  %v634_v28 = vmul.f32 %v632_v19, %v1052_v22  ;;  %v635_v29 = vmul.f32 %v632_v19, %v1046_v16  ;;  %v636_v30 = vmul.f32 %v632_v19, %v1050_v20 }
 0x22e   :  { %v627_v25 = vsel %vm378_vm0, %v626_v21, %v621_v23 }
 0x22f   :  { %v628_v27 = vsel %vm610_vm2, %v627_v25, %v624_v24 }
 0x230   :  { %v640_v31 = vrot.slane %v628_v27, %v596_v2 }
 0x232   :  { %v641_v32 = vadd.f32 %v640_v31, %v633_v26  ;;  %v642_v33 = vadd.f32 %v640_v31, %v634_v28  ;;  %v643_v34 = vadd.f32 %v640_v31, %v635_v29  ;;  %v644_v35 = vadd.f32 %v640_v31, %v636_v30 }
 0x234   :  { %v645_v36 = vmax.f32 %v641_v32, 0.0  ;;  %v646_v37 = vmax.f32 %v642_v33, 0.0  ;;  %v647_v38 = vmax.f32 %v643_v34, 0.0  ;;  %v648_v39 = vmax.f32 %v644_v35, 0.0 }
 0x236   :  { %v733_v40 = vpack.c.bf16 %v646_v37, %v645_v36  ;;  %v738_v41 = vpack.c.bf16 %v648_v39, %v647_v38 }
 0x238   :  { %734 = vst [vmem:[%s1101_s5] sm:$0xff] %v733_v40   ;;  %740 = vst [vmem:[%s1101_s5 + $0x8] sm:$0xff] %v738_v41  }

// kernel: tile.72
= control target key start
LH: loop header
LB: loop body
LE: loop exit
PB: predicated region body
PF: predicated region fallthrough
CT: control target
= control target key end

     0   :  { %s22_s0 = inlined_call_operand.vmem [shape: f32[64], index: 0, kind: input, shape index: {}]   ;;  %s23_s1 = inlined_call_operand.vmem [shape: f32[2,64], index: 1, kind: output, shape index: {}]  }
   0x1   :  { %v4_v0 = vld [vmem:[%s22_s0] ss:$0 sm:$0xff] }
   0x2   :  { %5 = vst [vmem:[%s23_s1] sm:$0x3] %v4_v0 }

// kernel: tile.73
= control target key start
LH: loop header
LB: loop body
LE: loop exit
PB: predicated region body
PF: predicated region fallthrough
CT: control target
= control target key end

     0   :  { %vm7_vm0 = vcmask 523264   ;;  %vm13_vm1 = vcmask 1048064   ;;  %s39_s0 = inlined_call_operand.vmem [shape: f32[2,64], index: 0, kind: input, shape index: {}]   ;;  %s40_s1 = inlined_call_operand.vmem [shape: f32[1,128], index: 1, kind: output, shape index: {}]  }
   0x1   :  { %v4_v0 = vld [vmem:[%s39_s0] sm:$0x3]  ;;  %s22_s0 = smov 64  }
   0x2   :  { %5 = vst [vmem:[#allocation1] sm:$0x3] %v4_v0 }
   0x9   :  { %v10_v1 = vld [vmem:[#allocation1 + $0x1] sm:$0x1]   ;;  %v6_v2 = vld [vmem:[#allocation1] sm:$0x1]  }
   0xa   :  { %11 = vrot.lane.b32.xlu0 %v10_v1, %s22_s0  ;;  %8 = vst.msk [vmem:[#allocation0] sm:$0x1] %vm7_vm0, %v6_v2  }
  0x7c   :  { %v12_v3 = vpop.permute.xlu0 %11  }
  0x7d   :  { %14 = vst.msk [vmem:[#allocation0] sm:$0x1] %vm13_vm1, %v12_v3  }
  0x84   :  { %v18_v4 = vld [vmem:[#allocation0] sm:$0x1] }
  0x85   :  { %20 = vst [vmem:[%s40_s1] sm:$0x1] %v18_v4 }

// kernel: unet_generator_forward.14
= control target key start
LH: loop header
LB: loop body
LE: loop exit
PB: predicated region body
PF: predicated region fallthrough
CT: control target
= control target key end

     0   :  { %v720_v33 = vmov 0.0   ;;  %vm721_vm0 = vmmov 0   ;;  %vm347_vm1 = vcmask 523264   ;;  %s891_s1 = inlined_call_operand.vmem [shape: bf16[576,128], index: 1, kind: input, shape index: {}]   ;;  %s892_s0 = inlined_call_operand.vmem [shape: bf16[16,576], index: 0, kind: input, shape index: {}]   ;;  %s893_s2 = inlined_call_operand.vmem [shape: f32[1,128], index: 2, kind: input, shape index: {}]   ;;  %s894_s3 = inlined_call_operand.vmem [shape: f32[1,64], index: 3, kind: input, shape index: {}]   ;;  %s895_s4 = inlined_call_operand.vmem [shape: f32[1,64], index: 4, kind: input, shape index: {}]   ;;  %s896_s5 = inlined_call_operand.vmem [shape: bf16[16,128], index: 5, kind: output, shape index: {}]  }
   0x1   :  { %v675_v0 = vld [vmem:[%s891_s1 + $0x40] sm:$0xff]   ;;  %v679_v4 = vld [vmem:[%s891_s1 + $0x48] sm:$0xff]   ;;  %v683_v8 = vld [vmem:[%s891_s1 + $0x50] sm:$0xff]  }
   0x2   :  { %v676_v1 = vld [vmem:[%s891_s1] sm:$0xff]   ;;  %611 = vmatprep.subr.bf16.mxu0 %v675_v0  ;;  %v680_v5 = vld [vmem:[%s891_s1 + $0x8] sm:$0xff]   ;;  %v684_v9 = vld [vmem:[%s891_s1 + $0x10] sm:$0xff]  }
   0x3   :  { %v677_v2 = vld [vmem:[%s891_s1 + $0xc0] sm:$0xff]   ;;  %612 = vmatpush3.bf16.msra.mxu0 %v676_v1  ;;  %v681_v6 = vld [vmem:[%s891_s1 + $0xc8] sm:$0xff]   ;;  %v685_v10 = vld [vmem:[%s891_s1 + $0xd0] sm:$0xff]  }
   0x4   :  { %v678_v3 = vld [vmem:[%s891_s1 + $0x80] sm:$0xff]   ;;  %633 = vmatprep.subr.bf16.mxu1 %v677_v2  ;;  %613 = vmatprep.subr.bf16.mxu0 %v679_v4  ;;  %v682_v7 = vld [vmem:[%s891_s1 + $0x88] sm:$0xff]   ;;  %v686_v11 = vld [vmem:[%s891_s1 + $0x90] sm:$0xff]  }
   0x5   :  { %634 = vmatpush3.bf16.msra.mxu1 %v678_v3  ;;  %v687_v12 = vld [vmem:[%s891_s1 + $0x58] sm:$0xff]   ;;  %v691_v16 = vld [vmem:[%s891_s1 + $0x60] sm:$0xff]   ;;  %v695_v20 = vld [vmem:[%s891_s1 + $0x68] sm:$0xff]  }
   0x6   :  { %635 = vmatprep.subr.bf16.mxu1 %v681_v6  ;;  %v688_v13 = vld [vmem:[%s891_s1 + $0x18] sm:$0xff]   ;;  %v692_v17 = vld [vmem:[%s891_s1 + $0x20] sm:$0xff]   ;;  %v696_v21 = vld [vmem:[%s891_s1 + $0x28] sm:$0xff]  }
   0x7   :  { %614 = vmatpush3.bf16.msra.mxu0 %v680_v5  ;;  %v689_v14 = vld [vmem:[%s891_s1 + $0xd8] sm:$0xff]   ;;  %v693_v18 = vld [vmem:[%s891_s1 + $0xe0] sm:$0xff]   ;;  %v697_v22 = vld [vmem:[%s891_s1 + $0xe8] sm:$0xff]  }
   0x8   :  { %615 = vmatprep.subr.bf16.mxu0 %v683_v8  ;;  %v690_v15 = vld [vmem:[%s891_s1 + $0x98] sm:$0xff]   ;;  %v694_v19 = vld [vmem:[%s891_s1 + $0xa0] sm:$0xff]   ;;  %v698_v23 = vld [vmem:[%s891_s1 + $0xa8] sm:$0xff]  }
   0x9   :  { %636 = vmatpush3.bf16.msra.mxu1 %v682_v7  ;;  %v699_v24 = vld [vmem:[%s891_s1 + $0x70] sm:$0xff]   ;;  %v703_v28 = vld [vmem:[%s891_s1 + $0x78] sm:$0xff]   ;;  %v712_v36 = vld [vmem:[%s892_s0 + $0xc] ss:$20 sps:$4 sm:$0xff]  }
   0xa   :  { %637 = vmatprep.subr.bf16.mxu1 %v685_v10  ;;  %v700_v25 = vld [vmem:[%s891_s1 + $0x30] sm:$0xff]   ;;  %v704_v29 = vld [vmem:[%s891_s1 + $0x38] sm:$0xff]   ;;  %v713_v37 = vld [vmem:[%s891_s1 + $0x100] sm:$0xff]   ;;  %424 = vmatprep.mubr.bf16.mxu1 %v712_v36 }
   0xb   :  { %616 = vmatpush3.bf16.msra.mxu0 %v684_v9  ;;  %v701_v26 = vld [vmem:[%s891_s1 + $0xf0] sm:$0xff]   ;;  %v705_v30 = vld [vmem:[%s891_s1 + $0xf8] sm:$0xff]   ;;  %v714_v38 = vld [vmem:[%s891_s1 + $0x108] sm:$0xff]  }
   0xc   :  { %617 = vmatprep.subr.bf16.mxu0 %v687_v12  ;;  %v702_v27 = vld [vmem:[%s891_s1 + $0xb0] sm:$0xff]   ;;  %v708_v32 = vld [vmem:[%s892_s0 + $0x4] ss:$20 sps:$4 sm:$0xff]   ;;  %v710_v35 = vld [vmem:[%s892_s0 + $0x8] ss:$20 sps:$4 sm:$0xff]  }
   0xd   :  { %638 = vmatpush3.bf16.msra.mxu1 %v686_v11  ;;  %v706_v31 = vld [vmem:[%s892_s0] ss:$20 sps:$4 sm:$0xff]   ;;  %v709_v34 = vld [vmem:[%s891_s1 + $0xb8] sm:$0xff]   ;;  %383 = vmatprep.mubr.bf16.mxu0 %v708_v32  ;;  %v717_v41 = vld [vmem:[%s892_s0 + $0x10] ss:$20 sps:$4 sm:$0xff]   ;;  %s722_s0 = smov 64  }
   0xe   :  { %639 = vmatprep.subr.bf16.mxu1 %v689_v14  ;;  %v715_v39 = vld [vmem:[%s891_s1 + $0x110] sm:$0xff]   ;;  %v716_v40 = vld [vmem:[%s891_s1 + $0x118] sm:$0xff]   ;;  %v559_v43 = vld [vmem:[%s893_s2] ss:$0 sm:$0xff] }
   0xf   :  { %618 = vmatpush3.bf16.msra.mxu0 %v688_v13 }
  0x10   :  { %619 = vmatprep.subr.bf16.mxu0 %v691_v16 }
  0x11   :  { %640 = vmatpush3.bf16.msra.mxu1 %v690_v15 }
  0x12   :  { %641 = vmatprep.subr.bf16.mxu1 %v693_v18 }
  0x13   :  { %620 = vmatpush3.bf16.msra.mxu0 %v692_v17 }
  0x14   :  { %621 = vmatprep.subr.bf16.mxu0 %v695_v20 }
  0x15   :  { %642 = vmatpush3.bf16.msra.mxu1 %v694_v19 }
  0x16   :  { %643 = vmatprep.subr.bf16.mxu1 %v697_v22 }
  0x17   :  { %622 = vmatpush3.bf16.msra.mxu0 %v696_v21 }
  0x18   :  { %623 = vmatprep.subr.bf16.mxu0 %v699_v24 }
  0x19   :  { %644 = vmatpush3.bf16.msra.mxu1 %v698_v23 }
  0x1a   :  { %645 = vmatprep.subr.bf16.mxu1 %v701_v26 }
  0x1b   :  { %624 = vmatpush3.bf16.msra.mxu0 %v700_v25 }
  0x1c   :  { %625 = vmatprep.subr.bf16.mxu0 %v703_v28 }
  0x1d   :  { %646 = vmatpush3.bf16.msra.mxu1 %v702_v27  ;;  %v514_v27 = vlaneseq }
  0x1e   :  { %647 = vmatprep.subr.bf16.mxu1 %v705_v30 }
  0x1f   :  { %626 = vmatpush3.bf16.msra.mxu0 %v704_v29  ;;  %v515_v28 = vshrl.u32 %v514_v27, 7  ;;  %v506_v29 = vld [vmem:[%s894_s3] sm:$0x1] }
  0x20   :  { %660 = vmatprep.subr.bf16.mxu0 %v720_v33 }
  0x21   :  { %648 = vmatpush3.bf16.msra.mxu1 %v709_v34  ;;  %v516_v30 = vsub.s32 0, %v515_v28 }
  0x22   :  { %384 = vmatmul.mubr.bf16.vlgmr.msra.gmra.mrb[0].mxu0 %v706_v31 }
  0x23   :  { %668 = vmatprep.mubr.msk.bf16.mxu0 %vm721_vm0, %v720_v33  ;;  %661 = vmatpush3.bf16.msra.mxu0 %v713_v37 }
  0x24   :  { %425 = vmatmul.mubr.bf16.vlgmr.msra.gmra.mrb[0].mxu1 %v710_v35  ;;  %662 = vmatprep.subr.bf16.mxu0 %v720_v33 }
  0x27   :  { %663 = vmatpush3.bf16.msra.mxu0 %v714_v38 }
  0x28   :  { %664 = vmatprep.subr.bf16.mxu0 %v720_v33 }
  0x2b   :  { %665 = vmatpush3.bf16.msra.mxu0 %v715_v39 }
  0x2c   :  { %666 = vmatprep.subr.bf16.mxu0 %v720_v33  ;;  %v510_v33 = vld [vmem:[%s895_s4] sm:$0x1] }
  0x2f   :  { %667 = vmatpush3.bf16.msra.mxu0 %v716_v40 }
  0x32   :  { %669 = vmatmul.mubr.msk.bf16.vlgmr.msra.gmra.mrb[4].mxu0 %vm347_vm1, %v717_v41 }
  0xf5   :  { %v627_v42 = vpop.f32.mrb[0].mxu0 }
  0xf6   :  { %v628_v44 = vpop.f32.mrb[1].mxu0 }
  0xf7   :  { %v629_v45 = vadd.f32 %v628_v44, %v627_v42  ;;  %v630_v46 = vpop.f32.mrb[2].mxu0  ;;  %v649_v47 = vpop.f32.mrb[0].mxu1 }
  0xf8   :  { %v631_v48 = vpop.f32.mrb[3].mxu0  ;;  %v650_v51 = vpop.f32.mrb[1].mxu1 }
  0xf9   :  { %v386_v49 = vadd.f32 %v629_v45, %v559_v43  ;;  %v632_v50 = vadd.f32 %v631_v48, %v630_v46  ;;  %v651_v52 = vadd.f32 %v650_v51, %v649_v47  ;;  %v652_v53 = vpop.f32.mrb[2].mxu1 }
  0xfa   :  { %v653_v55 = vpop.f32.mrb[3].mxu1 }
  0xfb   :  { %v389_v54 = vadd.f32 %v632_v50, %v559_v43  ;;  %v654_v56 = vadd.f32 %v653_v55, %v652_v53  ;;  %v427_v57 = vadd.f32 %v651_v52, %v386_v49 }
  0xfd   :  { %v430_v58 = vadd.f32 %v654_v56, %v389_v54 }
 0x105   :  { %v467_v59 = vpop.f32.mrb[4].mxu0 }
 0x106   :  { %v468_v60 = vadd.f32 %v467_v59, %v427_v57  ;;  %v670_v61 = vpop.f32.mrb[5].mxu0 }
 0x107   :  { %v470_v62 = vpop.f32.mrb[6].mxu0 }
 0x108   :  { %v471_v63 = vadd.f32 %v470_v62, %v430_v58  ;;  %v671_v0 = vpop.f32.mrb[7].mxu0  ;;  %v481_v1 = vmul.f32 %v468_v60, %v468_v60 }
 0x10a   :  { %v474_v2 = vadd.f32 %v471_v63, %v468_v60  ;;  %v482_v3 = vmul.f32 %v471_v63, %v471_v63 }
 0x10c   :  { %v475_v4 = vrot.slane %v474_v2, 4  ;;  %v483_v5 = vadd.f32 %v482_v3, %v481_v1 }
 0x10e   :  { %v484_v6 = vrot.slane %v483_v5, 4  ;;  %v476_v7 = vadd.f32 %v475_v4, %v474_v2 }
 0x110   :  { %v477_v8 = vrot.slane %v476_v7, 2  ;;  %v485_v9 = vadd.f32 %v484_v6, %v483_v5 }
 0x112   :  { %v478_v10 = vadd.f32 %v477_v8, %v476_v7  ;;  %v486_v11 = vrot.slane %v485_v9, 2 }
 0x114   :  { %v479_v12 = vrot.slane %v478_v10, 1  ;;  %v487_v13 = vadd.f32 %v486_v11, %v485_v9 }
 0x116   :  { %v480_v14 = vadd.f32 %v479_v12, %v478_v10  ;;  %v488_v15 = vrot.slane %v487_v13, 1 }
 0x118   :  { %491 = vrot.lane.b32.xlu0 %v480_v14, %s722_s0  ;;  %v489_v16 = vadd.f32 %v488_v15, %v487_v13 }
 0x11c   :  { %496 = vrot.lane.b32.xlu0 %v489_v16, %s722_s0 }
 0x18a   :  { %v492_v17 = vpop.permute.xlu0 %491 }
 0x18b   :  { %v494_v18 = vadd.f32 %v492_v17, %v480_v14 }
 0x18d   :  { %v501_v19 = vmul.f32 0.03125, %v494_v18 }
 0x18e   :  { %v497_v20 = vpop.permute.xlu0 %496 }
 0x18f   :  { %v499_v21 = vadd.f32 %v497_v20, %v489_v16  ;;  %v503_v22 = vmul.f32 %v501_v19, %v501_v19 }
 0x191   :  { %v502_v23 = vmul.f32 0.03125, %v499_v21 }
 0x193   :  { %v504_v24 = vsub.f32 %v502_v23, %v503_v22 }
 0x195   :  { %v505_v25 = vmax.f32 %v504_v24, 0.0 }
 0x197   :  { %v507_v26 = vadd.f32 1e-05, %v505_v25 }
 0x199   :  { %718 = vrsqrt.f32 %v507_v26 }
 0x1a3   :  { %v719_v31 = vpop.eup %718 }
 0x1a4   :  { %v509_v32 = vmul.f32 %v719_v31, %v506_v29 }
 0x1a6   :  { %v517_v34 = vrot.slane %v509_v32, %v516_v30  ;;  %v511_v35 = vmul.f32 %v509_v32, %v501_v19 }
 0x1a8   :  { %518 = vrot.lane.b32.xlu1 %v517_v34, %s722_s0  ;;  %v512_v36 = vsub.f32 %v510_v33, %v511_v35 }
 0x1aa   :  { %v526_v37 = vrot.slane %v512_v36, %v516_v30 }
 0x1ac   :  { %527 = vrot.lane.b32.xlu1 %v526_v37, %s722_s0 }
 0x21a   :  { %v519_v38 = vpop.permute.xlu1 %518 }
 0x21b   :  { %v521_v39 = vsel %vm347_vm1, %v509_v32, %v519_v38 }
 0x21c   :  { %v534_v40 = vrot.slane %v521_v39, %v516_v30 }
 0x21e   :  { %v528_v41 = vpop.permute.xlu1 %527  ;;  %v535_v43 = vmul.f32 %v534_v40, %v468_v60  ;;  %v536_v44 = vmul.f32 %v534_v40, %v471_v63 }
 0x21f   :  { %v530_v42 = vsel %vm347_vm1, %v512_v36, %v528_v41 }
 0x220   :  { %v540_v45 = vrot.slane %v530_v42, %v516_v30 }
 0x222   :  { %v541_v46 = vadd.f32 %v540_v45, %v535_v43  ;;  %v542_v47 = vadd.f32 %v540_v45, %v536_v44 }
 0x224   :  { %v543_v48 = vmax.f32 %v541_v46, 0.0  ;;  %v544_v49 = vmax.f32 %v542_v47, 0.0 }
 0x226   :  { %v609_v50 = vpack.c.bf16 %v544_v49, %v543_v48 }
 0x228   :  { %610 = vst [vmem:[%s896_s5] sm:$0xff] %v609_v50  }

// kernel: unet_generator_forward.15
= control target key start
LH: loop header
LB: loop body
LE: loop exit
PB: predicated region body
PF: predicated region fallthrough
CT: control target
= control target key end

     0   :  { %vm1250_vm0 = vmmov 0   ;;  %vm912_vm1 = vcmask 523264   ;;  %s1537_s1 = inlined_call_operand.vmem [shape: bf16[1152,128], index: 1, kind: input, shape index: {}]   ;;  %s1538_s0 = inlined_call_operand.vmem [shape: bf16[16,1152], index: 0, kind: input, shape index: {}]   ;;  %s1539_s2 = inlined_call_operand.vmem [shape: f32[1,128], index: 2, kind: input, shape index: {}]   ;;  %s1540_s3 = inlined_call_operand.vmem [shape: f32[1,64], index: 3, kind: input, shape index: {}]   ;;  %s1541_s4 = inlined_call_operand.vmem [shape: f32[1,64], index: 4, kind: input, shape index: {}]   ;;  %s1542_s5 = inlined_call_operand.vmem [shape: bf16[16,128], index: 5, kind: output, shape index: {}]  }
   0x1   :  { %v1162_v0 = vld [vmem:[%s1537_s1 + $0x40] sm:$0xff]   ;;  %v1166_v4 = vld [vmem:[%s1537_s1 + $0x48] sm:$0xff]   ;;  %v1170_v8 = vld [vmem:[%s1537_s1 + $0x50] sm:$0xff]  }
   0x2   :  { %v1163_v1 = vld [vmem:[%s1537_s1] sm:$0xff]   ;;  %1042 = vmatprep.subr.bf16.mxu0 %v1162_v0  ;;  %v1167_v5 = vld [vmem:[%s1537_s1 + $0x8] sm:$0xff]   ;;  %v1171_v9 = vld [vmem:[%s1537_s1 + $0x10] sm:$0xff]  }
   0x3   :  { %v1164_v2 = vld [vmem:[%s1537_s1 + $0xc0] sm:$0xff]   ;;  %1043 = vmatpush3.bf16.msra.mxu0 %v1163_v1  ;;  %v1168_v6 = vld [vmem:[%s1537_s1 + $0xc8] sm:$0xff]   ;;  %v1172_v10 = vld [vmem:[%s1537_s1 + $0xd0] sm:$0xff]  }
   0x4   :  { %v1165_v3 = vld [vmem:[%s1537_s1 + $0x80] sm:$0xff]   ;;  %1064 = vmatprep.subr.bf16.mxu1 %v1164_v2  ;;  %1044 = vmatprep.subr.bf16.mxu0 %v1166_v4  ;;  %v1169_v7 = vld [vmem:[%s1537_s1 + $0x88] sm:$0xff]   ;;  %v1173_v11 = vld [vmem:[%s1537_s1 + $0x90] sm:$0xff]  }
   0x5   :  { %1065 = vmatpush3.bf16.msra.mxu1 %v1165_v3  ;;  %v1174_v12 = vld [vmem:[%s1537_s1 + $0x58] sm:$0xff]   ;;  %v1178_v16 = vld [vmem:[%s1537_s1 + $0x60] sm:$0xff]   ;;  %v1182_v20 = vld [vmem:[%s1537_s1 + $0x68] sm:$0xff]  }
   0x6   :  { %1066 = vmatprep.subr.bf16.mxu1 %v1168_v6  ;;  %v1175_v13 = vld [vmem:[%s1537_s1 + $0x18] sm:$0xff]   ;;  %v1179_v17 = vld [vmem:[%s1537_s1 + $0x20] sm:$0xff]   ;;  %v1183_v21 = vld [vmem:[%s1537_s1 + $0x28] sm:$0xff]   ;;  %v1249_v6 = vmov 0.0  }
   0x7   :  { %1045 = vmatpush3.bf16.msra.mxu0 %v1167_v5  ;;  %v1176_v14 = vld [vmem:[%s1537_s1 + $0xd8] sm:$0xff]   ;;  %v1180_v18 = vld [vmem:[%s1537_s1 + $0xe0] sm:$0xff]   ;;  %v1184_v22 = vld [vmem:[%s1537_s1 + $0xe8] sm:$0xff]  }
   0x8   :  { %1046 = vmatprep.subr.bf16.mxu0 %v1170_v8  ;;  %v1177_v15 = vld [vmem:[%s1537_s1 + $0x98] sm:$0xff]   ;;  %v1181_v19 = vld [vmem:[%s1537_s1 + $0xa0] sm:$0xff]   ;;  %v1185_v23 = vld [vmem:[%s1537_s1 + $0xa8] sm:$0xff]  }
   0x9   :  { %1067 = vmatpush3.bf16.msra.mxu1 %v1169_v7  ;;  %v1186_v24 = vld [vmem:[%s1537_s1 + $0x70] sm:$0xff]   ;;  %v1190_v28 = vld [vmem:[%s1537_s1 + $0x78] sm:$0xff]   ;;  %v1193_v31 = vld [vmem:[%s1538_s0] ss:$36 sps:$4 sm:$0xff]  }
   0xa   :  { %1068 = vmatprep.subr.bf16.mxu1 %v1172_v10  ;;  %v1187_v25 = vld [vmem:[%s1537_s1 + $0x30] sm:$0xff]   ;;  %v1191_v29 = vld [vmem:[%s1537_s1 + $0x38] sm:$0xff]   ;;  %v1195_v32 = vld [vmem:[%s1538_s0 + $0x4] ss:$36 sps:$4 sm:$0xff]  }
   0xb   :  { %1047 = vmatpush3.bf16.msra.mxu0 %v1171_v9  ;;  %v1188_v26 = vld [vmem:[%s1537_s1 + $0xf0] sm:$0xff]   ;;  %v1192_v30 = vld [vmem:[%s1537_s1 + $0xf8] sm:$0xff]   ;;  %692 = vmatprep.mubr.bf16.mxu0 %v1195_v32  ;;  %v1197_v34 = vld [vmem:[%s1537_s1 + $0x140] sm:$0xff]  }
   0xc   :  { %1048 = vmatprep.subr.bf16.mxu0 %v1174_v12  ;;  %v1189_v27 = vld [vmem:[%s1537_s1 + $0xb0] sm:$0xff]   ;;  %v1196_v33 = vld [vmem:[%s1537_s1 + $0xb8] sm:$0xff]   ;;  %v1198_v35 = vld [vmem:[%s1538_s0 + $0x8] ss:$36 sps:$4 sm:$0xff]  }
   0xd   :  { %1069 = vmatpush3.bf16.msra.mxu1 %v1173_v11  ;;  %v1200_v36 = vld [vmem:[%s1538_s0 + $0xc] ss:$36 sps:$4 sm:$0xff]   ;;  %v1201_v37 = vld [vmem:[%s1537_s1 + $0x100] sm:$0xff]   ;;  %v1212_v48 = vld [vmem:[%s1537_s1 + $0x158] sm:$0xff]  }
   0xe   :  { %1070 = vmatprep.subr.bf16.mxu1 %v1176_v14  ;;  %733 = vmatprep.mubr.bf16.mxu1 %v1200_v36  ;;  %v1202_v38 = vld [vmem:[%s1537_s1 + $0x1c0] sm:$0xff]   ;;  %v1204_v40 = vld [vmem:[%s1537_s1 + $0x148] sm:$0xff]   ;;  %v1208_v44 = vld [vmem:[%s1537_s1 + $0x150] sm:$0xff]  }
   0xf   :  { %1049 = vmatpush3.bf16.msra.mxu0 %v1175_v13  ;;  %v1203_v39 = vld [vmem:[%s1537_s1 + $0x180] sm:$0xff]   ;;  %v1205_v41 = vld [vmem:[%s1537_s1 + $0x108] sm:$0xff]   ;;  %v1209_v45 = vld [vmem:[%s1537_s1 + $0x110] sm:$0xff]  }
  0x10   :  { %1050 = vmatprep.subr.bf16.mxu0 %v1178_v16  ;;  %v1206_v42 = vld [vmem:[%s1537_s1 + $0x1c8] sm:$0xff]   ;;  %v1210_v46 = vld [vmem:[%s1537_s1 + $0x1d0] sm:$0xff]   ;;  %v1213_v49 = vld [vmem:[%s1537_s1 + $0x118] sm:$0xff]  }
  0x11   :  { %1071 = vmatpush3.bf16.msra.mxu1 %v1177_v15  ;;  %v1207_v43 = vld [vmem:[%s1537_s1 + $0x188] sm:$0xff]   ;;  %v1211_v47 = vld [vmem:[%s1537_s1 + $0x190] sm:$0xff]   ;;  %v1214_v50 = vld [vmem:[%s1537_s1 + $0x1d8] sm:$0xff]  }
  0x12   :  { %1072 = vmatprep.subr.bf16.mxu1 %v1180_v18  ;;  %v1215_v51 = vld [vmem:[%s1537_s1 + $0x198] sm:$0xff]   ;;  %v1216_v52 = vld [vmem:[%s1537_s1 + $0x160] sm:$0xff]   ;;  %v1220_v56 = vld [vmem:[%s1537_s1 + $0x168] sm:$0xff]  }
  0x13   :  { %1051 = vmatpush3.bf16.msra.mxu0 %v1179_v17  ;;  %v1217_v53 = vld [vmem:[%s1537_s1 + $0x120] sm:$0xff]   ;;  %v1221_v57 = vld [vmem:[%s1537_s1 + $0x128] sm:$0xff]   ;;  %v1224_v60 = vld [vmem:[%s1537_s1 + $0x170] sm:$0xff]  }
  0x14   :  { %1052 = vmatprep.subr.bf16.mxu0 %v1182_v20  ;;  %v1218_v54 = vld [vmem:[%s1537_s1 + $0x1e0] sm:$0xff]   ;;  %v1222_v58 = vld [vmem:[%s1537_s1 + $0x1e8] sm:$0xff]   ;;  %v1225_v61 = vld [vmem:[%s1537_s1 + $0x130] sm:$0xff]  }
  0x15   :  { %1073 = vmatpush3.bf16.msra.mxu1 %v1181_v19  ;;  %v1219_v55 = vld [vmem:[%s1537_s1 + $0x1a0] sm:$0xff]   ;;  %v1223_v59 = vld [vmem:[%s1537_s1 + $0x1a8] sm:$0xff]   ;;  %v1226_v62 = vld [vmem:[%s1537_s1 + $0x1f0] sm:$0xff]  }
  0x16   :  { %1074 = vmatprep.subr.bf16.mxu1 %v1184_v22  ;;  %v1227_v63 = vld [vmem:[%s1537_s1 + $0x1b0] sm:$0xff]   ;;  %v1228_v0 = vld [vmem:[%s1537_s1 + $0x178] sm:$0xff]   ;;  %v1238_v9 = vld [vmem:[%s1537_s1 + $0x200] sm:$0xff]  }
  0x17   :  { %1053 = vmatpush3.bf16.msra.mxu0 %v1183_v21  ;;  %v1229_v1 = vld [vmem:[%s1537_s1 + $0x138] sm:$0xff]   ;;  %v1231_v3 = vld [vmem:[%s1538_s0 + $0x10] ss:$36 sps:$4 sm:$0xff]   ;;  %v1239_v10 = vld [vmem:[%s1537_s1 + $0x208] sm:$0xff]  }
  0x18   :  { %1054 = vmatprep.subr.bf16.mxu0 %v1186_v24  ;;  %v1230_v2 = vld [vmem:[%s1537_s1 + $0x1f8] sm:$0xff]   ;;  %v1240_v11 = vld [vmem:[%s1537_s1 + $0x210] sm:$0xff]   ;;  %v1242_v13 = vld [vmem:[%s1537_s1 + $0x220] sm:$0xff]  }
  0x19   :  { %1075 = vmatpush3.bf16.msra.mxu1 %v1185_v23  ;;  %v1233_v4 = vld [vmem:[%s1538_s0 + $0x14] ss:$36 sps:$4 sm:$0xff]   ;;  %v1237_v8 = vld [vmem:[%s1538_s0 + $0x1c] ss:$36 sps:$4 sm:$0xff]   ;;  %v1243_v14 = vld [vmem:[%s1537_s1 + $0x228] sm:$0xff]  }
  0x1a   :  { %1076 = vmatprep.subr.bf16.mxu1 %v1188_v26  ;;  %v1234_v5 = vld [vmem:[%s1537_s1 + $0x1b8] sm:$0xff]   ;;  %v1244_v15 = vld [vmem:[%s1537_s1 + $0x230] sm:$0xff]   ;;  %v1246_v17 = vld [vmem:[%s1538_s0 + $0x20] ss:$36 sps:$4 sm:$0xff]  }
  0x1b   :  { %1055 = vmatpush3.bf16.msra.mxu0 %v1187_v25  ;;  %v1235_v7 = vld [vmem:[%s1538_s0 + $0x18] ss:$36 sps:$4 sm:$0xff]   ;;  %v951_v19 = vld [vmem:[%s1539_s2] ss:$0 sm:$0xff]  ;;  %s1251_s0 = smov 64  }
  0x1c   :  { %1056 = vmatprep.subr.bf16.mxu0 %v1190_v28  ;;  %v1241_v12 = vld [vmem:[%s1537_s1 + $0x218] sm:$0xff]  }
  0x1d   :  { %1077 = vmatpush3.bf16.msra.mxu1 %v1189_v27  ;;  %v1245_v16 = vld [vmem:[%s1537_s1 + $0x238] sm:$0xff]  }
  0x1e   :  { %1078 = vmatprep.subr.bf16.mxu1 %v1192_v30 }
  0x1f   :  { %1057 = vmatpush3.bf16.msra.mxu0 %v1191_v29 }
  0x20   :  { %1086 = vmatprep.subr.bf16.mxu0 %v1197_v34 }
  0x21   :  { %1079 = vmatpush3.bf16.msra.mxu1 %v1196_v33 }
  0x22   :  { %693 = vmatmul.mubr.bf16.vlgmr.msra.gmra.mrb[0].mxu0 %v1193_v31  ;;  %1108 = vmatprep.subr.bf16.mxu1 %v1202_v38 }
  0x23   :  { %1087 = vmatpush3.bf16.msra.mxu0 %v1201_v37  ;;  %774 = vmatprep.mubr.bf16.mxu0 %v1233_v4 }
  0x24   :  { %734 = vmatmul.mubr.bf16.vlgmr.msra.gmra.mrb[0].mxu1 %v1198_v35  ;;  %1088 = vmatprep.subr.bf16.mxu0 %v1204_v40 }
  0x25   :  { %1109 = vmatpush3.bf16.msra.mxu1 %v1203_v39  ;;  %815 = vmatprep.mubr.bf16.mxu1 %v1237_v8 }
  0x26   :  { %1110 = vmatprep.subr.bf16.mxu1 %v1206_v42 }
  0x27   :  { %1089 = vmatpush3.bf16.msra.mxu0 %v1205_v41 }
  0x28   :  { %1090 = vmatprep.subr.bf16.mxu0 %v1208_v44 }
  0x29   :  { %1111 = vmatpush3.bf16.msra.mxu1 %v1207_v43 }
  0x2a   :  { %1112 = vmatprep.subr.bf16.mxu1 %v1210_v46 }
  0x2b   :  { %1091 = vmatpush3.bf16.msra.mxu0 %v1209_v45 }
  0x2c   :  { %1092 = vmatprep.subr.bf16.mxu0 %v1212_v48 }
  0x2d   :  { %1113 = vmatpush3.bf16.msra.mxu1 %v1211_v47 }
  0x2e   :  { %1114 = vmatprep.subr.bf16.mxu1 %v1214_v50 }
  0x2f   :  { %1093 = vmatpush3.bf16.msra.mxu0 %v1213_v49 }
  0x30   :  { %1094 = vmatprep.subr.bf16.mxu0 %v1216_v52 }
  0x31   :  { %1115 = vmatpush3.bf16.msra.mxu1 %v1215_v51 }
  0x32   :  { %1116 = vmatprep.subr.bf16.mxu1 %v1218_v54 }
  0x33   :  { %1095 = vmatpush3.bf16.msra.mxu0 %v1217_v53 }
  0x34   :  { %1096 = vmatprep.subr.bf16.mxu0 %v1220_v56 }
  0x35   :  { %1117 = vmatpush3.bf16.msra.mxu1 %v1219_v55 }
  0x36   :  { %1118 = vmatprep.subr.bf16.mxu1 %v1222_v58 }
  0x37   :  { %1097 = vmatpush3.bf16.msra.mxu0 %v1221_v57 }
  0x38   :  { %1098 = vmatprep.subr.bf16.mxu0 %v1224_v60 }
  0x39   :  { %1119 = vmatpush3.bf16.msra.mxu1 %v1223_v59 }
  0x3a   :  { %1120 = vmatprep.subr.bf16.mxu1 %v1226_v62 }
  0x3b   :  { %1099 = vmatpush3.bf16.msra.mxu0 %v1225_v61 }
  0x3c   :  { %1100 = vmatprep.subr.bf16.mxu0 %v1228_v0 }
  0x3d   :  { %1121 = vmatpush3.bf16.msra.mxu1 %v1227_v63 }
  0x3e   :  { %1122 = vmatprep.subr.bf16.mxu1 %v1230_v2 }
  0x3f   :  { %1101 = vmatpush3.bf16.msra.mxu0 %v1229_v1 }
  0x40   :  { %1139 = vmatprep.subr.bf16.mxu0 %v1249_v6 }
  0x41   :  { %1123 = vmatpush3.bf16.msra.mxu1 %v1234_v5 }
  0x42   :  { %775 = vmatmul.mubr.bf16.vlgmr.msra.gmra.mrb[4].mxu0 %v1231_v3 }
  0x43   :  { %1155 = vmatprep.mubr.msk.bf16.mxu0 %vm1250_vm0, %v1249_v6  ;;  %1140 = vmatpush3.bf16.msra.mxu0 %v1238_v9 }
  0x44   :  { %816 = vmatmul.mubr.bf16.vlgmr.msra.gmra.mrb[4].mxu1 %v1235_v7  ;;  %1141 = vmatprep.subr.bf16.mxu0 %v1249_v6 }
  0x47   :  { %1142 = vmatpush3.bf16.msra.mxu0 %v1239_v10 }
  0x48   :  { %1143 = vmatprep.subr.bf16.mxu0 %v1249_v6 }
  0x4b   :  { %1144 = vmatpush3.bf16.msra.mxu0 %v1240_v11 }
  0x4c   :  { %1145 = vmatprep.subr.bf16.mxu0 %v1249_v6 }
  0x4f   :  { %1146 = vmatpush3.bf16.msra.mxu0 %v1241_v12 }
  0x50   :  { %1147 = vmatprep.subr.bf16.mxu0 %v1249_v6 }
  0x53   :  { %1148 = vmatpush3.bf16.msra.mxu0 %v1242_v13 }
  0x54   :  { %1149 = vmatprep.subr.bf16.mxu0 %v1249_v6 }
  0x57   :  { %1150 = vmatpush3.bf16.msra.mxu0 %v1243_v14 }
  0x58   :  { %1151 = vmatprep.subr.bf16.mxu0 %v1249_v6 }
  0x5b   :  { %1152 = vmatpush3.bf16.msra.mxu0 %v1244_v15 }
  0x5c   :  { %1153 = vmatprep.subr.bf16.mxu0 %v1249_v6 }
  0x5f   :  { %1154 = vmatpush3.bf16.msra.mxu0 %v1245_v16 }
  0x62   :  { %1156 = vmatmul.mubr.bf16.vlgmr.msra.gmra.mrb[8].mxu0 %v1246_v17 }
  0xf5   :  { %v1058_v18 = vpop.f32.mrb[0].mxu0 }
  0xf6   :  { %v1059_v20 = vpop.f32.mrb[1].mxu0 }
  0xf7   :  { %v1060_v21 = vadd.f32 %v1059_v20, %v1058_v18  ;;  %v1061_v22 = vpop.f32.mrb[2].mxu0  ;;  %v1080_v23 = vpop.f32.mrb[0].mxu1 }
  0xf8   :  { %v1062_v24 = vpop.f32.mrb[3].mxu0  ;;  %v1081_v27 = vpop.f32.mrb[1].mxu1 }
  0xf9   :  { %v695_v25 = vadd.f32 %v1060_v21, %v951_v19  ;;  %v1063_v26 = vadd.f32 %v1062_v24, %v1061_v22  ;;  %v1082_v28 = vadd.f32 %v1081_v27, %v1080_v23  ;;  %v1083_v29 = vpop.f32.mrb[2].mxu1  ;;  %v897_v21 = vld [vmem:[%s1540_s3] sm:$0x1] }
  0xfa   :  { %v1084_v31 = vpop.f32.mrb[3].mxu1 }
  0xfb   :  { %v698_v30 = vadd.f32 %v1063_v26, %v951_v19  ;;  %v736_v32 = vadd.f32 %v1082_v28, %v695_v25  ;;  %v1085_v33 = vadd.f32 %v1084_v31, %v1083_v29  ;;  %v905_v19 = vlaneseq  ;;  %v901_v25 = vld [vmem:[%s1541_s4] sm:$0x1] }
  0xfd   :  { %v739_v34 = vadd.f32 %v1085_v33, %v698_v30  ;;  %v906_v20 = vshrl.u32 %v905_v19, 7 }
  0xff   :  { %v907_v22 = vsub.s32 0, %v906_v20 }
 0x115   :  { %v1102_v35 = vpop.f32.mrb[4].mxu0 }
 0x116   :  { %v1103_v36 = vpop.f32.mrb[5].mxu0 }
 0x117   :  { %v1104_v37 = vadd.f32 %v1103_v36, %v1102_v35  ;;  %v1105_v38 = vpop.f32.mrb[6].mxu0  ;;  %v1124_v39 = vpop.f32.mrb[4].mxu1 }
 0x118   :  { %v1106_v40 = vpop.f32.mrb[7].mxu0  ;;  %v1125_v43 = vpop.f32.mrb[5].mxu1 }
 0x119   :  { %v777_v41 = vadd.f32 %v1104_v37, %v736_v32  ;;  %v1107_v42 = vadd.f32 %v1106_v40, %v1105_v38  ;;  %v1126_v44 = vadd.f32 %v1125_v43, %v1124_v39  ;;  %v1127_v45 = vpop.f32.mrb[6].mxu1 }
 0x11a   :  { %v1128_v47 = vpop.f32.mrb[7].mxu1 }
 0x11b   :  { %v780_v46 = vadd.f32 %v1107_v42, %v739_v34  ;;  %v1129_v48 = vadd.f32 %v1128_v47, %v1127_v45  ;;  %v818_v49 = vadd.f32 %v1126_v44, %v777_v41 }
 0x11d   :  { %v821_v50 = vadd.f32 %v1129_v48, %v780_v46 }
 0x135   :  { %v858_v51 = vpop.f32.mrb[8].mxu0 }
 0x136   :  { %v859_v52 = vadd.f32 %v858_v51, %v818_v49  ;;  %v1157_v53 = vpop.f32.mrb[9].mxu0 }
 0x137   :  { %v861_v54 = vpop.f32.mrb[10].mxu0 }
 0x138   :  { %v862_v55 = vadd.f32 %v861_v54, %v821_v50  ;;  %v1158_v56 = vpop.f32.mrb[11].mxu0  ;;  %v872_v57 = vmul.f32 %v859_v52, %v859_v52 }
 0x13a   :  { %v865_v58 = vadd.f32 %v862_v55, %v859_v52  ;;  %v873_v59 = vmul.f32 %v862_v55, %v862_v55 }
 0x13c   :  { %v866_v60 = vrot.slane %v865_v58, 4  ;;  %v874_v61 = vadd.f32 %v873_v59, %v872_v57 }
 0x13e   :  { %v875_v62 = vrot.slane %v874_v61, 4  ;;  %v867_v63 = vadd.f32 %v866_v60, %v865_v58 }
 0x140   :  { %v868_v0 = vrot.slane %v867_v63, 2  ;;  %v876_v1 = vadd.f32 %v875_v62, %v874_v61 }
 0x142   :  { %v869_v2 = vadd.f32 %v868_v0, %v867_v63  ;;  %v877_v3 = vrot.slane %v876_v1, 2 }
 0x144   :  { %v870_v4 = vrot.slane %v869_v2, 1  ;;  %v878_v5 = vadd.f32 %v877_v3, %v876_v1 }
 0x146   :  { %v871_v6 = vadd.f32 %v870_v4, %v869_v2  ;;  %v879_v7 = vrot.slane %v878_v5, 1 }
 0x148   :  { %882 = vrot.lane.b32.xlu0 %v871_v6, %s1251_s0  ;;  %v880_v8 = vadd.f32 %v879_v7, %v878_v5 }
 0x14c   :  { %887 = vrot.lane.b32.xlu0 %v880_v8, %s1251_s0 }
 0x1ba   :  { %v883_v9 = vpop.permute.xlu0 %882 }
 0x1bb   :  { %v885_v10 = vadd.f32 %v883_v9, %v871_v6 }
 0x1bd   :  { %v892_v11 = vmul.f32 0.03125, %v885_v10 }
 0x1be   :  { %v888_v12 = vpop.permute.xlu0 %887 }
 0x1bf   :  { %v890_v13 = vadd.f32 %v888_v12, %v880_v8  ;;  %v894_v14 = vmul.f32 %v892_v11, %v892_v11 }
 0x1c1   :  { %v893_v15 = vmul.f32 0.03125, %v890_v13 }
 0x1c3   :  { %v895_v16 = vsub.f32 %v893_v15, %v894_v14 }
 0x1c5   :  { %v896_v17 = vmax.f32 %v895_v16, 0.0 }
 0x1c7   :  { %v898_v18 = vadd.f32 1e-05, %v896_v17 }
 0x1c9   :  { %1247 = vrsqrt.f32 %v898_v18 }
 0x1d3   :  { %v1248_v23 = vpop.eup %1247 }
 0x1d4   :  { %v900_v24 = vmul.f32 %v1248_v23, %v897_v21 }
 0x1d6   :  { %v908_v26 = vrot.slane %v900_v24, %v907_v22  ;;  %v902_v27 = vmul.f32 %v900_v24, %v892_v11 }
 0x1d8   :  { %909 = vrot.lane.b32.xlu1 %v908_v26, %s1251_s0  ;;  %v903_v28 = vsub.f32 %v901_v25, %v902_v27 }
 0x1da   :  { %v918_v29 = vrot.slane %v903_v28, %v907_v22 }
 0x1dc   :  { %919 = vrot.lane.b32.xlu1 %v918_v29, %s1251_s0 }
 0x24a   :  { %v910_v30 = vpop.permute.xlu1 %909 }
 0x24b   :  { %v913_v31 = vsel %vm912_vm1, %v900_v24, %v910_v30 }
 0x24c   :  { %v926_v32 = vrot.slane %v913_v31, %v907_v22 }
 0x24e   :  { %v920_v33 = vpop.permute.xlu1 %919  ;;  %v927_v35 = vmul.f32 %v926_v32, %v859_v52  ;;  %v928_v36 = vmul.f32 %v926_v32, %v862_v55 }
 0x24f   :  { %v922_v34 = vsel %vm912_vm1, %v903_v28, %v920_v33 }
 0x250   :  { %v932_v37 = vrot.slane %v922_v34, %v907_v22 }
 0x252   :  { %v933_v38 = vadd.f32 %v932_v37, %v927_v35  ;;  %v934_v39 = vadd.f32 %v932_v37, %v928_v36 }
 0x254   :  { %v935_v40 = vmax.f32 %v933_v38, 0.0  ;;  %v936_v41 = vmax.f32 %v934_v39, 0.0 }
 0x256   :  { %v1040_v42 = vpack.c.bf16 %v936_v41, %v935_v40 }
 0x258   :  { %1041 = vst [vmem:[%s1542_s5] sm:$0xff] %v1040_v42  }

// kernel: unet_generator_forward.16
= control target key start
LH: loop header
LB: loop body
LE: loop exit
PB: predicated region body
PF: predicated region fallthrough
CT: control target
= control target key end

     0   :  { %vm1261_vm0 = vmmov 0   ;;  %vm915_vm1 = vcmask 523264   ;;  %s1556_s1 = inlined_call_operand.vmem [shape: bf16[1152,128], index: 1, kind: input, shape index: {}]   ;;  %s1557_s0 = inlined_call_operand.vmem [shape: bf16[16,1152], index: 0, kind: input, shape index: {}]   ;;  %s1558_s2 = inlined_call_operand.vmem [shape: f32[1,128], index: 2, kind: input, shape index: {}]   ;;  %s1559_s3 = inlined_call_operand.vmem [shape: f32[1,64], index: 3, kind: input, shape index: {}]   ;;  %s1560_s4 = inlined_call_operand.vmem [shape: f32[1,64], index: 4, kind: input, shape index: {}]   ;;  %s1561_s5 = inlined_call_operand.vmem [shape: bf16[16,128], index: 5, kind: input, shape index: {}]   ;;  %s1562_s6 = inlined_call_operand.vmem [shape: bf16[16,128], index: 6, kind: output, shape index: {}]  }
   0x1   :  { %v1173_v0 = vld [vmem:[%s1556_s1 + $0x40] sm:$0xff]   ;;  %v1177_v4 = vld [vmem:[%s1556_s1 + $0x48] sm:$0xff]   ;;  %v1181_v8 = vld [vmem:[%s1556_s1 + $0x50] sm:$0xff]  }
   0x2   :  { %v1174_v1 = vld [vmem:[%s1556_s1] sm:$0xff]   ;;  %1053 = vmatprep.subr.bf16.mxu0 %v1173_v0  ;;  %v1178_v5 = vld [vmem:[%s1556_s1 + $0x8] sm:$0xff]   ;;  %v1182_v9 = vld [vmem:[%s1556_s1 + $0x10] sm:$0xff]  }
   0x3   :  { %v1175_v2 = vld [vmem:[%s1556_s1 + $0xc0] sm:$0xff]   ;;  %1054 = vmatpush3.bf16.msra.mxu0 %v1174_v1  ;;  %v1179_v6 = vld [vmem:[%s1556_s1 + $0xc8] sm:$0xff]   ;;  %v1183_v10 = vld [vmem:[%s1556_s1 + $0xd0] sm:$0xff]  }
   0x4   :  { %v1176_v3 = vld [vmem:[%s1556_s1 + $0x80] sm:$0xff]   ;;  %1075 = vmatprep.subr.bf16.mxu1 %v1175_v2  ;;  %1055 = vmatprep.subr.bf16.mxu0 %v1177_v4  ;;  %v1180_v7 = vld [vmem:[%s1556_s1 + $0x88] sm:$0xff]   ;;  %v1184_v11 = vld [vmem:[%s1556_s1 + $0x90] sm:$0xff]  }
   0x5   :  { %1076 = vmatpush3.bf16.msra.mxu1 %v1176_v3  ;;  %v1185_v12 = vld [vmem:[%s1556_s1 + $0x58] sm:$0xff]   ;;  %v1189_v16 = vld [vmem:[%s1556_s1 + $0x60] sm:$0xff]   ;;  %v1193_v20 = vld [vmem:[%s1556_s1 + $0x68] sm:$0xff]  }
   0x6   :  { %1077 = vmatprep.subr.bf16.mxu1 %v1179_v6  ;;  %v1186_v13 = vld [vmem:[%s1556_s1 + $0x18] sm:$0xff]   ;;  %v1190_v17 = vld [vmem:[%s1556_s1 + $0x20] sm:$0xff]   ;;  %v1194_v21 = vld [vmem:[%s1556_s1 + $0x28] sm:$0xff]   ;;  %v1260_v6 = vmov 0.0  }
   0x7   :  { %1056 = vmatpush3.bf16.msra.mxu0 %v1178_v5  ;;  %v1187_v14 = vld [vmem:[%s1556_s1 + $0xd8] sm:$0xff]   ;;  %v1191_v18 = vld [vmem:[%s1556_s1 + $0xe0] sm:$0xff]   ;;  %v1195_v22 = vld [vmem:[%s1556_s1 + $0xe8] sm:$0xff]  }
   0x8   :  { %1057 = vmatprep.subr.bf16.mxu0 %v1181_v8  ;;  %v1188_v15 = vld [vmem:[%s1556_s1 + $0x98] sm:$0xff]   ;;  %v1192_v19 = vld [vmem:[%s1556_s1 + $0xa0] sm:$0xff]   ;;  %v1196_v23 = vld [vmem:[%s1556_s1 + $0xa8] sm:$0xff]  }
   0x9   :  { %1078 = vmatpush3.bf16.msra.mxu1 %v1180_v7  ;;  %v1197_v24 = vld [vmem:[%s1556_s1 + $0x70] sm:$0xff]   ;;  %v1201_v28 = vld [vmem:[%s1556_s1 + $0x78] sm:$0xff]   ;;  %v1204_v31 = vld [vmem:[%s1557_s0] ss:$36 sps:$4 sm:$0xff]  }
   0xa   :  { %1079 = vmatprep.subr.bf16.mxu1 %v1183_v10  ;;  %v1198_v25 = vld [vmem:[%s1556_s1 + $0x30] sm:$0xff]   ;;  %v1202_v29 = vld [vmem:[%s1556_s1 + $0x38] sm:$0xff]   ;;  %v1206_v32 = vld [vmem:[%s1557_s0 + $0x4] ss:$36 sps:$4 sm:$0xff]  }
   0xb   :  { %1058 = vmatpush3.bf16.msra.mxu0 %v1182_v9  ;;  %v1199_v26 = vld [vmem:[%s1556_s1 + $0xf0] sm:$0xff]   ;;  %v1203_v30 = vld [vmem:[%s1556_s1 + $0xf8] sm:$0xff]   ;;  %695 = vmatprep.mubr.bf16.mxu0 %v1206_v32  ;;  %v1208_v34 = vld [vmem:[%s1556_s1 + $0x140] sm:$0xff]  }
   0xc   :  { %1059 = vmatprep.subr.bf16.mxu0 %v1185_v12  ;;  %v1200_v27 = vld [vmem:[%s1556_s1 + $0xb0] sm:$0xff]   ;;  %v1207_v33 = vld [vmem:[%s1556_s1 + $0xb8] sm:$0xff]   ;;  %v1209_v35 = vld [vmem:[%s1557_s0 + $0x8] ss:$36 sps:$4 sm:$0xff]  }
   0xd   :  { %1080 = vmatpush3.bf16.msra.mxu1 %v1184_v11  ;;  %v1211_v36 = vld [vmem:[%s1557_s0 + $0xc] ss:$36 sps:$4 sm:$0xff]   ;;  %v1212_v37 = vld [vmem:[%s1556_s1 + $0x100] sm:$0xff]   ;;  %v1223_v48 = vld [vmem:[%s1556_s1 + $0x158] sm:$0xff]  }
   0xe   :  { %1081 = vmatprep.subr.bf16.mxu1 %v1187_v14  ;;  %736 = vmatprep.mubr.bf16.mxu1 %v1211_v36  ;;  %v1213_v38 = vld [vmem:[%s1556_s1 + $0x1c0] sm:$0xff]   ;;  %v1215_v40 = vld [vmem:[%s1556_s1 + $0x148] sm:$0xff]   ;;  %v1219_v44 = vld [vmem:[%s1556_s1 + $0x150] sm:$0xff]  }
   0xf   :  { %1060 = vmatpush3.bf16.msra.mxu0 %v1186_v13  ;;  %v1214_v39 = vld [vmem:[%s1556_s1 + $0x180] sm:$0xff]   ;;  %v1216_v41 = vld [vmem:[%s1556_s1 + $0x108] sm:$0xff]   ;;  %v1220_v45 = vld [vmem:[%s1556_s1 + $0x110] sm:$0xff]  }
  0x10   :  { %1061 = vmatprep.subr.bf16.mxu0 %v1189_v16  ;;  %v1217_v42 = vld [vmem:[%s1556_s1 + $0x1c8] sm:$0xff]   ;;  %v1221_v46 = vld [vmem:[%s1556_s1 + $0x1d0] sm:$0xff]   ;;  %v1224_v49 = vld [vmem:[%s1556_s1 + $0x118] sm:$0xff]  }
  0x11   :  { %1082 = vmatpush3.bf16.msra.mxu1 %v1188_v15  ;;  %v1218_v43 = vld [vmem:[%s1556_s1 + $0x188] sm:$0xff]   ;;  %v1222_v47 = vld [vmem:[%s1556_s1 + $0x190] sm:$0xff]   ;;  %v1225_v50 = vld [vmem:[%s1556_s1 + $0x1d8] sm:$0xff]  }
  0x12   :  { %1083 = vmatprep.subr.bf16.mxu1 %v1191_v18  ;;  %v1226_v51 = vld [vmem:[%s1556_s1 + $0x198] sm:$0xff]   ;;  %v1227_v52 = vld [vmem:[%s1556_s1 + $0x160] sm:$0xff]   ;;  %v1231_v56 = vld [vmem:[%s1556_s1 + $0x168] sm:$0xff]  }
  0x13   :  { %1062 = vmatpush3.bf16.msra.mxu0 %v1190_v17  ;;  %v1228_v53 = vld [vmem:[%s1556_s1 + $0x120] sm:$0xff]   ;;  %v1232_v57 = vld [vmem:[%s1556_s1 + $0x128] sm:$0xff]   ;;  %v1235_v60 = vld [vmem:[%s1556_s1 + $0x170] sm:$0xff]  }
  0x14   :  { %1063 = vmatprep.subr.bf16.mxu0 %v1193_v20  ;;  %v1229_v54 = vld [vmem:[%s1556_s1 + $0x1e0] sm:$0xff]   ;;  %v1233_v58 = vld [vmem:[%s1556_s1 + $0x1e8] sm:$0xff]   ;;  %v1236_v61 = vld [vmem:[%s1556_s1 + $0x130] sm:$0xff]  }
  0x15   :  { %1084 = vmatpush3.bf16.msra.mxu1 %v1192_v19  ;;  %v1230_v55 = vld [vmem:[%s1556_s1 + $0x1a0] sm:$0xff]   ;;  %v1234_v59 = vld [vmem:[%s1556_s1 + $0x1a8] sm:$0xff]   ;;  %v1237_v62 = vld [vmem:[%s1556_s1 + $0x1f0] sm:$0xff]  }
  0x16   :  { %1085 = vmatprep.subr.bf16.mxu1 %v1195_v22  ;;  %v1238_v63 = vld [vmem:[%s1556_s1 + $0x1b0] sm:$0xff]   ;;  %v1239_v0 = vld [vmem:[%s1556_s1 + $0x178] sm:$0xff]   ;;  %v1249_v9 = vld [vmem:[%s1556_s1 + $0x200] sm:$0xff]  }
  0x17   :  { %1064 = vmatpush3.bf16.msra.mxu0 %v1194_v21  ;;  %v1240_v1 = vld [vmem:[%s1556_s1 + $0x138] sm:$0xff]   ;;  %v1242_v3 = vld [vmem:[%s1557_s0 + $0x10] ss:$36 sps:$4 sm:$0xff]   ;;  %v1250_v10 = vld [vmem:[%s1556_s1 + $0x208] sm:$0xff]  }
  0x18   :  { %1065 = vmatprep.subr.bf16.mxu0 %v1197_v24  ;;  %v1241_v2 = vld [vmem:[%s1556_s1 + $0x1f8] sm:$0xff]   ;;  %v1251_v11 = vld [vmem:[%s1556_s1 + $0x210] sm:$0xff]   ;;  %v1253_v13 = vld [vmem:[%s1556_s1 + $0x220] sm:$0xff]  }
  0x19   :  { %1086 = vmatpush3.bf16.msra.mxu1 %v1196_v23  ;;  %v1244_v4 = vld [vmem:[%s1557_s0 + $0x14] ss:$36 sps:$4 sm:$0xff]   ;;  %v1248_v8 = vld [vmem:[%s1557_s0 + $0x1c] ss:$36 sps:$4 sm:$0xff]   ;;  %v1254_v14 = vld [vmem:[%s1556_s1 + $0x228] sm:$0xff]  }
  0x1a   :  { %1087 = vmatprep.subr.bf16.mxu1 %v1199_v26  ;;  %v1245_v5 = vld [vmem:[%s1556_s1 + $0x1b8] sm:$0xff]   ;;  %v1255_v15 = vld [vmem:[%s1556_s1 + $0x230] sm:$0xff]   ;;  %v1257_v17 = vld [vmem:[%s1557_s0 + $0x20] ss:$36 sps:$4 sm:$0xff]  }
  0x1b   :  { %1066 = vmatpush3.bf16.msra.mxu0 %v1198_v25  ;;  %v1246_v7 = vld [vmem:[%s1557_s0 + $0x18] ss:$36 sps:$4 sm:$0xff]   ;;  %v958_v19 = vld [vmem:[%s1558_s2] ss:$0 sm:$0xff]  ;;  %s1262_s0 = smov 64  }
  0x1c   :  { %1067 = vmatprep.subr.bf16.mxu0 %v1201_v28  ;;  %v1252_v12 = vld [vmem:[%s1556_s1 + $0x218] sm:$0xff]  }
  0x1d   :  { %1088 = vmatpush3.bf16.msra.mxu1 %v1200_v27  ;;  %v1256_v16 = vld [vmem:[%s1556_s1 + $0x238] sm:$0xff]  }
  0x1e   :  { %1089 = vmatprep.subr.bf16.mxu1 %v1203_v30 }
  0x1f   :  { %1068 = vmatpush3.bf16.msra.mxu0 %v1202_v29 }
  0x20   :  { %1097 = vmatprep.subr.bf16.mxu0 %v1208_v34 }
  0x21   :  { %1090 = vmatpush3.bf16.msra.mxu1 %v1207_v33 }
  0x22   :  { %696 = vmatmul.mubr.bf16.vlgmr.msra.gmra.mrb[0].mxu0 %v1204_v31  ;;  %1119 = vmatprep.subr.bf16.mxu1 %v1213_v38 }
  0x23   :  { %1098 = vmatpush3.bf16.msra.mxu0 %v1212_v37  ;;  %777 = vmatprep.mubr.bf16.mxu0 %v1244_v4 }
  0x24   :  { %737 = vmatmul.mubr.bf16.vlgmr.msra.gmra.mrb[0].mxu1 %v1209_v35  ;;  %1099 = vmatprep.subr.bf16.mxu0 %v1215_v40 }
  0x25   :  { %1120 = vmatpush3.bf16.msra.mxu1 %v1214_v39  ;;  %818 = vmatprep.mubr.bf16.mxu1 %v1248_v8 }
  0x26   :  { %1121 = vmatprep.subr.bf16.mxu1 %v1217_v42 }
  0x27   :  { %1100 = vmatpush3.bf16.msra.mxu0 %v1216_v41 }
  0x28   :  { %1101 = vmatprep.subr.bf16.mxu0 %v1219_v44 }
  0x29   :  { %1122 = vmatpush3.bf16.msra.mxu1 %v1218_v43 }
  0x2a   :  { %1123 = vmatprep.subr.bf16.mxu1 %v1221_v46 }
  0x2b   :  { %1102 = vmatpush3.bf16.msra.mxu0 %v1220_v45 }
  0x2c   :  { %1103 = vmatprep.subr.bf16.mxu0 %v1223_v48 }
  0x2d   :  { %1124 = vmatpush3.bf16.msra.mxu1 %v1222_v47 }
  0x2e   :  { %1125 = vmatprep.subr.bf16.mxu1 %v1225_v50 }
  0x2f   :  { %1104 = vmatpush3.bf16.msra.mxu0 %v1224_v49 }
  0x30   :  { %1105 = vmatprep.subr.bf16.mxu0 %v1227_v52 }
  0x31   :  { %1126 = vmatpush3.bf16.msra.mxu1 %v1226_v51 }
  0x32   :  { %1127 = vmatprep.subr.bf16.mxu1 %v1229_v54 }
  0x33   :  { %1106 = vmatpush3.bf16.msra.mxu0 %v1228_v53 }
  0x34   :  { %1107 = vmatprep.subr.bf16.mxu0 %v1231_v56 }
  0x35   :  { %1128 = vmatpush3.bf16.msra.mxu1 %v1230_v55 }
  0x36   :  { %1129 = vmatprep.subr.bf16.mxu1 %v1233_v58 }
  0x37   :  { %1108 = vmatpush3.bf16.msra.mxu0 %v1232_v57 }
  0x38   :  { %1109 = vmatprep.subr.bf16.mxu0 %v1235_v60 }
  0x39   :  { %1130 = vmatpush3.bf16.msra.mxu1 %v1234_v59 }
  0x3a   :  { %1131 = vmatprep.subr.bf16.mxu1 %v1237_v62 }
  0x3b   :  { %1110 = vmatpush3.bf16.msra.mxu0 %v1236_v61 }
  0x3c   :  { %1111 = vmatprep.subr.bf16.mxu0 %v1239_v0 }
  0x3d   :  { %1132 = vmatpush3.bf16.msra.mxu1 %v1238_v63 }
  0x3e   :  { %1133 = vmatprep.subr.bf16.mxu1 %v1241_v2 }
  0x3f   :  { %1112 = vmatpush3.bf16.msra.mxu0 %v1240_v1 }
  0x40   :  { %1150 = vmatprep.subr.bf16.mxu0 %v1260_v6 }
  0x41   :  { %1134 = vmatpush3.bf16.msra.mxu1 %v1245_v5 }
  0x42   :  { %778 = vmatmul.mubr.bf16.vlgmr.msra.gmra.mrb[4].mxu0 %v1242_v3 }
  0x43   :  { %1166 = vmatprep.mubr.msk.bf16.mxu0 %vm1261_vm0, %v1260_v6  ;;  %1151 = vmatpush3.bf16.msra.mxu0 %v1249_v9 }
  0x44   :  { %819 = vmatmul.mubr.bf16.vlgmr.msra.gmra.mrb[4].mxu1 %v1246_v7  ;;  %1152 = vmatprep.subr.bf16.mxu0 %v1260_v6 }
  0x47   :  { %1153 = vmatpush3.bf16.msra.mxu0 %v1250_v10 }
  0x48   :  { %1154 = vmatprep.subr.bf16.mxu0 %v1260_v6 }
  0x4b   :  { %1155 = vmatpush3.bf16.msra.mxu0 %v1251_v11 }
  0x4c   :  { %1156 = vmatprep.subr.bf16.mxu0 %v1260_v6 }
  0x4f   :  { %1157 = vmatpush3.bf16.msra.mxu0 %v1252_v12 }
  0x50   :  { %1158 = vmatprep.subr.bf16.mxu0 %v1260_v6 }
  0x53   :  { %1159 = vmatpush3.bf16.msra.mxu0 %v1253_v13 }
  0x54   :  { %1160 = vmatprep.subr.bf16.mxu0 %v1260_v6 }
  0x57   :  { %1161 = vmatpush3.bf16.msra.mxu0 %v1254_v14 }
  0x58   :  { %1162 = vmatprep.subr.bf16.mxu0 %v1260_v6 }
  0x5b   :  { %1163 = vmatpush3.bf16.msra.mxu0 %v1255_v15 }
  0x5c   :  { %1164 = vmatprep.subr.bf16.mxu0 %v1260_v6 }
  0x5f   :  { %1165 = vmatpush3.bf16.msra.mxu0 %v1256_v16 }
  0x62   :  { %1167 = vmatmul.mubr.bf16.vlgmr.msra.gmra.mrb[8].mxu0 %v1257_v17 }
  0xf5   :  { %v1069_v18 = vpop.f32.mrb[0].mxu0 }
  0xf6   :  { %v1070_v20 = vpop.f32.mrb[1].mxu0 }
  0xf7   :  { %v1071_v21 = vadd.f32 %v1070_v20, %v1069_v18  ;;  %v1072_v22 = vpop.f32.mrb[2].mxu0  ;;  %v1091_v23 = vpop.f32.mrb[0].mxu1 }
  0xf8   :  { %v1073_v24 = vpop.f32.mrb[3].mxu0  ;;  %v1092_v27 = vpop.f32.mrb[1].mxu1 }
  0xf9   :  { %v698_v25 = vadd.f32 %v1071_v21, %v958_v19  ;;  %v1074_v26 = vadd.f32 %v1073_v24, %v1072_v22  ;;  %v1093_v28 = vadd.f32 %v1092_v27, %v1091_v23  ;;  %v1094_v29 = vpop.f32.mrb[2].mxu1  ;;  %v900_v21 = vld [vmem:[%s1559_s3] sm:$0x1] }
  0xfa   :  { %v1095_v31 = vpop.f32.mrb[3].mxu1 }
  0xfb   :  { %v701_v30 = vadd.f32 %v1074_v26, %v958_v19  ;;  %v739_v32 = vadd.f32 %v1093_v28, %v698_v25  ;;  %v1096_v33 = vadd.f32 %v1095_v31, %v1094_v29  ;;  %v908_v19 = vlaneseq  ;;  %v904_v25 = vld [vmem:[%s1560_s4] sm:$0x1] }
  0xfd   :  { %v742_v34 = vadd.f32 %v1096_v33, %v701_v30  ;;  %v909_v20 = vshrl.u32 %v908_v19, 7  ;;  %v1045_v33 = vld [vmem:[%s1561_s5] sm:$0xff]  }
  0xff   :  { %v910_v22 = vsub.s32 0, %v909_v20 }
 0x115   :  { %v1113_v35 = vpop.f32.mrb[4].mxu0 }
 0x116   :  { %v1114_v36 = vpop.f32.mrb[5].mxu0 }
 0x117   :  { %v1115_v37 = vadd.f32 %v1114_v36, %v1113_v35  ;;  %v1116_v38 = vpop.f32.mrb[6].mxu0  ;;  %v1135_v39 = vpop.f32.mrb[4].mxu1  ;;  %v1046_v35 = vunpack.c.l.bf16 %v1045_v33 }
 0x118   :  { %v1117_v40 = vpop.f32.mrb[7].mxu0  ;;  %v1136_v43 = vpop.f32.mrb[5].mxu1 }
 0x119   :  { %v780_v41 = vadd.f32 %v1115_v37, %v739_v32  ;;  %v1118_v42 = vadd.f32 %v1117_v40, %v1116_v38  ;;  %v1137_v44 = vadd.f32 %v1136_v43, %v1135_v39  ;;  %v1138_v45 = vpop.f32.mrb[6].mxu1  ;;  %v1047_v39 = vunpack.c.h.bf16 %v1045_v33 }
 0x11a   :  { %v1139_v47 = vpop.f32.mrb[7].mxu1 }
 0x11b   :  { %v783_v46 = vadd.f32 %v1118_v42, %v742_v34  ;;  %v1140_v48 = vadd.f32 %v1139_v47, %v1138_v45  ;;  %v821_v49 = vadd.f32 %v1137_v44, %v780_v41 }
 0x11d   :  { %v824_v50 = vadd.f32 %v1140_v48, %v783_v46 }
 0x135   :  { %v861_v51 = vpop.f32.mrb[8].mxu0 }
 0x136   :  { %v862_v52 = vadd.f32 %v861_v51, %v821_v49  ;;  %v1168_v53 = vpop.f32.mrb[9].mxu0 }
 0x137   :  { %v864_v54 = vpop.f32.mrb[10].mxu0 }
 0x138   :  { %v865_v55 = vadd.f32 %v864_v54, %v824_v50  ;;  %v1169_v56 = vpop.f32.mrb[11].mxu0  ;;  %v875_v57 = vmul.f32 %v862_v52, %v862_v52 }
 0x13a   :  { %v868_v58 = vadd.f32 %v865_v55, %v862_v52  ;;  %v876_v59 = vmul.f32 %v865_v55, %v865_v55 }
 0x13c   :  { %v869_v60 = vrot.slane %v868_v58, 4  ;;  %v877_v61 = vadd.f32 %v876_v59, %v875_v57 }
 0x13e   :  { %v878_v62 = vrot.slane %v877_v61, 4  ;;  %v870_v63 = vadd.f32 %v869_v60, %v868_v58 }
 0x140   :  { %v871_v0 = vrot.slane %v870_v63, 2  ;;  %v879_v1 = vadd.f32 %v878_v62, %v877_v61 }
 0x142   :  { %v872_v2 = vadd.f32 %v871_v0, %v870_v63  ;;  %v880_v3 = vrot.slane %v879_v1, 2 }
 0x144   :  { %v873_v4 = vrot.slane %v872_v2, 1  ;;  %v881_v5 = vadd.f32 %v880_v3, %v879_v1 }
 0x146   :  { %v874_v6 = vadd.f32 %v873_v4, %v872_v2  ;;  %v882_v7 = vrot.slane %v881_v5, 1 }
 0x148   :  { %885 = vrot.lane.b32.xlu0 %v874_v6, %s1262_s0  ;;  %v883_v8 = vadd.f32 %v882_v7, %v881_v5 }
 0x14c   :  { %890 = vrot.lane.b32.xlu0 %v883_v8, %s1262_s0 }
 0x1ba   :  { %v886_v9 = vpop.permute.xlu0 %885 }
 0x1bb   :  { %v888_v10 = vadd.f32 %v886_v9, %v874_v6 }
 0x1bd   :  { %v895_v11 = vmul.f32 0.03125, %v888_v10 }
 0x1be   :  { %v891_v12 = vpop.permute.xlu0 %890 }
 0x1bf   :  { %v893_v13 = vadd.f32 %v891_v12, %v883_v8  ;;  %v897_v14 = vmul.f32 %v895_v11, %v895_v11 }
 0x1c1   :  { %v896_v15 = vmul.f32 0.03125, %v893_v13 }
 0x1c3   :  { %v898_v16 = vsub.f32 %v896_v15, %v897_v14 }
 0x1c5   :  { %v899_v17 = vmax.f32 %v898_v16, 0.0 }
 0x1c7   :  { %v901_v18 = vadd.f32 1e-05, %v899_v17 }
 0x1c9   :  { %1258 = vrsqrt.f32 %v901_v18 }
 0x1d3   :  { %v1259_v23 = vpop.eup %1258 }
 0x1d4   :  { %v903_v24 = vmul.f32 %v1259_v23, %v900_v21 }
 0x1d6   :  { %v911_v26 = vrot.slane %v903_v24, %v910_v22  ;;  %v905_v27 = vmul.f32 %v903_v24, %v895_v11 }
 0x1d8   :  { %912 = vrot.lane.b32.xlu1 %v911_v26, %s1262_s0  ;;  %v906_v28 = vsub.f32 %v904_v25, %v905_v27 }
 0x1da   :  { %v921_v29 = vrot.slane %v906_v28, %v910_v22 }
 0x1dc   :  { %922 = vrot.lane.b32.xlu1 %v921_v29, %s1262_s0 }
 0x24a   :  { %v913_v30 = vpop.permute.xlu1 %912 }
 0x24b   :  { %v916_v31 = vsel %vm915_vm1, %v903_v24, %v913_v30 }
 0x24c   :  { %v929_v32 = vrot.slane %v916_v31, %v910_v22 }
 0x24e   :  { %v923_v34 = vpop.permute.xlu1 %922  ;;  %v930_v37 = vmul.f32 %v929_v32, %v862_v52  ;;  %v931_v38 = vmul.f32 %v929_v32, %v865_v55 }
 0x24f   :  { %v925_v36 = vsel %vm915_vm1, %v906_v28, %v923_v34 }
 0x250   :  { %v935_v40 = vrot.slane %v925_v36, %v910_v22 }
 0x252   :  { %v936_v41 = vadd.f32 %v935_v40, %v930_v37  ;;  %v937_v42 = vadd.f32 %v935_v40, %v931_v38 }
 0x254   :  { %v942_v43 = vadd.f32 %v1046_v35, %v936_v41  ;;  %v943_v44 = vadd.f32 %v1047_v39, %v937_v42 }
 0x256   :  { %v1051_v45 = vpack.c.bf16 %v943_v44, %v942_v43 }
 0x258   :  { %1052 = vst [vmem:[%s1562_s6] sm:$0xff] %v1051_v45  }

// kernel: unet_generator_forward.21
= control target key start
LH: loop header
LB: loop body
LE: loop exit
PB: predicated region body
PF: predicated region fallthrough
CT: control target
= control target key end

     0   :  { %vm304_vm0 = vcmask 261120   ;;  %vm306_vm1 = vcmask 523264   ;;  %vm308_vm2 = vcmask 785408   ;;  %s626_s1 = inlined_call_operand.vmem [shape: bf16[256,128], index: 1, kind: input, shape index: {}]   ;;  %s627_s0 = inlined_call_operand.vmem [shape: bf16[32,256], index: 0, kind: input, shape index: {}]   ;;  %s628_s2 = inlined_call_operand.vmem [shape: f32[1,128], index: 2, kind: input, shape index: {}]   ;;  %s629_s3 = inlined_call_operand.vmem [shape: f32[1,32], index: 3, kind: input, shape index: {}]   ;;  %s630_s4 = inlined_call_operand.vmem [shape: f32[1,32], index: 4, kind: input, shape index: {}]   ;;  %s631_s5 = inlined_call_operand.vmem [shape: bf16[32,128], index: 5, kind: output, shape index: {}]  }
   0x1   :  { %v458_v0 = vld [vmem:[%s626_s1 + $0x40] sm:$0xff]   ;;  %v460_v2 = vld [vmem:[%s626_s1 + $0x48] sm:$0xff]   ;;  %v462_v4 = vld [vmem:[%s626_s1 + $0x50] sm:$0xff]  }
   0x2   :  { %v459_v1 = vld [vmem:[%s626_s1] sm:$0xff]   ;;  %411 = vmatprep.subr.bf16.mxu0 %v458_v0  ;;  %439 = vmatprep.subr.bf16.mxu1 %v458_v0  ;;  %v461_v3 = vld [vmem:[%s626_s1 + $0x8] sm:$0xff]   ;;  %v463_v5 = vld [vmem:[%s626_s1 + $0x10] sm:$0xff]  }
   0x3   :  { %412 = vmatpush3.bf16.msra.mxu0 %v459_v1  ;;  %447 = vmatpush3.bf16.msra.mxu1 %v459_v1  ;;  %v464_v6 = vld [vmem:[%s626_s1 + $0x58] sm:$0xff]   ;;  %v466_v8 = vld [vmem:[%s626_s1 + $0x60] sm:$0xff]   ;;  %v468_v10 = vld [vmem:[%s626_s1 + $0x68] sm:$0xff]  }
   0x4   :  { %413 = vmatprep.subr.bf16.mxu0 %v460_v2  ;;  %440 = vmatprep.subr.bf16.mxu1 %v460_v2  ;;  %v465_v7 = vld [vmem:[%s626_s1 + $0x18] sm:$0xff]   ;;  %v467_v9 = vld [vmem:[%s626_s1 + $0x20] sm:$0xff]   ;;  %v469_v13 = vld [vmem:[%s626_s1 + $0x28] sm:$0xff]  }
   0x5   :  { %v476_v11 = vld [vmem:[%s627_s0 + $0x4] ss:$8 sps:$4 sm:$0xff]   ;;  %v479_v12 = vld [vmem:[%s627_s0 + $0x14] ss:$8 sps:$4 sm:$0xff]   ;;  %v474_v18 = vld [vmem:[%s627_s0] ss:$8 sps:$4 sm:$0xff]  }
   0x6   :  { %v470_v14 = vld [vmem:[%s626_s1 + $0x70] sm:$0xff]   ;;  %212 = vmatprep.mubr.bf16.mxu0 %v476_v11  ;;  %220 = vmatprep.mubr.bf16.mxu1 %v479_v12  ;;  %v472_v16 = vld [vmem:[%s626_s1 + $0x78] sm:$0xff]   ;;  %v371_v22 = vld [vmem:[%s628_s2] ss:$0 sm:$0xff]  ;;  %s484_s2 = smov 32  }
   0x7   :  { %414 = vmatpush3.bf16.msra.mxu0 %v461_v3  ;;  %448 = vmatpush3.bf16.msra.mxu1 %v461_v3  ;;  %v471_v15 = vld [vmem:[%s626_s1 + $0x30] sm:$0xff]   ;;  %v473_v17 = vld [vmem:[%s626_s1 + $0x38] sm:$0xff]   ;;  %s483_s1 = smov 96  }
   0x8   :  { %415 = vmatprep.subr.bf16.mxu0 %v462_v4  ;;  %441 = vmatprep.subr.bf16.mxu1 %v462_v4  ;;  %v477_v19 = vld [vmem:[%s627_s0 + $0x10] ss:$8 sps:$4 sm:$0xff]   ;;  %s482_s0 = smov 64  }
   0xb   :  { %416 = vmatpush3.bf16.msra.mxu0 %v463_v5  ;;  %449 = vmatpush3.bf16.msra.mxu1 %v463_v5 }
   0xc   :  { %417 = vmatprep.subr.bf16.mxu0 %v464_v6  ;;  %442 = vmatprep.subr.bf16.mxu1 %v464_v6 }
   0xf   :  { %418 = vmatpush3.bf16.msra.mxu0 %v465_v7  ;;  %450 = vmatpush3.bf16.msra.mxu1 %v465_v7 }
  0x10   :  { %419 = vmatprep.subr.bf16.mxu0 %v466_v8  ;;  %443 = vmatprep.subr.bf16.mxu1 %v466_v8 }
  0x13   :  { %420 = vmatpush3.bf16.msra.mxu0 %v467_v9  ;;  %451 = vmatpush3.bf16.msra.mxu1 %v467_v9 }
  0x14   :  { %421 = vmatprep.subr.bf16.mxu0 %v468_v10  ;;  %444 = vmatprep.subr.bf16.mxu1 %v468_v10 }
  0x17   :  { %422 = vmatpush3.bf16.msra.mxu0 %v469_v13  ;;  %452 = vmatpush3.bf16.msra.mxu1 %v469_v13  ;;  %v291_v13 = vlaneseq }
  0x18   :  { %423 = vmatprep.subr.bf16.mxu0 %v470_v14  ;;  %445 = vmatprep.subr.bf16.mxu1 %v470_v14 }
  0x19   :  { %v292_v14 = vshrl.u32 %v291_v13, 7 }
  0x1b   :  { %424 = vmatpush3.bf16.msra.mxu0 %v471_v15  ;;  %453 = vmatpush3.bf16.msra.mxu1 %v471_v15  ;;  %v283_v15 = vld [vmem:[%s629_s3] sm:$0x1] }
  0x1c   :  { %425 = vmatprep.subr.bf16.mxu0 %v472_v16  ;;  %446 = vmatprep.subr.bf16.mxu1 %v472_v16  ;;  %v293_v16 = vsub.s32 0, %v292_v14 }
  0x1f   :  { %426 = vmatpush3.bf16.msra.mxu0 %v473_v17  ;;  %454 = vmatpush3.bf16.msra.mxu1 %v473_v17 }
  0x22   :  { %213 = vmatmul.mubr.bf16.vlgmr.msra.gmra.mrb[0].mxu0 %v474_v18  ;;  %221 = vmatmul.mubr.bf16.vlgmr.msra.gmra.mrb[0].mxu1 %v477_v19  ;;  %v287_v19 = vld [vmem:[%s630_s4] sm:$0x1] }
  0xf5   :  { %v427_v20 = vpop.f32.mrb[0].mxu0  ;;  %v433_v21 = vpop.f32.mrb[0].mxu1 }
  0xf6   :  { %v428_v23 = vpop.f32.mrb[1].mxu0  ;;  %v434_v24 = vpop.f32.mrb[1].mxu1 }
  0xf7   :  { %v429_v25 = vadd.f32 %v428_v23, %v427_v20  ;;  %v430_v26 = vpop.f32.mrb[2].mxu0  ;;  %v435_v27 = vadd.f32 %v434_v24, %v433_v21  ;;  %v436_v28 = vpop.f32.mrb[2].mxu1 }
  0xf8   :  { %v431_v29 = vpop.f32.mrb[3].mxu0  ;;  %v437_v30 = vpop.f32.mrb[3].mxu1 }
  0xf9   :  { %v578_v31 = vadd.f32 %v429_v25, %v371_v22  ;;  %v580_v32 = vadd.f32 %v435_v27, %v371_v22  ;;  %v432_v33 = vadd.f32 %v431_v29, %v430_v26  ;;  %v438_v34 = vadd.f32 %v437_v30, %v436_v28 }
  0xfb   :  { %v582_v35 = vadd.f32 %v432_v33, %v371_v22  ;;  %v238_v36 = vmul.f32 %v578_v31, %v578_v31  ;;  %v240_v37 = vmul.f32 %v580_v32, %v580_v32  ;;  %v592_v40 = vadd.f32 %v438_v34, %v371_v22 }
  0xfd   :  { %v229_v38 = vadd.f32 %v582_v35, %v578_v31  ;;  %v239_v39 = vmul.f32 %v582_v35, %v582_v35  ;;  %v241_v44 = vmul.f32 %v592_v40, %v592_v40 }
  0xff   :  { %v242_v41 = vadd.f32 %v239_v39, %v238_v36  ;;  %v230_v42 = vadd.f32 %v229_v38, %v580_v32 }
 0x101   :  { %v231_v43 = vadd.f32 %v230_v42, %v592_v40  ;;  %v243_v45 = vadd.f32 %v242_v41, %v240_v37 }
 0x103   :  { %v232_v46 = vrot.slane %v231_v43, 4  ;;  %v244_v47 = vadd.f32 %v243_v45, %v241_v44 }
 0x105   :  { %v233_v48 = vadd.f32 %v232_v46, %v231_v43  ;;  %v245_v49 = vrot.slane %v244_v47, 4 }
 0x107   :  { %v234_v50 = vrot.slane %v233_v48, 2  ;;  %v246_v51 = vadd.f32 %v245_v49, %v244_v47 }
 0x109   :  { %v235_v52 = vadd.f32 %v234_v50, %v233_v48  ;;  %v247_v53 = vrot.slane %v246_v51, 2 }
 0x10b   :  { %v236_v54 = vrot.slane %v235_v52, 1  ;;  %v248_v55 = vadd.f32 %v247_v53, %v246_v51 }
 0x10d   :  { %v237_v56 = vadd.f32 %v236_v54, %v235_v52  ;;  %v249_v57 = vrot.slane %v248_v55, 1 }
 0x10f   :  { %261 = vrot.lane.b32.xlu1 %v237_v56, %s482_s0  ;;  %252 = vrot.lane.b32.xlu0 %v237_v56, %s483_s1  ;;  %v250_v58 = vadd.f32 %v249_v57, %v248_v55 }
 0x113   :  { %265 = vrot.lane.b32.xlu1 %v250_v58, %s482_s0  ;;  %257 = vrot.lane.b32.xlu0 %v250_v58, %s483_s1 }
 0x117   :  { %273 = vrot.lane.b32.xlu1 %v250_v58, %s484_s2  ;;  %269 = vrot.lane.b32.xlu0 %v237_v56, %s484_s2 }
 0x181   :  { %v262_v59 = vpop.permute.xlu1 %261  ;;  %v253_v60 = vpop.permute.xlu0 %252 }
 0x182   :  { %v255_v61 = vadd.f32 %v253_v60, %v237_v56 }
 0x184   :  { %v264_v2 = vadd.f32 %v262_v59, %v255_v61 }
 0x185   :  { %v266_v62 = vpop.permute.xlu1 %265  ;;  %v258_v63 = vpop.permute.xlu0 %257 }
 0x186   :  { %v260_v0 = vadd.f32 %v258_v63, %v250_v58 }
 0x188   :  { %v268_v1 = vadd.f32 %v266_v62, %v260_v0 }
 0x189   :  { %v274_v3 = vpop.permute.xlu1 %273  ;;  %v270_v4 = vpop.permute.xlu0 %269 }
 0x18a   :  { %v276_v5 = vadd.f32 %v274_v3, %v268_v1  ;;  %v272_v6 = vadd.f32 %v270_v4, %v264_v2 }
 0x18c   :  { %v278_v7 = vmul.f32 0.0078125, %v272_v6  ;;  %v279_v8 = vmul.f32 0.0078125, %v276_v5 }
 0x18e   :  { %v280_v9 = vmul.f32 %v278_v7, %v278_v7 }
 0x190   :  { %v281_v10 = vsub.f32 %v279_v8, %v280_v9 }
 0x192   :  { %v282_v11 = vmax.f32 %v281_v10, 0.0 }
 0x194   :  { %v284_v12 = vadd.f32 1e-05, %v282_v11 }
 0x196   :  { %480 = vrsqrt.f32 %v284_v12 }
 0x1a0   :  { %v481_v17 = vpop.eup %480 }
 0x1a1   :  { %v286_v18 = vmul.f32 %v481_v17, %v283_v15 }
 0x1a3   :  { %v288_v20 = vmul.f32 %v286_v18, %v278_v7  ;;  %v294_v21 = vrot.slane %v286_v18, %v293_v16 }
 0x1a5   :  { %v289_v22 = vsub.f32 %v287_v19, %v288_v20  ;;  %298 = vrot.lane.b32.xlu1 %v294_v21, %s482_s0  ;;  %295 = vrot.lane.b32.xlu0 %v294_v21, %s484_s2 }
 0x1a7   :  { %v314_v23 = vrot.slane %v289_v22, %v293_v16 }
 0x1a9   :  { %301 = vrot.lane.b32.xlu0 %v294_v21, %s483_s1  ;;  %315 = vrot.lane.b32.xlu1 %v314_v23, %s484_s2 }
 0x1ad   :  { %318 = vrot.lane.b32.xlu0 %v314_v23, %s482_s0  ;;  %321 = vrot.lane.b32.xlu1 %v314_v23, %s483_s1 }
 0x217   :  { %v299_v24 = vpop.permute.xlu1 %298  ;;  %v296_v25 = vpop.permute.xlu0 %295 }
 0x218   :  { %v305_v26 = vsel %vm304_vm0, %v286_v18, %v296_v25 }
 0x219   :  { %v307_v27 = vsel %vm306_vm1, %v305_v26, %v299_v24 }
 0x21b   :  { %v302_v28 = vpop.permute.xlu0 %301  ;;  %v316_v29 = vpop.permute.xlu1 %315 }
 0x21c   :  { %v309_v30 = vsel %vm308_vm2, %v307_v27, %v302_v28  ;;  %v324_v34 = vsel %vm304_vm0, %v289_v22, %v316_v29 }
 0x21d   :  { %v330_v33 = vrot.slane %v309_v30, %v293_v16 }
 0x21f   :  { %v319_v36 = vpop.permute.xlu0 %318  ;;  %v322_v37 = vpop.permute.xlu1 %321  ;;  %v331_v39 = vmul.f32 %v330_v33, %v578_v31  ;;  %v332_v42 = vmul.f32 %v330_v33, %v582_v35  ;;  %v333_v43 = vmul.f32 %v330_v33, %v580_v32  ;;  %v334_v44 = vmul.f32 %v330_v33, %v592_v40 }
 0x220   :  { %v325_v38 = vsel %vm306_vm1, %v324_v34, %v319_v36 }
 0x221   :  { %v326_v41 = vsel %vm308_vm2, %v325_v38, %v322_v37 }
 0x222   :  { %v338_v45 = vrot.slane %v326_v41, %v293_v16 }
 0x224   :  { %v339_v46 = vadd.f32 %v338_v45, %v331_v39  ;;  %v340_v47 = vadd.f32 %v338_v45, %v332_v42  ;;  %v341_v48 = vadd.f32 %v338_v45, %v333_v43  ;;  %v342_v49 = vadd.f32 %v338_v45, %v334_v44 }
 0x226   :  { %v343_v50 = vmax.f32 %v339_v46, 0.0  ;;  %v344_v51 = vmax.f32 %v340_v47, 0.0  ;;  %v345_v52 = vmax.f32 %v341_v48, 0.0  ;;  %v346_v53 = vmax.f32 %v342_v49, 0.0 }
 0x228   :  { %v403_v54 = vpack.c.bf16 %v344_v51, %v343_v50  ;;  %v408_v55 = vpack.c.bf16 %v346_v53, %v345_v52 }
 0x22a   :  { %404 = vst [vmem:[%s631_s5] sm:$0xff] %v403_v54   ;;  %410 = vst [vmem:[%s631_s5 + $0x8] sm:$0xff] %v408_v55  }

// kernel: tile.112
= control target key start
LH: loop header
LB: loop body
LE: loop exit
PB: predicated region body
PF: predicated region fallthrough
CT: control target
= control target key end

     0   :  { %s22_s0 = inlined_call_operand.vmem [shape: f32[16], index: 0, kind: input, shape index: {}]   ;;  %s23_s1 = inlined_call_operand.vmem [shape: f32[4,16], index: 1, kind: output, shape index: {}]  }
   0x1   :  { %v4_v0 = vld [vmem:[%s22_s0] ss:$0 sm:$0xff] }
   0x2   :  { %5 = vst [vmem:[%s23_s1] sm:$0xf] %v4_v0 }

// kernel: tile.115
= control target key start
LH: loop header
LB: loop body
LE: loop exit
PB: predicated region body
PF: predicated region fallthrough
CT: control target
= control target key end

     0   :  { %vm7_vm0 = vcmask 130048   ;;  %s37_s8 = smov 16   ;;  %s38_s9 = smov 32   ;;  %vm13_vm1 = vcmask 523648   ;;  %vm19_vm2 = vcmask 392448   ;;  %vm25_vm3 = vcmask 261248   ;;  %s55_s0 = inlined_call_operand.vmem [shape: f32[4,16], index: 0, kind: input, shape index: {}]   ;;  %s56_s1 = inlined_call_operand.vmem [shape: f32[64], index: 1, kind: output, shape index: {}]  }
   0x1   :  { %v4_v0 = vld [vmem:[%s55_s0] sm:$0xf]  ;;  %s36_s0 = smov 48  }
   0x2   :  { %5 = vst [vmem:[#allocation1] sm:$0xf] %v4_v0 }
   0x9   :  { %v10_v1 = vld [vmem:[#allocation1 + $0x3] sm:$0x1]   ;;  %v22_v2 = vld [vmem:[#allocation1 + $0x1] sm:$0x1]   ;;  %v6_v3 = vld [vmem:[#allocation1] sm:$0x1]  }
   0xa   :  { %11 = vrot.lane.b32.xlu0 %v10_v1, %s36_s0  ;;  %23 = vrot.lane.b32.xlu1 %v22_v2, %s37_s8  ;;  %v16_v4 = vld [vmem:[#allocation1 + $0x2] sm:$0x1]   ;;  %8 = vst.msk [vmem:[#allocation0] sm:$0x1] %vm7_vm0, %v6_v3  }
   0xe   :  { %17 = vrot.lane.b32.xlu0 %v16_v4, %s38_s9 }
  0x7c   :  { %v12_v5 = vpop.permute.xlu0 %11   ;;  %v24_v6 = vpop.permute.xlu1 %23  }
  0x7d   :  { %14 = vst.msk [vmem:[#allocation0] sm:$0x1] %vm13_vm1, %v12_v5  }
  0x80   :  { %v18_v7 = vpop.permute.xlu0 %17  }
  0x81   :  { %20 = vst.msk [vmem:[#allocation0] sm:$0x1] %vm19_vm2, %v18_v7  }
  0x82   :  { %26 = vst.msk [vmem:[#allocation0] sm:$0x1] %vm25_vm3, %v24_v6  }
  0x89   :  { %v30_v8 = vld [vmem:[#allocation0] sm:$0x1] }
  0x8a   :  { %32 = vst [vmem:[%s56_s1] sm:$0x1] %v30_v8 }

// kernel: unet_generator_forward.22
= control target key start
LH: loop header
LB: loop body
LE: loop exit
PB: predicated region body
PF: predicated region fallthrough
CT: control target
= control target key end

     0   :  { %s682_s17 = smov 80   ;;  %s683_s18 = smov 64   ;;  %vm400_vm0 = vcmask 130048   ;;  %vm402_vm1 = vcmask 261120   ;;  %vm404_vm2 = vcmask 392192   ;;  %vm406_vm3 = vcmask 523264   ;;  %s900_s1 = inlined_call_operand.vmem [shape: bf16[256,128], index: 1, kind: input, shape index: {}]   ;;  %s901_s0 = inlined_call_operand.vmem [shape: bf16[64,256], index: 0, kind: input, shape index: {}]   ;;  %s902_s2 = inlined_call_operand.vmem [shape: f32[1,128], index: 2, kind: input, shape index: {}]   ;;  %s903_s3 = inlined_call_operand.vmem [shape: f32[1,16], index: 3, kind: input, shape index: {}]   ;;  %s904_s4 = inlined_call_operand.vmem [shape: f32[1,16], index: 4, kind: input, shape index: {}]   ;;  %s905_s5 = inlined_call_operand.vmem [shape: bf16[64,128], index: 5, kind: output, shape index: {}]  }
   0x1   :  { %v650_v0 = vld [vmem:[%s900_s1 + $0x40] sm:$0xff]   ;;  %v652_v2 = vld [vmem:[%s900_s1 + $0x48] sm:$0xff]   ;;  %v654_v4 = vld [vmem:[%s900_s1 + $0x50] sm:$0xff]   ;;  %s684_s19 = smov 48   ;;  %s685_s20 = smov 32   ;;  %vm408_vm4 = vcmask 654336  }
   0x2   :  { %v651_v1 = vld [vmem:[%s900_s1] sm:$0xff]   ;;  %587 = vmatprep.subr.bf16.mxu0 %v650_v0  ;;  %627 = vmatprep.subr.bf16.mxu1 %v650_v0  ;;  %v653_v3 = vld [vmem:[%s900_s1 + $0x8] sm:$0xff]   ;;  %v655_v5 = vld [vmem:[%s900_s1 + $0x10] sm:$0xff]   ;;  %s686_s21 = smov 16   ;;  %vm410_vm5 = vcmask 785408   ;;  %vm412_vm6 = vcmask 916480  }
   0x3   :  { %588 = vmatpush3.bf16.msra.mxu0 %v651_v1  ;;  %635 = vmatpush3.bf16.msra.mxu1 %v651_v1  ;;  %v656_v6 = vld [vmem:[%s900_s1 + $0x58] sm:$0xff]   ;;  %v658_v8 = vld [vmem:[%s900_s1 + $0x60] sm:$0xff]   ;;  %v660_v10 = vld [vmem:[%s900_s1 + $0x68] sm:$0xff]  }
   0x4   :  { %589 = vmatprep.subr.bf16.mxu0 %v652_v2  ;;  %628 = vmatprep.subr.bf16.mxu1 %v652_v2  ;;  %v657_v7 = vld [vmem:[%s900_s1 + $0x18] sm:$0xff]   ;;  %v659_v9 = vld [vmem:[%s900_s1 + $0x20] sm:$0xff]   ;;  %v661_v13 = vld [vmem:[%s900_s1 + $0x28] sm:$0xff]  }
   0x5   :  { %v668_v11 = vld [vmem:[%s901_s0 + $0x4] ss:$8 sps:$4 sm:$0xff]   ;;  %v662_v14 = vld [vmem:[%s900_s1 + $0x70] sm:$0xff]   ;;  %v664_v16 = vld [vmem:[%s900_s1 + $0x78] sm:$0xff]  }
   0x6   :  { %v671_v12 = vld [vmem:[%s901_s0 + $0x24] ss:$8 sps:$4 sm:$0xff]   ;;  %236 = vmatprep.mubr.bf16.mxu0 %v668_v11  ;;  %v663_v15 = vld [vmem:[%s900_s1 + $0x30] sm:$0xff]   ;;  %v665_v17 = vld [vmem:[%s900_s1 + $0x38] sm:$0xff]  }
   0x7   :  { %590 = vmatpush3.bf16.msra.mxu0 %v653_v3  ;;  %636 = vmatpush3.bf16.msra.mxu1 %v653_v3  ;;  %v666_v18 = vld [vmem:[%s901_s0] ss:$8 sps:$4 sm:$0xff]   ;;  %v672_v20 = vld [vmem:[%s901_s0 + $0x14] ss:$8 sps:$4 sm:$0xff]   ;;  %v674_v22 = vld [vmem:[%s901_s0 + $0x10] ss:$8 sps:$4 sm:$0xff]  }
   0x8   :  { %591 = vmatprep.subr.bf16.mxu0 %v654_v4  ;;  %629 = vmatprep.subr.bf16.mxu1 %v654_v4  ;;  %v669_v19 = vld [vmem:[%s901_s0 + $0x20] ss:$8 sps:$4 sm:$0xff]   ;;  %v675_v21 = vld [vmem:[%s901_s0 + $0x34] ss:$8 sps:$4 sm:$0xff]   ;;  %v677_v23 = vld [vmem:[%s901_s0 + $0x30] ss:$8 sps:$4 sm:$0xff]  }
   0x9   :  { %252 = vmatprep.mubr.bf16.mxu1 %v671_v12  ;;  %v523_v34 = vld [vmem:[%s902_s2] ss:$0 sm:$0xff]  ;;  %s680_s0 = smov 96   ;;  %s681_s2 = smov 112  }
   0xb   :  { %592 = vmatpush3.bf16.msra.mxu0 %v655_v5  ;;  %637 = vmatpush3.bf16.msra.mxu1 %v655_v5 }
   0xc   :  { %593 = vmatprep.subr.bf16.mxu0 %v656_v6  ;;  %630 = vmatprep.subr.bf16.mxu1 %v656_v6 }
   0xf   :  { %594 = vmatpush3.bf16.msra.mxu0 %v657_v7  ;;  %638 = vmatpush3.bf16.msra.mxu1 %v657_v7 }
  0x10   :  { %595 = vmatprep.subr.bf16.mxu0 %v658_v8  ;;  %631 = vmatprep.subr.bf16.mxu1 %v658_v8 }
  0x13   :  { %596 = vmatpush3.bf16.msra.mxu0 %v659_v9  ;;  %639 = vmatpush3.bf16.msra.mxu1 %v659_v9 }
  0x14   :  { %597 = vmatprep.subr.bf16.mxu0 %v660_v10  ;;  %632 = vmatprep.subr.bf16.mxu1 %v660_v10 }
  0x17   :  { %598 = vmatpush3.bf16.msra.mxu0 %v661_v13  ;;  %640 = vmatpush3.bf16.msra.mxu1 %v661_v13 }
  0x18   :  { %599 = vmatprep.subr.bf16.mxu0 %v662_v14  ;;  %633 = vmatprep.subr.bf16.mxu1 %v662_v14 }
  0x1b   :  { %600 = vmatpush3.bf16.msra.mxu0 %v663_v15  ;;  %641 = vmatpush3.bf16.msra.mxu1 %v663_v15 }
  0x1c   :  { %601 = vmatprep.subr.bf16.mxu0 %v664_v16  ;;  %634 = vmatprep.subr.bf16.mxu1 %v664_v16 }
  0x1f   :  { %602 = vmatpush3.bf16.msra.mxu0 %v665_v17  ;;  %642 = vmatpush3.bf16.msra.mxu1 %v665_v17 }
  0x22   :  { %237 = vmatmul.mubr.bf16.vlgmr.msra.gmra.mrb[0].mxu0 %v666_v18  ;;  %253 = vmatmul.mubr.bf16.vlgmr.msra.gmra.mrb[0].mxu1 %v669_v19 }
  0x23   :  { %244 = vmatprep.mubr.bf16.mxu0 %v672_v20  ;;  %260 = vmatprep.mubr.bf16.mxu1 %v675_v21 }
  0x2a   :  { %245 = vmatmul.mubr.bf16.gmra.mrb[4].mxu0 %v674_v22  ;;  %261 = vmatmul.mubr.bf16.gmra.mrb[4].mxu1 %v677_v23 }
  0xf5   :  { %v603_v24 = vpop.f32.mrb[0].mxu0  ;;  %v615_v25 = vpop.f32.mrb[0].mxu1 }
  0xf6   :  { %v604_v26 = vpop.f32.mrb[1].mxu0  ;;  %v616_v27 = vpop.f32.mrb[1].mxu1 }
  0xf7   :  { %v605_v28 = vadd.f32 %v604_v26, %v603_v24  ;;  %v606_v29 = vpop.f32.mrb[2].mxu0  ;;  %v617_v30 = vadd.f32 %v616_v27, %v615_v25  ;;  %v618_v31 = vpop.f32.mrb[2].mxu1 }
  0xf8   :  { %v607_v32 = vpop.f32.mrb[3].mxu0  ;;  %v619_v33 = vpop.f32.mrb[3].mxu1 }
  0xf9   :  { %v608_v35 = vadd.f32 %v607_v32, %v606_v29  ;;  %v620_v36 = vadd.f32 %v619_v33, %v618_v31  ;;  %v794_v38 = vadd.f32 %v605_v28, %v523_v34  ;;  %v804_v55 = vadd.f32 %v617_v30, %v523_v34 }
  0xfb   :  { %v792_v37 = vadd.f32 %v608_v35, %v523_v34  ;;  %v282_v48 = vmul.f32 %v794_v38, %v794_v38  ;;  %v811_v60 = vadd.f32 %v620_v36, %v523_v34  ;;  %v286_v1 = vmul.f32 %v804_v55, %v804_v55 }
  0xfd   :  { %v609_v39 = vpop.f32.mrb[4].mxu0  ;;  %v621_v40 = vpop.f32.mrb[4].mxu1  ;;  %v283_v43 = vmul.f32 %v792_v37, %v792_v37  ;;  %v269_v51 = vadd.f32 %v792_v37, %v794_v38  ;;  %v287_v4 = vmul.f32 %v811_v60, %v811_v60 }
  0xfe   :  { %v610_v41 = vpop.f32.mrb[5].mxu0  ;;  %v622_v42 = vpop.f32.mrb[5].mxu1 }
  0xff   :  { %v611_v44 = vadd.f32 %v610_v41, %v609_v39  ;;  %v612_v45 = vpop.f32.mrb[6].mxu0  ;;  %v623_v46 = vadd.f32 %v622_v42, %v621_v40  ;;  %v624_v47 = vpop.f32.mrb[6].mxu1  ;;  %v290_v56 = vadd.f32 %v283_v43, %v282_v48 }
 0x100   :  { %v613_v49 = vpop.f32.mrb[7].mxu0  ;;  %v625_v50 = vpop.f32.mrb[7].mxu1 }
 0x101   :  { %v802_v52 = vadd.f32 %v611_v44, %v523_v34  ;;  %v614_v53 = vadd.f32 %v613_v49, %v612_v45  ;;  %v626_v54 = vadd.f32 %v625_v50, %v624_v47  ;;  %v816_v0 = vadd.f32 %v623_v46, %v523_v34 }
 0x103   :  { %v270_v57 = vadd.f32 %v269_v51, %v802_v52  ;;  %v284_v58 = vmul.f32 %v802_v52, %v802_v52  ;;  %v809_v59 = vadd.f32 %v614_v53, %v523_v34  ;;  %v288_v7 = vmul.f32 %v816_v0, %v816_v0 }
 0x104   :  { %v826_v8 = vadd.f32 %v626_v54, %v523_v34 }
 0x105   :  { %v291_v61 = vadd.f32 %v290_v56, %v284_v58  ;;  %v271_v62 = vadd.f32 %v270_v57, %v809_v59  ;;  %v285_v63 = vmul.f32 %v809_v59, %v809_v59 }
 0x106   :  { %v289_v13 = vmul.f32 %v826_v8, %v826_v8 }
 0x107   :  { %v272_v2 = vadd.f32 %v271_v62, %v804_v55  ;;  %v292_v3 = vadd.f32 %v291_v61, %v285_v63 }
 0x109   :  { %v293_v5 = vadd.f32 %v292_v3, %v286_v1  ;;  %v273_v6 = vadd.f32 %v272_v2, %v811_v60 }
 0x10b   :  { %v274_v9 = vadd.f32 %v273_v6, %v816_v0  ;;  %v294_v10 = vadd.f32 %v293_v5, %v287_v4  ;;  %v375_v4 = vlaneseq  ;;  %v367_v6 = vld [vmem:[%s903_s3] sm:$0x1] }
 0x10d   :  { %v295_v11 = vadd.f32 %v294_v10, %v288_v7  ;;  %v275_v12 = vadd.f32 %v274_v9, %v826_v8  ;;  %v376_v5 = vshrl.u32 %v375_v4, 7 }
 0x10f   :  { %v276_v14 = vrot.slane %v275_v12, 4  ;;  %v296_v15 = vadd.f32 %v295_v11, %v289_v13  ;;  %v377_v7 = vsub.s32 0, %v376_v5  ;;  %v371_v11 = vld [vmem:[%s904_s4] sm:$0x1] }
 0x111   :  { %v277_v16 = vadd.f32 %v276_v14, %v275_v12  ;;  %v297_v17 = vrot.slane %v296_v15, 4 }
 0x113   :  { %v278_v18 = vrot.slane %v277_v16, 2  ;;  %v298_v19 = vadd.f32 %v297_v17, %v296_v15 }
 0x115   :  { %v279_v20 = vadd.f32 %v278_v18, %v277_v16  ;;  %v299_v21 = vrot.slane %v298_v19, 2 }
 0x117   :  { %v280_v22 = vrot.slane %v279_v20, 1  ;;  %v300_v23 = vadd.f32 %v299_v21, %v298_v19 }
 0x119   :  { %v281_v24 = vadd.f32 %v280_v22, %v279_v20  ;;  %v301_v25 = vrot.slane %v300_v23, 1 }
 0x11b   :  { %313 = vrot.lane.b32.xlu1 %v281_v24, %s680_s0  ;;  %304 = vrot.lane.b32.xlu0 %v281_v24, %s681_s2  ;;  %v302_v26 = vadd.f32 %v301_v25, %v300_v23 }
 0x11f   :  { %317 = vrot.lane.b32.xlu1 %v302_v26, %s680_s0  ;;  %321 = vrot.lane.b32.xlu0 %v281_v24, %s682_s17 }
 0x123   :  { %325 = vrot.lane.b32.xlu1 %v302_v26, %s682_s17  ;;  %329 = vrot.lane.b32.xlu0 %v281_v24, %s683_s18 }
 0x127   :  { %333 = vrot.lane.b32.xlu1 %v302_v26, %s683_s18  ;;  %309 = vrot.lane.b32.xlu0 %v302_v26, %s681_s2 }
 0x12b   :  { %341 = vrot.lane.b32.xlu1 %v302_v26, %s684_s19  ;;  %337 = vrot.lane.b32.xlu0 %v281_v24, %s684_s19 }
 0x12f   :  { %349 = vrot.lane.b32.xlu1 %v302_v26, %s685_s20  ;;  %345 = vrot.lane.b32.xlu0 %v281_v24, %s685_s20 }
 0x133   :  { %357 = vrot.lane.b32.xlu1 %v302_v26, %s686_s21  ;;  %353 = vrot.lane.b32.xlu0 %v281_v24, %s686_s21 }
 0x18d   :  { %v314_v27 = vpop.permute.xlu1 %313  ;;  %v305_v28 = vpop.permute.xlu0 %304 }
 0x18e   :  { %v307_v33 = vadd.f32 %v305_v28, %v281_v24 }
 0x190   :  { %v316_v36 = vadd.f32 %v314_v27, %v307_v33 }
 0x191   :  { %v318_v29 = vpop.permute.xlu1 %317  ;;  %v322_v30 = vpop.permute.xlu0 %321 }
 0x192   :  { %v324_v43 = vadd.f32 %v322_v30, %v316_v36 }
 0x195   :  { %v326_v31 = vpop.permute.xlu1 %325  ;;  %v330_v32 = vpop.permute.xlu0 %329 }
 0x196   :  { %v332_v45 = vadd.f32 %v330_v32, %v324_v43 }
 0x199   :  { %v334_v34 = vpop.permute.xlu1 %333  ;;  %v310_v35 = vpop.permute.xlu0 %309 }
 0x19a   :  { %v312_v39 = vadd.f32 %v310_v35, %v302_v26 }
 0x19c   :  { %v320_v40 = vadd.f32 %v318_v29, %v312_v39 }
 0x19d   :  { %v342_v41 = vpop.permute.xlu1 %341  ;;  %v338_v42 = vpop.permute.xlu0 %337 }
 0x19e   :  { %v328_v44 = vadd.f32 %v326_v31, %v320_v40  ;;  %v340_v50 = vadd.f32 %v338_v42, %v332_v45 }
 0x1a0   :  { %v336_v46 = vadd.f32 %v334_v34, %v328_v44 }
 0x1a1   :  { %v350_v47 = vpop.permute.xlu1 %349  ;;  %v346_v48 = vpop.permute.xlu0 %345 }
 0x1a2   :  { %v344_v49 = vadd.f32 %v342_v41, %v336_v46  ;;  %v348_v53 = vadd.f32 %v346_v48, %v340_v50 }
 0x1a4   :  { %v352_v51 = vadd.f32 %v350_v47, %v344_v49 }
 0x1a5   :  { %v358_v54 = vpop.permute.xlu1 %357  ;;  %v354_v56 = vpop.permute.xlu0 %353 }
 0x1a6   :  { %v360_v57 = vadd.f32 %v358_v54, %v352_v51  ;;  %v356_v58 = vadd.f32 %v354_v56, %v348_v53 }
 0x1a8   :  { %v362_v61 = vmul.f32 0.001953125, %v356_v58  ;;  %v363_v62 = vmul.f32 0.001953125, %v360_v57 }
 0x1aa   :  { %v364_v63 = vmul.f32 %v362_v61, %v362_v61 }
 0x1ac   :  { %v365_v1 = vsub.f32 %v363_v62, %v364_v63 }
 0x1ae   :  { %v366_v2 = vmax.f32 %v365_v1, 0.0 }
 0x1b0   :  { %v368_v3 = vadd.f32 1e-05, %v366_v2 }
 0x1b2   :  { %678 = vrsqrt.f32 %v368_v3 }
 0x1bc   :  { %v679_v9 = vpop.eup %678 }
 0x1bd   :  { %v370_v10 = vmul.f32 %v679_v9, %v367_v6 }
 0x1bf   :  { %v372_v12 = vmul.f32 %v370_v10, %v362_v61  ;;  %v378_v13 = vrot.slane %v370_v10, %v377_v7 }
 0x1c1   :  { %v373_v14 = vsub.f32 %v371_v11, %v372_v12  ;;  %382 = vrot.lane.b32.xlu1 %v378_v13, %s685_s20  ;;  %379 = vrot.lane.b32.xlu0 %v378_v13, %s686_s21 }
 0x1c3   :  { %v418_v15 = vrot.slane %v373_v14, %v377_v7 }
 0x1c5   :  { %385 = vrot.lane.b32.xlu0 %v378_v13, %s684_s19  ;;  %419 = vrot.lane.b32.xlu1 %v418_v15, %s686_s21 }
 0x1c9   :  { %388 = vrot.lane.b32.xlu0 %v378_v13, %s683_s18  ;;  %422 = vrot.lane.b32.xlu1 %v418_v15, %s685_s20 }
 0x1cd   :  { %391 = vrot.lane.b32.xlu0 %v378_v13, %s682_s17  ;;  %425 = vrot.lane.b32.xlu1 %v418_v15, %s684_s19 }
 0x1d1   :  { %394 = vrot.lane.b32.xlu0 %v378_v13, %s680_s0  ;;  %428 = vrot.lane.b32.xlu1 %v418_v15, %s683_s18 }
 0x1d5   :  { %397 = vrot.lane.b32.xlu0 %v378_v13, %s681_s2  ;;  %431 = vrot.lane.b32.xlu1 %v418_v15, %s682_s17 }
 0x1d9   :  { %434 = vrot.lane.b32.xlu0 %v418_v15, %s680_s0  ;;  %437 = vrot.lane.b32.xlu1 %v418_v15, %s681_s2 }
 0x233   :  { %v383_v16 = vpop.permute.xlu1 %382  ;;  %v380_v17 = vpop.permute.xlu0 %379 }
 0x234   :  { %v401_v24 = vsel %vm400_vm0, %v370_v10, %v380_v17 }
 0x235   :  { %v403_v25 = vsel %vm402_vm1, %v401_v24, %v383_v16 }
 0x237   :  { %v386_v18 = vpop.permute.xlu0 %385  ;;  %v420_v19 = vpop.permute.xlu1 %419 }
 0x238   :  { %v405_v28 = vsel %vm404_vm2, %v403_v25, %v386_v18  ;;  %v440_v34 = vsel %vm400_vm0, %v373_v14, %v420_v19 }
 0x23b   :  { %v389_v20 = vpop.permute.xlu0 %388  ;;  %v423_v21 = vpop.permute.xlu1 %422 }
 0x23c   :  { %v407_v29 = vsel %vm406_vm3, %v405_v28, %v389_v20  ;;  %v441_v36 = vsel %vm402_vm1, %v440_v34, %v423_v21 }
 0x23f   :  { %v392_v22 = vpop.permute.xlu0 %391  ;;  %v426_v23 = vpop.permute.xlu1 %425 }
 0x240   :  { %v409_v30 = vsel %vm408_vm4, %v407_v29, %v392_v22  ;;  %v442_v39 = vsel %vm404_vm2, %v441_v36, %v426_v23 }
 0x243   :  { %v395_v26 = vpop.permute.xlu0 %394  ;;  %v429_v27 = vpop.permute.xlu1 %428 }
 0x244   :  { %v411_v31 = vsel %vm410_vm5, %v409_v30, %v395_v26  ;;  %v443_v41 = vsel %vm406_vm3, %v442_v39, %v429_v27 }
 0x247   :  { %v398_v32 = vpop.permute.xlu0 %397  ;;  %v432_v33 = vpop.permute.xlu1 %431 }
 0x248   :  { %v413_v35 = vsel %vm412_vm6, %v411_v31, %v398_v32  ;;  %v444_v44 = vsel %vm408_vm4, %v443_v41, %v432_v33 }
 0x249   :  { %v450_v40 = vrot.slane %v413_v35, %v377_v7 }
 0x24b   :  { %v435_v42 = vpop.permute.xlu0 %434  ;;  %v438_v43 = vpop.permute.xlu1 %437  ;;  %v451_v46 = vmul.f32 %v450_v40, %v794_v38  ;;  %v452_v48 = vmul.f32 %v450_v40, %v792_v37  ;;  %v453_v49 = vmul.f32 %v450_v40, %v802_v52  ;;  %v454_v50 = vmul.f32 %v450_v40, %v809_v59 }
 0x24c   :  { %v445_v45 = vsel %vm410_vm5, %v444_v44, %v435_v42  ;;  %v455_v53 = vmul.f32 %v450_v40, %v804_v55  ;;  %v456_v54 = vmul.f32 %v450_v40, %v811_v60  ;;  %v457_v56 = vmul.f32 %v450_v40, %v816_v0 }
 0x24d   :  { %v446_v47 = vsel %vm412_vm6, %v445_v45, %v438_v43  ;;  %v458_v57 = vmul.f32 %v450_v40, %v826_v8 }
 0x24e   :  { %v462_v51 = vrot.slane %v446_v47, %v377_v7 }
 0x250   :  { %v463_v58 = vadd.f32 %v462_v51, %v451_v46  ;;  %v464_v61 = vadd.f32 %v462_v51, %v452_v48  ;;  %v465_v38 = vadd.f32 %v462_v51, %v453_v49  ;;  %v466_v62 = vadd.f32 %v462_v51, %v454_v50 }
 0x251   :  { %v467_v63 = vadd.f32 %v462_v51, %v455_v53  ;;  %v468_v1 = vadd.f32 %v462_v51, %v456_v54  ;;  %v469_v37 = vadd.f32 %v462_v51, %v457_v56  ;;  %v470_v2 = vadd.f32 %v462_v51, %v458_v57 }
 0x252   :  { %v471_v52 = vmax.f32 %v463_v58, 0.0  ;;  %v472_v3 = vmax.f32 %v464_v61, 0.0  ;;  %v473_v59 = vmax.f32 %v465_v38, 0.0  ;;  %v474_v4 = vmax.f32 %v466_v62, 0.0 }
 0x253   :  { %v475_v5 = vmax.f32 %v467_v63, 0.0  ;;  %v476_v55 = vmax.f32 %v468_v1, 0.0  ;;  %v477_v6 = vmax.f32 %v469_v37, 0.0  ;;  %v478_v60 = vmax.f32 %v470_v2, 0.0 }
 0x254   :  { %v567_v7 = vpack.c.bf16 %v472_v3, %v471_v52  ;;  %v572_v0 = vpack.c.bf16 %v474_v4, %v473_v59 }
 0x255   :  { %v577_v9 = vpack.c.bf16 %v476_v55, %v475_v5  ;;  %v582_v8 = vpack.c.bf16 %v478_v60, %v477_v6 }
 0x256   :  { %568 = vst [vmem:[%s905_s5] sm:$0xff] %v567_v7   ;;  %584 = vst [vmem:[%s905_s5 + $0x8] sm:$0xff] %v572_v0  }
 0x257   :  { %585 = vst [vmem:[%s905_s5 + $0x10] sm:$0xff] %v577_v9   ;;  %586 = vst [vmem:[%s905_s5 + $0x18] sm:$0xff] %v582_v8  }

// kernel: unet_generator_forward.23
= control target key start
LH: loop header
LB: loop body
LE: loop exit
PB: predicated region body
PF: predicated region fallthrough
CT: control target
= control target key end

     0   :  { %v4368_v0 = vmov 0   ;;  %vm1790_vm0 = vcmask 130048   ;;  %vm3107_vm1 = vcmask 23552   ;;  %s6056_s1 = inlined_call_operand.vmem [shape: bf16[784,3], index: 1, kind: input, shape index: {}]   ;;  %s6057_s0 = inlined_call_operand.vmem [shape: bf16[512,784], index: 0, kind: input, shape index: {}]   ;;  %s6058_s2 = inlined_call_operand.vmem [shape: f32[1,3], index: 2, kind: input, shape index: {}]   ;;  %s6059_s3 = inlined_call_operand.vmem [shape: f32[512,3], index: 3, kind: output, shape index: {}]  }
   0x1   :  { %1887 = vmatprep.subr.bf16.mxu1 %v4368_v0  ;;  %2176 = vmatprep.subr.bf16.mxu0 %v4368_v0  ;;  %v3870_v1 = vld [vmem:[%s6056_s1] sm:$0xff]   ;;  %v3872_v3 = vld [vmem:[%s6056_s1 + $0x8] sm:$0xff]   ;;  %v3874_v5 = vld [vmem:[%s6056_s1 + $0x10] sm:$0xff]  }
   0x2   :  { %v4397_v2 = vld [vmem:[%s6056_s1 + $0x80] sm:$0xff]   ;;  %1888 = vmatpush1.bf16.msra.mxu1 %v3870_v1  ;;  %v4407_v4 = vld [vmem:[%s6056_s1 + $0x88] sm:$0xff]   ;;  %v4418_v6 = vld [vmem:[%s6056_s1 + $0x90] sm:$0xff]  }
   0x3   :  { %2177 = vmatpush1.bf16.msra.mxu0 %v4397_v2  ;;  %1889 = vmatprep.subr.bf16.mxu1 %v4368_v0  ;;  %v3876_v7 = vld [vmem:[%s6056_s1 + $0x18] sm:$0xff]   ;;  %v3878_v9 = vld [vmem:[%s6056_s1 + $0x20] sm:$0xff]   ;;  %v3880_v11 = vld [vmem:[%s6056_s1 + $0x28] sm:$0xff]  }
   0x4   :  { %2178 = vmatprep.subr.bf16.mxu0 %v4368_v0  ;;  %v4429_v8 = vld [vmem:[%s6056_s1 + $0x98] sm:$0xff]   ;;  %v4440_v10 = vld [vmem:[%s6056_s1 + $0xa0] sm:$0xff]   ;;  %v4451_v12 = vld [vmem:[%s6056_s1 + $0xa8] sm:$0xff]  }
   0x5   :  { %v3882_v13 = vld [vmem:[%s6056_s1 + $0x30] sm:$0xff]   ;;  %v3884_v15 = vld [vmem:[%s6056_s1 + $0x38] sm:$0xff]   ;;  %v3886_v17 = vld [vmem:[%s6056_s1 + $0x40] sm:$0xff]  }
   0x6   :  { %1890 = vmatpush1.bf16.msra.mxu1 %v3872_v3  ;;  %v4462_v14 = vld [vmem:[%s6056_s1 + $0xb0] sm:$0xff]   ;;  %v4473_v16 = vld [vmem:[%s6056_s1 + $0xb8] sm:$0xff]   ;;  %v4484_v18 = vld [vmem:[%s6056_s1 + $0xc0] sm:$0xff]  }
   0x7   :  { %2179 = vmatpush1.bf16.msra.mxu0 %v4407_v4  ;;  %1891 = vmatprep.subr.bf16.mxu1 %v4368_v0  ;;  %v3904_v19 = vld [vmem:[%s6057_s0 + $0x4] ss:$28 sps:$4 sm:$0xff]   ;;  %v3888_v20 = vld [vmem:[%s6056_s1 + $0x48] sm:$0xff]   ;;  %v3890_v23 = vld [vmem:[%s6056_s1 + $0x50] sm:$0xff]  }
   0x8   :  { %2180 = vmatprep.subr.bf16.mxu0 %v4368_v0  ;;  %v3907_v21 = vld [vmem:[%s6057_s0 + $0xc] ss:$28 sps:$4 sm:$0xff]   ;;  %1919 = vmatprep.mubr.bf16.mxu1 %v3904_v19  ;;  %v4512_v24 = vld [vmem:[%s6056_s1 + $0xd0] sm:$0xff]   ;;  %v3892_v25 = vld [vmem:[%s6056_s1 + $0x58] sm:$0xff]  }
   0x9   :  { %v4501_v22 = vld [vmem:[%s6056_s1 + $0xc8] sm:$0xff]   ;;  %2208 = vmatprep.mubr.bf16.mxu0 %v3907_v21  ;;  %v4523_v26 = vld [vmem:[%s6056_s1 + $0xd8] sm:$0xff]   ;;  %v3894_v27 = vld [vmem:[%s6056_s1 + $0x60] sm:$0xff]  }
   0xa   :  { %1892 = vmatpush1.bf16.msra.mxu1 %v3874_v5  ;;  %v4534_v28 = vld [vmem:[%s6056_s1 + $0xe0] sm:$0xff]   ;;  %v3896_v29 = vld [vmem:[%s6056_s1 + $0x68] sm:$0xff]   ;;  %v3898_v31 = vld [vmem:[%s6056_s1 + $0x70] sm:$0xff]  }
   0xb   :  { %2181 = vmatpush1.bf16.msra.mxu0 %v4418_v6  ;;  %1893 = vmatprep.subr.bf16.mxu1 %v4368_v0  ;;  %v4545_v30 = vld [vmem:[%s6056_s1 + $0xe8] sm:$0xff]   ;;  %v4556_v32 = vld [vmem:[%s6056_s1 + $0xf0] sm:$0xff]   ;;  %v3900_v33 = vld [vmem:[%s6056_s1 + $0x78] sm:$0xff]  }
   0xc   :  { %2182 = vmatprep.subr.bf16.mxu0 %v4368_v0  ;;  %v4567_v34 = vld [vmem:[%s6056_s1 + $0xf8] sm:$0xff]   ;;  %v3905_v36 = vld [vmem:[%s6057_s0 + $0x8] ss:$28 sps:$4 sm:$0xff]   ;;  %v3916_v43 = vld [vmem:[%s6057_s0 + $0x74] ss:$28 sps:$4 sm:$0xff]  }
   0xd   :  { %v3902_v35 = vld [vmem:[%s6057_s0] ss:$28 sps:$4 sm:$0xff]   ;;  %v3915_v40 = vld [vmem:[%s6056_s1 + $0x108] sm:$0xff]   ;;  %v3913_v41 = vld [vmem:[%s6057_s0 + $0x38] ss:$28 sps:$4 sm:$0xff]  }
   0xe   :  { %1894 = vmatpush1.bf16.msra.mxu1 %v3876_v7  ;;  %v3908_v37 = vld [vmem:[%s6056_s1 + $0x100] sm:$0xff]   ;;  %v3909_v38 = vld [vmem:[%s6057_s0 + $0x3c] ss:$28 sps:$4 sm:$0xff]   ;;  %v3928_v45 = vld [vmem:[%s6056_s1 + $0x110] sm:$0xff]  }
   0xf   :  { %2183 = vmatpush1.bf16.msra.mxu0 %v4429_v8  ;;  %1895 = vmatprep.subr.bf16.mxu1 %v4368_v0  ;;  %v3911_v39 = vld [vmem:[%s6057_s0 + $0x44] ss:$28 sps:$4 sm:$0xff]   ;;  %v3918_v44 = vld [vmem:[%s6057_s0 + $0x7c] ss:$28 sps:$4 sm:$0xff]   ;;  %v3920_v47 = vld [vmem:[%s6057_s0 + $0x70] ss:$28 sps:$4 sm:$0xff]  }
  0x10   :  { %2184 = vmatprep.subr.bf16.mxu0 %v4368_v0  ;;  %v3914_v42 = vld [vmem:[%s6057_s0 + $0x40] ss:$28 sps:$4 sm:$0xff]   ;;  %v3921_v48 = vld [vmem:[%s6057_s0 + $0x78] ss:$28 sps:$4 sm:$0xff]   ;;  %v3922_v49 = vld [vmem:[%s6057_s0 + $0xac] ss:$28 sps:$4 sm:$0xff]  }
  0x11   :  { %v3935_v46 = vld [vmem:[%s6056_s1 + $0x118] sm:$0xff]   ;;  %v3924_v50 = vld [vmem:[%s6057_s0 + $0xb4] ss:$28 sps:$4 sm:$0xff]   ;;  %v3948_v51 = vld [vmem:[%s6056_s1 + $0x120] sm:$0xff]  }
  0x12   :  { %1896 = vmatpush1.bf16.msra.mxu1 %v3878_v9  ;;  %v3955_v52 = vld [vmem:[%s6056_s1 + $0x128] sm:$0xff]   ;;  %v3929_v55 = vld [vmem:[%s6057_s0 + $0xe4] ss:$28 sps:$4 sm:$0xff]   ;;  %v3968_v57 = vld [vmem:[%s6056_s1 + $0x130] sm:$0xff]  }
  0x13   :  { %2185 = vmatpush1.bf16.msra.mxu0 %v4440_v10  ;;  %1897 = vmatprep.subr.bf16.mxu1 %v4368_v0  ;;  %v3926_v53 = vld [vmem:[%s6057_s0 + $0xa8] ss:$28 sps:$4 sm:$0xff]   ;;  %v3927_v54 = vld [vmem:[%s6057_s0 + $0xb0] ss:$28 sps:$4 sm:$0xff]   ;;  %v3975_v58 = vld [vmem:[%s6056_s1 + $0x138] sm:$0xff]  }
  0x14   :  { %2186 = vmatprep.subr.bf16.mxu0 %v4368_v0  ;;  %v3931_v56 = vld [vmem:[%s6057_s0 + $0xec] ss:$28 sps:$4 sm:$0xff]   ;;  %v3933_v59 = vld [vmem:[%s6057_s0 + $0xe0] ss:$28 sps:$4 sm:$0xff]   ;;  %v3947_v9 = vld [vmem:[%s6057_s0 + $0x158] ss:$28 sps:$4 sm:$0xff]  }
  0x15   :  { %v3934_v60 = vld [vmem:[%s6057_s0 + $0xe8] ss:$28 sps:$4 sm:$0xff]   ;;  %v3936_v61 = vld [vmem:[%s6057_s0 + $0x11c] ss:$28 sps:$4 sm:$0xff]   ;;  %v3946_v7 = vld [vmem:[%s6057_s0 + $0x150] ss:$28 sps:$4 sm:$0xff]  }
  0x16   :  { %1898 = vmatpush1.bf16.msra.mxu1 %v3880_v11  ;;  %v3938_v62 = vld [vmem:[%s6057_s0 + $0x124] ss:$28 sps:$4 sm:$0xff]   ;;  %v3995_v1 = vld [vmem:[%s6056_s1 + $0x148] sm:$0xff]   ;;  %v3944_v5 = vld [vmem:[%s6057_s0 + $0x15c] ss:$28 sps:$4 sm:$0xff]  }
  0x17   :  { %2187 = vmatpush1.bf16.msra.mxu0 %v4451_v12  ;;  %1899 = vmatprep.subr.bf16.mxu1 %v4368_v0  ;;  %v3988_v63 = vld [vmem:[%s6056_s1 + $0x140] sm:$0xff]   ;;  %v3951_v11 = vld [vmem:[%s6057_s0 + $0x194] ss:$28 sps:$4 sm:$0xff]  }
  0x18   :  { %2188 = vmatprep.subr.bf16.mxu0 %v4368_v0  ;;  %v3941_v3 = vld [vmem:[%s6057_s0 + $0x120] ss:$28 sps:$4 sm:$0xff]   ;;  %v3961_v21 = vld [vmem:[%s6057_s0 + $0x1c8] ss:$28 sps:$4 sm:$0xff]  }
  0x19   :  { %v3960_v19 = vld [vmem:[%s6057_s0 + $0x1c0] ss:$28 sps:$4 sm:$0xff]  }
  0x1a   :  { %1900 = vmatpush1.bf16.msra.mxu1 %v3882_v13  ;;  %v3953_v13 = vld [vmem:[%s6057_s0 + $0x188] ss:$28 sps:$4 sm:$0xff]  }
  0x1b   :  { %2189 = vmatpush1.bf16.msra.mxu0 %v4462_v14  ;;  %1901 = vmatprep.subr.bf16.mxu1 %v4368_v0 }
  0x1c   :  { %2190 = vmatprep.subr.bf16.mxu0 %v4368_v0 }
  0x1e   :  { %1902 = vmatpush1.bf16.msra.mxu1 %v3884_v15  ;;  %v3954_v15 = vld [vmem:[%s6057_s0 + $0x190] ss:$28 sps:$4 sm:$0xff]  }
  0x1f   :  { %2191 = vmatpush1.bf16.msra.mxu0 %v4473_v16  ;;  %1903 = vmatprep.subr.bf16.mxu1 %v4368_v0 }
  0x20   :  { %2192 = vmatprep.subr.bf16.mxu0 %v4368_v0 }
  0x22   :  { %1904 = vmatpush1.bf16.msra.mxu1 %v3886_v17  ;;  %v3958_v17 = vld [vmem:[%s6057_s0 + $0x1cc] ss:$28 sps:$4 sm:$0xff]  }
  0x23   :  { %2193 = vmatpush1.bf16.msra.mxu0 %v4484_v18  ;;  %1905 = vmatprep.subr.bf16.mxu1 %v4368_v0 }
  0x24   :  { %2194 = vmatprep.subr.bf16.mxu0 %v4368_v0 }
  0x26   :  { %1906 = vmatpush1.bf16.msra.mxu1 %v3888_v20  ;;  %v4055_v20 = vld [vmem:[%s6056_s1 + $0x178] sm:$0xff]  }
  0x27   :  { %2195 = vmatpush1.bf16.msra.mxu0 %v4501_v22  ;;  %1907 = vmatprep.subr.bf16.mxu1 %v4368_v0 }
  0x28   :  { %2196 = vmatprep.subr.bf16.mxu0 %v4368_v0 }
  0x2a   :  { %1908 = vmatpush1.bf16.msra.mxu1 %v3890_v23  ;;  %v3964_v23 = vld [vmem:[%s6057_s0 + $0x204] ss:$28 sps:$4 sm:$0xff]  }
  0x2b   :  { %2197 = vmatpush1.bf16.msra.mxu0 %v4512_v24  ;;  %1909 = vmatprep.subr.bf16.mxu1 %v4368_v0 }
  0x2c   :  { %2198 = vmatprep.subr.bf16.mxu0 %v4368_v0 }
  0x2e   :  { %1910 = vmatpush1.bf16.msra.mxu1 %v3892_v25  ;;  %v3967_v25 = vld [vmem:[%s6057_s0 + $0x200] ss:$28 sps:$4 sm:$0xff]  }
  0x2f   :  { %2199 = vmatpush1.bf16.msra.mxu0 %v4523_v26  ;;  %1911 = vmatprep.subr.bf16.mxu1 %v4368_v0 }
  0x30   :  { %2200 = vmatprep.subr.bf16.mxu0 %v4368_v0 }
  0x32   :  { %1912 = vmatpush1.bf16.msra.mxu1 %v3894_v27  ;;  %v3973_v27 = vld [vmem:[%s6057_s0 + $0x230] ss:$28 sps:$4 sm:$0xff]  }
  0x33   :  { %2201 = vmatpush1.bf16.msra.mxu0 %v4534_v28  ;;  %1913 = vmatprep.subr.bf16.mxu1 %v4368_v0 }
  0x34   :  { %2202 = vmatprep.subr.bf16.mxu0 %v4368_v0 }
  0x36   :  { %1914 = vmatpush1.bf16.msra.mxu1 %v3896_v29  ;;  %v3976_v29 = vld [vmem:[%s6057_s0 + $0x26c] ss:$28 sps:$4 sm:$0xff]  }
  0x37   :  { %2203 = vmatpush1.bf16.msra.mxu0 %v4545_v30  ;;  %1915 = vmatprep.subr.bf16.mxu1 %v4368_v0 }
  0x38   :  { %2204 = vmatprep.subr.bf16.mxu0 %v4368_v0 }
  0x3a   :  { %1916 = vmatpush1.bf16.msra.mxu1 %v3898_v31  ;;  %v3980_v31 = vld [vmem:[%s6057_s0 + $0x268] ss:$28 sps:$4 sm:$0xff]  }
  0x3b   :  { %2205 = vmatpush1.bf16.msra.mxu0 %v4556_v32  ;;  %1917 = vmatprep.subr.bf16.mxu1 %v4368_v0 }
  0x3c   :  { %2206 = vmatprep.subr.bf16.mxu0 %v4368_v0 }
  0x3e   :  { %1918 = vmatpush1.bf16.msra.mxu1 %v3900_v33  ;;  %v3982_v33 = vld [vmem:[%s6057_s0 + $0x2a4] ss:$28 sps:$4 sm:$0xff]  }
  0x3f   :  { %2207 = vmatpush1.bf16.msra.mxu0 %v4567_v34  ;;  %3581 = vmatprep.subr.bf16.mxu1 %v4368_v0 }
  0x40   :  { %2465 = vmatprep.subr.bf16.mxu0 %v4368_v0 }
  0x41   :  { %1920 = vmatmul.mubr.bf16.vlgmr.msra.gmra.mrb[0].mxu1 %v3902_v35  ;;  %v3986_v35 = vld [vmem:[%s6057_s0 + $0x2a0] ss:$28 sps:$4 sm:$0xff]  }
  0x42   :  { %2209 = vmatmul.mubr.bf16.vlgmr.msra.gmra.mrb[0].mxu0 %v3905_v36  ;;  %3597 = vmatpush1.bf16.msra.mxu1 %v4397_v2  ;;  %v3940_v2 = vld [vmem:[%s6057_s0 + $0x118] ss:$28 sps:$4 sm:$0xff]   ;;  %v3987_v36 = vld [vmem:[%s6057_s0 + $0x2a8] ss:$28 sps:$4 sm:$0xff]  }
  0x43   :  { %2466 = vmatpush1.bf16.msra.mxu0 %v3908_v37  ;;  %1927 = vmatprep.mubr.bf16.mxu1 %v3909_v38  ;;  %v3989_v37 = vld [vmem:[%s6057_s0 + $0x2dc] ss:$28 sps:$4 sm:$0xff]   ;;  %v3991_v38 = vld [vmem:[%s6057_s0 + $0x2e4] ss:$28 sps:$4 sm:$0xff]  }
  0x44   :  { %2216 = vmatprep.mubr.bf16.mxu0 %v3911_v39  ;;  %2467 = vmatprep.subr.bf16.mxu0 %v4368_v0  ;;  %v3993_v39 = vld [vmem:[%s6057_s0 + $0x2d8] ss:$28 sps:$4 sm:$0xff]  }
  0x45   :  { %3582 = vmatprep.subr.bf16.mxu1 %v4368_v0 }
  0x46   :  { %3598 = vmatpush1.bf16.msra.mxu1 %v4407_v4  ;;  %v3942_v4 = vld [vmem:[%s6057_s0 + $0x154] ss:$28 sps:$4 sm:$0xff]  }
  0x47   :  { %2468 = vmatpush1.bf16.msra.mxu0 %v3915_v40  ;;  %3583 = vmatprep.subr.bf16.mxu1 %v4368_v0  ;;  %v3994_v40 = vld [vmem:[%s6057_s0 + $0x2e0] ss:$28 sps:$4 sm:$0xff]  }
  0x48   :  { %2469 = vmatprep.subr.bf16.mxu0 %v4368_v0 }
  0x49   :  { %1928 = vmatmul.mubr.bf16.gmra.mrb[4].mxu1 %v3913_v41  ;;  %v3996_v41 = vld [vmem:[%s6057_s0 + $0x314] ss:$28 sps:$4 sm:$0xff]  }
  0x4a   :  { %2217 = vmatmul.mubr.bf16.gmra.mrb[4].mxu0 %v3914_v42  ;;  %1935 = vmatprep.mubr.bf16.mxu1 %v3916_v43  ;;  %v3998_v42 = vld [vmem:[%s6057_s0 + $0x31c] ss:$28 sps:$4 sm:$0xff]   ;;  %v4000_v43 = vld [vmem:[%s6057_s0 + $0x310] ss:$28 sps:$4 sm:$0xff]  }
  0x4b   :  { %2224 = vmatprep.mubr.bf16.mxu0 %v3918_v44  ;;  %2470 = vmatpush1.bf16.msra.mxu0 %v3928_v45  ;;  %v4001_v44 = vld [vmem:[%s6057_s0 + $0x318] ss:$28 sps:$4 sm:$0xff]   ;;  %v4002_v45 = vld [vmem:[%s6057_s0 + $0x34c] ss:$28 sps:$4 sm:$0xff]  }
  0x4c   :  { %3599 = vmatpush1.bf16.msra.mxu1 %v4418_v6  ;;  %2471 = vmatprep.subr.bf16.mxu0 %v4368_v0  ;;  %v4008_v6 = vld [vmem:[%s6056_s1 + $0x150] sm:$0xff]  }
  0x4d   :  { %3584 = vmatprep.subr.bf16.mxu1 %v4368_v0 }
  0x4f   :  { %2472 = vmatpush1.bf16.msra.mxu0 %v3935_v46  ;;  %v4004_v46 = vld [vmem:[%s6057_s0 + $0x354] ss:$28 sps:$4 sm:$0xff]  }
  0x50   :  { %2473 = vmatprep.subr.bf16.mxu0 %v4368_v0  ;;  %3600 = vmatpush1.bf16.msra.mxu1 %v4429_v8  ;;  %v4015_v8 = vld [vmem:[%s6056_s1 + $0x158] sm:$0xff]  }
  0x51   :  { %1936 = vmatmul.mubr.bf16.gmra.mrb[8].mxu1 %v3920_v47  ;;  %3585 = vmatprep.subr.bf16.mxu1 %v4368_v0  ;;  %v4006_v47 = vld [vmem:[%s6057_s0 + $0x348] ss:$28 sps:$4 sm:$0xff]  }
  0x52   :  { %2225 = vmatmul.mubr.bf16.gmra.mrb[8].mxu0 %v3921_v48  ;;  %1943 = vmatprep.mubr.bf16.mxu1 %v3922_v49  ;;  %v4007_v48 = vld [vmem:[%s6057_s0 + $0x350] ss:$28 sps:$4 sm:$0xff]   ;;  %v4009_v49 = vld [vmem:[%s6057_s0 + $0x384] ss:$28 sps:$4 sm:$0xff]  }
  0x53   :  { %2232 = vmatprep.mubr.bf16.mxu0 %v3924_v50  ;;  %2474 = vmatpush1.bf16.msra.mxu0 %v3948_v51  ;;  %v4011_v50 = vld [vmem:[%s6057_s0 + $0x38c] ss:$28 sps:$4 sm:$0xff]   ;;  %v4013_v51 = vld [vmem:[%s6057_s0 + $0x380] ss:$28 sps:$4 sm:$0xff]  }
  0x54   :  { %2475 = vmatprep.subr.bf16.mxu0 %v4368_v0  ;;  %3601 = vmatpush1.bf16.msra.mxu1 %v4440_v10  ;;  %v3949_v10 = vld [vmem:[%s6057_s0 + $0x18c] ss:$28 sps:$4 sm:$0xff]  }
  0x55   :  { %3586 = vmatprep.subr.bf16.mxu1 %v4368_v0 }
  0x57   :  { %2476 = vmatpush1.bf16.msra.mxu0 %v3955_v52  ;;  %v4014_v52 = vld [vmem:[%s6057_s0 + $0x388] ss:$28 sps:$4 sm:$0xff]  }
  0x58   :  { %2477 = vmatprep.subr.bf16.mxu0 %v4368_v0  ;;  %3602 = vmatpush1.bf16.msra.mxu1 %v4451_v12  ;;  %v4028_v12 = vld [vmem:[%s6056_s1 + $0x160] sm:$0xff]  }
  0x59   :  { %1944 = vmatmul.mubr.bf16.gmra.mrb[12].mxu1 %v3926_v53  ;;  %3587 = vmatprep.subr.bf16.mxu1 %v4368_v0  ;;  %v4016_v53 = vld [vmem:[%s6057_s0 + $0x3bc] ss:$28 sps:$4 sm:$0xff]  }
  0x5a   :  { %2233 = vmatmul.mubr.bf16.gmra.mrb[12].mxu0 %v3927_v54  ;;  %1951 = vmatprep.mubr.bf16.mxu1 %v3929_v55  ;;  %v4018_v54 = vld [vmem:[%s6057_s0 + $0x3c4] ss:$28 sps:$4 sm:$0xff]  }
  0x5b   :  { %2240 = vmatprep.mubr.bf16.mxu0 %v3931_v56  ;;  %2478 = vmatpush1.bf16.msra.mxu0 %v3968_v57  ;;  %v4874_v55 = vld [vmem:[%s6056_s1 + $0x180] sm:$0xff]   ;;  %v4020_v56 = vld [vmem:[%s6057_s0 + $0x3b8] ss:$28 sps:$4 sm:$0xff]  }
  0x5c   :  { %2479 = vmatprep.subr.bf16.mxu0 %v4368_v0  ;;  %3603 = vmatpush1.bf16.msra.mxu1 %v4462_v14  ;;  %v4035_v14 = vld [vmem:[%s6056_s1 + $0x168] sm:$0xff]   ;;  %v4021_v57 = vld [vmem:[%s6057_s0 + $0x3c0] ss:$28 sps:$4 sm:$0xff]  }
  0x5d   :  { %3588 = vmatprep.subr.bf16.mxu1 %v4368_v0 }
  0x5f   :  { %2480 = vmatpush1.bf16.msra.mxu0 %v3975_v58  ;;  %v4022_v58 = vld [vmem:[%s6057_s0 + $0x3f4] ss:$28 sps:$4 sm:$0xff]  }
  0x60   :  { %2481 = vmatprep.subr.bf16.mxu0 %v4368_v0  ;;  %3604 = vmatpush1.bf16.msra.mxu1 %v4473_v16  ;;  %v3956_v16 = vld [vmem:[%s6057_s0 + $0x1c4] ss:$28 sps:$4 sm:$0xff]  }
  0x61   :  { %1952 = vmatmul.mubr.bf16.gmra.mrb[16].mxu1 %v3933_v59  ;;  %3589 = vmatprep.subr.bf16.mxu1 %v4368_v0  ;;  %v4024_v59 = vld [vmem:[%s6057_s0 + $0x3fc] ss:$28 sps:$4 sm:$0xff]  }
  0x62   :  { %2241 = vmatmul.mubr.bf16.gmra.mrb[16].mxu0 %v3934_v60  ;;  %1959 = vmatprep.mubr.bf16.mxu1 %v3936_v61  ;;  %v4026_v60 = vld [vmem:[%s6057_s0 + $0x3f0] ss:$28 sps:$4 sm:$0xff]   ;;  %v4027_v61 = vld [vmem:[%s6057_s0 + $0x3f8] ss:$28 sps:$4 sm:$0xff]  }
  0x63   :  { %2248 = vmatprep.mubr.bf16.mxu0 %v3938_v62  ;;  %2482 = vmatpush1.bf16.msra.mxu0 %v3988_v63  ;;  %v4029_v62 = vld [vmem:[%s6057_s0 + $0x42c] ss:$28 sps:$4 sm:$0xff]   ;;  %v4031_v63 = vld [vmem:[%s6057_s0 + $0x434] ss:$28 sps:$4 sm:$0xff]  }
  0x64   :  { %2483 = vmatprep.subr.bf16.mxu0 %v4368_v0  ;;  %3605 = vmatpush1.bf16.msra.mxu1 %v4484_v18  ;;  %v4048_v18 = vld [vmem:[%s6056_s1 + $0x170] sm:$0xff]  }
  0x65   :  { %3590 = vmatprep.subr.bf16.mxu1 %v4368_v0 }
  0x67   :  { %2484 = vmatpush1.bf16.msra.mxu0 %v3995_v1  ;;  %v4033_v1 = vld [vmem:[%s6057_s0 + $0x428] ss:$28 sps:$4 sm:$0xff]  }
  0x68   :  { %2485 = vmatprep.subr.bf16.mxu0 %v4368_v0  ;;  %3606 = vmatpush1.bf16.msra.mxu1 %v4501_v22  ;;  %v3962_v22 = vld [vmem:[%s6057_s0 + $0x1fc] ss:$28 sps:$4 sm:$0xff]  }
  0x69   :  { %1960 = vmatmul.mubr.bf16.gmra.mrb[20].mxu1 %v3940_v2  ;;  %3591 = vmatprep.subr.bf16.mxu1 %v4368_v0  ;;  %v4034_v2 = vld [vmem:[%s6057_s0 + $0x430] ss:$28 sps:$4 sm:$0xff]  }
  0x6a   :  { %2249 = vmatmul.mubr.bf16.gmra.mrb[20].mxu0 %v3941_v3  ;;  %1967 = vmatprep.mubr.bf16.mxu1 %v3942_v4  ;;  %v4036_v3 = vld [vmem:[%s6057_s0 + $0x464] ss:$28 sps:$4 sm:$0xff]   ;;  %v4038_v4 = vld [vmem:[%s6057_s0 + $0x46c] ss:$28 sps:$4 sm:$0xff]  }
  0x6b   :  { %2256 = vmatprep.mubr.bf16.mxu0 %v3944_v5  ;;  %2486 = vmatpush1.bf16.msra.mxu0 %v4008_v6  ;;  %v4040_v5 = vld [vmem:[%s6057_s0 + $0x460] ss:$28 sps:$4 sm:$0xff]   ;;  %v4041_v6 = vld [vmem:[%s6057_s0 + $0x468] ss:$28 sps:$4 sm:$0xff]  }
  0x6c   :  { %2487 = vmatprep.subr.bf16.mxu0 %v4368_v0  ;;  %3607 = vmatpush1.bf16.msra.mxu1 %v4512_v24  ;;  %v3966_v24 = vld [vmem:[%s6057_s0 + $0x1f8] ss:$28 sps:$4 sm:$0xff]  }
  0x6d   :  { %3592 = vmatprep.subr.bf16.mxu1 %v4368_v0 }
  0x6f   :  { %2488 = vmatpush1.bf16.msra.mxu0 %v4015_v8  ;;  %v4044_v8 = vld [vmem:[%s6057_s0 + $0x4a4] ss:$28 sps:$4 sm:$0xff]  }
  0x70   :  { %2489 = vmatprep.subr.bf16.mxu0 %v4368_v0  ;;  %3608 = vmatpush1.bf16.msra.mxu1 %v4523_v26  ;;  %v3969_v26 = vld [vmem:[%s6057_s0 + $0x234] ss:$28 sps:$4 sm:$0xff]  }
  0x71   :  { %1968 = vmatmul.mubr.bf16.gmra.mrb[24].mxu1 %v3946_v7  ;;  %3593 = vmatprep.subr.bf16.mxu1 %v4368_v0  ;;  %v4042_v7 = vld [vmem:[%s6057_s0 + $0x49c] ss:$28 sps:$4 sm:$0xff]  }
  0x72   :  { %2257 = vmatmul.mubr.bf16.gmra.mrb[24].mxu0 %v3947_v9  ;;  %1975 = vmatprep.mubr.bf16.mxu1 %v3949_v10  ;;  %v4046_v9 = vld [vmem:[%s6057_s0 + $0x498] ss:$28 sps:$4 sm:$0xff]   ;;  %v4047_v10 = vld [vmem:[%s6057_s0 + $0x4a0] ss:$28 sps:$4 sm:$0xff]  }
  0x73   :  { %2264 = vmatprep.mubr.bf16.mxu0 %v3951_v11  ;;  %2490 = vmatpush1.bf16.msra.mxu0 %v4028_v12  ;;  %v4049_v11 = vld [vmem:[%s6057_s0 + $0x4d4] ss:$28 sps:$4 sm:$0xff]   ;;  %v4051_v12 = vld [vmem:[%s6057_s0 + $0x4dc] ss:$28 sps:$4 sm:$0xff]  }
  0x74   :  { %2491 = vmatprep.subr.bf16.mxu0 %v4368_v0  ;;  %3609 = vmatpush1.bf16.msra.mxu1 %v4534_v28  ;;  %v3974_v28 = vld [vmem:[%s6057_s0 + $0x238] ss:$28 sps:$4 sm:$0xff]  }
  0x75   :  { %3594 = vmatprep.subr.bf16.mxu1 %v4368_v0 }
  0x77   :  { %2492 = vmatpush1.bf16.msra.mxu0 %v4035_v14  ;;  %v4054_v14 = vld [vmem:[%s6057_s0 + $0x4d8] ss:$28 sps:$4 sm:$0xff]  }
  0x78   :  { %2493 = vmatprep.subr.bf16.mxu0 %v4368_v0  ;;  %3610 = vmatpush1.bf16.msra.mxu1 %v4545_v30  ;;  %v3978_v30 = vld [vmem:[%s6057_s0 + $0x274] ss:$28 sps:$4 sm:$0xff]  }
  0x79   :  { %1976 = vmatmul.mubr.bf16.gmra.mrb[28].mxu1 %v3953_v13  ;;  %3595 = vmatprep.subr.bf16.mxu1 %v4368_v0  ;;  %v4053_v13 = vld [vmem:[%s6057_s0 + $0x4d0] ss:$28 sps:$4 sm:$0xff]  }
  0x7a   :  { %2265 = vmatmul.mubr.bf16.gmra.mrb[28].mxu0 %v3954_v15  ;;  %1983 = vmatprep.mubr.bf16.mxu1 %v3956_v16  ;;  %v4056_v15 = vld [vmem:[%s6057_s0 + $0x50c] ss:$28 sps:$4 sm:$0xff]   ;;  %v4058_v16 = vld [vmem:[%s6057_s0 + $0x514] ss:$28 sps:$4 sm:$0xff]  }
  0x7b   :  { %2272 = vmatprep.mubr.bf16.mxu0 %v3958_v17  ;;  %2494 = vmatpush1.bf16.msra.mxu0 %v4048_v18  ;;  %v4060_v17 = vld [vmem:[%s6057_s0 + $0x508] ss:$28 sps:$4 sm:$0xff]   ;;  %v4061_v18 = vld [vmem:[%s6057_s0 + $0x510] ss:$28 sps:$4 sm:$0xff]  }
  0x7c   :  { %2495 = vmatprep.subr.bf16.mxu0 %v4368_v0  ;;  %3611 = vmatpush1.bf16.msra.mxu1 %v4556_v32  ;;  %v3981_v32 = vld [vmem:[%s6057_s0 + $0x270] ss:$28 sps:$4 sm:$0xff]  }
  0x7d   :  { %3596 = vmatprep.subr.bf16.mxu1 %v4368_v0  ;;  %v3971_v0 = vld [vmem:[%s6057_s0 + $0x23c] ss:$28 sps:$4 sm:$0xff]  }
  0x7f   :  { %2496 = vmatpush1.bf16.msra.mxu0 %v4055_v20  ;;  %v4066_v20 = vld [vmem:[%s6057_s0 + $0x14] ss:$28 sps:$4 sm:$0xff]  }
  0x80   :  { %3612 = vmatpush1.bf16.msra.mxu1 %v4567_v34  ;;  %v3984_v34 = vld [vmem:[%s6057_s0 + $0x2ac] ss:$28 sps:$4 sm:$0xff]  }
  0x81   :  { %1984 = vmatmul.mubr.bf16.gmra.mrb[32].mxu1 %v3960_v19  ;;  %3515 = vmatprep.subr.bf16.mxu1 %v4874_v55  ;;  %v4062_v19 = vld [vmem:[%s6057_s0 + $0x544] ss:$28 sps:$4 sm:$0xff]  }
  0x82   :  { %2273 = vmatmul.mubr.bf16.gmra.mrb[32].mxu0 %v3961_v21  ;;  %1991 = vmatprep.mubr.bf16.mxu1 %v3962_v22  ;;  %v4067_v21 = vld [vmem:[%s6057_s0 + $0x540] ss:$28 sps:$4 sm:$0xff]   ;;  %v4064_v22 = vld [vmem:[%s6057_s0 + $0x10] ss:$28 sps:$4 sm:$0xff]  }
  0x83   :  { %2280 = vmatprep.mubr.bf16.mxu0 %v3964_v23  ;;  %v4068_v23 = vld [vmem:[%s6057_s0 + $0x57c] ss:$28 sps:$4 sm:$0xff]  }
  0x89   :  { %1992 = vmatmul.mubr.bf16.gmra.mrb[36].mxu1 %v3966_v24  ;;  %v4070_v24 = vld [vmem:[%s6057_s0 + $0x4c] ss:$28 sps:$4 sm:$0xff]  }
  0x8a   :  { %2281 = vmatmul.mubr.bf16.gmra.mrb[36].mxu0 %v3967_v25  ;;  %1999 = vmatprep.mubr.bf16.mxu1 %v3969_v26  ;;  %v4072_v25 = vld [vmem:[%s6057_s0 + $0x578] ss:$28 sps:$4 sm:$0xff]   ;;  %v4073_v26 = vld [vmem:[%s6057_s0 + $0x48] ss:$28 sps:$4 sm:$0xff]  }
  0x8b   :  { %2288 = vmatprep.mubr.bf16.mxu0 %v3971_v0  ;;  %v4074_v0 = vld [vmem:[%s6057_s0 + $0x5b4] ss:$28 sps:$4 sm:$0xff]  }
  0x91   :  { %2000 = vmatmul.mubr.bf16.gmra.mrb[40].mxu1 %v3973_v27  ;;  %v4076_v27 = vld [vmem:[%s6057_s0 + $0x84] ss:$28 sps:$4 sm:$0xff]  }
  0x92   :  { %2289 = vmatmul.mubr.bf16.gmra.mrb[40].mxu0 %v3974_v28  ;;  %2007 = vmatprep.mubr.bf16.mxu1 %v3976_v29  ;;  %v4078_v28 = vld [vmem:[%s6057_s0 + $0x5b0] ss:$28 sps:$4 sm:$0xff]   ;;  %v4079_v29 = vld [vmem:[%s6057_s0 + $0x80] ss:$28 sps:$4 sm:$0xff]  }
  0x93   :  { %2296 = vmatprep.mubr.bf16.mxu0 %v3978_v30  ;;  %v4080_v30 = vld [vmem:[%s6057_s0 + $0x5ec] ss:$28 sps:$4 sm:$0xff]  }
  0x99   :  { %2008 = vmatmul.mubr.bf16.gmra.mrb[44].mxu1 %v3980_v31  ;;  %v4082_v31 = vld [vmem:[%s6057_s0 + $0xbc] ss:$28 sps:$4 sm:$0xff]  }
  0x9a   :  { %2297 = vmatmul.mubr.bf16.gmra.mrb[44].mxu0 %v3981_v32  ;;  %2015 = vmatprep.mubr.bf16.mxu1 %v3982_v33 }
  0x9b   :  { %2304 = vmatprep.mubr.bf16.mxu0 %v3984_v34  ;;  %v4084_v34 = vld [vmem:[%s6057_s0 + $0x5e8] ss:$28 sps:$4 sm:$0xff]  }
  0xa1   :  { %2016 = vmatmul.mubr.bf16.gmra.mrb[48].mxu1 %v3986_v35 }
  0xa2   :  { %2305 = vmatmul.mubr.bf16.gmra.mrb[48].mxu0 %v3987_v36  ;;  %2023 = vmatprep.mubr.bf16.mxu1 %v3989_v37  ;;  %v4085_v36 = vld [vmem:[%s6057_s0 + $0xb8] ss:$28 sps:$4 sm:$0xff]   ;;  %v4086_v37 = vld [vmem:[%s6057_s0 + $0x624] ss:$28 sps:$4 sm:$0xff]  }
  0xa3   :  { %2312 = vmatprep.mubr.bf16.mxu0 %v3991_v38 }
  0xa9   :  { %2024 = vmatmul.mubr.bf16.gmra.mrb[52].mxu1 %v3993_v39  ;;  %v4088_v39 = vld [vmem:[%s6057_s0 + $0xf4] ss:$28 sps:$4 sm:$0xff]  }
  0xaa   :  { %2313 = vmatmul.mubr.bf16.gmra.mrb[52].mxu0 %v3994_v40  ;;  %2031 = vmatprep.mubr.bf16.mxu1 %v3996_v41 }
  0xab   :  { %2320 = vmatprep.mubr.bf16.mxu0 %v3998_v42  ;;  %v4090_v42 = vld [vmem:[%s6057_s0 + $0x620] ss:$28 sps:$4 sm:$0xff]  }
  0xb1   :  { %2032 = vmatmul.mubr.bf16.gmra.mrb[56].mxu1 %v4000_v43 }
  0xb2   :  { %2321 = vmatmul.mubr.bf16.gmra.mrb[56].mxu0 %v4001_v44  ;;  %2039 = vmatprep.mubr.bf16.mxu1 %v4002_v45  ;;  %v4091_v44 = vld [vmem:[%s6057_s0 + $0xf0] ss:$28 sps:$4 sm:$0xff]   ;;  %v4092_v45 = vld [vmem:[%s6057_s0 + $0x65c] ss:$28 sps:$4 sm:$0xff]  }
  0xb3   :  { %2328 = vmatprep.mubr.bf16.mxu0 %v4004_v46 }
  0xb9   :  { %2040 = vmatmul.mubr.bf16.gmra.mrb[60].mxu1 %v4006_v47  ;;  %v4094_v47 = vld [vmem:[%s6057_s0 + $0x12c] ss:$28 sps:$4 sm:$0xff]  }
  0xba   :  { %2329 = vmatmul.mubr.bf16.gmra.mrb[60].mxu0 %v4007_v48  ;;  %2047 = vmatprep.mubr.bf16.mxu1 %v4009_v49 }
  0xbb   :  { %2336 = vmatprep.mubr.bf16.mxu0 %v4011_v50  ;;  %v4096_v50 = vld [vmem:[%s6057_s0 + $0x658] ss:$28 sps:$4 sm:$0xff]  }
  0xc1   :  { %2048 = vmatmul.mubr.bf16.gmra.mrb[64].mxu1 %v4013_v51 }
  0xc2   :  { %2337 = vmatmul.mubr.bf16.gmra.mrb[64].mxu0 %v4014_v52  ;;  %2055 = vmatprep.mubr.bf16.mxu1 %v4016_v53  ;;  %v4097_v52 = vld [vmem:[%s6057_s0 + $0x128] ss:$28 sps:$4 sm:$0xff]   ;;  %v4098_v53 = vld [vmem:[%s6057_s0 + $0x694] ss:$28 sps:$4 sm:$0xff]  }
  0xc3   :  { %2344 = vmatprep.mubr.bf16.mxu0 %v4018_v54 }
  0xc9   :  { %2056 = vmatmul.mubr.bf16.gmra.mrb[68].mxu1 %v4020_v56  ;;  %v4100_v56 = vld [vmem:[%s6057_s0 + $0x164] ss:$28 sps:$4 sm:$0xff]  }
  0xca   :  { %2345 = vmatmul.mubr.bf16.gmra.mrb[68].mxu0 %v4021_v57  ;;  %2063 = vmatprep.mubr.bf16.mxu1 %v4022_v58 }
  0xcb   :  { %2352 = vmatprep.mubr.bf16.mxu0 %v4024_v59  ;;  %v4102_v59 = vld [vmem:[%s6057_s0 + $0x690] ss:$28 sps:$4 sm:$0xff]  }
  0xd1   :  { %2064 = vmatmul.mubr.bf16.gmra.mrb[72].mxu1 %v4026_v60 }
  0xd2   :  { %2353 = vmatmul.mubr.bf16.gmra.mrb[72].mxu0 %v4027_v61  ;;  %2071 = vmatprep.mubr.bf16.mxu1 %v4029_v62  ;;  %v4103_v61 = vld [vmem:[%s6057_s0 + $0x160] ss:$28 sps:$4 sm:$0xff]   ;;  %v4104_v62 = vld [vmem:[%s6057_s0 + $0x6cc] ss:$28 sps:$4 sm:$0xff]  }
  0xd3   :  { %2360 = vmatprep.mubr.bf16.mxu0 %v4031_v63 }
  0xd9   :  { %2072 = vmatmul.mubr.bf16.gmra.mrb[76].mxu1 %v4033_v1  ;;  %v4106_v1 = vld [vmem:[%s6057_s0 + $0x19c] ss:$28 sps:$4 sm:$0xff]  }
  0xda   :  { %2361 = vmatmul.mubr.bf16.gmra.mrb[76].mxu0 %v4034_v2  ;;  %2079 = vmatprep.mubr.bf16.mxu1 %v4036_v3 }
  0xdb   :  { %2368 = vmatprep.mubr.bf16.mxu0 %v4038_v4  ;;  %v4108_v4 = vld [vmem:[%s6057_s0 + $0x6c8] ss:$28 sps:$4 sm:$0xff]  }
  0xe1   :  { %2080 = vmatmul.mubr.bf16.gmra.mrb[80].mxu1 %v4040_v5 }
  0xe2   :  { %2369 = vmatmul.mubr.bf16.gmra.mrb[80].mxu0 %v4041_v6  ;;  %2087 = vmatprep.mubr.bf16.mxu1 %v4042_v7  ;;  %v4109_v6 = vld [vmem:[%s6057_s0 + $0x198] ss:$28 sps:$4 sm:$0xff]   ;;  %v4112_v7 = vld [vmem:[%s6057_s0 + $0x54c] ss:$28 sps:$4 sm:$0xff]  }
  0xe3   :  { %2376 = vmatprep.mubr.bf16.mxu0 %v4044_v8 }
  0xe9   :  { %2088 = vmatmul.mubr.bf16.gmra.mrb[84].mxu1 %v4046_v9  ;;  %v4113_v9 = vld [vmem:[%s6057_s0 + $0x1d4] ss:$28 sps:$4 sm:$0xff]  }
  0xea   :  { %2377 = vmatmul.mubr.bf16.gmra.mrb[84].mxu0 %v4047_v10  ;;  %2095 = vmatprep.mubr.bf16.mxu1 %v4049_v11 }
  0xeb   :  { %2384 = vmatprep.mubr.bf16.mxu0 %v4051_v12  ;;  %v4110_v12 = vld [vmem:[%s6057_s0 + $0x548] ss:$28 sps:$4 sm:$0xff]  }
  0xf1   :  { %2096 = vmatmul.mubr.bf16.gmra.mrb[88].mxu1 %v4053_v13 }
  0xf2   :  { %2385 = vmatmul.mubr.bf16.gmra.mrb[88].mxu0 %v4054_v14  ;;  %2103 = vmatprep.mubr.bf16.mxu1 %v4056_v15  ;;  %v4115_v14 = vld [vmem:[%s6057_s0 + $0x1d0] ss:$28 sps:$4 sm:$0xff]  }
  0xf3   :  { %2392 = vmatprep.mubr.bf16.mxu0 %v4058_v16  ;;  %v4117_v16 = vld [vmem:[%s6057_s0 + $0x584] ss:$28 sps:$4 sm:$0xff]  }
  0xf9   :  { %2104 = vmatmul.mubr.bf16.gmra.mrb[92].mxu1 %v4060_v17  ;;  %v4119_v17 = vld [vmem:[%s6057_s0 + $0x20c] ss:$28 sps:$4 sm:$0xff]  }
  0xfa   :  { %2393 = vmatmul.mubr.bf16.gmra.mrb[92].mxu0 %v4061_v18  ;;  %2111 = vmatprep.mubr.bf16.mxu1 %v4062_v19 }
  0xfb   :  { %2497 = vmatprep.mubr.bf16.mxu0 %v4066_v20  ;;  %v4121_v20 = vld [vmem:[%s6057_s0 + $0x580] ss:$28 sps:$4 sm:$0xff]  }
 0x101   :  { %2112 = vmatmul.mubr.bf16.gmra.mrb[96].mxu1 %v4067_v21 }
 0x102   :  { %2498 = vmatmul.mubr.bf16.vlgmr.msra.gmra.mrb[0].mxu0 %v4064_v22  ;;  %2119 = vmatprep.mubr.bf16.mxu1 %v4068_v23  ;;  %v4122_v22 = vld [vmem:[%s6057_s0 + $0x208] ss:$28 sps:$4 sm:$0xff]   ;;  %v4123_v23 = vld [vmem:[%s6057_s0 + $0x5bc] ss:$28 sps:$4 sm:$0xff]  }
 0x103   :  { %2505 = vmatprep.mubr.bf16.mxu0 %v4070_v24  ;;  %v4125_v24 = vld [vmem:[%s6057_s0 + $0x244] ss:$28 sps:$4 sm:$0xff]  }
 0x109   :  { %2120 = vmatmul.mubr.bf16.gmra.mrb[100].mxu1 %v4072_v25 }
 0x10a   :  { %2506 = vmatmul.mubr.bf16.gmra.mrb[4].mxu0 %v4073_v26  ;;  %2127 = vmatprep.mubr.bf16.mxu1 %v4074_v0  ;;  %v4127_v0 = vld [vmem:[%s6057_s0 + $0x5b8] ss:$28 sps:$4 sm:$0xff]  }
 0x10b   :  { %2513 = vmatprep.mubr.bf16.mxu0 %v4076_v27 }
 0x111   :  { %2128 = vmatmul.mubr.bf16.gmra.mrb[104].mxu1 %v4078_v28  ;;  %v4128_v28 = vld [vmem:[%s6057_s0 + $0x240] ss:$28 sps:$4 sm:$0xff]  }
 0x112   :  { %2514 = vmatmul.mubr.bf16.gmra.mrb[8].mxu0 %v4079_v29  ;;  %2135 = vmatprep.mubr.bf16.mxu1 %v4080_v30  ;;  %v4129_v29 = vld [vmem:[%s6057_s0 + $0x5f4] ss:$28 sps:$4 sm:$0xff]  }
 0x113   :  { %2521 = vmatprep.mubr.bf16.mxu0 %v4082_v31  ;;  %v4131_v31 = vld [vmem:[%s6057_s0 + $0x27c] ss:$28 sps:$4 sm:$0xff]  }
 0x114   :  { %v4997_v32 = vpop.f32.mrb[0].mxu1 }
 0x115   :  { %v1923_v33 = vpop.f32.mrb[1].mxu1 }
 0x116   :  { %v5002_v35 = vpop.f32.mrb[2].mxu1 }
 0x117   :  { %v1926_v38 = vpop.f32.mrb[3].mxu1 }
 0x118   :  { %v4134_v38 = vld [vmem:[%s6057_s0 + $0x278] ss:$28 sps:$4 sm:$0xff]  }
 0x119   :  { %2136 = vmatmul.mubr.bf16.gmra.mrb[108].mxu1 %v4084_v34 }
 0x11a   :  { %2522 = vmatmul.mubr.bf16.gmra.mrb[12].mxu0 %v4085_v36  ;;  %2143 = vmatprep.mubr.bf16.mxu1 %v4086_v37  ;;  %v4133_v36 = vld [vmem:[%s6057_s0 + $0x5f0] ss:$28 sps:$4 sm:$0xff]  }
 0x11b   :  { %2529 = vmatprep.mubr.bf16.mxu0 %v4088_v39  ;;  %v4135_v39 = vld [vmem:[%s6057_s0 + $0x62c] ss:$28 sps:$4 sm:$0xff]  }
 0x11c   :  { %v5013_v40 = vpop.f32.mrb[4].mxu1 }
 0x11d   :  { %v1931_v41 = vpop.f32.mrb[5].mxu1 }
 0x11e   :  { %v5018_v43 = vpop.f32.mrb[6].mxu1 }
 0x11f   :  { %v1934_v46 = vpop.f32.mrb[7].mxu1 }
 0x120   :  { %v4139_v46 = vld [vmem:[%s6057_s0 + $0x628] ss:$28 sps:$4 sm:$0xff]  }
 0x121   :  { %2144 = vmatmul.mubr.bf16.gmra.mrb[112].mxu1 %v4090_v42  ;;  %v4137_v42 = vld [vmem:[%s6057_s0 + $0x2b4] ss:$28 sps:$4 sm:$0xff]  }
 0x122   :  { %2530 = vmatmul.mubr.bf16.gmra.mrb[16].mxu0 %v4091_v44  ;;  %2151 = vmatprep.mubr.bf16.mxu1 %v4092_v45 }
 0x123   :  { %2537 = vmatprep.mubr.bf16.mxu0 %v4094_v47 }
 0x124   :  { %v5029_v48 = vpop.f32.mrb[8].mxu1 }
 0x125   :  { %v1939_v49 = vpop.f32.mrb[9].mxu1 }
 0x126   :  { %v5034_v51 = vpop.f32.mrb[10].mxu1  ;;  %v4140_v49 = vld [vmem:[%s6057_s0 + $0x2b0] ss:$28 sps:$4 sm:$0xff]  }
 0x127   :  { %v1942_v54 = vpop.f32.mrb[11].mxu1 }
 0x129   :  { %2152 = vmatmul.mubr.bf16.gmra.mrb[116].mxu1 %v4096_v50  ;;  %v4141_v50 = vld [vmem:[%s6057_s0 + $0x664] ss:$28 sps:$4 sm:$0xff]  }
 0x12a   :  { %2538 = vmatmul.mubr.bf16.gmra.mrb[20].mxu0 %v4097_v52  ;;  %2159 = vmatprep.mubr.bf16.mxu1 %v4098_v53  ;;  %v4143_v53 = vld [vmem:[%s6057_s0 + $0x2ec] ss:$28 sps:$4 sm:$0xff]  }
 0x12b   :  { %2545 = vmatprep.mubr.bf16.mxu0 %v4100_v56 }
 0x12c   :  { %v5045_v57 = vpop.f32.mrb[12].mxu1 }
 0x12d   :  { %v1947_v58 = vpop.f32.mrb[13].mxu1 }
 0x12e   :  { %v5050_v60 = vpop.f32.mrb[14].mxu1  ;;  %v4145_v58 = vld [vmem:[%s6057_s0 + $0x660] ss:$28 sps:$4 sm:$0xff]  }
 0x12f   :  { %v1950_v63 = vpop.f32.mrb[15].mxu1 }
 0x131   :  { %2160 = vmatmul.mubr.bf16.gmra.mrb[120].mxu1 %v4102_v59 }
 0x132   :  { %2546 = vmatmul.mubr.bf16.gmra.mrb[24].mxu0 %v4103_v61  ;;  %2167 = vmatprep.mubr.bf16.mxu1 %v4104_v62  ;;  %v4146_v61 = vld [vmem:[%s6057_s0 + $0x2e8] ss:$28 sps:$4 sm:$0xff]   ;;  %v4147_v62 = vld [vmem:[%s6057_s0 + $0x69c] ss:$28 sps:$4 sm:$0xff]  }
 0x133   :  { %2553 = vmatprep.mubr.bf16.mxu0 %v4106_v1  ;;  %v4149_v1 = vld [vmem:[%s6057_s0 + $0x324] ss:$28 sps:$4 sm:$0xff]  }
 0x134   :  { %v5061_v2 = vpop.f32.mrb[16].mxu1 }
 0x135   :  { %v1955_v3 = vpop.f32.mrb[17].mxu1 }
 0x136   :  { %v5066_v5 = vpop.f32.mrb[18].mxu1 }
 0x137   :  { %v1958_v8 = vpop.f32.mrb[19].mxu1 }
 0x138   :  { %v4152_v8 = vld [vmem:[%s6057_s0 + $0x320] ss:$28 sps:$4 sm:$0xff]  }
 0x139   :  { %2168 = vmatmul.mubr.bf16.gmra.mrb[124].mxu1 %v4108_v4 }
 0x13a   :  { %2554 = vmatmul.mubr.bf16.gmra.mrb[28].mxu0 %v4109_v6  ;;  %2400 = vmatprep.mubr.bf16.mxu1 %v4112_v7  ;;  %v4151_v6 = vld [vmem:[%s6057_s0 + $0x698] ss:$28 sps:$4 sm:$0xff]  }
 0x13b   :  { %2561 = vmatprep.mubr.bf16.mxu0 %v4113_v9  ;;  %v4153_v9 = vld [vmem:[%s6057_s0 + $0x6d4] ss:$28 sps:$4 sm:$0xff]  }
 0x13c   :  { %v5077_v10 = vpop.f32.mrb[20].mxu1 }
 0x13d   :  { %v1963_v11 = vpop.f32.mrb[21].mxu1 }
 0x13e   :  { %v5082_v13 = vpop.f32.mrb[22].mxu1 }
 0x13f   :  { %v1966_v15 = vpop.f32.mrb[23].mxu1 }
 0x141   :  { %2401 = vmatmul.mubr.bf16.vlgmr.msra.gmra.mrb[96].mxu1 %v4110_v12  ;;  %v4155_v12 = vld [vmem:[%s6057_s0 + $0x35c] ss:$28 sps:$4 sm:$0xff]  }
 0x142   :  { %2562 = vmatmul.mubr.bf16.gmra.mrb[32].mxu0 %v4115_v14  ;;  %3516 = vmatpush3.bf16.msra.mxu1 %v4874_v55 }
 0x143   :  { %2408 = vmatprep.mubr.bf16.mxu1 %v4117_v16  ;;  %2569 = vmatprep.mubr.bf16.mxu0 %v4119_v17  ;;  %v4157_v16 = vld [vmem:[%s6057_s0 + $0x6d0] ss:$28 sps:$4 sm:$0xff]  }
 0x144   :  { %v5094_v18 = vpop.f32.mrb[24].mxu1 }
 0x145   :  { %v1971_v19 = vpop.f32.mrb[25].mxu1 }
 0x146   :  { %v5099_v21 = vpop.f32.mrb[26].mxu1  ;;  %v4158_v19 = vld [vmem:[%s6057_s0 + $0x358] ss:$28 sps:$4 sm:$0xff]  }
 0x147   :  { %v1974_v55 = vpop.f32.mrb[27].mxu1 }
 0x149   :  { %2409 = vmatmul.mubr.bf16.gmra.mrb[100].mxu1 %v4121_v20  ;;  %v4161_v20 = vld [vmem:[%s6057_s0 + $0x18] ss:$28 sps:$4 sm:$0xff]  }
 0x14a   :  { %2570 = vmatmul.mubr.bf16.gmra.mrb[36].mxu0 %v4122_v22  ;;  %2416 = vmatprep.mubr.bf16.mxu1 %v4123_v23  ;;  %v4159_v23 = vld [vmem:[%s6057_s0 + $0x394] ss:$28 sps:$4 sm:$0xff]  }
 0x14b   :  { %2577 = vmatprep.mubr.bf16.mxu0 %v4125_v24 }
 0x14c   :  { %v5110_v25 = vpop.f32.mrb[28].mxu1 }
 0x14d   :  { %v1979_v26 = vpop.f32.mrb[29].mxu1 }
 0x14e   :  { %v5115_v27 = vpop.f32.mrb[30].mxu1  ;;  %v4163_v26 = vld [vmem:[%s6057_s0 + $0x50] ss:$28 sps:$4 sm:$0xff]  }
 0x14f   :  { %v1982_v30 = vpop.f32.mrb[31].mxu1 }
 0x151   :  { %2417 = vmatmul.mubr.bf16.gmra.mrb[104].mxu1 %v4127_v0 }
 0x152   :  { %2578 = vmatmul.mubr.bf16.gmra.mrb[40].mxu0 %v4128_v28  ;;  %2424 = vmatprep.mubr.bf16.mxu1 %v4129_v29  ;;  %v4162_v28 = vld [vmem:[%s6057_s0 + $0x390] ss:$28 sps:$4 sm:$0xff]   ;;  %v4166_v29 = vld [vmem:[%s6057_s0 + $0x88] ss:$28 sps:$4 sm:$0xff]  }
 0x153   :  { %2585 = vmatprep.mubr.bf16.mxu0 %v4131_v31  ;;  %v4164_v31 = vld [vmem:[%s6057_s0 + $0x3cc] ss:$28 sps:$4 sm:$0xff]  }
 0x154   :  { %v5126_v33 = vpop.f32.mrb[32].mxu1 }
 0x155   :  { %v1987_v34 = vpop.f32.mrb[33].mxu1 }
 0x156   :  { %v5131_v37 = vpop.f32.mrb[34].mxu1 }
 0x157   :  { %v1990_v41 = vpop.f32.mrb[35].mxu1 }
 0x158   :  { %v4167_v41 = vld [vmem:[%s6057_s0 + $0x3c8] ss:$28 sps:$4 sm:$0xff]  }
 0x159   :  { %2425 = vmatmul.mubr.bf16.gmra.mrb[108].mxu1 %v4133_v36 }
 0x15a   :  { %2586 = vmatmul.mubr.bf16.gmra.mrb[44].mxu0 %v4134_v38  ;;  %2432 = vmatprep.mubr.bf16.mxu1 %v4135_v39  ;;  %v4168_v38 = vld [vmem:[%s6057_s0 + $0xc0] ss:$28 sps:$4 sm:$0xff]  }
 0x15b   :  { %2593 = vmatprep.mubr.bf16.mxu0 %v4137_v42  ;;  %v4171_v42 = vld [vmem:[%s6057_s0 + $0xf8] ss:$28 sps:$4 sm:$0xff]  }
 0x15c   :  { %v5142_v44 = vpop.f32.mrb[36].mxu1 }
 0x15d   :  { %v1995_v45 = vpop.f32.mrb[37].mxu1 }
 0x15e   :  { %v5147_v47 = vpop.f32.mrb[38].mxu1 }
 0x15f   :  { %v1998_v52 = vpop.f32.mrb[39].mxu1 }
 0x160   :  { %v4173_v52 = vld [vmem:[%s6057_s0 + $0x130] ss:$28 sps:$4 sm:$0xff]  }
 0x161   :  { %2433 = vmatmul.mubr.bf16.gmra.mrb[112].mxu1 %v4139_v46  ;;  %v4169_v46 = vld [vmem:[%s6057_s0 + $0x404] ss:$28 sps:$4 sm:$0xff]  }
 0x162   :  { %2594 = vmatmul.mubr.bf16.gmra.mrb[48].mxu0 %v4140_v49  ;;  %2440 = vmatprep.mubr.bf16.mxu1 %v4141_v50 }
 0x163   :  { %2601 = vmatprep.mubr.bf16.mxu0 %v4143_v53 }
 0x164   :  { %v5158_v54 = vpop.f32.mrb[40].mxu1 }
 0x165   :  { %v2003_v56 = vpop.f32.mrb[41].mxu1 }
 0x166   :  { %v5163_v59 = vpop.f32.mrb[42].mxu1  ;;  %v4172_v56 = vld [vmem:[%s6057_s0 + $0x400] ss:$28 sps:$4 sm:$0xff]  }
 0x167   :  { %v2006_v63 = vpop.f32.mrb[43].mxu1 }
 0x169   :  { %2441 = vmatmul.mubr.bf16.gmra.mrb[116].mxu1 %v4145_v58  ;;  %v4176_v58 = vld [vmem:[%s6057_s0 + $0x168] ss:$28 sps:$4 sm:$0xff]  }
 0x16a   :  { %2602 = vmatmul.mubr.bf16.gmra.mrb[52].mxu0 %v4146_v61  ;;  %2448 = vmatprep.mubr.bf16.mxu1 %v4147_v62  ;;  %v4174_v62 = vld [vmem:[%s6057_s0 + $0x43c] ss:$28 sps:$4 sm:$0xff]  }
 0x16b   :  { %2609 = vmatprep.mubr.bf16.mxu0 %v4149_v1 }
 0x16c   :  { %v5174_v3 = vpop.f32.mrb[44].mxu1 }
 0x16d   :  { %v2011_v4 = vpop.f32.mrb[45].mxu1 }
 0x16e   :  { %v5179_v7 = vpop.f32.mrb[46].mxu1  ;;  %v4178_v4 = vld [vmem:[%s6057_s0 + $0x1a0] ss:$28 sps:$4 sm:$0xff]  }
 0x16f   :  { %v2014_v11 = vpop.f32.mrb[47].mxu1 }
 0x171   :  { %2449 = vmatmul.mubr.bf16.gmra.mrb[120].mxu1 %v4151_v6 }
 0x172   :  { %2610 = vmatmul.mubr.bf16.gmra.mrb[56].mxu0 %v4152_v8  ;;  %2456 = vmatprep.mubr.bf16.mxu1 %v4153_v9  ;;  %v4177_v8 = vld [vmem:[%s6057_s0 + $0x438] ss:$28 sps:$4 sm:$0xff]  }
 0x173   :  { %2617 = vmatprep.mubr.bf16.mxu0 %v4155_v12  ;;  %v4181_v9 = vld [vmem:[%s6057_s0 + $0x1d8] ss:$28 sps:$4 sm:$0xff]  }
 0x174   :  { %v5190_v14 = vpop.f32.mrb[48].mxu1  ;;  %v4179_v12 = vld [vmem:[%s6057_s0 + $0x474] ss:$28 sps:$4 sm:$0xff]  }
 0x175   :  { %v2019_v15 = vpop.f32.mrb[49].mxu1 }
 0x176   :  { %v5195_v17 = vpop.f32.mrb[50].mxu1 }
 0x177   :  { %v2022_v22 = vpop.f32.mrb[51].mxu1 }
 0x178   :  { %v4182_v22 = vld [vmem:[%s6057_s0 + $0x470] ss:$28 sps:$4 sm:$0xff]  }
 0x179   :  { %2457 = vmatmul.mubr.bf16.gmra.mrb[124].mxu1 %v4157_v16 }
 0x17a   :  { %2618 = vmatmul.mubr.bf16.gmra.mrb[60].mxu0 %v4158_v19  ;;  %3517 = vmatprep.mubr.msk.bf16.mxu1 %vm1790_vm0, %v4161_v20  ;;  %v4183_v19 = vld [vmem:[%s6057_s0 + $0x210] ss:$28 sps:$4 sm:$0xff]  }
 0x17b   :  { %2625 = vmatprep.mubr.bf16.mxu0 %v4159_v23  ;;  %v4186_v23 = vld [vmem:[%s6057_s0 + $0x248] ss:$28 sps:$4 sm:$0xff]  }
 0x17c   :  { %v5207_v55 = vpop.f32.mrb[52].mxu1 }
 0x17d   :  { %v2027_v24 = vpop.f32.mrb[53].mxu1 }
 0x17e   :  { %v5212_v0 = vpop.f32.mrb[54].mxu1 }
 0x17f   :  { %v2030_v30 = vpop.f32.mrb[55].mxu1 }
 0x180   :  { %v4188_v30 = vld [vmem:[%s6057_s0 + $0x280] ss:$28 sps:$4 sm:$0xff]  }
 0x181   :  { %3518 = vmatmul.mubr.msk.bf16.vlgmr.msra.gmra.mrb[128].mxu1 %vm1790_vm0, %v4163_v26  ;;  %v4184_v26 = vld [vmem:[%s6057_s0 + $0x4ac] ss:$28 sps:$4 sm:$0xff]  }
 0x182   :  { %2626 = vmatmul.mubr.bf16.gmra.mrb[64].mxu0 %v4162_v28  ;;  %3521 = vmatprep.mubr.msk.bf16.mxu1 %vm1790_vm0, %v4166_v29 }
 0x183   :  { %2633 = vmatprep.mubr.bf16.mxu0 %v4164_v31 }
 0x184   :  { %v5225_v34 = vpop.f32.mrb[56].mxu1 }
 0x185   :  { %v2035_v36 = vpop.f32.mrb[57].mxu1 }
 0x186   :  { %v5230_v39 = vpop.f32.mrb[58].mxu1  ;;  %v4187_v36 = vld [vmem:[%s6057_s0 + $0x4a8] ss:$28 sps:$4 sm:$0xff]  }
 0x187   :  { %v2038_v45 = vpop.f32.mrb[59].mxu1 }
 0x189   :  { %3522 = vmatmul.mubr.msk.bf16.gmra.mrb[132].mxu1 %vm1790_vm0, %v4168_v38  ;;  %v4191_v38 = vld [vmem:[%s6057_s0 + $0x2b8] ss:$28 sps:$4 sm:$0xff]  }
 0x18a   :  { %2634 = vmatmul.mubr.bf16.gmra.mrb[68].mxu0 %v4167_v41  ;;  %3525 = vmatprep.mubr.msk.bf16.mxu1 %vm1790_vm0, %v4171_v42  ;;  %v4189_v42 = vld [vmem:[%s6057_s0 + $0x4e4] ss:$28 sps:$4 sm:$0xff]  }
 0x18b   :  { %2641 = vmatprep.mubr.bf16.mxu0 %v4169_v46 }
 0x18c   :  { %v5243_v49 = vpop.f32.mrb[60].mxu1 }
 0x18d   :  { %v2043_v50 = vpop.f32.mrb[61].mxu1 }
 0x18e   :  { %v5248_v53 = vpop.f32.mrb[62].mxu1  ;;  %v4193_v50 = vld [vmem:[%s6057_s0 + $0x2f0] ss:$28 sps:$4 sm:$0xff]  }
 0x18f   :  { %v2046_v61 = vpop.f32.mrb[63].mxu1 }
 0x191   :  { %3526 = vmatmul.mubr.msk.bf16.gmra.mrb[136].mxu1 %vm1790_vm0, %v4173_v52 }
 0x192   :  { %2642 = vmatmul.mubr.bf16.gmra.mrb[72].mxu0 %v4172_v56  ;;  %3529 = vmatprep.mubr.msk.bf16.mxu1 %vm1790_vm0, %v4176_v58  ;;  %v4192_v56 = vld [vmem:[%s6057_s0 + $0x4e0] ss:$28 sps:$4 sm:$0xff]   ;;  %v4196_v58 = vld [vmem:[%s6057_s0 + $0x328] ss:$28 sps:$4 sm:$0xff]  }
 0x193   :  { %2649 = vmatprep.mubr.bf16.mxu0 %v4174_v62  ;;  %v4194_v62 = vld [vmem:[%s6057_s0 + $0x51c] ss:$28 sps:$4 sm:$0xff]  }
 0x194   :  { %v5261_v63 = vpop.f32.mrb[64].mxu1 }
 0x195   :  { %v2051_v1 = vpop.f32.mrb[65].mxu1 }
 0x196   :  { %v5266_v6 = vpop.f32.mrb[66].mxu1 }
 0x197   :  { %v2054_v11 = vpop.f32.mrb[67].mxu1 }
 0x198   :  { %v4197_v11 = vld [vmem:[%s6057_s0 + $0x518] ss:$28 sps:$4 sm:$0xff]  }
 0x199   :  { %3530 = vmatmul.mubr.msk.bf16.gmra.mrb[140].mxu1 %vm1790_vm0, %v4178_v4 }
 0x19a   :  { %2650 = vmatmul.mubr.bf16.gmra.mrb[76].mxu0 %v4177_v8  ;;  %3533 = vmatprep.mubr.msk.bf16.mxu1 %vm1790_vm0, %v4181_v9  ;;  %v4198_v8 = vld [vmem:[%s6057_s0 + $0x360] ss:$28 sps:$4 sm:$0xff]  }
 0x19b   :  { %2657 = vmatprep.mubr.bf16.mxu0 %v4179_v12  ;;  %v4201_v12 = vld [vmem:[%s6057_s0 + $0x398] ss:$28 sps:$4 sm:$0xff]  }
 0x19c   :  { %v5279_v15 = vpop.f32.mrb[68].mxu1 }
 0x19d   :  { %v2059_v16 = vpop.f32.mrb[69].mxu1 }
 0x19e   :  { %v5284_v20 = vpop.f32.mrb[70].mxu1 }
 0x19f   :  { %v2062_v24 = vpop.f32.mrb[71].mxu1 }
 0x1a0   :  { %v4203_v24 = vld [vmem:[%s6057_s0 + $0x3d0] ss:$28 sps:$4 sm:$0xff]  }
 0x1a1   :  { %3534 = vmatmul.mubr.msk.bf16.gmra.mrb[144].mxu1 %vm1790_vm0, %v4183_v19  ;;  %v4199_v19 = vld [vmem:[%s6057_s0 + $0x554] ss:$28 sps:$4 sm:$0xff]  }
 0x1a2   :  { %2658 = vmatmul.mubr.bf16.gmra.mrb[80].mxu0 %v4182_v22  ;;  %3537 = vmatprep.mubr.msk.bf16.mxu1 %vm1790_vm0, %v4186_v23 }
 0x1a3   :  { %2665 = vmatprep.mubr.bf16.mxu0 %v4184_v26 }
 0x1a4   :  { %v5297_v28 = vpop.f32.mrb[72].mxu1 }
 0x1a5   :  { %v2067_v29 = vpop.f32.mrb[73].mxu1 }
 0x1a6   :  { %v5302_v31 = vpop.f32.mrb[74].mxu1  ;;  %v4202_v29 = vld [vmem:[%s6057_s0 + $0x550] ss:$28 sps:$4 sm:$0xff]  }
 0x1a7   :  { %v2070_v41 = vpop.f32.mrb[75].mxu1 }
 0x1a9   :  { %3538 = vmatmul.mubr.msk.bf16.gmra.mrb[148].mxu1 %vm1790_vm0, %v4188_v30  ;;  %v4206_v30 = vld [vmem:[%s6057_s0 + $0x408] ss:$28 sps:$4 sm:$0xff]  }
 0x1aa   :  { %2666 = vmatmul.mubr.bf16.gmra.mrb[84].mxu0 %v4187_v36  ;;  %3541 = vmatprep.mubr.msk.bf16.mxu1 %vm1790_vm0, %v4191_v38  ;;  %v4204_v38 = vld [vmem:[%s6057_s0 + $0x58c] ss:$28 sps:$4 sm:$0xff]  }
 0x1ab   :  { %2673 = vmatprep.mubr.bf16.mxu0 %v4189_v42 }
 0x1ac   :  { %v5315_v45 = vpop.f32.mrb[76].mxu1 }
 0x1ad   :  { %v2075_v46 = vpop.f32.mrb[77].mxu1 }
 0x1ae   :  { %v5320_v52 = vpop.f32.mrb[78].mxu1  ;;  %v4208_v46 = vld [vmem:[%s6057_s0 + $0x440] ss:$28 sps:$4 sm:$0xff]  }
 0x1af   :  { %v2078_v61 = vpop.f32.mrb[79].mxu1 }
 0x1b1   :  { %3542 = vmatmul.mubr.msk.bf16.gmra.mrb[152].mxu1 %vm1790_vm0, %v4193_v50 }
 0x1b2   :  { %2674 = vmatmul.mubr.bf16.gmra.mrb[88].mxu0 %v4192_v56  ;;  %3545 = vmatprep.mubr.msk.bf16.mxu1 %vm1790_vm0, %v4196_v58  ;;  %v4207_v56 = vld [vmem:[%s6057_s0 + $0x588] ss:$28 sps:$4 sm:$0xff]   ;;  %v4211_v58 = vld [vmem:[%s6057_s0 + $0x478] ss:$28 sps:$4 sm:$0xff]  }
 0x1b3   :  { %2681 = vmatprep.mubr.bf16.mxu0 %v4194_v62  ;;  %v4209_v62 = vld [vmem:[%s6057_s0 + $0x5c4] ss:$28 sps:$4 sm:$0xff]  }
 0x1b4   :  { %v5333_v1 = vpop.f32.mrb[80].mxu1 }
 0x1b5   :  { %v2083_v4 = vpop.f32.mrb[81].mxu1 }
 0x1b6   :  { %v5338_v9 = vpop.f32.mrb[82].mxu1 }
 0x1b7   :  { %v2086_v16 = vpop.f32.mrb[83].mxu1 }
 0x1b8   :  { %v4212_v16 = vld [vmem:[%s6057_s0 + $0x5c0] ss:$28 sps:$4 sm:$0xff]  }
 0x1b9   :  { %3546 = vmatmul.mubr.msk.bf16.gmra.mrb[156].mxu1 %vm1790_vm0, %v4198_v8 }
 0x1ba   :  { %2682 = vmatmul.mubr.bf16.gmra.mrb[92].mxu0 %v4197_v11  ;;  %3549 = vmatprep.mubr.msk.bf16.mxu1 %vm1790_vm0, %v4201_v12  ;;  %v4213_v11 = vld [vmem:[%s6057_s0 + $0x4b0] ss:$28 sps:$4 sm:$0xff]  }
 0x1bb   :  { %2689 = vmatprep.mubr.bf16.mxu0 %v4199_v19  ;;  %v4216_v19 = vld [vmem:[%s6057_s0 + $0x4e8] ss:$28 sps:$4 sm:$0xff]  }
 0x1bc   :  { %v5351_v22 = vpop.f32.mrb[84].mxu1 }
 0x1bd   :  { %v2091_v23 = vpop.f32.mrb[85].mxu1 }
 0x1be   :  { %v5356_v26 = vpop.f32.mrb[86].mxu1 }
 0x1bf   :  { %v2094_v36 = vpop.f32.mrb[87].mxu1 }
 0x1c1   :  { %3550 = vmatmul.mubr.msk.bf16.gmra.mrb[160].mxu1 %vm1790_vm0, %v4203_v24  ;;  %v4214_v24 = vld [vmem:[%s6057_s0 + $0x5fc] ss:$28 sps:$4 sm:$0xff]  }
 0x1c2   :  { %2690 = vmatmul.mubr.bf16.gmra.mrb[96].mxu0 %v4202_v29  ;;  %3553 = vmatprep.mubr.msk.bf16.mxu1 %vm1790_vm0, %v4206_v30  ;;  %v5406_v29 = vld [vmem:[%s6058_s2] ss:$0 sm:$0xff] }
 0x1c3   :  { %2697 = vmatprep.mubr.bf16.mxu0 %v4204_v38  ;;  %v1922_v30 = vadd.f32 %v5406_v29, %v4997_v32  ;;  %v4218_v38 = vld [vmem:[%s6057_s0 + $0x520] ss:$28 sps:$4 sm:$0xff]  }
 0x1c4   :  { %v5369_v41 = vpop.f32.mrb[88].mxu1 }
 0x1c5   :  { %v2099_v42 = vpop.f32.mrb[89].mxu1 }
 0x1c6   :  { %v5374_v50 = vpop.f32.mrb[90].mxu1  ;;  %v1925_v42 = vadd.f32 %v5406_v29, %v5002_v35  ;;  %v1930_v35 = vadd.f32 %v5406_v29, %v5013_v40 }
 0x1c7   :  { %v2102_v61 = vpop.f32.mrb[91].mxu1 }
 0x1c8   :  { %v4221_v61 = vld [vmem:[%s6057_s0 + $0x558] ss:$28 sps:$4 sm:$0xff]  }
 0x1c9   :  { %3554 = vmatmul.mubr.msk.bf16.gmra.mrb[164].mxu1 %vm1790_vm0, %v4208_v46 }
 0x1ca   :  { %2698 = vmatmul.mubr.bf16.gmra.mrb[100].mxu0 %v4207_v56  ;;  %3557 = vmatprep.mubr.msk.bf16.mxu1 %vm1790_vm0, %v4211_v58  ;;  %v4217_v58 = vld [vmem:[%s6057_s0 + $0x5f8] ss:$28 sps:$4 sm:$0xff]  }
 0x1cb   :  { %2705 = vmatprep.mubr.bf16.mxu0 %v4209_v62  ;;  %v4219_v62 = vld [vmem:[%s6057_s0 + $0x634] ss:$28 sps:$4 sm:$0xff]  }
 0x1cc   :  { %v5387_v4 = vpop.f32.mrb[92].mxu1 }
 0x1cd   :  { %v2107_v8 = vpop.f32.mrb[93].mxu1 }
 0x1ce   :  { %v5392_v12 = vpop.f32.mrb[94].mxu1 }
 0x1cf   :  { %v2110_v23 = vpop.f32.mrb[95].mxu1 }
 0x1d0   :  { %v1933_v23 = vadd.f32 %v5406_v29, %v5018_v43  ;;  %v1938_v43 = vadd.f32 %v5406_v29, %v5029_v48 }
 0x1d1   :  { %3558 = vmatmul.mubr.msk.bf16.gmra.mrb[168].mxu1 %vm1790_vm0, %v4213_v11 }
 0x1d2   :  { %2706 = vmatmul.mubr.bf16.gmra.mrb[104].mxu0 %v4212_v16  ;;  %3561 = vmatprep.mubr.msk.bf16.mxu1 %vm1790_vm0, %v4216_v19  ;;  %v4223_v19 = vld [vmem:[%s6057_s0 + $0x590] ss:$28 sps:$4 sm:$0xff]  }
 0x1d3   :  { %2713 = vmatprep.mubr.bf16.mxu0 %v4214_v24 }
 0x1d5   :  { %v2499_v36 = vpop.f32.mrb[0].mxu0 }
 0x1d6   :  { %v5417_v46 = vadd.f32 %v2499_v36, %v1922_v30  ;;  %v2501_v56 = vpop.f32.mrb[1].mxu0  ;;  %v4222_v36 = vld [vmem:[%s6057_s0 + $0x630] ss:$28 sps:$4 sm:$0xff]  }
 0x1d7   :  { %v2502_v32 = vpop.f32.mrb[2].mxu0 }
 0x1d8   :  { %v5428_v8 = vadd.f32 %v2502_v32, %v1925_v42  ;;  %v2504_v11 = vpop.f32.mrb[3].mxu0  ;;  %v4224_v42 = vld [vmem:[%s6057_s0 + $0x66c] ss:$28 sps:$4 sm:$0xff]   ;;  %v4228_v32 = vld [vmem:[%s6057_s0 + $0x600] ss:$28 sps:$4 sm:$0xff]  }
 0x1d9   :  { %3562 = vmatmul.mubr.msk.bf16.gmra.mrb[172].mxu1 %vm1790_vm0, %v4218_v38  ;;  %v4226_v38 = vld [vmem:[%s6057_s0 + $0x5c8] ss:$28 sps:$4 sm:$0xff]  }
 0x1da   :  { %2714 = vmatmul.mubr.bf16.gmra.mrb[108].mxu0 %v4217_v58  ;;  %3565 = vmatprep.mubr.msk.bf16.mxu1 %vm1790_vm0, %v4221_v61 }
 0x1db   :  { %2721 = vmatprep.mubr.bf16.mxu0 %v4219_v62  ;;  %v1941_v62 = vadd.f32 %v5406_v29, %v5034_v51  ;;  %v1946_v51 = vadd.f32 %v5406_v29, %v5045_v57 }
 0x1dd   :  { %v2507_v16 = vpop.f32.mrb[4].mxu0 }
 0x1de   :  { %v5439_v24 = vadd.f32 %v2507_v16, %v1930_v35  ;;  %v2509_v30 = vpop.f32.mrb[5].mxu0  ;;  %v4227_v16 = vld [vmem:[%s6057_s0 + $0x668] ss:$28 sps:$4 sm:$0xff]  }
 0x1df   :  { %v2510_v40 = vpop.f32.mrb[6].mxu0 }
 0x1e0   :  { %v5450_v56 = vadd.f32 %v2510_v40, %v1933_v23  ;;  %v2512_v58 = vpop.f32.mrb[7].mxu0  ;;  %v4229_v23 = vld [vmem:[%s6057_s0 + $0x6a4] ss:$28 sps:$4 sm:$0xff]   ;;  %v4233_v40 = vld [vmem:[%s6057_s0 + $0x670] ss:$28 sps:$4 sm:$0xff]  }
 0x1e1   :  { %3566 = vmatmul.mubr.msk.bf16.gmra.mrb[176].mxu1 %vm1790_vm0, %v4223_v19  ;;  %v4231_v19 = vld [vmem:[%s6057_s0 + $0x638] ss:$28 sps:$4 sm:$0xff]  }
 0x1e2   :  { %2722 = vmatmul.mubr.bf16.gmra.mrb[112].mxu0 %v4222_v36  ;;  %3569 = vmatprep.mubr.msk.bf16.mxu1 %vm1790_vm0, %v4226_v38 }
 0x1e3   :  { %2729 = vmatprep.mubr.bf16.mxu0 %v4224_v42  ;;  %v1949_v42 = vadd.f32 %v5406_v29, %v5050_v60  ;;  %v1954_v60 = vadd.f32 %v5406_v29, %v5061_v2  ;;  %v1962_v2 = vadd.f32 %v5406_v29, %v5077_v10 }
 0x1e5   :  { %v2515_v61 = vpop.f32.mrb[8].mxu0 }
 0x1e6   :  { %v5461_v11 = vadd.f32 %v2515_v61, %v1938_v43  ;;  %v2517_v35 = vpop.f32.mrb[9].mxu0  ;;  %v4232_v61 = vld [vmem:[%s6057_s0 + $0x6a0] ss:$28 sps:$4 sm:$0xff]  }
 0x1e7   :  { %v2518_v48 = vpop.f32.mrb[10].mxu0 }
 0x1e8   :  { %v5472_v30 = vadd.f32 %v2518_v48, %v1941_v62  ;;  %v2520_v36 = vpop.f32.mrb[11].mxu0  ;;  %v4234_v62 = vld [vmem:[%s6057_s0 + $0x6dc] ss:$28 sps:$4 sm:$0xff]  }
 0x1e9   :  { %3570 = vmatmul.mubr.msk.bf16.gmra.mrb[180].mxu1 %vm1790_vm0, %v4228_v32  ;;  %v4236_v32 = vld [vmem:[%s6057_s0 + $0x6a8] ss:$28 sps:$4 sm:$0xff]   ;;  %v4238_v48 = vld [vmem:[%s6057_s0 + $0x6e0] ss:$28 sps:$4 sm:$0xff]  }
 0x1ea   :  { %2730 = vmatmul.mubr.bf16.gmra.mrb[116].mxu0 %v4227_v16  ;;  %3573 = vmatprep.mubr.msk.bf16.mxu1 %vm1790_vm0, %v4231_v19 }
 0x1eb   :  { %2737 = vmatprep.mubr.bf16.mxu0 %v4229_v23  ;;  %v1957_v23 = vadd.f32 %v5406_v29, %v5066_v5  ;;  %v1965_v5 = vadd.f32 %v5406_v29, %v5082_v13 }
 0x1ed   :  { %v2523_v38 = vpop.f32.mrb[12].mxu0 }
 0x1ee   :  { %v5483_v58 = vadd.f32 %v2523_v38, %v1946_v51  ;;  %v2525_v43 = vpop.f32.mrb[13].mxu0  ;;  %v4237_v38 = vld [vmem:[%s6057_s0 + $0x6d8] ss:$28 sps:$4 sm:$0xff]  }
 0x1ef   :  { %v2526_v57 = vpop.f32.mrb[14].mxu0 }
 0x1f0   :  { %v5494_v35 = vadd.f32 %v2526_v57, %v1949_v42  ;;  %v2528_v16 = vpop.f32.mrb[15].mxu0 }
 0x1f1   :  { %3574 = vmatmul.mubr.msk.bf16.gmra.mrb[184].mxu1 %vm1790_vm0, %v4233_v40 }
 0x1f2   :  { %2738 = vmatmul.mubr.bf16.gmra.mrb[120].mxu0 %v4232_v61  ;;  %3577 = vmatprep.mubr.msk.bf16.mxu1 %vm1790_vm0, %v4236_v32 }
 0x1f3   :  { %2745 = vmatprep.mubr.bf16.mxu0 %v4234_v62 }
 0x1f5   :  { %v2531_v19 = vpop.f32.mrb[16].mxu0 }
 0x1f6   :  { %v5505_v36 = vadd.f32 %v2531_v19, %v1954_v60  ;;  %v2533_v51 = vpop.f32.mrb[17].mxu0  ;;  %v1970_v19 = vadd.f32 %v5406_v29, %v5094_v18 }
 0x1f7   :  { %v2534_v40 = vpop.f32.mrb[18].mxu0 }
 0x1f8   :  { %v5510_v42 = vadd.f32 %v2534_v40, %v1957_v23  ;;  %v2536_v43 = vpop.f32.mrb[19].mxu0 }
 0x1f9   :  { %3578 = vmatmul.mubr.msk.bf16.gmra.mrb[188].mxu1 %vm1790_vm0, %v4238_v48  ;;  %v1973_v48 = vadd.f32 %v5406_v29, %v5099_v21  ;;  %v1978_v43 = vadd.f32 %v5406_v29, %v5110_v25  ;;  %v1989_v25 = vadd.f32 %v5406_v29, %v5131_v37  ;;  %v1997_v37 = vadd.f32 %v5406_v29, %v5147_v47 }
 0x1fa   :  { %2746 = vmatmul.mubr.bf16.gmra.mrb[124].mxu0 %v4237_v38  ;;  %v2005_v47 = vadd.f32 %v5406_v29, %v5163_v59  ;;  %v2013_v59 = vadd.f32 %v5406_v29, %v5179_v7  ;;  %v2021_v7 = vadd.f32 %v5406_v29, %v5195_v17  ;;  %v2029_v17 = vadd.f32 %v5406_v29, %v5212_v0 }
 0x1fb   :  { %v2037_v0 = vadd.f32 %v5406_v29, %v5230_v39  ;;  %v2045_v39 = vadd.f32 %v5406_v29, %v5248_v53  ;;  %v2053_v53 = vadd.f32 %v5406_v29, %v5266_v6  ;;  %v2058_v6 = vadd.f32 %v5406_v29, %v5279_v15 }
 0x1fd   :  { %v2539_v61 = vpop.f32.mrb[20].mxu0 }
 0x1fe   :  { %v5517_v32 = vadd.f32 %v2539_v61, %v1962_v2  ;;  %v2541_v57 = vpop.f32.mrb[21].mxu0  ;;  %v1981_v61 = vadd.f32 %v5406_v29, %v5115_v27 }
 0x1ff   :  { %v2542_v62 = vpop.f32.mrb[22].mxu0 }
 0x200   :  { %v5519_v16 = vadd.f32 %v2542_v62, %v1965_v5  ;;  %v2544_v60 = vpop.f32.mrb[23].mxu0 }
 0x201   :  { %v1986_v60 = vadd.f32 %v5406_v29, %v5126_v33  ;;  %v1994_v33 = vadd.f32 %v5406_v29, %v5142_v44  ;;  %v2002_v44 = vadd.f32 %v5406_v29, %v5158_v54  ;;  %v2010_v54 = vadd.f32 %v5406_v29, %v5174_v3 }
 0x202   :  { %v2018_v3 = vadd.f32 %v5406_v29, %v5190_v14  ;;  %v2026_v14 = vadd.f32 %v5406_v29, %v5207_v55  ;;  %v2034_v55 = vadd.f32 %v5406_v29, %v5225_v34  ;;  %v2042_v34 = vadd.f32 %v5406_v29, %v5243_v49 }
 0x203   :  { %v2050_v49 = vadd.f32 %v5406_v29, %v5261_v63 }
 0x205   :  { %v2547_v23 = vpop.f32.mrb[24].mxu0 }
 0x206   :  { %v5525_v51 = vadd.f32 %v2547_v23, %v1970_v19  ;;  %v2549_v10 = vpop.f32.mrb[25].mxu0 }
 0x207   :  { %v2550_v38 = vpop.f32.mrb[26].mxu0 }
 0x208   :  { %v5527_v40 = vadd.f32 %v2550_v38, %v1973_v48  ;;  %v2552_v13 = vpop.f32.mrb[27].mxu0 }
 0x20d   :  { %v2555_v2 = vpop.f32.mrb[28].mxu0 }
 0x20e   :  { %v5533_v5 = vadd.f32 %v2555_v2, %v1978_v43  ;;  %v2557_v18 = vpop.f32.mrb[29].mxu0 }
 0x20f   :  { %v2558_v57 = vpop.f32.mrb[30].mxu0 }
 0x210   :  { %v5535_v62 = vadd.f32 %v2558_v57, %v1981_v61  ;;  %v2560_v21 = vpop.f32.mrb[31].mxu0 }
 0x214   :  { %v5539_v19 = vpop.f32.mrb[96].mxu1 }
 0x215   :  { %v2563_v23 = vpop.f32.mrb[32].mxu0  ;;  %v2404_v48 = vpop.f32.mrb[97].mxu1 }
 0x216   :  { %v5543_v10 = vadd.f32 %v2563_v23, %v1986_v60  ;;  %v2565_v27 = vpop.f32.mrb[33].mxu0  ;;  %v5545_v38 = vpop.f32.mrb[98].mxu1 }
 0x217   :  { %6060 = vst [vmem:[#allocation2_spill] sm:$0xff] %v5545_v38  ;;  %v2566_v13 = vpop.f32.mrb[34].mxu0  ;;  %v2407_v43 = vpop.f32.mrb[99].mxu1 }
 0x218   :  { %v5547_v2 = vadd.f32 %v2566_v13, %v1989_v25  ;;  %v2568_v61 = vpop.f32.mrb[35].mxu0 }
 0x21c   :  { %v5551_v18 = vpop.f32.mrb[100].mxu1 }
 0x21d   :  { %6061 = vst [vmem:[#allocation3_spill] sm:$0xff] %v5551_v18  ;;  %v2571_v57 = vpop.f32.mrb[36].mxu0  ;;  %v2412_v21 = vpop.f32.mrb[101].mxu1 }
 0x21e   :  { %v5555_v60 = vadd.f32 %v2571_v57, %v1994_v33  ;;  %v2573_v23 = vpop.f32.mrb[37].mxu0  ;;  %v5557_v48 = vpop.f32.mrb[102].mxu1 }
 0x21f   :  { %6062 = vst [vmem:[#allocation4_spill] sm:$0xff] %v5557_v48  ;;  %v2574_v27 = vpop.f32.mrb[38].mxu0  ;;  %v2415_v43 = vpop.f32.mrb[103].mxu1 }
 0x220   :  { %v5559_v25 = vadd.f32 %v2574_v27, %v1997_v37  ;;  %v2576_v13 = vpop.f32.mrb[39].mxu0 }
 0x224   :  { %v5563_v61 = vpop.f32.mrb[104].mxu1 }
 0x225   :  { %6063 = vst [vmem:[#allocation5_spill] sm:$0xff] %v5563_v61  ;;  %v2579_v18 = vpop.f32.mrb[40].mxu0  ;;  %v2420_v21 = vpop.f32.mrb[105].mxu1 }
 0x226   :  { %v5567_v33 = vadd.f32 %v2579_v18, %v2002_v44  ;;  %v2581_v57 = vpop.f32.mrb[41].mxu0  ;;  %v5569_v23 = vpop.f32.mrb[106].mxu1 }
 0x227   :  { %6064 = vst [vmem:[#allocation6_spill] sm:$0xff] %v5569_v23  ;;  %v2582_v48 = vpop.f32.mrb[42].mxu0  ;;  %v2423_v43 = vpop.f32.mrb[107].mxu1 }
 0x228   :  { %v5571_v37 = vadd.f32 %v2582_v48, %v2005_v47  ;;  %v2584_v27 = vpop.f32.mrb[43].mxu0 }
 0x22c   :  { %v5575_v13 = vpop.f32.mrb[108].mxu1 }
 0x22d   :  { %6065 = vst [vmem:[#allocation7_spill] sm:$0xff] %v5575_v13  ;;  %v2587_v61 = vpop.f32.mrb[44].mxu0  ;;  %v2428_v21 = vpop.f32.mrb[109].mxu1 }
 0x22e   :  { %v5579_v18 = vadd.f32 %v2587_v61, %v2010_v54  ;;  %v2589_v44 = vpop.f32.mrb[45].mxu0  ;;  %v5581_v57 = vpop.f32.mrb[110].mxu1 }
 0x22f   :  { %6066 = vst [vmem:[#allocation8_spill] sm:$0xff] %v5581_v57  ;;  %v2590_v23 = vpop.f32.mrb[46].mxu0  ;;  %v2431_v43 = vpop.f32.mrb[111].mxu1 }
 0x230   :  { %v5583_v48 = vadd.f32 %v2590_v23, %v2013_v59  ;;  %v2592_v47 = vpop.f32.mrb[47].mxu0 }
 0x234   :  { %v5587_v27 = vpop.f32.mrb[112].mxu1 }
 0x235   :  { %6067 = vst [vmem:[#allocation9_spill] sm:$0xff] %v5587_v27  ;;  %v2595_v13 = vpop.f32.mrb[48].mxu0  ;;  %v2436_v21 = vpop.f32.mrb[113].mxu1 }
 0x236   :  { %v5591_v61 = vadd.f32 %v2595_v13, %v2018_v3  ;;  %v2597_v54 = vpop.f32.mrb[49].mxu0  ;;  %v5593_v44 = vpop.f32.mrb[114].mxu1 }
 0x237   :  { %6068 = vst [vmem:[#allocation10_spill] sm:$0xff] %v5593_v44  ;;  %v2598_v57 = vpop.f32.mrb[50].mxu0  ;;  %v2439_v43 = vpop.f32.mrb[115].mxu1 }
 0x238   :  { %v5595_v23 = vadd.f32 %v2598_v57, %v2021_v7  ;;  %v2600_v59 = vpop.f32.mrb[51].mxu0 }
 0x23c   :  { %v5599_v47 = vpop.f32.mrb[116].mxu1 }
 0x23d   :  { %6069 = vst [vmem:[#allocation11_spill] sm:$0xff] %v5599_v47  ;;  %v2603_v27 = vpop.f32.mrb[52].mxu0  ;;  %v2444_v21 = vpop.f32.mrb[117].mxu1 }
 0x23e   :  { %v5603_v13 = vadd.f32 %v2603_v27, %v2026_v14  ;;  %v2605_v3 = vpop.f32.mrb[53].mxu0  ;;  %v5605_v54 = vpop.f32.mrb[118].mxu1 }
 0x23f   :  { %6070 = vst [vmem:[#allocation12_spill] sm:$0xff] %v5605_v54  ;;  %v2606_v44 = vpop.f32.mrb[54].mxu0  ;;  %v2447_v43 = vpop.f32.mrb[119].mxu1 }
 0x240   :  { %v5607_v57 = vadd.f32 %v2606_v44, %v2029_v17  ;;  %v2608_v7 = vpop.f32.mrb[55].mxu0 }
 0x244   :  { %v5611_v59 = vpop.f32.mrb[120].mxu1 }
 0x245   :  { %6071 = vst [vmem:[#allocation13_spill] sm:$0xff] %v5611_v59  ;;  %v2611_v47 = vpop.f32.mrb[56].mxu0  ;;  %v2452_v21 = vpop.f32.mrb[121].mxu1 }
 0x246   :  { %v5615_v27 = vadd.f32 %v2611_v47, %v2034_v55  ;;  %v2613_v14 = vpop.f32.mrb[57].mxu0  ;;  %v5617_v3 = vpop.f32.mrb[122].mxu1 }
 0x247   :  { %6072 = vst [vmem:[#allocation14_spill] sm:$0xff] %v5617_v3  ;;  %v2614_v54 = vpop.f32.mrb[58].mxu0  ;;  %v2455_v43 = vpop.f32.mrb[123].mxu1 }
 0x248   :  { %v5619_v44 = vadd.f32 %v2614_v54, %v2037_v0  ;;  %v2616_v17 = vpop.f32.mrb[59].mxu0 }
 0x24c   :  { %v5623_v7 = vpop.f32.mrb[124].mxu1 }
 0x24d   :  { %6073 = vst [vmem:[#allocation15_spill] sm:$0xff] %v5623_v7  ;;  %v2619_v59 = vpop.f32.mrb[60].mxu0  ;;  %v2460_v21 = vpop.f32.mrb[125].mxu1 }
 0x24e   :  { %v5627_v47 = vadd.f32 %v2619_v59, %v2042_v34  ;;  %v2621_v55 = vpop.f32.mrb[61].mxu0  ;;  %v5629_v14 = vpop.f32.mrb[126].mxu1 }
 0x24f   :  { %6074 = vst [vmem:[#allocation16_spill] sm:$0xff] %v5629_v14  ;;  %v2622_v3 = vpop.f32.mrb[62].mxu0  ;;  %v2463_v43 = vpop.f32.mrb[127].mxu1 }
 0x250   :  { %v5631_v54 = vadd.f32 %v2622_v3, %v2045_v39  ;;  %v2624_v0 = vpop.f32.mrb[63].mxu0 }
 0x254   :  { %v3519_v17 = vpop.f32.mrb[128].mxu1 }
 0x255   :  { %v2627_v7 = vpop.f32.mrb[64].mxu0  ;;  %v2797_v21 = vadd.f32 %v5439_v24, %v3519_v17  ;;  %v2788_v38 = vpop.f32.mrb[129].mxu1 }
 0x256   :  { %v5638_v59 = vadd.f32 %v2627_v7, %v2050_v49  ;;  %v2629_v34 = vpop.f32.mrb[65].mxu0  ;;  %v2789_v55 = vadd.f32 %v5417_v46, %v2788_v38  ;;  %v3520_v43 = vpop.f32.mrb[130].mxu1 }
 0x257   :  { %4239 = vtanh.f32 %v2797_v21  ;;  %v2630_v3 = vpop.f32.mrb[66].mxu0  ;;  %v2800_v39 = vadd.f32 %v5450_v56, %v3520_v43  ;;  %v2791_v0 = vpop.f32.mrb[131].mxu1  ;;  %v2061_v56 = vadd.f32 %v5406_v29, %v5284_v20 }
 0x258   :  { %4241 = vtanh.f32 %v2789_v55  ;;  %v5642_v63 = vadd.f32 %v2630_v3, %v2053_v53  ;;  %v2632_v14 = vpop.f32.mrb[67].mxu0  ;;  %v2792_v24 = vadd.f32 %v5428_v8, %v2791_v0 }
 0x259   :  { %4243 = vtanh.f32 %v2800_v39  ;;  %v2066_v39 = vadd.f32 %v5406_v29, %v5297_v28 }
 0x25a   :  { %4245 = vtanh.f32 %v2792_v24 }
 0x25c   :  { %v3523_v7 = vpop.f32.mrb[132].mxu1 }
 0x25d   :  { %v2635_v49 = vpop.f32.mrb[68].mxu0  ;;  %v2813_v46 = vadd.f32 %v5483_v58, %v3523_v7  ;;  %v2804_v38 = vpop.f32.mrb[133].mxu1  ;;  %v2069_v7 = vadd.f32 %v5406_v29, %v5302_v31 }
 0x25e   :  { %v5650_v17 = vadd.f32 %v2635_v49, %v2058_v6  ;;  %v2637_v21 = vpop.f32.mrb[69].mxu0  ;;  %v2805_v14 = vadd.f32 %v5461_v11, %v2804_v38  ;;  %v3524_v53 = vpop.f32.mrb[134].mxu1 }
 0x25f   :  { %4247 = vtanh.f32 %v2813_v46  ;;  %v2638_v8 = vpop.f32.mrb[70].mxu0  ;;  %v2816_v34 = vadd.f32 %v5494_v35, %v3524_v53  ;;  %v2807_v15 = vpop.f32.mrb[135].mxu1 }
 0x260   :  { %4249 = vtanh.f32 %v2805_v14  ;;  %v5654_v55 = vadd.f32 %v2638_v8, %v2061_v56  ;;  %v2640_v58 = vpop.f32.mrb[71].mxu0  ;;  %v2808_v43 = vadd.f32 %v5472_v30, %v2807_v15  ;;  %v2074_v15 = vadd.f32 %v5406_v29, %v5315_v45 }
 0x261   :  { %v4240_v3 = vpop.eup %4239  ;;  %4251 = vtanh.f32 %v2816_v34 }
 0x262   :  { %v4242_v20 = vpop.eup %4241  ;;  %3110 = vst.msk [vmem:[%s6059_s3 + $0x10] sm:$0xff] %vm3107_vm1, %v4240_v3  ;;  %4253 = vtanh.f32 %v2808_v43 }
 0x263   :  { %v4244_v11 = vpop.eup %4243  ;;  %3108 = vst.msk [vmem:[%s6059_s3] sm:$0xff] %vm3107_vm1, %v4242_v20  ;;  %v2077_v20 = vadd.f32 %v5406_v29, %v5320_v52 }
 0x264   :  { %v4246_v35 = vpop.eup %4245  ;;  %3111 = vst.msk [vmem:[%s6059_s3 + $0x18] sm:$0xff] %vm3107_vm1, %v4244_v11  ;;  %v3527_v30 = vpop.f32.mrb[136].mxu1 }
 0x265   :  { %3109 = vst.msk [vmem:[%s6059_s3 + $0x8] sm:$0xff] %vm3107_vm1, %v4246_v35  ;;  %v2643_v0 = vpop.f32.mrb[72].mxu0  ;;  %v2829_v24 = vadd.f32 %v5517_v32, %v3527_v30  ;;  %v2820_v6 = vpop.f32.mrb[137].mxu1 }
 0x266   :  { %v5678_v49 = vadd.f32 %v2643_v0, %v2066_v39  ;;  %v2645_v28 = vpop.f32.mrb[73].mxu0  ;;  %v2821_v46 = vadd.f32 %v5505_v36, %v2820_v6  ;;  %v3528_v38 = vpop.f32.mrb[138].mxu1 }
 0x267   :  { %4255 = vtanh.f32 %v2829_v24  ;;  %v2646_v56 = vpop.f32.mrb[74].mxu0  ;;  %v2832_v21 = vadd.f32 %v5519_v16, %v3528_v38  ;;  %v2823_v14 = vpop.f32.mrb[139].mxu1 }
 0x268   :  { %4257 = vtanh.f32 %v2821_v46  ;;  %v5682_v53 = vadd.f32 %v2646_v56, %v2069_v7  ;;  %v2648_v8 = vpop.f32.mrb[75].mxu0  ;;  %v2824_v32 = vadd.f32 %v5510_v42, %v2823_v14  ;;  %v2082_v46 = vadd.f32 %v5406_v29, %v5333_v1 }
 0x269   :  { %v4248_v34 = vpop.eup %4247  ;;  %4259 = vtanh.f32 %v2832_v21  ;;  %v2085_v14 = vadd.f32 %v5406_v29, %v5338_v9 }
 0x26a   :  { %v4250_v31 = vpop.eup %4249  ;;  %3114 = vst.msk [vmem:[%s6059_s3 + $0x30] sm:$0xff] %vm3107_vm1, %v4248_v34  ;;  %4261 = vtanh.f32 %v2824_v32 }
 0x26b   :  { %v4252_v36 = vpop.eup %4251  ;;  %3112 = vst.msk [vmem:[%s6059_s3 + $0x20] sm:$0xff] %vm3107_vm1, %v4250_v31 }
 0x26c   :  { %v4254_v16 = vpop.eup %4253  ;;  %3115 = vst.msk [vmem:[%s6059_s3 + $0x38] sm:$0xff] %vm3107_vm1, %v4252_v36  ;;  %v3531_v42 = vpop.f32.mrb[140].mxu1 }
 0x26d   :  { %3113 = vst.msk [vmem:[%s6059_s3 + $0x28] sm:$0xff] %vm3107_vm1, %v4254_v16  ;;  %v2651_v58 = vpop.f32.mrb[76].mxu0  ;;  %v2845_v43 = vadd.f32 %v5533_v5, %v3531_v42  ;;  %v2836_v3 = vpop.f32.mrb[141].mxu1 }
 0x26e   :  { %v5706_v11 = vadd.f32 %v2651_v58, %v2074_v15  ;;  %v2653_v45 = vpop.f32.mrb[77].mxu0  ;;  %v2837_v35 = vadd.f32 %v5525_v51, %v2836_v3  ;;  %v3532_v39 = vpop.f32.mrb[142].mxu1 }
 0x26f   :  { %4263 = vtanh.f32 %v2845_v43  ;;  %v2654_v30 = vpop.f32.mrb[78].mxu0  ;;  %v2848_v0 = vadd.f32 %v5535_v62, %v3532_v39  ;;  %v2839_v24 = vpop.f32.mrb[143].mxu1  ;;  %v2090_v43 = vadd.f32 %v5406_v29, %v5351_v22 }
 0x270   :  { %4265 = vtanh.f32 %v2837_v35  ;;  %v5710_v6 = vadd.f32 %v2654_v30, %v2077_v20  ;;  %v2656_v7 = vpop.f32.mrb[79].mxu0  ;;  %v2840_v5 = vadd.f32 %v5527_v40, %v2839_v24  ;;  %v2093_v35 = vadd.f32 %v5406_v29, %v5356_v26 }
 0x271   :  { %v4256_v28 = vpop.eup %4255  ;;  %4267 = vtanh.f32 %v2848_v0 }
 0x272   :  { %v4258_v52 = vpop.eup %4257  ;;  %3118 = vst.msk [vmem:[%s6059_s3 + $0x50] sm:$0xff] %vm3107_vm1, %v4256_v28  ;;  %4269 = vtanh.f32 %v2840_v5 }
 0x273   :  { %v4260_v51 = vpop.eup %4259  ;;  %3116 = vst.msk [vmem:[%s6059_s3 + $0x40] sm:$0xff] %vm3107_vm1, %v4258_v52 }
 0x274   :  { %v4262_v62 = vpop.eup %4261  ;;  %3119 = vst.msk [vmem:[%s6059_s3 + $0x58] sm:$0xff] %vm3107_vm1, %v4260_v51  ;;  %v3535_v40 = vpop.f32.mrb[144].mxu1 }
 0x275   :  { %3117 = vst.msk [vmem:[%s6059_s3 + $0x48] sm:$0xff] %vm3107_vm1, %v4262_v62  ;;  %v2659_v38 = vpop.f32.mrb[80].mxu0  ;;  %v2861_v56 = vadd.f32 %v5555_v60, %v3535_v40  ;;  %v2852_v21 = vpop.f32.mrb[145].mxu1  ;;  %v2098_v62 = vadd.f32 %v5406_v29, %v5369_v41 }
 0x276   :  { %v5734_v8 = vadd.f32 %v2659_v38, %v2082_v46  ;;  %v2661_v1 = vpop.f32.mrb[81].mxu0  ;;  %v2853_v32 = vadd.f32 %v5543_v10, %v2852_v21  ;;  %v3536_v34 = vpop.f32.mrb[146].mxu1 }
 0x277   :  { %4271 = vtanh.f32 %v2861_v56  ;;  %v2662_v31 = vpop.f32.mrb[82].mxu0  ;;  %v2864_v36 = vadd.f32 %v5559_v25, %v3536_v34  ;;  %v2855_v16 = vpop.f32.mrb[147].mxu1  ;;  %v2101_v56 = vadd.f32 %v5406_v29, %v5374_v50 }
 0x278   :  { %4273 = vtanh.f32 %v2853_v32  ;;  %v5738_v15 = vadd.f32 %v2662_v31, %v2085_v14  ;;  %v2664_v42 = vpop.f32.mrb[83].mxu0  ;;  %v2856_v60 = vadd.f32 %v5547_v2, %v2855_v16 }
 0x279   :  { %v4264_v58 = vpop.eup %4263  ;;  %4275 = vtanh.f32 %v2864_v36 }
 0x27a   :  { %v4266_v9 = vpop.eup %4265  ;;  %3122 = vst.msk [vmem:[%s6059_s3 + $0x70] sm:$0xff] %vm3107_vm1, %v4264_v58  ;;  %4277 = vtanh.f32 %v2856_v60  ;;  %v2106_v60 = vadd.f32 %v5406_v29, %v5387_v4 }
 0x27b   :  { %v4268_v10 = vpop.eup %4267  ;;  %3120 = vst.msk [vmem:[%s6059_s3 + $0x60] sm:$0xff] %vm3107_vm1, %v4266_v9 }
 0x27c   :  { %v4270_v25 = vpop.eup %4269  ;;  %3123 = vst.msk [vmem:[%s6059_s3 + $0x78] sm:$0xff] %vm3107_vm1, %v4268_v10  ;;  %v3539_v2 = vpop.f32.mrb[148].mxu1 }
 0x27d   :  { %3121 = vst.msk [vmem:[%s6059_s3 + $0x68] sm:$0xff] %vm3107_vm1, %v4270_v25  ;;  %v2667_v3 = vpop.f32.mrb[84].mxu0  ;;  %v2877_v20 = vadd.f32 %v5579_v18, %v3539_v2  ;;  %v2868_v45 = vpop.f32.mrb[149].mxu1  ;;  %v2109_v25 = vadd.f32 %v5406_v29, %v5392_v12 }
 0x27e   :  { %v5762_v39 = vadd.f32 %v2667_v3, %v2090_v43  ;;  %v2669_v22 = vpop.f32.mrb[85].mxu0  ;;  %v2869_v30 = vadd.f32 %v5567_v33, %v2868_v45  ;;  %v3540_v0 = vpop.f32.mrb[150].mxu1 }
 0x27f   :  { %4279 = vtanh.f32 %v2877_v20  ;;  %v2670_v24 = vpop.f32.mrb[86].mxu0  ;;  %v2880_v7 = vadd.f32 %v5583_v48, %v3540_v0  ;;  %v2871_v5 = vpop.f32.mrb[151].mxu1 }
 0x280   :  { %4281 = vtanh.f32 %v2869_v30  ;;  %v5766_v28 = vadd.f32 %v2670_v24, %v2093_v35  ;;  %v2672_v52 = vpop.f32.mrb[87].mxu0  ;;  %v2872_v18 = vadd.f32 %v5571_v37, %v2871_v5  ;;  %v3709_v24 = vadd.f32 %v5406_v29, %v5539_v19 }
 0x281   :  { %v4272_v51 = vpop.eup %4271  ;;  %4283 = vtanh.f32 %v2880_v7 }
 0x282   :  { %v4274_v26 = vpop.eup %4273  ;;  %3126 = vst.msk [vmem:[%s6059_s3 + $0x90] sm:$0xff] %vm3107_vm1, %v4272_v51  ;;  %4285 = vtanh.f32 %v2872_v18  ;;  %v6075_v18 = vld [vmem:[#allocation2_spill] sm:$0xff] }
 0x283   :  { %v4276_v33 = vpop.eup %4275  ;;  %3124 = vst.msk [vmem:[%s6059_s3 + $0x80] sm:$0xff] %vm3107_vm1, %v4274_v26  ;;  %v3711_v51 = vadd.f32 %v5406_v29, %v6075_v18 }
 0x284   :  { %v4278_v48 = vpop.eup %4277  ;;  %3127 = vst.msk [vmem:[%s6059_s3 + $0x98] sm:$0xff] %vm3107_vm1, %v4276_v33  ;;  %v3543_v37 = vpop.f32.mrb[152].mxu1 }
 0x285   :  { %3125 = vst.msk [vmem:[%s6059_s3 + $0x88] sm:$0xff] %vm3107_vm1, %v4278_v48  ;;  %v2675_v46 = vpop.f32.mrb[88].mxu0  ;;  %v2893_v40 = vadd.f32 %v5603_v13, %v3543_v37  ;;  %v2884_v38 = vpop.f32.mrb[153].mxu1 }
 0x286   :  { %v5790_v21 = vadd.f32 %v2675_v46, %v2098_v62  ;;  %v2677_v41 = vpop.f32.mrb[89].mxu0  ;;  %v2885_v14 = vadd.f32 %v5591_v61, %v2884_v38  ;;  %v3544_v1 = vpop.f32.mrb[154].mxu1 }
 0x287   :  { %4287 = vtanh.f32 %v2893_v40  ;;  %v2678_v32 = vpop.f32.mrb[90].mxu0  ;;  %v2896_v34 = vadd.f32 %v5607_v57, %v3544_v1  ;;  %v2887_v31 = vpop.f32.mrb[155].mxu1 }
 0x288   :  { %4289 = vtanh.f32 %v2885_v14  ;;  %v5794_v36 = vadd.f32 %v2678_v32, %v2101_v56  ;;  %v2680_v16 = vpop.f32.mrb[91].mxu0  ;;  %v2888_v13 = vadd.f32 %v5595_v23, %v2887_v31  ;;  %v6076_v14 = vld [vmem:[#allocation3_spill] sm:$0xff] }
 0x289   :  { %v4280_v42 = vpop.eup %4279  ;;  %4291 = vtanh.f32 %v2896_v34  ;;  %v3713_v1 = vadd.f32 %v5406_v29, %v6076_v14  ;;  %v6077_v16 = vld [vmem:[#allocation4_spill] sm:$0xff] }
 0x28a   :  { %v4282_v50 = vpop.eup %4281  ;;  %3130 = vst.msk [vmem:[%s6059_s3 + $0xb0] sm:$0xff] %vm3107_vm1, %v4280_v42  ;;  %4293 = vtanh.f32 %v2888_v13  ;;  %v3715_v13 = vadd.f32 %v5406_v29, %v6077_v16 }
 0x28b   :  { %v4284_v61 = vpop.eup %4283  ;;  %3128 = vst.msk [vmem:[%s6059_s3 + $0xa0] sm:$0xff] %vm3107_vm1, %v4282_v50 }
 0x28c   :  { %v4286_v57 = vpop.eup %4285  ;;  %3131 = vst.msk [vmem:[%s6059_s3 + $0xb8] sm:$0xff] %vm3107_vm1, %v4284_v61  ;;  %v3547_v23 = vpop.f32.mrb[156].mxu1 }
 0x28d   :  { %3129 = vst.msk [vmem:[%s6059_s3 + $0xa8] sm:$0xff] %vm3107_vm1, %v4286_v57  ;;  %v2683_v58 = vpop.f32.mrb[92].mxu0  ;;  %v2909_v9 = vadd.f32 %v5627_v47, %v3547_v23  ;;  %v2900_v10 = vpop.f32.mrb[157].mxu1 }
 0x28e   :  { %v5818_v43 = vadd.f32 %v2683_v58, %v2106_v60  ;;  %v2685_v4 = vpop.f32.mrb[93].mxu0  ;;  %v2901_v2 = vadd.f32 %v5615_v27, %v2900_v10  ;;  %v3548_v3 = vpop.f32.mrb[158].mxu1 }
 0x28f   :  { %4295 = vtanh.f32 %v2909_v9  ;;  %v2686_v20 = vpop.f32.mrb[94].mxu0  ;;  %v2912_v45 = vadd.f32 %v5631_v54, %v3548_v3  ;;  %v2903_v35 = vpop.f32.mrb[159].mxu1 }
 0x290   :  { %4297 = vtanh.f32 %v2901_v2  ;;  %v5822_v22 = vadd.f32 %v2686_v20, %v2109_v25  ;;  %v2688_v30 = vpop.f32.mrb[95].mxu0  ;;  %v2904_v47 = vadd.f32 %v5619_v44, %v2903_v35  ;;  %v6078_v2 = vld [vmem:[#allocation5_spill] sm:$0xff] }
 0x291   :  { %v4288_v0 = vpop.eup %4287  ;;  %4299 = vtanh.f32 %v2912_v45  ;;  %v3717_v3 = vadd.f32 %v5406_v29, %v6078_v2  ;;  %v6079_v30 = vld [vmem:[#allocation6_spill] sm:$0xff] }
 0x292   :  { %v4290_v12 = vpop.eup %4289  ;;  %3134 = vst.msk [vmem:[%s6059_s3 + $0xd0] sm:$0xff] %vm3107_vm1, %v4288_v0  ;;  %4301 = vtanh.f32 %v2904_v47  ;;  %v3719_v47 = vadd.f32 %v5406_v29, %v6079_v30 }
 0x293   :  { %v4292_v27 = vpop.eup %4291  ;;  %3132 = vst.msk [vmem:[%s6059_s3 + $0xc0] sm:$0xff] %vm3107_vm1, %v4290_v12 }
 0x294   :  { %v4294_v54 = vpop.eup %4293  ;;  %3135 = vst.msk [vmem:[%s6059_s3 + $0xd8] sm:$0xff] %vm3107_vm1, %v4292_v27  ;;  %v3551_v44 = vpop.f32.mrb[160].mxu1 }
 0x295   :  { %3133 = vst.msk [vmem:[%s6059_s3 + $0xc8] sm:$0xff] %vm3107_vm1, %v4294_v54  ;;  %v2691_v7 = vpop.f32.mrb[96].mxu0  ;;  %v2925_v5 = vadd.f32 %v5650_v17, %v3551_v44  ;;  %v2916_v52 = vpop.f32.mrb[161].mxu1 }
 0x296   :  { %v5846_v26 = vadd.f32 %v3709_v24, %v2691_v7  ;;  %v2693_v19 = vpop.f32.mrb[97].mxu0  ;;  %v2917_v33 = vadd.f32 %v5638_v59, %v2916_v52  ;;  %v3552_v48 = vpop.f32.mrb[162].mxu1 }
 0x297   :  { %4303 = vtanh.f32 %v2925_v5  ;;  %v2694_v62 = vpop.f32.mrb[98].mxu0  ;;  %v2928_v37 = vadd.f32 %v5654_v55, %v3552_v48  ;;  %v2919_v46 = vpop.f32.mrb[163].mxu1  ;;  %v6080_v19 = vld [vmem:[#allocation7_spill] sm:$0xff] }
 0x298   :  { %4305 = vtanh.f32 %v2917_v33  ;;  %v5850_v40 = vadd.f32 %v3711_v51, %v2694_v62  ;;  %v2696_v38 = vpop.f32.mrb[99].mxu0  ;;  %v2920_v17 = vadd.f32 %v5642_v63, %v2919_v46  ;;  %v3721_v33 = vadd.f32 %v5406_v29, %v6080_v19  ;;  %v6081_v46 = vld [vmem:[#allocation8_spill] sm:$0xff] }
 0x299   :  { %v4296_v56 = vpop.eup %4295  ;;  %4307 = vtanh.f32 %v2928_v37  ;;  %v3723_v38 = vadd.f32 %v5406_v29, %v6081_v46 }
 0x29a   :  { %v4298_v41 = vpop.eup %4297  ;;  %3138 = vst.msk [vmem:[%s6059_s3 + $0xf0] sm:$0xff] %vm3107_vm1, %v4296_v56  ;;  %4309 = vtanh.f32 %v2920_v17 }
 0x29b   :  { %v4300_v59 = vpop.eup %4299  ;;  %3136 = vst.msk [vmem:[%s6059_s3 + $0xe0] sm:$0xff] %vm3107_vm1, %v4298_v41 }
 0x29c   :  { %v4302_v55 = vpop.eup %4301  ;;  %3139 = vst.msk [vmem:[%s6059_s3 + $0xf8] sm:$0xff] %vm3107_vm1, %v4300_v59  ;;  %v3555_v63 = vpop.f32.mrb[164].mxu1 }
 0x29d   :  { %3137 = vst.msk [vmem:[%s6059_s3 + $0xe8] sm:$0xff] %vm3107_vm1, %v4302_v55  ;;  %v2699_v32 = vpop.f32.mrb[100].mxu0  ;;  %v2941_v34 = vadd.f32 %v5706_v11, %v3555_v63  ;;  %v2932_v31 = vpop.f32.mrb[165].mxu1 }
 0x29e   :  { %v5874_v42 = vadd.f32 %v3713_v1, %v2699_v32  ;;  %v2701_v50 = vpop.f32.mrb[101].mxu0  ;;  %v2933_v61 = vadd.f32 %v5678_v49, %v2932_v31  ;;  %v3556_v57 = vpop.f32.mrb[166].mxu1 }
 0x29f   :  { %4311 = vtanh.f32 %v2941_v34  ;;  %v2702_v60 = vpop.f32.mrb[102].mxu0  ;;  %v2944_v23 = vadd.f32 %v5710_v6, %v3556_v57  ;;  %v2935_v58 = vpop.f32.mrb[167].mxu1 }
 0x2a0   :  { %4313 = vtanh.f32 %v2933_v61  ;;  %v5878_v9 = vadd.f32 %v3715_v13, %v2702_v60  ;;  %v2704_v10 = vpop.f32.mrb[103].mxu0  ;;  %v2936_v11 = vadd.f32 %v5682_v53, %v2935_v58  ;;  %v6083_v60 = vld [vmem:[#allocation10_spill] sm:$0xff] }
 0x2a1   :  { %v4304_v25 = vpop.eup %4303  ;;  %4315 = vtanh.f32 %v2944_v23 }
 0x2a2   :  { %v4306_v4 = vpop.eup %4305  ;;  %3142 = vst.msk [vmem:[%s6059_s3 + $0x110] sm:$0xff] %vm3107_vm1, %v4304_v25  ;;  %4317 = vtanh.f32 %v2936_v11 }
 0x2a3   :  { %v4308_v49 = vpop.eup %4307  ;;  %3140 = vst.msk [vmem:[%s6059_s3 + $0x100] sm:$0xff] %vm3107_vm1, %v4306_v4 }
 0x2a4   :  { %v4310_v6 = vpop.eup %4309  ;;  %3143 = vst.msk [vmem:[%s6059_s3 + $0x118] sm:$0xff] %vm3107_vm1, %v4308_v49  ;;  %v3559_v53 = vpop.f32.mrb[168].mxu1 }
 0x2a5   :  { %3141 = vst.msk [vmem:[%s6059_s3 + $0x108] sm:$0xff] %vm3107_vm1, %v4310_v6  ;;  %v2707_v20 = vpop.f32.mrb[104].mxu0  ;;  %v2957_v45 = vadd.f32 %v5762_v39, %v3559_v53  ;;  %v2948_v35 = vpop.f32.mrb[169].mxu1 }
 0x2a6   :  { %v5902_v0 = vadd.f32 %v3717_v3, %v2707_v20  ;;  %v2709_v12 = vpop.f32.mrb[105].mxu0  ;;  %v2949_v27 = vadd.f32 %v5734_v8, %v2948_v35  ;;  %v3560_v54 = vpop.f32.mrb[170].mxu1 }
 0x2a7   :  { %4319 = vtanh.f32 %v2957_v45  ;;  %v2710_v24 = vpop.f32.mrb[106].mxu0  ;;  %v2960_v44 = vadd.f32 %v5766_v28, %v3560_v54  ;;  %v2951_v7 = vpop.f32.mrb[171].mxu1  ;;  %v6084_v45 = vld [vmem:[#allocation11_spill] sm:$0xff] }
 0x2a8   :  { %4321 = vtanh.f32 %v2949_v27  ;;  %v5906_v5 = vadd.f32 %v3719_v47, %v2710_v24  ;;  %v2712_v52 = vpop.f32.mrb[107].mxu0  ;;  %v2952_v39 = vadd.f32 %v5738_v15, %v2951_v7  ;;  %v6085_v27 = vld [vmem:[#allocation12_spill] sm:$0xff] }
 0x2a9   :  { %v4312_v18 = vpop.eup %4311  ;;  %4323 = vtanh.f32 %v2960_v44 }
 0x2aa   :  { %v4314_v51 = vpop.eup %4313  ;;  %3146 = vst.msk [vmem:[%s6059_s3 + $0x130] sm:$0xff] %vm3107_vm1, %v4312_v18  ;;  %4325 = vtanh.f32 %v2952_v39 }
 0x2ab   :  { %v4316_v8 = vpop.eup %4315  ;;  %3144 = vst.msk [vmem:[%s6059_s3 + $0x120] sm:$0xff] %vm3107_vm1, %v4314_v51 }
 0x2ac   :  { %v4318_v28 = vpop.eup %4317  ;;  %3147 = vst.msk [vmem:[%s6059_s3 + $0x138] sm:$0xff] %vm3107_vm1, %v4316_v8  ;;  %v3563_v15 = vpop.f32.mrb[172].mxu1 }
 0x2ad   :  { %3145 = vst.msk [vmem:[%s6059_s3 + $0x128] sm:$0xff] %vm3107_vm1, %v4318_v28  ;;  %v2715_v48 = vpop.f32.mrb[108].mxu0  ;;  %v2973_v62 = vadd.f32 %v5818_v43, %v3563_v15  ;;  %v2964_v37 = vpop.f32.mrb[173].mxu1 }
 0x2ae   :  { %v3722_v17 = vadd.f32 %v3721_v33, %v2715_v48  ;;  %v2717_v56 = vpop.f32.mrb[109].mxu0  ;;  %v2965_v41 = vadd.f32 %v5790_v21, %v2964_v37  ;;  %v3564_v59 = vpop.f32.mrb[174].mxu1 }
 0x2af   :  { %4327 = vtanh.f32 %v2973_v62  ;;  %v2718_v55 = vpop.f32.mrb[110].mxu0  ;;  %v2976_v14 = vadd.f32 %v5822_v22, %v3564_v59  ;;  %v2967_v1 = vpop.f32.mrb[175].mxu1  ;;  %v6082_v22 = vld [vmem:[#allocation9_spill] sm:$0xff]  ;;  %v6087_v56 = vld [vmem:[#allocation14_spill] sm:$0xff] }
 0x2b0   :  { %4329 = vtanh.f32 %v2965_v41  ;;  %v3724_v63 = vadd.f32 %v3723_v38, %v2718_v55  ;;  %v2720_v32 = vpop.f32.mrb[111].mxu0  ;;  %v2968_v34 = vadd.f32 %v5794_v36, %v2967_v1  ;;  %v5944_v36 = vld [vmem:[%s6058_s2] ss:$0 sm:$0xff]  ;;  %v6086_v62 = vld [vmem:[#allocation13_spill] sm:$0xff] }
 0x2b1   :  { %v4320_v43 = vpop.eup %4319  ;;  %4331 = vtanh.f32 %v2976_v14  ;;  %v3725_v16 = vadd.f32 %v5944_v36, %v6082_v22  ;;  %v3727_v23 = vadd.f32 %v5944_v36, %v6083_v60  ;;  %v3729_v35 = vadd.f32 %v5944_v36, %v6084_v45 }
 0x2b2   :  { %v4322_v31 = vpop.eup %4321  ;;  %3150 = vst.msk [vmem:[%s6059_s3 + $0x150] sm:$0xff] %vm3107_vm1, %v4320_v43  ;;  %4333 = vtanh.f32 %v2968_v34  ;;  %v3731_v54 = vadd.f32 %v5944_v36, %v6085_v27  ;;  %v3733_v37 = vadd.f32 %v5944_v36, %v6086_v62  ;;  %v3735_v41 = vadd.f32 %v5944_v36, %v6087_v56 }
 0x2b3   :  { %v4324_v29 = vpop.eup %4323  ;;  %3148 = vst.msk [vmem:[%s6059_s3 + $0x140] sm:$0xff] %vm3107_vm1, %v4322_v31 }
 0x2b4   :  { %v4326_v21 = vpop.eup %4325  ;;  %3151 = vst.msk [vmem:[%s6059_s3 + $0x158] sm:$0xff] %vm3107_vm1, %v4324_v29  ;;  %v3567_v13 = vpop.f32.mrb[176].mxu1 }
 0x2b5   :  { %3149 = vst.msk [vmem:[%s6059_s3 + $0x148] sm:$0xff] %vm3107_vm1, %v4326_v21  ;;  %v2723_v50 = vpop.f32.mrb[112].mxu0  ;;  %v2989_v61 = vadd.f32 %v5874_v42, %v3567_v13  ;;  %v2980_v57 = vpop.f32.mrb[177].mxu1 }
 0x2b6   :  { %v3726_v58 = vadd.f32 %v3725_v16, %v2723_v50  ;;  %v2725_v10 = vpop.f32.mrb[113].mxu0  ;;  %v2981_v11 = vadd.f32 %v5846_v26, %v2980_v57  ;;  %v3568_v25 = vpop.f32.mrb[178].mxu1  ;;  %v6088_v50 = vld [vmem:[#allocation15_spill] sm:$0xff] }
 0x2b7   :  { %4335 = vtanh.f32 %v2989_v61  ;;  %v2726_v4 = vpop.f32.mrb[114].mxu0  ;;  %v2992_v49 = vadd.f32 %v5878_v9, %v3568_v25  ;;  %v2983_v6 = vpop.f32.mrb[179].mxu1  ;;  %v3737_v61 = vadd.f32 %v5944_v36, %v6088_v50 }
 0x2b8   :  { %4337 = vtanh.f32 %v2981_v11  ;;  %v3728_v2 = vadd.f32 %v3727_v23, %v2726_v4  ;;  %v2728_v3 = vpop.f32.mrb[115].mxu0  ;;  %v2984_v53 = vadd.f32 %v5850_v40, %v2983_v6 }
 0x2b9   :  { %v4328_v42 = vpop.eup %4327  ;;  %4339 = vtanh.f32 %v2992_v49 }
 0x2ba   :  { %v4330_v20 = vpop.eup %4329  ;;  %3154 = vst.msk [vmem:[%s6059_s3 + $0x170] sm:$0xff] %vm3107_vm1, %v4328_v42  ;;  %4341 = vtanh.f32 %v2984_v53 }
 0x2bb   :  { %v4332_v26 = vpop.eup %4331  ;;  %3152 = vst.msk [vmem:[%s6059_s3 + $0x160] sm:$0xff] %vm3107_vm1, %v4330_v20 }
 0x2bc   :  { %v4334_v9 = vpop.eup %4333  ;;  %3155 = vst.msk [vmem:[%s6059_s3 + $0x178] sm:$0xff] %vm3107_vm1, %v4332_v26  ;;  %v3571_v40 = vpop.f32.mrb[180].mxu1 }
 0x2bd   :  { %3153 = vst.msk [vmem:[%s6059_s3 + $0x168] sm:$0xff] %vm3107_vm1, %v4334_v9  ;;  %v2731_v30 = vpop.f32.mrb[116].mxu0  ;;  %v3005_v47 = vadd.f32 %v3722_v17, %v3571_v40  ;;  %v2996_v12 = vpop.f32.mrb[181].mxu1 }
 0x2be   :  { %v3730_v24 = vadd.f32 %v3729_v35, %v2731_v30  ;;  %v2733_v44 = vpop.f32.mrb[117].mxu0  ;;  %v2997_v7 = vadd.f32 %v5902_v0, %v2996_v12  ;;  %v3572_v52 = vpop.f32.mrb[182].mxu1 }
 0x2bf   :  { %4343 = vtanh.f32 %v3005_v47  ;;  %v2734_v39 = vpop.f32.mrb[118].mxu0  ;;  %v3008_v18 = vadd.f32 %v3724_v63, %v3572_v52  ;;  %v2999_v51 = vpop.f32.mrb[183].mxu1 }
 0x2c0   :  { %4345 = vtanh.f32 %v2997_v7  ;;  %v3732_v8 = vadd.f32 %v3731_v54, %v2734_v39  ;;  %v2736_v28 = vpop.f32.mrb[119].mxu0  ;;  %v3000_v19 = vadd.f32 %v5906_v5, %v2999_v51 }
 0x2c1   :  { %v4336_v33 = vpop.eup %4335  ;;  %4347 = vtanh.f32 %v3008_v18 }
 0x2c2   :  { %v4338_v15 = vpop.eup %4337  ;;  %3158 = vst.msk [vmem:[%s6059_s3 + $0x190] sm:$0xff] %vm3107_vm1, %v4336_v33  ;;  %4349 = vtanh.f32 %v3000_v19 }
 0x2c3   :  { %v4340_v0 = vpop.eup %4339  ;;  %3156 = vst.msk [vmem:[%s6059_s3 + $0x180] sm:$0xff] %vm3107_vm1, %v4338_v15 }
 0x2c4   :  { %v4342_v48 = vpop.eup %4341  ;;  %3159 = vst.msk [vmem:[%s6059_s3 + $0x198] sm:$0xff] %vm3107_vm1, %v4340_v0  ;;  %v3575_v5 = vpop.f32.mrb[184].mxu1 }
 0x2c5   :  { %3157 = vst.msk [vmem:[%s6059_s3 + $0x188] sm:$0xff] %vm3107_vm1, %v4342_v48  ;;  %v2739_v46 = vpop.f32.mrb[120].mxu0  ;;  %v3021_v38 = vadd.f32 %v3730_v24, %v3575_v5  ;;  %v3012_v17 = vpop.f32.mrb[185].mxu1 }
 0x2c6   :  { %v3734_v59 = vadd.f32 %v3733_v37, %v2739_v46  ;;  %v2741_v55 = vpop.f32.mrb[121].mxu0  ;;  %v3013_v14 = vadd.f32 %v3726_v58, %v3012_v17  ;;  %v3576_v1 = vpop.f32.mrb[186].mxu1  ;;  %v6089_v58 = vld [vmem:[#allocation16_spill] sm:$0xff] }
 0x2c7   :  { %4351 = vtanh.f32 %v3021_v38  ;;  %v2742_v63 = vpop.f32.mrb[122].mxu0  ;;  %v3024_v32 = vadd.f32 %v3732_v8, %v3576_v1  ;;  %v3015_v34 = vpop.f32.mrb[187].mxu1  ;;  %v3739_v10 = vadd.f32 %v5944_v36, %v6089_v58 }
 0x2c8   :  { %4353 = vtanh.f32 %v3013_v14  ;;  %v3736_v43 = vadd.f32 %v3735_v41, %v2742_v63  ;;  %v2744_v31 = vpop.f32.mrb[123].mxu0  ;;  %v3016_v29 = vadd.f32 %v3728_v2, %v3015_v34 }
 0x2c9   :  { %v4344_v21 = vpop.eup %4343  ;;  %4355 = vtanh.f32 %v3024_v32 }
 0x2ca   :  { %v4346_v22 = vpop.eup %4345  ;;  %3162 = vst.msk [vmem:[%s6059_s3 + $0x1b0] sm:$0xff] %vm3107_vm1, %v4344_v21  ;;  %4357 = vtanh.f32 %v3016_v29 }
 0x2cb   :  { %v4348_v16 = vpop.eup %4347  ;;  %3160 = vst.msk [vmem:[%s6059_s3 + $0x1a0] sm:$0xff] %vm3107_vm1, %v4346_v22 }
 0x2cc   :  { %v4350_v13 = vpop.eup %4349  ;;  %3163 = vst.msk [vmem:[%s6059_s3 + $0x1b8] sm:$0xff] %vm3107_vm1, %v4348_v16  ;;  %v3579_v57 = vpop.f32.mrb[188].mxu1 }
 0x2cd   :  { %3161 = vst.msk [vmem:[%s6059_s3 + $0x1a8] sm:$0xff] %vm3107_vm1, %v4350_v13  ;;  %v2747_v60 = vpop.f32.mrb[124].mxu0  ;;  %v3028_v23 = vpop.f32.mrb[189].mxu1 }
 0x2ce   :  { %v3738_v11 = vadd.f32 %v3737_v61, %v2747_v60  ;;  %v2749_v25 = vpop.f32.mrb[125].mxu0  ;;  %v3029_v4 = vadd.f32 %v3734_v59, %v3028_v23  ;;  %v3580_v49 = vpop.f32.mrb[190].mxu1 }
 0x2cf   :  { %v2750_v6 = vpop.f32.mrb[126].mxu0  ;;  %v3031_v2 = vpop.f32.mrb[191].mxu1 }
 0x2d0   :  { %v3037_v3 = vadd.f32 %v3738_v11, %v3579_v57  ;;  %4359 = vtanh.f32 %v3029_v4  ;;  %v3740_v53 = vadd.f32 %v3739_v10, %v2750_v6  ;;  %v2752_v42 = vpop.f32.mrb[127].mxu0  ;;  %v3032_v20 = vadd.f32 %v3736_v43, %v3031_v2 }
 0x2d1   :  { %v4352_v26 = vpop.eup %4351 }
 0x2d2   :  { %v4354_v9 = vpop.eup %4353  ;;  %3166 = vst.msk [vmem:[%s6059_s3 + $0x1d0] sm:$0xff] %vm3107_vm1, %v4352_v26  ;;  %4361 = vtanh.f32 %v3037_v3  ;;  %v3040_v36 = vadd.f32 %v3740_v53, %v3580_v49 }
 0x2d3   :  { %v4356_v45 = vpop.eup %4355  ;;  %3164 = vst.msk [vmem:[%s6059_s3 + $0x1c0] sm:$0xff] %vm3107_vm1, %v4354_v9  ;;  %4363 = vtanh.f32 %v3032_v20 }
 0x2d4   :  { %v4358_v35 = vpop.eup %4357  ;;  %3167 = vst.msk [vmem:[%s6059_s3 + $0x1d8] sm:$0xff] %vm3107_vm1, %v4356_v45  ;;  %4365 = vtanh.f32 %v3040_v36 }
 0x2d5   :  { %3165 = vst.msk [vmem:[%s6059_s3 + $0x1c8] sm:$0xff] %vm3107_vm1, %v4358_v35 }
 0x2da   :  { %v4360_v40 = vpop.eup %4359 }
 0x2db   :  { %3168 = vst.msk [vmem:[%s6059_s3 + $0x1e0] sm:$0xff] %vm3107_vm1, %v4360_v40 }
 0x2dc   :  { %v4362_v30 = vpop.eup %4361 }
 0x2dd   :  { %v4364_v47 = vpop.eup %4363  ;;  %3170 = vst.msk [vmem:[%s6059_s3 + $0x1f0] sm:$0xff] %vm3107_vm1, %v4362_v30 }
 0x2de   :  { %v4366_v12 = vpop.eup %4365  ;;  %3169 = vst.msk [vmem:[%s6059_s3 + $0x1e8] sm:$0xff] %vm3107_vm1, %v4364_v47 }
 0x2df   :  { %3171 = vst.msk [vmem:[%s6059_s3 + $0x1f8] sm:$0xff] %vm3107_vm1, %v4366_v12 }

</bundles_post_ra>
